<compile_context>
chip_gen: v6e
topology: v6e:2x2x1
jax: 0.10.0
libtpu: 0.0.40
codegen_flags: <defaults>
</compile_context>

<pallas_src>
import functools

import numpy as np
import jax
import jax.numpy as jnp
from jax.experimental import pallas as pl
from jax.experimental.pallas import tpu as pltpu


# Fits v7x's 64 MiB physical VMEM and comfortably exceeds v5e's 16 MiB
# scoped default, so one code path works on v5e / v6e / v7x.
VMEM_LIMIT = 48 * 1024 * 1024


# ----------------------------------------------------------------------------
# helpers
# ----------------------------------------------------------------------------
def _round_up(x, m):
    return (x + m - 1) // m * m


def _pad_m(m):
    """Pad a row count so the chosen TM tile always divides it."""
    mp = _round_up(m, 8)
    if mp > 256:
        mp = _round_up(mp, 256)
    return mp


# ----------------------------------------------------------------------------
# Kernel 1: tiled fused matmul   out = relu((A @ B) * scale + shift)
#   f32 VMEM scratch accumulator, single (bf16 by default) store on last k.
# ----------------------------------------------------------------------------
def _mm_affine_kernel(a_ref, b_ref, scale_ref, shift_ref, o_ref, acc_ref, *,
                      relu, nk):
    k = pl.program_id(2)

    @pl.when(k == 0)
    def _():
        acc_ref[...] = jnp.zeros_like(acc_ref)

    acc_ref[...] += jnp.dot(a_ref[...], b_ref[...],
                            preferred_element_type=jnp.float32)

    @pl.when(k == nk - 1)
    def _():
        out = acc_ref[...] * scale_ref[...] + shift_ref[...]
        if relu:
            out = jnp.maximum(out, 0.0)
        o_ref[...] = out.astype(o_ref.dtype)


def _mm_plain_kernel(a_ref, b_ref, o_ref, acc_ref, *, nk):
    k = pl.program_id(2)

    @pl.when(k == 0)
    def _():
        acc_ref[...] = jnp.zeros_like(acc_ref)

    acc_ref[...] += jnp.dot(a_ref[...], b_ref[...],
                            preferred_element_type=jnp.float32)

    @pl.when(k == nk - 1)
    def _():
        o_ref[...] = acc_ref[...].astype(o_ref.dtype)


def pallas_matmul(a_p, b_p, scale_p=None, shift_p=None, relu=False,
                  out_dtype=jnp.bfloat16):
    """Pre-padded operands: a_p (Mp, Kp) bf16, b_p (Kp, Np) bf16,
    scale_p/shift_p (1, Np) f32 or None (no-affine fast path)."""
    Mp, Kp = a_p.shape
    Kp2, Np = b_p.shape
    assert Kp == Kp2
    # >= 2 tiles on the parallel M axis whenever the shape allows (v7x 2 TCs).
    if Mp > 256:
        TM = 256
    elif Mp % 32 == 0 and Mp >= 32:
        TM = Mp // 2
    else:
        TM = Mp
    TN = 256 if Np % 256 == 0 else 128     # full 256-wide MXU on v6e/v7x
    TK = 256 if Kp % 256 == 0 else 128
    nm, nn, nk = Mp // TM, Np // TN, Kp // TK

    if scale_p is not None:
        kernel = functools.partial(_mm_affine_kernel, relu=relu, nk=nk)
        in_specs = [
            pl.BlockSpec((TM, TK), lambda i, j, k: (i, k)),
            pl.BlockSpec((TK, TN), lambda i, j, k: (k, j)),
            pl.BlockSpec((1, TN), lambda i, j, k: (0, j)),
            pl.BlockSpec((1, TN), lambda i, j, k: (0, j)),
        ]
        args = (a_p, b_p, scale_p, shift_p)
    else:
        kernel = functools.partial(_mm_plain_kernel, nk=nk)
        in_specs = [
            pl.BlockSpec((TM, TK), lambda i, j, k: (i, k)),
            pl.BlockSpec((TK, TN), lambda i, j, k: (k, j)),
        ]
        args = (a_p, b_p)

    return pl.pallas_call(
        kernel,
        out_shape=jax.ShapeDtypeStruct((Mp, Np), out_dtype),
        grid_spec=pltpu.PrefetchScalarGridSpec(
            num_scalar_prefetch=0,
            grid=(nm, nn, nk),
            in_specs=in_specs,
            out_specs=pl.BlockSpec((TM, TN), lambda i, j, k: (i, j)),
            scratch_shapes=[pltpu.VMEM((TM, TN), jnp.float32)],
        ),
        compiler_params=pltpu.CompilerParams(
            dimension_semantics=("parallel", "parallel", "arbitrary"),
            vmem_limit_bytes=VMEM_LIMIT),
    )(*args)


# ----------------------------------------------------------------------------
# Kernel 2: fused 3x3 stride-1 pad-1 conv, tiled over row blocks (pipelined)
# ----------------------------------------------------------------------------
def _conv3x3_kernel(xa_ref, xb_ref, w_ref, scale_ref, shift_ref, o_ref,
                    xwin_ref, acc_ref, *, relu, wrow, tm):
    # xa_ref: (TM,   Ck) bf16  -- this block's rows of the flattened padded act
    # xb_ref: (HALO, Ck) bf16  -- halo rows immediately after the block
    # w_ref : (9, Ck, Cop) bf16 -- taps in (di, dj) order
    # o_ref : (TM, Cop) bf16
    halo = xb_ref.shape[0]
    # Stage the TM+HALO row window once, as f32, so the nine row-shifted tap
    # views below are plain 32-bit sublane-offset slices (cheap & robust).
    xwin_ref[0:tm, :] = xa_ref[...].astype(jnp.float32)
    xwin_ref[tm:tm + halo, :] = xb_ref[...].astype(jnp.float32)
    for di in range(3):
        for dj in range(3):
            off = di * wrow + dj
            a = xwin_ref[off:off + tm, :].astype(jnp.bfloat16)
            part = jnp.dot(a, w_ref[di * 3 + dj],
                           preferred_element_type=jnp.float32)
            if di == 0 and dj == 0:
                acc_ref[...] = part
            else:
                acc_ref[...] += part
    out = acc_ref[...] * scale_ref[...] + shift_ref[...]
    if relu:
        out = jnp.maximum(out, 0.0)
    o_ref[...] = out.astype(o_ref.dtype)


def conv3x3_s1_fused(x, layer):
    """3x3, stride 1, padding 1 conv + folded BN/bias (+ReLU).
    x: (N, H, W, C) bf16 (channel-padded); returns (N, H, W, Cop) bf16."""
    x = x.astype(jnp.bfloat16)
    N, H, W, C = x.shape
    Ck, Cop = layer["w9"].shape[1], layer["w9"].shape[2]
    if C < Ck:
        x = jnp.pad(x, ((0, 0), (0, 0), (0, 0), (0, Ck - C)))
    elif C > Ck:
        x = x[..., :Ck]

    Hp = H + 2
    Wp8 = _round_up(W + 2, 8)              # padded row width, 8-aligned
    halo = 2 * Wp8 + 16                    # covers max tap offset, 16-aligned
    R = N * Hp * Wp8                       # flattened padded rows

    # row tile: multiple of halo, ~<=512 rows, and >=2 grid steps if possible
    qmax = max(1, 512 // halo)
    q = min(qmax, max(1, -(-R // (2 * halo))))
    TM = q * halo
    nm = max(2, -(-R // TM))
    L = (nm + 1) * TM                      # rows incl. trailing halo padding

    # single spatial pad + flatten + one small trailing row pad
    xp = jnp.pad(x, ((0, 0), (1, 1), (1, Wp8 - W - 1), (0, 0)))
    x_flat = jnp.pad(xp.reshape(R, Ck), ((0, L - R), (0, 0)))

    y = pl.pallas_call(
        functools.partial(_conv3x3_kernel, relu=layer["relu"], wrow=Wp8, tm=TM),
        out_shape=jax.ShapeDtypeStruct((nm * TM, Cop), jnp.bfloat16),
        grid_spec=pltpu.PrefetchScalarGridSpec(
            num_scalar_prefetch=0,
            grid=(nm,),
            in_specs=[
                pl.BlockSpec((TM, Ck), lambda i: (i, 0)),
                pl.BlockSpec((halo, Ck), lambda i, q=q: ((i + 1) * q, 0)),
                pl.BlockSpec((9, Ck, Cop), lambda i: (0, 0, 0)),
                pl.BlockSpec((1, Cop), lambda i: (0, 0)),
                pl.BlockSpec((1, Cop), lambda i: (0, 0)),
            ],
            out_specs=pl.BlockSpec((TM, Cop), lambda i: (i, 0)),
            scratch_shapes=[
                pltpu.VMEM((TM + halo, Ck), jnp.float32),   # staged window
                pltpu.VMEM((TM, Cop), jnp.float32),         # f32 accumulator
            ],
        ),
        compiler_params=pltpu.CompilerParams(
            dimension_semantics=("parallel",),
            vmem_limit_bytes=VMEM_LIMIT),
    )(x_flat, x_flat, layer["w9"], layer["scale"], layer["shift"])

    return y[:R].reshape(N, Hp, Wp8, Cop)[:, :H, :W, :]


# ----------------------------------------------------------------------------
# stride-2 stems (tiny, Cin=4): small host-side im2col + fused Pallas matmul
# ----------------------------------------------------------------------------
def _im2col(x, kh, kw, stride, padding):
    N, H, W, C = x.shape
    xp = jnp.pad(x, ((0, 0), (padding, padding), (padding, padding), (0, 0)))
    Ho = (H + 2 * padding - kh) // stride + 1
    Wo = (W + 2 * padding - kw) // stride + 1
    cols = []
    for di in range(kh):
        for dj in range(kw):
            cols.append(
                xp[:, di:di + stride * (Ho - 1) + 1:stride,
                      dj:dj + stride * (Wo - 1) + 1:stride, :])
    patches = jnp.concatenate(cols, axis=-1)
    return patches.reshape(N * Ho * Wo, kh * kw * C), (N, Ho, Wo)


def conv_s2_fused(x, layer):
    x = x[..., :layer["cin"]].astype(jnp.bfloat16)
    a, (N, Ho, Wo) = _im2col(x, layer["kh"], layer["kw"],
                             layer["stride"], layer["padding"])
    M, K = a.shape
    Kp, Np = layer["wmat"].shape
    Mp = _pad_m(M)
    a_p = jnp.pad(a, ((0, Mp - M), (0, Kp - K)))
    out = pallas_matmul(a_p, layer["wmat"], layer["scale"], layer["shift"],
                        relu=layer["relu"])
    return out[:M].reshape(N, Ho, Wo, Np)        # bf16, channel-padded


def conv1x1_fused(x, layer):
    N, H, W, C = x.shape
    Kp, Np = layer["wmat"].shape
    M = N * H * W
    Mp = _pad_m(M)
    a = x.astype(jnp.bfloat16).reshape(M, C)
    if C < Kp:
        a = jnp.pad(a, ((0, 0), (0, Kp - C)))
    elif C > Kp:
        a = a[:, :Kp]
    a_p = jnp.pad(a, ((0, Mp - M), (0, 0)))
    out = pallas_matmul(a_p, layer["wmat"], layer["scale"], layer["shift"],
                        relu=layer["relu"])
    return out[:M].reshape(N, H, W, Np)          # bf16, channel-padded


# ----------------------------------------------------------------------------
# Bilinear upsample (align_corners=True): separable H then W matmuls,
# identity resamples skipped, no dummy affine.
# ----------------------------------------------------------------------------
def _bilinear_matrix_np(out_size, in_size):
    if in_size == 1:
        return np.ones((out_size, 1), np.float32)
    if out_size == 1:
        pos = np.zeros((1,), np.float64)
    else:
        pos = np.arange(out_size, dtype=np.float64) * (in_size - 1) / (out_size - 1)
    lo = np.clip(np.floor(pos).astype(np.int64), 0, in_size - 2)
    frac = (pos - lo).astype(np.float32)
    mat = np.zeros((out_size, in_size), np.float32)
    rows = np.arange(out_size)
    mat[rows, lo] += 1.0 - frac
    mat[rows, lo + 1] += frac
    return mat


def _interp_matmul(wmat_np, b, out_rows, out_dtype):
    """(out, in) interpolation matrix @ b via the plain Pallas matmul."""
    M, K = wmat_np.shape
    Kb, Ncol = b.shape
    assert K == Kb
    Mp, Kp, Np = _pad_m(M), _round_up(K, 128), _round_up(Ncol, 128)
    a_p = jnp.asarray(np.pad(wmat_np, ((0, Mp - M), (0, Kp - K))), jnp.bfloat16)
    b_p = jnp.pad(b.astype(jnp.bfloat16), ((0, Kp - K), (0, Np - Ncol)))
    out = pallas_matmul(a_p, b_p, out_dtype=out_dtype)
    return out[:out_rows, :Ncol]


def bilinear_upsample(x, out_h, out_w, out_dtype=jnp.bfloat16):
    N, H, W, C = x.shape
    do_h, do_w = out_h != H, out_w != W
    if not do_h and not do_w:
        return x                               # identity resample: skip
    if do_h:
        dt = jnp.bfloat16 if do_w else out_dtype
        b = jnp.transpose(x, (1, 0, 2, 3)).reshape(H, N * W * C)
        y = _interp_matmul(_bilinear_matrix_np(out_h, H), b, out_h, dt)
        x = jnp.transpose(y.reshape(out_h, N, W, C), (1, 0, 2, 3))
    if do_w:
        Hc = x.shape[1]
        b = jnp.transpose(x, (2, 0, 1, 3)).reshape(W, N * Hc * C)
        y = _interp_matmul(_bilinear_matrix_np(out_w, W), b, out_w, out_dtype)
        x = jnp.transpose(y.reshape(out_w, N, Hc, C), (1, 2, 0, 3))
    return x


# ----------------------------------------------------------------------------
# Parameter creation: raw torch-like params -> pre-folded / pre-padded / bf16
# ----------------------------------------------------------------------------
LAYERS = [1, 1]
DEPTH = 2
BASE_MULTIPLIER = 8      # half_base = 4
NUM_CLASSES = 6
INPUT_CHANNEL = 4        # dataset == 'GID'
MULTI_DICT = {0: 1, 1: 2, 2: 4, 3: 8}
CONNECTIONS = [
    np.array([[-1, 0], [0, 0]]),   # pre_feature -> cell (0, 0)
    np.array([[0, 0], [1, 0]]),    # features[0][0] -> cell (1, 0)
]


def _raw_conv(key, kh, kw, cin, cout, bias=True, bn=True):
    ks = jax.random.split(key, 6)
    p = {"w": 0.1 * jax.random.normal(ks[0], (kh, kw, cin, cout), jnp.float32)}
    if bias:
        p["b"] = 0.05 * jax.random.normal(ks[1], (cout,), jnp.float32)
    if bn:
        p["bn"] = {
            "gamma": 1.0 + 0.1 * jax.random.normal(ks[2], (cout,), jnp.float32),
            "beta": 0.1 * jax.random.normal(ks[3], (cout,), jnp.float32),
            "mean": 0.05 * jax.random.normal(ks[4], (cout,), jnp.float32),
            "var": 1.0 + 0.1 * jnp.abs(jax.random.normal(ks[5], (cout,), jnp.float32)),
        }
    return p


def _fold_scale_shift(raw, cout):
    """Fold conv bias + BatchNorm (eval) into a single per-channel scale/shift."""
    bvec = raw.get("b", jnp.zeros((cout,), jnp.float32))
    bn = raw.get("bn", None)
    if bn is not None:
        inv = bn["gamma"] * jax.lax.rsqrt(bn["var"] + 1e-5)
        scale = inv
        shift = bn["beta"] + (bvec - bn["mean"]) * inv
    else:
        scale = jnp.ones((cout,), jnp.float32)
        shift = bvec
    return scale, shift


def _prep_mat_layer(raw, kh, kw, cin, cout, relu, stride, padding):
    K = kh * kw * cin
    Kp = _round_up(K, 128)
    Np = _round_up(cout, 128)
    wmat = jnp.pad(raw["w"].reshape(K, cout),
                   ((0, Kp - K), (0, Np - cout))).astype(jnp.bfloat16)
    scale, shift = _fold_scale_shift(raw, cout)
    return dict(wmat=wmat,
                scale=jnp.pad(scale, (0, Np - cout)).reshape(1, Np),
                shift=jnp.pad(shift, (0, Np - cout)).reshape(1, Np),
                relu=relu, kh=kh, kw=kw, stride=stride, padding=padding,
                cin=cin, cout=cout)


def _prep_conv3s1_layer(raw, cin, cout, relu):
    Ck = _round_up(cin, 128)
    Cop = _round_up(cout, 128)
    w9 = jnp.pad(raw["w"].reshape(9, cin, cout),
                 ((0, 0), (0, Ck - cin), (0, Cop - cout))).astype(jnp.bfloat16)
    scale, shift = _fold_scale_shift(raw, cout)
    return dict(w9=w9,
                scale=jnp.pad(scale, (0, Cop - cout)).reshape(1, Cop),
                shift=jnp.pad(shift, (0, Cop - cout)).reshape(1, Cop),
                relu=relu, cin=cin, cout=cout)


def init_params(key):
    half = BASE_MULTIPLIER // 2
    keys = jax.random.split(key, 16)
    params = {
        "stem0": _prep_mat_layer(_raw_conv(keys[0], 3, 3, INPUT_CHANNEL, half),
                                 3, 3, INPUT_CHANNEL, half, relu=True,
                                 stride=2, padding=1),
        "stem1": _prep_conv3s1_layer(_raw_conv(keys[1], 3, 3, half, half),
                                     half, half, relu=True),
        "stem2": _prep_mat_layer(_raw_conv(keys[2], 3, 3, half, BASE_MULTIPLIER),
                                 3, 3, half, BASE_MULTIPLIER, relu=True,
                                 stride=2, padding=1),
        "cells": {},
    }
    num_last_features = 0
    kidx = 3
    for i in range(len(LAYERS)):
        for j in range(DEPTH):
            num_connect = 0
            for conn in CONNECTIONS:
                if (np.array([i, j]) == conn[1]).all():
                    num_connect += 1
                    if conn[0][0] == -1:
                        cin = BASE_MULTIPLIER * MULTI_DICT[0]
                    else:
                        cin = BASE_MULTIPLIER * MULTI_DICT[conn[0][1]]
                    cout = BASE_MULTIPLIER * MULTI_DICT[conn[1][1]]
                    raw = _raw_conv(keys[kidx], 1, 1, cin, cout, bias=False, bn=True)
                    params["cells"][(i, j, str(conn[0]))] = _prep_mat_layer(
                        raw, 1, 1, cin, cout, relu=True, stride=1, padding=0)
                    kidx += 1
            if i == len(LAYERS) - 1 and num_connect != 0:
                num_last_features += BASE_MULTIPLIER * MULTI_DICT[j]
    params["last_conv0"] = _prep_conv3s1_layer(
        _raw_conv(keys[kidx + 0], 3, 3, num_last_features, 256, bias=False, bn=True),
        num_last_features, 256, relu=False)
    params["last_conv1"] = _prep_conv3s1_layer(
        _raw_conv(keys[kidx + 1], 3, 3, 256, 256, bias=False, bn=True),
        256, 256, relu=False)
    params["last_conv2"] = _prep_mat_layer(
        _raw_conv(keys[kidx + 2], 1, 1, 256, NUM_CLASSES, bias=True, bn=False),
        1, 1, 256, NUM_CLASSES, relu=False, stride=1, padding=0)
    return params


# ----------------------------------------------------------------------------
# MixedRetrainCell
# TODO(synk): MixedRetrainCell's source (cell_arch ops) is not provided in the
#             reference module; approximated as a 1x1 Conv -> BatchNorm -> ReLU
#             projection matching its (C_in -> C_out) signature.
# ----------------------------------------------------------------------------
def mixed_retrain_cell(x, layer):
    return conv1x1_fused(x, layer)


# ----------------------------------------------------------------------------
# Forward pass
# ----------------------------------------------------------------------------
def retrain_net_forward(params, x_nchw):
    x = jnp.transpose(x_nchw, (0, 2, 3, 1)).astype(jnp.float32)  # NCHW -> NHWC

    # stems (activations stay bf16 / channel-padded from here on)
    temp = conv_s2_fused(x, params["stem0"])
    temp = conv3x3_s1_fused(temp, params["stem1"])
    pre_feature = conv_s2_fused(temp, params["stem2"])

    # cell grid
    features = [[0 for _ in range(DEPTH)] for _ in range(len(LAYERS))]
    for i in range(len(LAYERS)):
        for j in range(DEPTH):
            for conn in CONNECTIONS:
                if (np.array([i, j]) == conn[1]).all():
                    cell_p = params["cells"][(i, j, str(conn[0]))]
                    if conn[0][0] == -1:
                        out = mixed_retrain_cell(pre_feature, cell_p)
                    else:
                        src = features[conn[0][0]][conn[0][1]]
                        if isinstance(src, int):
                            continue
                        out = mixed_retrain_cell(src, cell_p)
                    if isinstance(features[i][j], int):
                        features[i][j] = out
                    else:
                        features[i][j] = features[i][j] + out

    last_i = len(LAYERS) - 1
    last_feats = []
    for j in range(DEPTH):
        f = features[last_i][j]
        if not isinstance(f, int):
            last_feats.append((f, BASE_MULTIPLIER * MULTI_DICT[j]))
    tgt_h, tgt_w = last_feats[0][0].shape[1], last_feats[0][0].shape[2]
    ups = [bilinear_upsample(f, tgt_h, tgt_w) for f, _ in last_feats]
    if len(ups) == 1:
        result = ups[0]                       # already channel-padded bf16
    else:
        result = jnp.concatenate(
            [u[..., :c] for u, (_, c) in zip(ups, last_feats)], axis=-1)

    # last_conv: Conv-BN-Dropout-Conv-BN-Dropout-Conv (Dropout = identity, eval)
    result = conv3x3_s1_fused(result, params["last_conv0"])
    result = conv3x3_s1_fused(result, params["last_conv1"])
    result = conv1x1_fused(result, params["last_conv2"])

    # final separable bilinear upsample back to the input spatial size
    result = bilinear_upsample(result, x.shape[1], x.shape[2],
                               out_dtype=jnp.float32)
    result = result[..., :NUM_CLASSES].astype(jnp.float32)
    return jnp.transpose(result, (0, 3, 1, 2))  # NHWC -> NCHW


if __name__ == "__main__":
    key = jax.random.PRNGKey(0)
    k_param, k_input = jax.random.split(key)
    params = init_params(k_param)
    x = jax.random.normal(k_input, (2, INPUT_CHANNEL, 16, 16), jnp.float32)

    fwd = jax.jit(functools.partial(retrain_net_forward, params))
    out = jax.block_until_ready(fwd(x))

    assert out.shape == (2, NUM_CLASSES, 16, 16), out.shape
    assert bool(jnp.all(jnp.isfinite(out)))
    print("KERNEL_OK")
</pallas_src>

<mosaic_0001>
module attributes {stable_mosaic.version = 11 : i64} {
  func.func @_mm_affine_kernel(%arg0: i32, %arg1: i32, %arg2: i32, %arg3: memref<64x128xbf16, #tpu.memory_space<vmem>>, %arg4: memref<128x128xbf16, #tpu.memory_space<vmem>>, %arg5: memref<1x128xf32, #tpu.memory_space<vmem>>, %arg6: memref<1x128xf32, #tpu.memory_space<vmem>>, %arg7: memref<64x128xbf16, #tpu.memory_space<vmem>>, %arg8: memref<64x128xf32, #tpu.memory_space<vmem>>) attributes {dimension_semantics = [#tpu.dimension_semantics<parallel>, #tpu.dimension_semantics<parallel>, #tpu.dimension_semantics<arbitrary>], iteration_bounds = array<i64: 2, 1, 1>, scalar_prefetch = 0 : i64, scratch_operands = 1 : i64, tpu.core_type = #tpu.core_type<tc>, window_params = [{transform_indices = @transform_0, window_bounds = array<i64: 64, 128>}, {transform_indices = @transform_1, window_bounds = array<i64: 128, 128>}, {transform_indices = @transform_2, window_bounds = array<i64: 1, 128>}, {transform_indices = @transform_3, window_bounds = array<i64: 1, 128>}, {transform_indices = @transform_4, window_bounds = array<i64: 64, 128>}]} {
    %c0_i32 = arith.constant 0 : i32
    %0 = arith.cmpi eq, %arg2, %c0_i32 : i32
    %1 = arith.extui %0 : i1 to i32
    %c0_i32_0 = arith.constant 0 : i32
    %2 = arith.cmpi ne, %1, %c0_i32_0 : i32
    scf.if %2 {
      %cst_10 = arith.constant 0.000000e+00 : f32
      %12 = vector.broadcast %cst_10 : f32 to vector<64x128xf32>
      %c0_11 = arith.constant 0 : index
      %c0_12 = arith.constant 0 : index
      %13 = vector.load %arg8[%c0_11, %c0_12] : memref<64x128xf32, #tpu.memory_space<vmem>>, vector<64x128xf32>
      tpu.vector_store %arg8[%c0_11, %c0_12], %12 {strides = array<i32>} : memref<64x128xf32, #tpu.memory_space<vmem>>, vector<64x128xf32>,
    } else {
    }
    %c0 = arith.constant 0 : index
    %c0_1 = arith.constant 0 : index
    %3 = vector.load %arg8[%c0, %c0_1] : memref<64x128xf32, #tpu.memory_space<vmem>>, vector<64x128xf32>
    %c0_2 = arith.constant 0 : index
    %c0_3 = arith.constant 0 : index
    %4 = vector.load %arg3[%c0_2, %c0_3] : memref<64x128xbf16, #tpu.memory_space<vmem>>, vector<64x128xbf16>
    %c0_4 = arith.constant 0 : index
    %c0_5 = arith.constant 0 : index
    %5 = vector.load %arg4[%c0_4, %c0_5] : memref<128x128xbf16, #tpu.memory_space<vmem>>, vector<128x128xbf16>
    %cst = arith.constant dense<0.000000e+00> : vector<64x128xf32>
    %6 = tpu.matmul %4, %5, %cst {dimension_numbers = #tpu.dot_dimension_numbers<[1], [0], [0], [1], [0, 0, 1, 1], [], []>} : vector<64x128xbf16>, vector<128x128xbf16>, vector<64x128xf32> -> vector<64x128xf32>
    %7 = arith.addf %3, %6 : vector<64x128xf32>
    %c0_6 = arith.constant 0 : index
    %c0_7 = arith.constant 0 : index
    %8 = vector.load %arg8[%c0_6, %c0_7] : memref<64x128xf32, #tpu.memory_space<vmem>>, vector<64x128xf32>
    tpu.vector_store %arg8[%c0_6, %c0_7], %7 {strides = array<i32>} : memref<64x128xf32, #tpu.memory_space<vmem>>, vector<64x128xf32>,
    %c0_i32_8 = arith.constant 0 : i32
    %9 = arith.cmpi eq, %arg2, %c0_i32_8 : i32
    %10 = arith.extui %9 : i1 to i32
    %c0_i32_9 = arith.constant 0 : i32
    %11 = arith.cmpi ne, %10, %c0_i32_9 : i32
    scf.if %11 {
      %c0_10 = arith.constant 0 : index
      %c0_11 = arith.constant 0 : index
      %12 = vector.load %arg8[%c0_10, %c0_11] : memref<64x128xf32, #tpu.memory_space<vmem>>, vector<64x128xf32>
      %c0_12 = arith.constant 0 : index
      %c0_13 = arith.constant 0 : index
      %13 = vector.load %arg5[%c0_12, %c0_13] : memref<1x128xf32, #tpu.memory_space<vmem>>, vector<1x128xf32>
      %14 = vector.broadcast %13 : vector<1x128xf32> to vector<64x128xf32>
      %15 = arith.mulf %12, %14 : vector<64x128xf32>
      %c0_14 = arith.constant 0 : index
      %c0_15 = arith.constant 0 : index
      %16 = vector.load %arg6[%c0_14, %c0_15] : memref<1x128xf32, #tpu.memory_space<vmem>>, vector<1x128xf32>
      %17 = vector.broadcast %16 : vector<1x128xf32> to vector<64x128xf32>
      %18 = arith.addf %15, %17 : vector<64x128xf32>
      %cst_16 = arith.constant 0.000000e+00 : f32
      %19 = vector.broadcast %cst_16 : f32 to vector<64x128xf32>
      %20 = arith.maximumf %18, %19 : vector<64x128xf32>
      %21 = arith.truncf %20 : vector<64x128xf32> to vector<64x128xbf16>
      %c0_17 = arith.constant 0 : index
      %c0_18 = arith.constant 0 : index
      %22 = vector.load %arg7[%c0_17, %c0_18] : memref<64x128xbf16, #tpu.memory_space<vmem>>, vector<64x128xbf16>
      tpu.vector_store %arg7[%c0_17, %c0_18], %21 {strides = array<i32>} : memref<64x128xbf16, #tpu.memory_space<vmem>>, vector<64x128xbf16>,
    } else {
    }
    return
  }
  func.func @transform_0(%arg0: i32, %arg1: i32, %arg2: i32) -> (i32, i32) {
    %c0_i32 = arith.constant 0 : i32
    return %arg0, %arg2 : i32, i32
  }
  func.func @transform_1(%arg0: i32, %arg1: i32, %arg2: i32) -> (i32, i32) {
    %c0_i32 = arith.constant 0 : i32
    return %arg2, %arg1 : i32, i32
  }
  func.func @transform_2(%arg0: i32, %arg1: i32, %arg2: i32) -> (i32, i32) {
    %c0_i32 = arith.constant 0 : i32
    %c0_i32_0 = arith.constant 0 : i32
    return %c0_i32, %arg1 : i32, i32
  }
  func.func @transform_3(%arg0: i32, %arg1: i32, %arg2: i32) -> (i32, i32) {
    %c0_i32 = arith.constant 0 : i32
    %c0_i32_0 = arith.constant 0 : i32
    return %c0_i32, %arg1 : i32, i32
  }
  func.func @transform_4(%arg0: i32, %arg1: i32, %arg2: i32) -> (i32, i32) {
    %c0_i32 = arith.constant 0 : i32
    return %arg0, %arg1 : i32, i32
  }
}

module attributes {stable_mosaic.version = 11 : i64} {
  func.func @_conv3x3_kernel(%arg0: i32, %arg1: memref<192x128xbf16, #tpu.memory_space<vmem>>, %arg2: memref<48x128xbf16, #tpu.memory_space<vmem>>, %arg3: memref<9x128x128xbf16, #tpu.memory_space<vmem>>, %arg4: memref<1x128xf32, #tpu.memory_space<vmem>>, %arg5: memref<1x128xf32, #tpu.memory_space<vmem>>, %arg6: memref<192x128xbf16, #tpu.memory_space<vmem>>, %arg7: memref<240x128xf32, #tpu.memory_space<vmem>>, %arg8: memref<192x128xf32, #tpu.memory_space<vmem>>) attributes {dimension_semantics = [#tpu.dimension_semantics<parallel>], iteration_bounds = array<i64: 2>, scalar_prefetch = 0 : i64, scratch_operands = 2 : i64, tpu.core_type = #tpu.core_type<tc>, window_params = [{transform_indices = @transform_0, window_bounds = array<i64: 192, 128>}, {transform_indices = @transform_1, window_bounds = array<i64: 48, 128>}, {pipeline_mode = #tpu.pipeline_mode<synchronous>, transform_indices = @transform_2, window_bounds = array<i64: 9, 128, 128>}, {pipeline_mode = #tpu.pipeline_mode<synchronous>, transform_indices = @transform_3, window_bounds = array<i64: 1, 128>}, {pipeline_mode = #tpu.pipeline_mode<synchronous>, transform_indices = @transform_4, window_bounds = array<i64: 1, 128>}, {transform_indices = @transform_5, window_bounds = array<i64: 192, 128>}]} {
    %c0 = arith.constant 0 : index
    %c0_0 = arith.constant 0 : index
    %0 = vector.load %arg1[%c0, %c0_0] : memref<192x128xbf16, #tpu.memory_space<vmem>>, vector<192x128xbf16>
    %1 = arith.extf %0 : vector<192x128xbf16> to vector<192x128xf32>
    %c0_1 = arith.constant 0 : index
    %c0_2 = arith.constant 0 : index
    %2 = vector.load %arg7[%c0_1, %c0_2] : memref<240x128xf32, #tpu.memory_space<vmem>>, vector<192x128xf32>
    tpu.vector_store %arg7[%c0_1, %c0_2], %1 {strides = array<i32>} : memref<240x128xf32, #tpu.memory_space<vmem>>, vector<192x128xf32>,
    %c0_3 = arith.constant 0 : index
    %c0_4 = arith.constant 0 : index
    %3 = vector.load %arg2[%c0_3, %c0_4] : memref<48x128xbf16, #tpu.memory_space<vmem>>, vector<48x128xbf16>
    %4 = arith.extf %3 : vector<48x128xbf16> to vector<48x128xf32>
    %c192 = arith.constant 192 : index
    %c0_5 = arith.constant 0 : index
    %5 = vector.load %arg7[%c192, %c0_5] : memref<240x128xf32, #tpu.memory_space<vmem>>, vector<48x128xf32>
    tpu.vector_store %arg7[%c192, %c0_5], %4 {strides = array<i32>} : memref<240x128xf32, #tpu.memory_space<vmem>>, vector<48x128xf32>,
    %c0_6 = arith.constant 0 : index
    %c0_7 = arith.constant 0 : index
    %6 = vector.load %arg7[%c0_6, %c0_7] : memref<240x128xf32, #tpu.memory_space<vmem>>, vector<192x128xf32>
    %7 = arith.truncf %6 : vector<192x128xf32> to vector<192x128xbf16>
    %c0_8 = arith.constant 0 : index
    %c0_9 = arith.constant 0 : index
    %c0_10 = arith.constant 0 : index
    %8 = vector.load %arg3[%c0_8, %c0_9, %c0_10] : memref<9x128x128xbf16, #tpu.memory_space<vmem>>, vector<1x128x128xbf16>
    %9 = vector.shape_cast %8 : vector<1x128x128xbf16> to vector<128x128xbf16>
    %cst = arith.constant dense<0.000000e+00> : vector<192x128xf32>
    %10 = tpu.matmul %7, %9, %cst {dimension_numbers = #tpu.dot_dimension_numbers<[1], [0], [0], [1], [0, 0, 1, 1], [], []>} : vector<192x128xbf16>, vector<128x128xbf16>, vector<192x128xf32> -> vector<192x128xf32>
    %c0_11 = arith.constant 0 : index
    %c0_12 = arith.constant 0 : index
    %11 = vector.load %arg8[%c0_11, %c0_12] : memref<192x128xf32, #tpu.memory_space<vmem>>, vector<192x128xf32>
    tpu.vector_store %arg8[%c0_11, %c0_12], %10 {strides = array<i32>} : memref<192x128xf32, #tpu.memory_space<vmem>>, vector<192x128xf32>,
    %c1 = arith.constant 1 : index
    %c0_13 = arith.constant 0 : index
    %12 = vector.load %arg7[%c1, %c0_13] : memref<240x128xf32, #tpu.memory_space<vmem>>, vector<192x128xf32>
    %13 = arith.truncf %12 : vector<192x128xf32> to vector<192x128xbf16>
    %c1_14 = arith.constant 1 : index
    %c0_15 = arith.constant 0 : index
    %c0_16 = arith.constant 0 : index
    %14 = vector.load %arg3[%c1_14, %c0_15, %c0_16] : memref<9x128x128xbf16, #tpu.memory_space<vmem>>, vector<1x128x128xbf16>
    %15 = vector.shape_cast %14 : vector<1x128x128xbf16> to vector<128x128xbf16>
    %cst_17 = arith.constant dense<0.000000e+00> : vector<192x128xf32>
    %16 = tpu.matmul %13, %15, %cst_17 {dimension_numbers = #tpu.dot_dimension_numbers<[1], [0], [0], [1], [0, 0, 1, 1], [], []>} : vector<192x128xbf16>, vector<128x128xbf16>, vector<192x128xf32> -> vector<192x128xf32>
    %c0_18 = arith.constant 0 : index
    %c0_19 = arith.constant 0 : index
    %17 = vector.load %arg8[%c0_18, %c0_19] : memref<192x128xf32, #tpu.memory_space<vmem>>, vector<192x128xf32>
    %18 = arith.addf %17, %16 : vector<192x128xf32>
    %c0_20 = arith.constant 0 : index
    %c0_21 = arith.constant 0 : index
    %19 = vector.load %arg8[%c0_20, %c0_21] : memref<192x128xf32, #tpu.memory_space<vmem>>, vector<192x128xf32>
    tpu.vector_store %arg8[%c0_20, %c0_21], %18 {strides = array<i32>} : memref<192x128xf32, #tpu.memory_space<vmem>>, vector<192x128xf32>,
    %c2 = arith.constant 2 : index
    %c0_22 = arith.constant 0 : index
    %20 = vector.load %arg7[%c2, %c0_22] : memref<240x128xf32, #tpu.memory_space<vmem>>, vector<192x128xf32>
    %21 = arith.truncf %20 : vector<192x128xf32> to vector<192x128xbf16>
    %c2_23 = arith.constant 2 : index
    %c0_24 = arith.constant 0 : index
    %c0_25 = arith.constant 0 : index
    %22 = vector.load %arg3[%c2_23, %c0_24, %c0_25] : memref<9x128x128xbf16, #tpu.memory_space<vmem>>, vector<1x128x128xbf16>
    %23 = vector.shape_cast %22 : vector<1x128x128xbf16> to vector<128x128xbf16>
    %cst_26 = arith.constant dense<0.000000e+00> : vector<192x128xf32>
    %24 = tpu.matmul %21, %23, %cst_26 {dimension_numbers = #tpu.dot_dimension_numbers<[1], [0], [0], [1], [0, 0, 1, 1], [], []>} : vector<192x128xbf16>, vector<128x128xbf16>, vector<192x128xf32> -> vector<192x128xf32>
    %c0_27 = arith.constant 0 : index
    %c0_28 = arith.constant 0 : index
    %25 = vector.load %arg8[%c0_27, %c0_28] : memref<192x128xf32, #tpu.memory_space<vmem>>, vector<192x128xf32>
    %26 = arith.addf %25, %24 : vector<192x128xf32>
    %c0_29 = arith.constant 0 : index
    %c0_30 = arith.constant 0 : index
    %27 = vector.load %arg8[%c0_29, %c0_30] : memref<192x128xf32, #tpu.memory_space<vmem>>, vector<192x128xf32>
    tpu.vector_store %arg8[%c0_29, %c0_30], %26 {strides = array<i32>} : memref<192x128xf32, #tpu.memory_space<vmem>>, vector<192x128xf32>,
    %c16 = arith.constant 16 : index
    %c0_31 = arith.constant 0 : index
    %28 = vector.load %arg7[%c16, %c0_31] : memref<240x128xf32, #tpu.memory_space<vmem>>, vector<192x128xf32>
    %29 = arith.truncf %28 : vector<192x128xf32> to vector<192x128xbf16>
    %c3 = arith.constant 3 : index
    %c0_32 = arith.constant 0 : index
    %c0_33 = arith.constant 0 : index
    %30 = vector.load %arg3[%c3, %c0_32, %c0_33] : memref<9x128x128xbf16, #tpu.memory_space<vmem>>, vector<1x128x128xbf16>
    %31 = vector.shape_cast %30 : vector<1x128x128xbf16> to vector<128x128xbf16>
    %cst_34 = arith.constant dense<0.000000e+00> : vector<192x128xf32>
    %32 = tpu.matmul %29, %31, %cst_34 {dimension_numbers = #tpu.dot_dimension_numbers<[1], [0], [0], [1], [0, 0, 1, 1], [], []>} : vector<192x128xbf16>, vector<128x128xbf16>, vector<192x128xf32> -> vector<192x128xf32>
    %c0_35 = arith.constant 0 : index
    %c0_36 = arith.constant 0 : index
    %33 = vector.load %arg8[%c0_35, %c0_36] : memref<192x128xf32, #tpu.memory_space<vmem>>, vector<192x128xf32>
    %34 = arith.addf %33, %32 : vector<192x128xf32>
    %c0_37 = arith.constant 0 : index
    %c0_38 = arith.constant 0 : index
    %35 = vector.load %arg8[%c0_37, %c0_38] : memref<192x128xf32, #tpu.memory_space<vmem>>, vector<192x128xf32>
    tpu.vector_store %arg8[%c0_37, %c0_38], %34 {strides = array<i32>} : memref<192x128xf32, #tpu.memory_space<vmem>>, vector<192x128xf32>,
    %c17 = arith.constant 17 : index
    %c0_39 = arith.constant 0 : index
    %36 = vector.load %arg7[%c17, %c0_39] : memref<240x128xf32, #tpu.memory_space<vmem>>, vector<192x128xf32>
    %37 = arith.truncf %36 : vector<192x128xf32> to vector<192x128xbf16>
    %c4 = arith.constant 4 : index
    %c0_40 = arith.constant 0 : index
    %c0_41 = arith.constant 0 : index
    %38 = vector.load %arg3[%c4, %c0_40, %c0_41] : memref<9x128x128xbf16, #tpu.memory_space<vmem>>, vector<1x128x128xbf16>
    %39 = vector.shape_cast %38 : vector<1x128x128xbf16> to vector<128x128xbf16>
    %cst_42 = arith.constant dense<0.000000e+00> : vector<192x128xf32>
    %40 = tpu.matmul %37, %39, %cst_42 {dimension_numbers = #tpu.dot_dimension_numbers<[1], [0], [0], [1], [0, 0, 1, 1], [], []>} : vector<192x128xbf16>, vector<128x128xbf16>, vector<192x128xf32> -> vector<192x128xf32>
    %c0_43 = arith.constant 0 : index
    %c0_44 = arith.constant 0 : index
    %41 = vector.load %arg8[%c0_43, %c0_44] : memref<192x128xf32, #tpu.memory_space<vmem>>, vector<192x128xf32>
    %42 = arith.addf %41, %40 : vector<192x128xf32>
    %c0_45 = arith.constant 0 : index
    %c0_46 = arith.constant 0 : index
    %43 = vector.load %arg8[%c0_45, %c0_46] : memref<192x128xf32, #tpu.memory_space<vmem>>, vector<192x128xf32>
    tpu.vector_store %arg8[%c0_45, %c0_46], %42 {strides = array<i32>} : memref<192x128xf32, #tpu.memory_space<vmem>>, vector<192x128xf32>,
    %c18 = arith.constant 18 : index
    %c0_47 = arith.constant 0 : index
    %44 = vector.load %arg7[%c18, %c0_47] : memref<240x128xf32, #tpu.memory_space<vmem>>, vector<192x128xf32>
    %45 = arith.truncf %44 : vector<192x128xf32> to vector<192x128xbf16>
    %c5 = arith.constant 5 : index
    %c0_48 = arith.constant 0 : index
    %c0_49 = arith.constant 0 : index
    %46 = vector.load %arg3[%c5, %c0_48, %c0_49] : memref<9x128x128xbf16, #tpu.memory_space<vmem>>, vector<1x128x128xbf16>
    %47 = vector.shape_cast %46 : vector<1x128x128xbf16> to vector<128x128xbf16>
    %cst_50 = arith.constant dense<0.000000e+00> : vector<192x128xf32>
    %48 = tpu.matmul %45, %47, %cst_50 {dimension_numbers = #tpu.dot_dimension_numbers<[1], [0], [0], [1], [0, 0, 1, 1], [], []>} : vector<192x128xbf16>, vector<128x128xbf16>, vector<192x128xf32> -> vector<192x128xf32>
    %c0_51 = arith.constant 0 : index
    %c0_52 = arith.constant 0 : index
    %49 = vector.load %arg8[%c0_51, %c0_52] : memref<192x128xf32, #tpu.memory_space<vmem>>, vector<192x128xf32>
    %50 = arith.addf %49, %48 : vector<192x128xf32>
    %c0_53 = arith.constant 0 : index
    %c0_54 = arith.constant 0 : index
    %51 = vector.load %arg8[%c0_53, %c0_54] : memref<192x128xf32, #tpu.memory_space<vmem>>, vector<192x128xf32>
    tpu.vector_store %arg8[%c0_53, %c0_54], %50 {strides = array<i32>} : memref<192x128xf32, #tpu.memory_space<vmem>>, vector<192x128xf32>,
    %c32 = arith.constant 32 : index
    %c0_55 = arith.constant 0 : index
    %52 = vector.load %arg7[%c32, %c0_55] : memref<240x128xf32, #tpu.memory_space<vmem>>, vector<192x128xf32>
    %53 = arith.truncf %52 : vector<192x128xf32> to vector<192x128xbf16>
    %c6 = arith.constant 6 : index
    %c0_56 = arith.constant 0 : index
    %c0_57 = arith.constant 0 : index
    %54 = vector.load %arg3[%c6, %c0_56, %c0_57] : memref<9x128x128xbf16, #tpu.memory_space<vmem>>, vector<1x128x128xbf16>
    %55 = vector.shape_cast %54 : vector<1x128x128xbf16> to vector<128x128xbf16>
    %cst_58 = arith.constant dense<0.000000e+00> : vector<192x128xf32>
    %56 = tpu.matmul %53, %55, %cst_58 {dimension_numbers = #tpu.dot_dimension_numbers<[1], [0], [0], [1], [0, 0, 1, 1], [], []>} : vector<192x128xbf16>, vector<128x128xbf16>, vector<192x128xf32> -> vector<192x128xf32>
    %c0_59 = arith.constant 0 : index
    %c0_60 = arith.constant 0 : index
    %57 = vector.load %arg8[%c0_59, %c0_60] : memref<192x128xf32, #tpu.memory_space<vmem>>, vector<192x128xf32>
    %58 = arith.addf %57, %56 : vector<192x128xf32>
    %c0_61 = arith.constant 0 : index
    %c0_62 = arith.constant 0 : index
    %59 = vector.load %arg8[%c0_61, %c0_62] : memref<192x128xf32, #tpu.memory_space<vmem>>, vector<192x128xf32>
    tpu.vector_store %arg8[%c0_61, %c0_62], %58 {strides = array<i32>} : memref<192x128xf32, #tpu.memory_space<vmem>>, vector<192x128xf32>,
    %c33 = arith.constant 33 : index
    %c0_63 = arith.constant 0 : index
    %60 = vector.load %arg7[%c33, %c0_63] : memref<240x128xf32, #tpu.memory_space<vmem>>, vector<192x128xf32>
    %61 = arith.truncf %60 : vector<192x128xf32> to vector<192x128xbf16>
    %c7 = arith.constant 7 : index
    %c0_64 = arith.constant 0 : index
    %c0_65 = arith.constant 0 : index
    %62 = vector.load %arg3[%c7, %c0_64, %c0_65] : memref<9x128x128xbf16, #tpu.memory_space<vmem>>, vector<1x128x128xbf16>
    %63 = vector.shape_cast %62 : vector<1x128x128xbf16> to vector<128x128xbf16>
    %cst_66 = arith.constant dense<0.000000e+00> : vector<192x128xf32>
    %64 = tpu.matmul %61, %63, %cst_66 {dimension_numbers = #tpu.dot_dimension_numbers<[1], [0], [0], [1], [0, 0, 1, 1], [], []>} : vector<192x128xbf16>, vector<128x128xbf16>, vector<192x128xf32> -> vector<192x128xf32>
    %c0_67 = arith.constant 0 : index
    %c0_68 = arith.constant 0 : index
    %65 = vector.load %arg8[%c0_67, %c0_68] : memref<192x128xf32, #tpu.memory_space<vmem>>, vector<192x128xf32>
    %66 = arith.addf %65, %64 : vector<192x128xf32>
    %c0_69 = arith.constant 0 : index
    %c0_70 = arith.constant 0 : index
    %67 = vector.load %arg8[%c0_69, %c0_70] : memref<192x128xf32, #tpu.memory_space<vmem>>, vector<192x128xf32>
    tpu.vector_store %arg8[%c0_69, %c0_70], %66 {strides = array<i32>} : memref<192x128xf32, #tpu.memory_space<vmem>>, vector<192x128xf32>,
    %c34 = arith.constant 34 : index
    %c0_71 = arith.constant 0 : index
    %68 = vector.load %arg7[%c34, %c0_71] : memref<240x128xf32, #tpu.memory_space<vmem>>, vector<192x128xf32>
    %69 = arith.truncf %68 : vector<192x128xf32> to vector<192x128xbf16>
    %c8 = arith.constant 8 : index
    %c0_72 = arith.constant 0 : index
    %c0_73 = arith.constant 0 : index
    %70 = vector.load %arg3[%c8, %c0_72, %c0_73] : memref<9x128x128xbf16, #tpu.memory_space<vmem>>, vector<1x128x128xbf16>
    %71 = vector.shape_cast %70 : vector<1x128x128xbf16> to vector<128x128xbf16>
    %cst_74 = arith.constant dense<0.000000e+00> : vector<192x128xf32>
    %72 = tpu.matmul %69, %71, %cst_74 {dimension_numbers = #tpu.dot_dimension_numbers<[1], [0], [0], [1], [0, 0, 1, 1], [], []>} : vector<192x128xbf16>, vector<128x128xbf16>, vector<192x128xf32> -> vector<192x128xf32>
    %c0_75 = arith.constant 0 : index
    %c0_76 = arith.constant 0 : index
    %73 = vector.load %arg8[%c0_75, %c0_76] : memref<192x128xf32, #tpu.memory_space<vmem>>, vector<192x128xf32>
    %74 = arith.addf %73, %72 : vector<192x128xf32>
    %c0_77 = arith.constant 0 : index
    %c0_78 = arith.constant 0 : index
    %75 = vector.load %arg8[%c0_77, %c0_78] : memref<192x128xf32, #tpu.memory_space<vmem>>, vector<192x128xf32>
    tpu.vector_store %arg8[%c0_77, %c0_78], %74 {strides = array<i32>} : memref<192x128xf32, #tpu.memory_space<vmem>>, vector<192x128xf32>,
    %c0_79 = arith.constant 0 : index
    %c0_80 = arith.constant 0 : index
    %76 = vector.load %arg8[%c0_79, %c0_80] : memref<192x128xf32, #tpu.memory_space<vmem>>, vector<192x128xf32>
    %c0_81 = arith.constant 0 : index
    %c0_82 = arith.constant 0 : index
    %77 = vector.load %arg4[%c0_81, %c0_82] : memref<1x128xf32, #tpu.memory_space<vmem>>, vector<1x128xf32>
    %78 = vector.broadcast %77 : vector<1x128xf32> to vector<192x128xf32>
    %79 = arith.mulf %76, %78 : vector<192x128xf32>
    %c0_83 = arith.constant 0 : index
    %c0_84 = arith.constant 0 : index
    %80 = vector.load %arg5[%c0_83, %c0_84] : memref<1x128xf32, #tpu.memory_space<vmem>>, vector<1x128xf32>
    %81 = vector.broadcast %80 : vector<1x128xf32> to vector<192x128xf32>
    %82 = arith.addf %79, %81 : vector<192x128xf32>
    %cst_85 = arith.constant 0.000000e+00 : f32
    %83 = vector.broadcast %cst_85 : f32 to vector<192x128xf32>
    %84 = arith.maximumf %82, %83 : vector<192x128xf32>
    %85 = arith.truncf %84 : vector<192x128xf32> to vector<192x128xbf16>
    %c0_86 = arith.constant 0 : index
    %c0_87 = arith.constant 0 : index
    %86 = vector.load %arg6[%c0_86, %c0_87] : memref<192x128xbf16, #tpu.memory_space<vmem>>, vector<192x128xbf16>
    tpu.vector_store %arg6[%c0_86, %c0_87], %85 {strides = array<i32>} : memref<192x128xbf16, #tpu.memory_space<vmem>>, vector<192x128xbf16>,
    return
  }
  func.func @transform_0(%arg0: i32) -> (i32, i32) {
    %c0_i32 = arith.constant 0 : i32
    %c0_i32_0 = arith.constant 0 : i32
    return %arg0, %c0_i32 : i32, i32
  }
  func.func @transform_1(%arg0: i32) -> (i32, i32) {
    %c1_i32 = arith.constant 1 : i32
    %0 = arith.addi %arg0, %c1_i32 : i32
    %c4_i32 = arith.constant 4 : i32
    %1 = arith.muli %0, %c4_i32 : i32
    %c0_i32 = arith.constant 0 : i32
    %c0_i32_0 = arith.constant 0 : i32
    return %1, %c0_i32 : i32, i32
  }
  func.func @transform_2(%arg0: i32) -> (i32, i32, i32) {
    %c0_i32 = arith.constant 0 : i32
    %c0_i32_0 = arith.constant 0 : i32
    %c0_i32_1 = arith.constant 0 : i32
    %c0_i32_2 = arith.constant 0 : i32
    return %c0_i32, %c0_i32_0, %c0_i32_1 : i32, i32, i32
  }
  func.func @transform_3(%arg0: i32) -> (i32, i32) {
    %c0_i32 = arith.constant 0 : i32
    %c0_i32_0 = arith.constant 0 : i32
    %c0_i32_1 = arith.constant 0 : i32
    return %c0_i32, %c0_i32_0 : i32, i32
  }
  func.func @transform_4(%arg0: i32) -> (i32, i32) {
    %c0_i32 = arith.constant 0 : i32
    %c0_i32_0 = arith.constant 0 : i32
    %c0_i32_1 = arith.constant 0 : i32
    return %c0_i32, %c0_i32_0 : i32, i32
  }
  func.func @transform_5(%arg0: i32) -> (i32, i32) {
    %c0_i32 = arith.constant 0 : i32
    %c0_i32_0 = arith.constant 0 : i32
    return %arg0, %c0_i32 : i32, i32
  }
}

module attributes {stable_mosaic.version = 11 : i64} {
  func.func @_mm_affine_kernel(%arg0: i32, %arg1: i32, %arg2: i32, %arg3: memref<16x128xbf16, #tpu.memory_space<vmem>>, %arg4: memref<128x128xbf16, #tpu.memory_space<vmem>>, %arg5: memref<1x128xf32, #tpu.memory_space<vmem>>, %arg6: memref<1x128xf32, #tpu.memory_space<vmem>>, %arg7: memref<16x128xbf16, #tpu.memory_space<vmem>>, %arg8: memref<16x128xf32, #tpu.memory_space<vmem>>) attributes {dimension_semantics = [#tpu.dimension_semantics<parallel>, #tpu.dimension_semantics<parallel>, #tpu.dimension_semantics<arbitrary>], iteration_bounds = array<i64: 2, 1, 1>, scalar_prefetch = 0 : i64, scratch_operands = 1 : i64, tpu.core_type = #tpu.core_type<tc>, window_params = [{transform_indices = @transform_0, window_bounds = array<i64: 16, 128>}, {transform_indices = @transform_1, window_bounds = array<i64: 128, 128>}, {transform_indices = @transform_2, window_bounds = array<i64: 1, 128>}, {transform_indices = @transform_3, window_bounds = array<i64: 1, 128>}, {transform_indices = @transform_4, window_bounds = array<i64: 16, 128>}]} {
    %c0_i32 = arith.constant 0 : i32
    %0 = arith.cmpi eq, %arg2, %c0_i32 : i32
    %1 = arith.extui %0 : i1 to i32
    %c0_i32_0 = arith.constant 0 : i32
    %2 = arith.cmpi ne, %1, %c0_i32_0 : i32
    scf.if %2 {
      %cst_10 = arith.constant 0.000000e+00 : f32
      %12 = vector.broadcast %cst_10 : f32 to vector<16x128xf32>
      %c0_11 = arith.constant 0 : index
      %c0_12 = arith.constant 0 : index
      %13 = vector.load %arg8[%c0_11, %c0_12] : memref<16x128xf32, #tpu.memory_space<vmem>>, vector<16x128xf32>
      tpu.vector_store %arg8[%c0_11, %c0_12], %12 {strides = array<i32>} : memref<16x128xf32, #tpu.memory_space<vmem>>, vector<16x128xf32>,
    } else {
    }
    %c0 = arith.constant 0 : index
    %c0_1 = arith.constant 0 : index
    %3 = vector.load %arg8[%c0, %c0_1] : memref<16x128xf32, #tpu.memory_space<vmem>>, vector<16x128xf32>
    %c0_2 = arith.constant 0 : index
    %c0_3 = arith.constant 0 : index
    %4 = vector.load %arg3[%c0_2, %c0_3] : memref<16x128xbf16, #tpu.memory_space<vmem>>, vector<16x128xbf16>
    %c0_4 = arith.constant 0 : index
    %c0_5 = arith.constant 0 : index
    %5 = vector.load %arg4[%c0_4, %c0_5] : memref<128x128xbf16, #tpu.memory_space<vmem>>, vector<128x128xbf16>
    %cst = arith.constant dense<0.000000e+00> : vector<16x128xf32>
    %6 = tpu.matmul %4, %5, %cst {dimension_numbers = #tpu.dot_dimension_numbers<[1], [0], [0], [1], [0, 0, 1, 1], [], []>} : vector<16x128xbf16>, vector<128x128xbf16>, vector<16x128xf32> -> vector<16x128xf32>
    %7 = arith.addf %3, %6 : vector<16x128xf32>
    %c0_6 = arith.constant 0 : index
    %c0_7 = arith.constant 0 : index
    %8 = vector.load %arg8[%c0_6, %c0_7] : memref<16x128xf32, #tpu.memory_space<vmem>>, vector<16x128xf32>
    tpu.vector_store %arg8[%c0_6, %c0_7], %7 {strides = array<i32>} : memref<16x128xf32, #tpu.memory_space<vmem>>, vector<16x128xf32>,
    %c0_i32_8 = arith.constant 0 : i32
    %9 = arith.cmpi eq, %arg2, %c0_i32_8 : i32
    %10 = arith.extui %9 : i1 to i32
    %c0_i32_9 = arith.constant 0 : i32
    %11 = arith.cmpi ne, %10, %c0_i32_9 : i32
    scf.if %11 {
      %c0_10 = arith.constant 0 : index
      %c0_11 = arith.constant 0 : index
      %12 = vector.load %arg8[%c0_10, %c0_11] : memref<16x128xf32, #tpu.memory_space<vmem>>, vector<16x128xf32>
      %c0_12 = arith.constant 0 : index
      %c0_13 = arith.constant 0 : index
      %13 = vector.load %arg5[%c0_12, %c0_13] : memref<1x128xf32, #tpu.memory_space<vmem>>, vector<1x128xf32>
      %14 = vector.broadcast %13 : vector<1x128xf32> to vector<16x128xf32>
      %15 = arith.mulf %12, %14 : vector<16x128xf32>
      %c0_14 = arith.constant 0 : index
      %c0_15 = arith.constant 0 : index
      %16 = vector.load %arg6[%c0_14, %c0_15] : memref<1x128xf32, #tpu.memory_space<vmem>>, vector<1x128xf32>
      %17 = vector.broadcast %16 : vector<1x128xf32> to vector<16x128xf32>
      %18 = arith.addf %15, %17 : vector<16x128xf32>
      %cst_16 = arith.constant 0.000000e+00 : f32
      %19 = vector.broadcast %cst_16 : f32 to vector<16x128xf32>
      %20 = arith.maximumf %18, %19 : vector<16x128xf32>
      %21 = arith.truncf %20 : vector<16x128xf32> to vector<16x128xbf16>
      %c0_17 = arith.constant 0 : index
      %c0_18 = arith.constant 0 : index
      %22 = vector.load %arg7[%c0_17, %c0_18] : memref<16x128xbf16, #tpu.memory_space<vmem>>, vector<16x128xbf16>
      tpu.vector_store %arg7[%c0_17, %c0_18], %21 {strides = array<i32>} : memref<16x128xbf16, #tpu.memory_space<vmem>>, vector<16x128xbf16>,
    } else {
    }
    return
  }
  func.func @transform_0(%arg0: i32, %arg1: i32, %arg2: i32) -> (i32, i32) {
    %c0_i32 = arith.constant 0 : i32
    return %arg0, %arg2 : i32, i32
  }
  func.func @transform_1(%arg0: i32, %arg1: i32, %arg2: i32) -> (i32, i32) {
    %c0_i32 = arith.constant 0 : i32
    return %arg2, %arg1 : i32, i32
  }
  func.func @transform_2(%arg0: i32, %arg1: i32, %arg2: i32) -> (i32, i32) {
    %c0_i32 = arith.constant 0 : i32
    %c0_i32_0 = arith.constant 0 : i32
    return %c0_i32, %arg1 : i32, i32
  }
  func.func @transform_3(%arg0: i32, %arg1: i32, %arg2: i32) -> (i32, i32) {
    %c0_i32 = arith.constant 0 : i32
    %c0_i32_0 = arith.constant 0 : i32
    return %c0_i32, %arg1 : i32, i32
  }
  func.func @transform_4(%arg0: i32, %arg1: i32, %arg2: i32) -> (i32, i32) {
    %c0_i32 = arith.constant 0 : i32
    return %arg0, %arg1 : i32, i32
  }
}

module attributes {stable_mosaic.version = 11 : i64} {
  func.func @_conv3x3_kernel(%arg0: i32, %arg1: memref<64x128xbf16, #tpu.memory_space<vmem>>, %arg2: memref<32x128xbf16, #tpu.memory_space<vmem>>, %arg3: memref<9x128x256xbf16, #tpu.memory_space<vmem>>, %arg4: memref<1x256xf32, #tpu.memory_space<vmem>>, %arg5: memref<1x256xf32, #tpu.memory_space<vmem>>, %arg6: memref<64x256xbf16, #tpu.memory_space<vmem>>, %arg7: memref<96x128xf32, #tpu.memory_space<vmem>>, %arg8: memref<64x256xf32, #tpu.memory_space<vmem>>) attributes {dimension_semantics = [#tpu.dimension_semantics<parallel>], iteration_bounds = array<i64: 2>, scalar_prefetch = 0 : i64, scratch_operands = 2 : i64, tpu.core_type = #tpu.core_type<tc>, window_params = [{transform_indices = @transform_0, window_bounds = array<i64: 64, 128>}, {transform_indices = @transform_1, window_bounds = array<i64: 32, 128>}, {pipeline_mode = #tpu.pipeline_mode<synchronous>, transform_indices = @transform_2, window_bounds = array<i64: 9, 128, 256>}, {pipeline_mode = #tpu.pipeline_mode<synchronous>, transform_indices = @transform_3, window_bounds = array<i64: 1, 256>}, {pipeline_mode = #tpu.pipeline_mode<synchronous>, transform_indices = @transform_4, window_bounds = array<i64: 1, 256>}, {transform_indices = @transform_5, window_bounds = array<i64: 64, 256>}]} {
    %c0 = arith.constant 0 : index
    %c0_0 = arith.constant 0 : index
    %0 = vector.load %arg1[%c0, %c0_0] : memref<64x128xbf16, #tpu.memory_space<vmem>>, vector<64x128xbf16>
    %1 = arith.extf %0 : vector<64x128xbf16> to vector<64x128xf32>
    %c0_1 = arith.constant 0 : index
    %c0_2 = arith.constant 0 : index
    %2 = vector.load %arg7[%c0_1, %c0_2] : memref<96x128xf32, #tpu.memory_space<vmem>>, vector<64x128xf32>
    tpu.vector_store %arg7[%c0_1, %c0_2], %1 {strides = array<i32>} : memref<96x128xf32, #tpu.memory_space<vmem>>, vector<64x128xf32>,
    %c0_3 = arith.constant 0 : index
    %c0_4 = arith.constant 0 : index
    %3 = vector.load %arg2[%c0_3, %c0_4] : memref<32x128xbf16, #tpu.memory_space<vmem>>, vector<32x128xbf16>
    %4 = arith.extf %3 : vector<32x128xbf16> to vector<32x128xf32>
    %c64 = arith.constant 64 : index
    %c0_5 = arith.constant 0 : index
    %5 = vector.load %arg7[%c64, %c0_5] : memref<96x128xf32, #tpu.memory_space<vmem>>, vector<32x128xf32>
    tpu.vector_store %arg7[%c64, %c0_5], %4 {strides = array<i32>} : memref<96x128xf32, #tpu.memory_space<vmem>>, vector<32x128xf32>,
    %c0_6 = arith.constant 0 : index
    %c0_7 = arith.constant 0 : index
    %6 = vector.load %arg7[%c0_6, %c0_7] : memref<96x128xf32, #tpu.memory_space<vmem>>, vector<64x128xf32>
    %7 = arith.truncf %6 : vector<64x128xf32> to vector<64x128xbf16>
    %c0_8 = arith.constant 0 : index
    %c0_9 = arith.constant 0 : index
    %c0_10 = arith.constant 0 : index
    %8 = vector.load %arg3[%c0_8, %c0_9, %c0_10] : memref<9x128x256xbf16, #tpu.memory_space<vmem>>, vector<1x128x256xbf16>
    %9 = vector.shape_cast %8 : vector<1x128x256xbf16> to vector<128x256xbf16>
    %cst = arith.constant dense<0.000000e+00> : vector<64x256xf32>
    %10 = tpu.matmul %7, %9, %cst {dimension_numbers = #tpu.dot_dimension_numbers<[1], [0], [0], [1], [0, 0, 1, 1], [], []>} : vector<64x128xbf16>, vector<128x256xbf16>, vector<64x256xf32> -> vector<64x256xf32>
    %c0_11 = arith.constant 0 : index
    %c0_12 = arith.constant 0 : index
    %11 = vector.load %arg8[%c0_11, %c0_12] : memref<64x256xf32, #tpu.memory_space<vmem>>, vector<64x256xf32>
    tpu.vector_store %arg8[%c0_11, %c0_12], %10 {strides = array<i32>} : memref<64x256xf32, #tpu.memory_space<vmem>>, vector<64x256xf32>,
    %c1 = arith.constant 1 : index
    %c0_13 = arith.constant 0 : index
    %12 = vector.load %arg7[%c1, %c0_13] : memref<96x128xf32, #tpu.memory_space<vmem>>, vector<64x128xf32>
    %13 = arith.truncf %12 : vector<64x128xf32> to vector<64x128xbf16>
    %c1_14 = arith.constant 1 : index
    %c0_15 = arith.constant 0 : index
    %c0_16 = arith.constant 0 : index
    %14 = vector.load %arg3[%c1_14, %c0_15, %c0_16] : memref<9x128x256xbf16, #tpu.memory_space<vmem>>, vector<1x128x256xbf16>
    %15 = vector.shape_cast %14 : vector<1x128x256xbf16> to vector<128x256xbf16>
    %cst_17 = arith.constant dense<0.000000e+00> : vector<64x256xf32>
    %16 = tpu.matmul %13, %15, %cst_17 {dimension_numbers = #tpu.dot_dimension_numbers<[1], [0], [0], [1], [0, 0, 1, 1], [], []>} : vector<64x128xbf16>, vector<128x256xbf16>, vector<64x256xf32> -> vector<64x256xf32>
    %c0_18 = arith.constant 0 : index
    %c0_19 = arith.constant 0 : index
    %17 = vector.load %arg8[%c0_18, %c0_19] : memref<64x256xf32, #tpu.memory_space<vmem>>, vector<64x256xf32>
    %18 = arith.addf %17, %16 : vector<64x256xf32>
    %c0_20 = arith.constant 0 : index
    %c0_21 = arith.constant 0 : index
    %19 = vector.load %arg8[%c0_20, %c0_21] : memref<64x256xf32, #tpu.memory_space<vmem>>, vector<64x256xf32>
    tpu.vector_store %arg8[%c0_20, %c0_21], %18 {strides = array<i32>} : memref<64x256xf32, #tpu.memory_space<vmem>>, vector<64x256xf32>,
    %c2 = arith.constant 2 : index
    %c0_22 = arith.constant 0 : index
    %20 = vector.load %arg7[%c2, %c0_22] : memref<96x128xf32, #tpu.memory_space<vmem>>, vector<64x128xf32>
    %21 = arith.truncf %20 : vector<64x128xf32> to vector<64x128xbf16>
    %c2_23 = arith.constant 2 : index
    %c0_24 = arith.constant 0 : index
    %c0_25 = arith.constant 0 : index
    %22 = vector.load %arg3[%c2_23, %c0_24, %c0_25] : memref<9x128x256xbf16, #tpu.memory_space<vmem>>, vector<1x128x256xbf16>
    %23 = vector.shape_cast %22 : vector<1x128x256xbf16> to vector<128x256xbf16>
    %cst_26 = arith.constant dense<0.000000e+00> : vector<64x256xf32>
    %24 = tpu.matmul %21, %23, %cst_26 {dimension_numbers = #tpu.dot_dimension_numbers<[1], [0], [0], [1], [0, 0, 1, 1], [], []>} : vector<64x128xbf16>, vector<128x256xbf16>, vector<64x256xf32> -> vector<64x256xf32>
    %c0_27 = arith.constant 0 : index
    %c0_28 = arith.constant 0 : index
    %25 = vector.load %arg8[%c0_27, %c0_28] : memref<64x256xf32, #tpu.memory_space<vmem>>, vector<64x256xf32>
    %26 = arith.addf %25, %24 : vector<64x256xf32>
    %c0_29 = arith.constant 0 : index
    %c0_30 = arith.constant 0 : index
    %27 = vector.load %arg8[%c0_29, %c0_30] : memref<64x256xf32, #tpu.memory_space<vmem>>, vector<64x256xf32>
    tpu.vector_store %arg8[%c0_29, %c0_30], %26 {strides = array<i32>} : memref<64x256xf32, #tpu.memory_space<vmem>>, vector<64x256xf32>,
    %c8 = arith.constant 8 : index
    %c0_31 = arith.constant 0 : index
    %28 = vector.load %arg7[%c8, %c0_31] : memref<96x128xf32, #tpu.memory_space<vmem>>, vector<64x128xf32>
    %29 = arith.truncf %28 : vector<64x128xf32> to vector<64x128xbf16>
    %c3 = arith.constant 3 : index
    %c0_32 = arith.constant 0 : index
    %c0_33 = arith.constant 0 : index
    %30 = vector.load %arg3[%c3, %c0_32, %c0_33] : memref<9x128x256xbf16, #tpu.memory_space<vmem>>, vector<1x128x256xbf16>
    %31 = vector.shape_cast %30 : vector<1x128x256xbf16> to vector<128x256xbf16>
    %cst_34 = arith.constant dense<0.000000e+00> : vector<64x256xf32>
    %32 = tpu.matmul %29, %31, %cst_34 {dimension_numbers = #tpu.dot_dimension_numbers<[1], [0], [0], [1], [0, 0, 1, 1], [], []>} : vector<64x128xbf16>, vector<128x256xbf16>, vector<64x256xf32> -> vector<64x256xf32>
    %c0_35 = arith.constant 0 : index
    %c0_36 = arith.constant 0 : index
    %33 = vector.load %arg8[%c0_35, %c0_36] : memref<64x256xf32, #tpu.memory_space<vmem>>, vector<64x256xf32>
    %34 = arith.addf %33, %32 : vector<64x256xf32>
    %c0_37 = arith.constant 0 : index
    %c0_38 = arith.constant 0 : index
    %35 = vector.load %arg8[%c0_37, %c0_38] : memref<64x256xf32, #tpu.memory_space<vmem>>, vector<64x256xf32>
    tpu.vector_store %arg8[%c0_37, %c0_38], %34 {strides = array<i32>} : memref<64x256xf32, #tpu.memory_space<vmem>>, vector<64x256xf32>,
    %c9 = arith.constant 9 : index
    %c0_39 = arith.constant 0 : index
    %36 = vector.load %arg7[%c9, %c0_39] : memref<96x128xf32, #tpu.memory_space<vmem>>, vector<64x128xf32>
    %37 = arith.truncf %36 : vector<64x128xf32> to vector<64x128xbf16>
    %c4 = arith.constant 4 : index
    %c0_40 = arith.constant 0 : index
    %c0_41 = arith.constant 0 : index
    %38 = vector.load %arg3[%c4, %c0_40, %c0_41] : memref<9x128x256xbf16, #tpu.memory_space<vmem>>, vector<1x128x256xbf16>
    %39 = vector.shape_cast %38 : vector<1x128x256xbf16> to vector<128x256xbf16>
    %cst_42 = arith.constant dense<0.000000e+00> : vector<64x256xf32>
    %40 = tpu.matmul %37, %39, %cst_42 {dimension_numbers = #tpu.dot_dimension_numbers<[1], [0], [0], [1], [0, 0, 1, 1], [], []>} : vector<64x128xbf16>, vector<128x256xbf16>, vector<64x256xf32> -> vector<64x256xf32>
    %c0_43 = arith.constant 0 : index
    %c0_44 = arith.constant 0 : index
    %41 = vector.load %arg8[%c0_43, %c0_44] : memref<64x256xf32, #tpu.memory_space<vmem>>, vector<64x256xf32>
    %42 = arith.addf %41, %40 : vector<64x256xf32>
    %c0_45 = arith.constant 0 : index
    %c0_46 = arith.constant 0 : index
    %43 = vector.load %arg8[%c0_45, %c0_46] : memref<64x256xf32, #tpu.memory_space<vmem>>, vector<64x256xf32>
    tpu.vector_store %arg8[%c0_45, %c0_46], %42 {strides = array<i32>} : memref<64x256xf32, #tpu.memory_space<vmem>>, vector<64x256xf32>,
    %c10 = arith.constant 10 : index
    %c0_47 = arith.constant 0 : index
    %44 = vector.load %arg7[%c10, %c0_47] : memref<96x128xf32, #tpu.memory_space<vmem>>, vector<64x128xf32>
    %45 = arith.truncf %44 : vector<64x128xf32> to vector<64x128xbf16>
    %c5 = arith.constant 5 : index
    %c0_48 = arith.constant 0 : index
    %c0_49 = arith.constant 0 : index
    %46 = vector.load %arg3[%c5, %c0_48, %c0_49] : memref<9x128x256xbf16, #tpu.memory_space<vmem>>, vector<1x128x256xbf16>
    %47 = vector.shape_cast %46 : vector<1x128x256xbf16> to vector<128x256xbf16>
    %cst_50 = arith.constant dense<0.000000e+00> : vector<64x256xf32>
    %48 = tpu.matmul %45, %47, %cst_50 {dimension_numbers = #tpu.dot_dimension_numbers<[1], [0], [0], [1], [0, 0, 1, 1], [], []>} : vector<64x128xbf16>, vector<128x256xbf16>, vector<64x256xf32> -> vector<64x256xf32>
    %c0_51 = arith.constant 0 : index
    %c0_52 = arith.constant 0 : index
    %49 = vector.load %arg8[%c0_51, %c0_52] : memref<64x256xf32, #tpu.memory_space<vmem>>, vector<64x256xf32>
    %50 = arith.addf %49, %48 : vector<64x256xf32>
    %c0_53 = arith.constant 0 : index
    %c0_54 = arith.constant 0 : index
    %51 = vector.load %arg8[%c0_53, %c0_54] : memref<64x256xf32, #tpu.memory_space<vmem>>, vector<64x256xf32>
    tpu.vector_store %arg8[%c0_53, %c0_54], %50 {strides = array<i32>} : memref<64x256xf32, #tpu.memory_space<vmem>>, vector<64x256xf32>,
    %c16 = arith.constant 16 : index
    %c0_55 = arith.constant 0 : index
    %52 = vector.load %arg7[%c16, %c0_55] : memref<96x128xf32, #tpu.memory_space<vmem>>, vector<64x128xf32>
    %53 = arith.truncf %52 : vector<64x128xf32> to vector<64x128xbf16>
    %c6 = arith.constant 6 : index
    %c0_56 = arith.constant 0 : index
    %c0_57 = arith.constant 0 : index
    %54 = vector.load %arg3[%c6, %c0_56, %c0_57] : memref<9x128x256xbf16, #tpu.memory_space<vmem>>, vector<1x128x256xbf16>
    %55 = vector.shape_cast %54 : vector<1x128x256xbf16> to vector<128x256xbf16>
    %cst_58 = arith.constant dense<0.000000e+00> : vector<64x256xf32>
    %56 = tpu.matmul %53, %55, %cst_58 {dimension_numbers = #tpu.dot_dimension_numbers<[1], [0], [0], [1], [0, 0, 1, 1], [], []>} : vector<64x128xbf16>, vector<128x256xbf16>, vector<64x256xf32> -> vector<64x256xf32>
    %c0_59 = arith.constant 0 : index
    %c0_60 = arith.constant 0 : index
    %57 = vector.load %arg8[%c0_59, %c0_60] : memref<64x256xf32, #tpu.memory_space<vmem>>, vector<64x256xf32>
    %58 = arith.addf %57, %56 : vector<64x256xf32>
    %c0_61 = arith.constant 0 : index
    %c0_62 = arith.constant 0 : index
    %59 = vector.load %arg8[%c0_61, %c0_62] : memref<64x256xf32, #tpu.memory_space<vmem>>, vector<64x256xf32>
    tpu.vector_store %arg8[%c0_61, %c0_62], %58 {strides = array<i32>} : memref<64x256xf32, #tpu.memory_space<vmem>>, vector<64x256xf32>,
    %c17 = arith.constant 17 : index
    %c0_63 = arith.constant 0 : index
    %60 = vector.load %arg7[%c17, %c0_63] : memref<96x128xf32, #tpu.memory_space<vmem>>, vector<64x128xf32>
    %61 = arith.truncf %60 : vector<64x128xf32> to vector<64x128xbf16>
    %c7 = arith.constant 7 : index
    %c0_64 = arith.constant 0 : index
    %c0_65 = arith.constant 0 : index
    %62 = vector.load %arg3[%c7, %c0_64, %c0_65] : memref<9x128x256xbf16, #tpu.memory_space<vmem>>, vector<1x128x256xbf16>
    %63 = vector.shape_cast %62 : vector<1x128x256xbf16> to vector<128x256xbf16>
    %cst_66 = arith.constant dense<0.000000e+00> : vector<64x256xf32>
    %64 = tpu.matmul %61, %63, %cst_66 {dimension_numbers = #tpu.dot_dimension_numbers<[1], [0], [0], [1], [0, 0, 1, 1], [], []>} : vector<64x128xbf16>, vector<128x256xbf16>, vector<64x256xf32> -> vector<64x256xf32>
    %c0_67 = arith.constant 0 : index
    %c0_68 = arith.constant 0 : index
    %65 = vector.load %arg8[%c0_67, %c0_68] : memref<64x256xf32, #tpu.memory_space<vmem>>, vector<64x256xf32>
    %66 = arith.addf %65, %64 : vector<64x256xf32>
    %c0_69 = arith.constant 0 : index
    %c0_70 = arith.constant 0 : index
    %67 = vector.load %arg8[%c0_69, %c0_70] : memref<64x256xf32, #tpu.memory_space<vmem>>, vector<64x256xf32>
    tpu.vector_store %arg8[%c0_69, %c0_70], %66 {strides = array<i32>} : memref<64x256xf32, #tpu.memory_space<vmem>>, vector<64x256xf32>,
    %c18 = arith.constant 18 : index
    %c0_71 = arith.constant 0 : index
    %68 = vector.load %arg7[%c18, %c0_71] : memref<96x128xf32, #tpu.memory_space<vmem>>, vector<64x128xf32>
    %69 = arith.truncf %68 : vector<64x128xf32> to vector<64x128xbf16>
    %c8_72 = arith.constant 8 : index
    %c0_73 = arith.constant 0 : index
    %c0_74 = arith.constant 0 : index
    %70 = vector.load %arg3[%c8_72, %c0_73, %c0_74] : memref<9x128x256xbf16, #tpu.memory_space<vmem>>, vector<1x128x256xbf16>
    %71 = vector.shape_cast %70 : vector<1x128x256xbf16> to vector<128x256xbf16>
    %cst_75 = arith.constant dense<0.000000e+00> : vector<64x256xf32>
    %72 = tpu.matmul %69, %71, %cst_75 {dimension_numbers = #tpu.dot_dimension_numbers<[1], [0], [0], [1], [0, 0, 1, 1], [], []>} : vector<64x128xbf16>, vector<128x256xbf16>, vector<64x256xf32> -> vector<64x256xf32>
    %c0_76 = arith.constant 0 : index
    %c0_77 = arith.constant 0 : index
    %73 = vector.load %arg8[%c0_76, %c0_77] : memref<64x256xf32, #tpu.memory_space<vmem>>, vector<64x256xf32>
    %74 = arith.addf %73, %72 : vector<64x256xf32>
    %c0_78 = arith.constant 0 : index
    %c0_79 = arith.constant 0 : index
    %75 = vector.load %arg8[%c0_78, %c0_79] : memref<64x256xf32, #tpu.memory_space<vmem>>, vector<64x256xf32>
    tpu.vector_store %arg8[%c0_78, %c0_79], %74 {strides = array<i32>} : memref<64x256xf32, #tpu.memory_space<vmem>>, vector<64x256xf32>,
    %c0_80 = arith.constant 0 : index
    %c0_81 = arith.constant 0 : index
    %76 = vector.load %arg8[%c0_80, %c0_81] : memref<64x256xf32, #tpu.memory_space<vmem>>, vector<64x256xf32>
    %c0_82 = arith.constant 0 : index
    %c0_83 = arith.constant 0 : index
    %77 = vector.load %arg4[%c0_82, %c0_83] : memref<1x256xf32, #tpu.memory_space<vmem>>, vector<1x256xf32>
    %78 = vector.broadcast %77 : vector<1x256xf32> to vector<64x256xf32>
    %79 = arith.mulf %76, %78 : vector<64x256xf32>
    %c0_84 = arith.constant 0 : index
    %c0_85 = arith.constant 0 : index
    %80 = vector.load %arg5[%c0_84, %c0_85] : memref<1x256xf32, #tpu.memory_space<vmem>>, vector<1x256xf32>
    %81 = vector.broadcast %80 : vector<1x256xf32> to vector<64x256xf32>
    %82 = arith.addf %79, %81 : vector<64x256xf32>
    %83 = arith.truncf %82 : vector<64x256xf32> to vector<64x256xbf16>
    %c0_86 = arith.constant 0 : index
    %c0_87 = arith.constant 0 : index
    %84 = vector.load %arg6[%c0_86, %c0_87] : memref<64x256xbf16, #tpu.memory_space<vmem>>, vector<64x256xbf16>
    tpu.vector_store %arg6[%c0_86, %c0_87], %83 {strides = array<i32>} : memref<64x256xbf16, #tpu.memory_space<vmem>>, vector<64x256xbf16>,
    return
  }
  func.func @transform_0(%arg0: i32) -> (i32, i32) {
    %c0_i32 = arith.constant 0 : i32
    %c0_i32_0 = arith.constant 0 : i32
    return %arg0, %c0_i32 : i32, i32
  }
  func.func @transform_1(%arg0: i32) -> (i32, i32) {
    %c1_i32 = arith.constant 1 : i32
    %0 = arith.addi %arg0, %c1_i32 : i32
    %c2_i32 = arith.constant 2 : i32
    %1 = arith.muli %0, %c2_i32 : i32
    %c0_i32 = arith.constant 0 : i32
    %c0_i32_0 = arith.constant 0 : i32
    return %1, %c0_i32 : i32, i32
  }
  func.func @transform_2(%arg0: i32) -> (i32, i32, i32) {
    %c0_i32 = arith.constant 0 : i32
    %c0_i32_0 = arith.constant 0 : i32
    %c0_i32_1 = arith.constant 0 : i32
    %c0_i32_2 = arith.constant 0 : i32
    return %c0_i32, %c0_i32_0, %c0_i32_1 : i32, i32, i32
  }
  func.func @transform_3(%arg0: i32) -> (i32, i32) {
    %c0_i32 = arith.constant 0 : i32
    %c0_i32_0 = arith.constant 0 : i32
    %c0_i32_1 = arith.constant 0 : i32
    return %c0_i32, %c0_i32_0 : i32, i32
  }
  func.func @transform_4(%arg0: i32) -> (i32, i32) {
    %c0_i32 = arith.constant 0 : i32
    %c0_i32_0 = arith.constant 0 : i32
    %c0_i32_1 = arith.constant 0 : i32
    return %c0_i32, %c0_i32_0 : i32, i32
  }
  func.func @transform_5(%arg0: i32) -> (i32, i32) {
    %c0_i32 = arith.constant 0 : i32
    %c0_i32_0 = arith.constant 0 : i32
    return %arg0, %c0_i32 : i32, i32
  }
}

module attributes {stable_mosaic.version = 11 : i64} {
  func.func @_mm_affine_kernel(%arg0: i32, %arg1: i32, %arg2: i32, %arg3: memref<16x256xbf16, #tpu.memory_space<vmem>>, %arg4: memref<256x128xbf16, #tpu.memory_space<vmem>>, %arg5: memref<1x128xf32, #tpu.memory_space<vmem>>, %arg6: memref<1x128xf32, #tpu.memory_space<vmem>>, %arg7: memref<16x128xbf16, #tpu.memory_space<vmem>>, %arg8: memref<16x128xf32, #tpu.memory_space<vmem>>) attributes {dimension_semantics = [#tpu.dimension_semantics<parallel>, #tpu.dimension_semantics<parallel>, #tpu.dimension_semantics<arbitrary>], iteration_bounds = array<i64: 2, 1, 1>, scalar_prefetch = 0 : i64, scratch_operands = 1 : i64, tpu.core_type = #tpu.core_type<tc>, window_params = [{transform_indices = @transform_0, window_bounds = array<i64: 16, 256>}, {transform_indices = @transform_1, window_bounds = array<i64: 256, 128>}, {transform_indices = @transform_2, window_bounds = array<i64: 1, 128>}, {transform_indices = @transform_3, window_bounds = array<i64: 1, 128>}, {transform_indices = @transform_4, window_bounds = array<i64: 16, 128>}]} {
    %c0_i32 = arith.constant 0 : i32
    %0 = arith.cmpi eq, %arg2, %c0_i32 : i32
    %1 = arith.extui %0 : i1 to i32
    %c0_i32_0 = arith.constant 0 : i32
    %2 = arith.cmpi ne, %1, %c0_i32_0 : i32
    scf.if %2 {
      %cst_10 = arith.constant 0.000000e+00 : f32
      %12 = vector.broadcast %cst_10 : f32 to vector<16x128xf32>
      %c0_11 = arith.constant 0 : index
      %c0_12 = arith.constant 0 : index
      %13 = vector.load %arg8[%c0_11, %c0_12] : memref<16x128xf32, #tpu.memory_space<vmem>>, vector<16x128xf32>
      tpu.vector_store %arg8[%c0_11, %c0_12], %12 {strides = array<i32>} : memref<16x128xf32, #tpu.memory_space<vmem>>, vector<16x128xf32>,
    } else {
    }
    %c0 = arith.constant 0 : index
    %c0_1 = arith.constant 0 : index
    %3 = vector.load %arg8[%c0, %c0_1] : memref<16x128xf32, #tpu.memory_space<vmem>>, vector<16x128xf32>
    %c0_2 = arith.constant 0 : index
    %c0_3 = arith.constant 0 : index
    %4 = vector.load %arg3[%c0_2, %c0_3] : memref<16x256xbf16, #tpu.memory_space<vmem>>, vector<16x256xbf16>
    %c0_4 = arith.constant 0 : index
    %c0_5 = arith.constant 0 : index
    %5 = vector.load %arg4[%c0_4, %c0_5] : memref<256x128xbf16, #tpu.memory_space<vmem>>, vector<256x128xbf16>
    %cst = arith.constant dense<0.000000e+00> : vector<16x128xf32>
    %6 = tpu.matmul %4, %5, %cst {dimension_numbers = #tpu.dot_dimension_numbers<[1], [0], [0], [1], [0, 0, 1, 1], [], []>} : vector<16x256xbf16>, vector<256x128xbf16>, vector<16x128xf32> -> vector<16x128xf32>
    %7 = arith.addf %3, %6 : vector<16x128xf32>
    %c0_6 = arith.constant 0 : index
    %c0_7 = arith.constant 0 : index
    %8 = vector.load %arg8[%c0_6, %c0_7] : memref<16x128xf32, #tpu.memory_space<vmem>>, vector<16x128xf32>
    tpu.vector_store %arg8[%c0_6, %c0_7], %7 {strides = array<i32>} : memref<16x128xf32, #tpu.memory_space<vmem>>, vector<16x128xf32>,
    %c0_i32_8 = arith.constant 0 : i32
    %9 = arith.cmpi eq, %arg2, %c0_i32_8 : i32
    %10 = arith.extui %9 : i1 to i32
    %c0_i32_9 = arith.constant 0 : i32
    %11 = arith.cmpi ne, %10, %c0_i32_9 : i32
    scf.if %11 {
      %c0_10 = arith.constant 0 : index
      %c0_11 = arith.constant 0 : index
      %12 = vector.load %arg8[%c0_10, %c0_11] : memref<16x128xf32, #tpu.memory_space<vmem>>, vector<16x128xf32>
      %c0_12 = arith.constant 0 : index
      %c0_13 = arith.constant 0 : index
      %13 = vector.load %arg5[%c0_12, %c0_13] : memref<1x128xf32, #tpu.memory_space<vmem>>, vector<1x128xf32>
      %14 = vector.broadcast %13 : vector<1x128xf32> to vector<16x128xf32>
      %15 = arith.mulf %12, %14 : vector<16x128xf32>
      %c0_14 = arith.constant 0 : index
      %c0_15 = arith.constant 0 : index
      %16 = vector.load %arg6[%c0_14, %c0_15] : memref<1x128xf32, #tpu.memory_space<vmem>>, vector<1x128xf32>
      %17 = vector.broadcast %16 : vector<1x128xf32> to vector<16x128xf32>
      %18 = arith.addf %15, %17 : vector<16x128xf32>
      %19 = arith.truncf %18 : vector<16x128xf32> to vector<16x128xbf16>
      %c0_16 = arith.constant 0 : index
      %c0_17 = arith.constant 0 : index
      %20 = vector.load %arg7[%c0_16, %c0_17] : memref<16x128xbf16, #tpu.memory_space<vmem>>, vector<16x128xbf16>
      tpu.vector_store %arg7[%c0_16, %c0_17], %19 {strides = array<i32>} : memref<16x128xbf16, #tpu.memory_space<vmem>>, vector<16x128xbf16>,
    } else {
    }
    return
  }
  func.func @transform_0(%arg0: i32, %arg1: i32, %arg2: i32) -> (i32, i32) {
    %c0_i32 = arith.constant 0 : i32
    return %arg0, %arg2 : i32, i32
  }
  func.func @transform_1(%arg0: i32, %arg1: i32, %arg2: i32) -> (i32, i32) {
    %c0_i32 = arith.constant 0 : i32
    return %arg2, %arg1 : i32, i32
  }
  func.func @transform_2(%arg0: i32, %arg1: i32, %arg2: i32) -> (i32, i32) {
    %c0_i32 = arith.constant 0 : i32
    %c0_i32_0 = arith.constant 0 : i32
    return %c0_i32, %arg1 : i32, i32
  }
  func.func @transform_3(%arg0: i32, %arg1: i32, %arg2: i32) -> (i32, i32) {
    %c0_i32 = arith.constant 0 : i32
    %c0_i32_0 = arith.constant 0 : i32
    return %c0_i32, %arg1 : i32, i32
  }
  func.func @transform_4(%arg0: i32, %arg1: i32, %arg2: i32) -> (i32, i32) {
    %c0_i32 = arith.constant 0 : i32
    return %arg0, %arg1 : i32, i32
  }
}

module attributes {stable_mosaic.version = 11 : i64} {
  func.func @_conv3x3_kernel(%arg0: i32, %arg1: memref<64x256xbf16, #tpu.memory_space<vmem>>, %arg2: memref<32x256xbf16, #tpu.memory_space<vmem>>, %arg3: memref<9x256x256xbf16, #tpu.memory_space<vmem>>, %arg4: memref<1x256xf32, #tpu.memory_space<vmem>>, %arg5: memref<1x256xf32, #tpu.memory_space<vmem>>, %arg6: memref<64x256xbf16, #tpu.memory_space<vmem>>, %arg7: memref<96x256xf32, #tpu.memory_space<vmem>>, %arg8: memref<64x256xf32, #tpu.memory_space<vmem>>) attributes {dimension_semantics = [#tpu.dimension_semantics<parallel>], iteration_bounds = array<i64: 2>, scalar_prefetch = 0 : i64, scratch_operands = 2 : i64, tpu.core_type = #tpu.core_type<tc>, window_params = [{transform_indices = @transform_0, window_bounds = array<i64: 64, 256>}, {transform_indices = @transform_1, window_bounds = array<i64: 32, 256>}, {pipeline_mode = #tpu.pipeline_mode<synchronous>, transform_indices = @transform_2, window_bounds = array<i64: 9, 256, 256>}, {pipeline_mode = #tpu.pipeline_mode<synchronous>, transform_indices = @transform_3, window_bounds = array<i64: 1, 256>}, {pipeline_mode = #tpu.pipeline_mode<synchronous>, transform_indices = @transform_4, window_bounds = array<i64: 1, 256>}, {transform_indices = @transform_5, window_bounds = array<i64: 64, 256>}]} {
    %c0 = arith.constant 0 : index
    %c0_0 = arith.constant 0 : index
    %0 = vector.load %arg1[%c0, %c0_0] : memref<64x256xbf16, #tpu.memory_space<vmem>>, vector<64x256xbf16>
    %1 = arith.extf %0 : vector<64x256xbf16> to vector<64x256xf32>
    %c0_1 = arith.constant 0 : index
    %c0_2 = arith.constant 0 : index
    %2 = vector.load %arg7[%c0_1, %c0_2] : memref<96x256xf32, #tpu.memory_space<vmem>>, vector<64x256xf32>
    tpu.vector_store %arg7[%c0_1, %c0_2], %1 {strides = array<i32>} : memref<96x256xf32, #tpu.memory_space<vmem>>, vector<64x256xf32>,
    %c0_3 = arith.constant 0 : index
    %c0_4 = arith.constant 0 : index
    %3 = vector.load %arg2[%c0_3, %c0_4] : memref<32x256xbf16, #tpu.memory_space<vmem>>, vector<32x256xbf16>
    %4 = arith.extf %3 : vector<32x256xbf16> to vector<32x256xf32>
    %c64 = arith.constant 64 : index
    %c0_5 = arith.constant 0 : index
    %5 = vector.load %arg7[%c64, %c0_5] : memref<96x256xf32, #tpu.memory_space<vmem>>, vector<32x256xf32>
    tpu.vector_store %arg7[%c64, %c0_5], %4 {strides = array<i32>} : memref<96x256xf32, #tpu.memory_space<vmem>>, vector<32x256xf32>,
    %c0_6 = arith.constant 0 : index
    %c0_7 = arith.constant 0 : index
    %6 = vector.load %arg7[%c0_6, %c0_7] : memref<96x256xf32, #tpu.memory_space<vmem>>, vector<64x256xf32>
    %7 = arith.truncf %6 : vector<64x256xf32> to vector<64x256xbf16>
    %c0_8 = arith.constant 0 : index
    %c0_9 = arith.constant 0 : index
    %c0_10 = arith.constant 0 : index
    %8 = vector.load %arg3[%c0_8, %c0_9, %c0_10] : memref<9x256x256xbf16, #tpu.memory_space<vmem>>, vector<1x256x256xbf16>
    %9 = vector.shape_cast %8 : vector<1x256x256xbf16> to vector<256x256xbf16>
    %cst = arith.constant dense<0.000000e+00> : vector<64x256xf32>
    %10 = tpu.matmul %7, %9, %cst {dimension_numbers = #tpu.dot_dimension_numbers<[1], [0], [0], [1], [0, 0, 1, 1], [], []>} : vector<64x256xbf16>, vector<256x256xbf16>, vector<64x256xf32> -> vector<64x256xf32>
    %c0_11 = arith.constant 0 : index
    %c0_12 = arith.constant 0 : index
    %11 = vector.load %arg8[%c0_11, %c0_12] : memref<64x256xf32, #tpu.memory_space<vmem>>, vector<64x256xf32>
    tpu.vector_store %arg8[%c0_11, %c0_12], %10 {strides = array<i32>} : memref<64x256xf32, #tpu.memory_space<vmem>>, vector<64x256xf32>,
    %c1 = arith.constant 1 : index
    %c0_13 = arith.constant 0 : index
    %12 = vector.load %arg7[%c1, %c0_13] : memref<96x256xf32, #tpu.memory_space<vmem>>, vector<64x256xf32>
    %13 = arith.truncf %12 : vector<64x256xf32> to vector<64x256xbf16>
    %c1_14 = arith.constant 1 : index
    %c0_15 = arith.constant 0 : index
    %c0_16 = arith.constant 0 : index
    %14 = vector.load %arg3[%c1_14, %c0_15, %c0_16] : memref<9x256x256xbf16, #tpu.memory_space<vmem>>, vector<1x256x256xbf16>
    %15 = vector.shape_cast %14 : vector<1x256x256xbf16> to vector<256x256xbf16>
    %cst_17 = arith.constant dense<0.000000e+00> : vector<64x256xf32>
    %16 = tpu.matmul %13, %15, %cst_17 {dimension_numbers = #tpu.dot_dimension_numbers<[1], [0], [0], [1], [0, 0, 1, 1], [], []>} : vector<64x256xbf16>, vector<256x256xbf16>, vector<64x256xf32> -> vector<64x256xf32>
    %c0_18 = arith.constant 0 : index
    %c0_19 = arith.constant 0 : index
    %17 = vector.load %arg8[%c0_18, %c0_19] : memref<64x256xf32, #tpu.memory_space<vmem>>, vector<64x256xf32>
    %18 = arith.addf %17, %16 : vector<64x256xf32>
    %c0_20 = arith.constant 0 : index
    %c0_21 = arith.constant 0 : index
    %19 = vector.load %arg8[%c0_20, %c0_21] : memref<64x256xf32, #tpu.memory_space<vmem>>, vector<64x256xf32>
    tpu.vector_store %arg8[%c0_20, %c0_21], %18 {strides = array<i32>} : memref<64x256xf32, #tpu.memory_space<vmem>>, vector<64x256xf32>,
    %c2 = arith.constant 2 : index
    %c0_22 = arith.constant 0 : index
    %20 = vector.load %arg7[%c2, %c0_22] : memref<96x256xf32, #tpu.memory_space<vmem>>, vector<64x256xf32>
    %21 = arith.truncf %20 : vector<64x256xf32> to vector<64x256xbf16>
    %c2_23 = arith.constant 2 : index
    %c0_24 = arith.constant 0 : index
    %c0_25 = arith.constant 0 : index
    %22 = vector.load %arg3[%c2_23, %c0_24, %c0_25] : memref<9x256x256xbf16, #tpu.memory_space<vmem>>, vector<1x256x256xbf16>
    %23 = vector.shape_cast %22 : vector<1x256x256xbf16> to vector<256x256xbf16>
    %cst_26 = arith.constant dense<0.000000e+00> : vector<64x256xf32>
    %24 = tpu.matmul %21, %23, %cst_26 {dimension_numbers = #tpu.dot_dimension_numbers<[1], [0], [0], [1], [0, 0, 1, 1], [], []>} : vector<64x256xbf16>, vector<256x256xbf16>, vector<64x256xf32> -> vector<64x256xf32>
    %c0_27 = arith.constant 0 : index
    %c0_28 = arith.constant 0 : index
    %25 = vector.load %arg8[%c0_27, %c0_28] : memref<64x256xf32, #tpu.memory_space<vmem>>, vector<64x256xf32>
    %26 = arith.addf %25, %24 : vector<64x256xf32>
    %c0_29 = arith.constant 0 : index
    %c0_30 = arith.constant 0 : index
    %27 = vector.load %arg8[%c0_29, %c0_30] : memref<64x256xf32, #tpu.memory_space<vmem>>, vector<64x256xf32>
    tpu.vector_store %arg8[%c0_29, %c0_30], %26 {strides = array<i32>} : memref<64x256xf32, #tpu.memory_space<vmem>>, vector<64x256xf32>,
    %c8 = arith.constant 8 : index
    %c0_31 = arith.constant 0 : index
    %28 = vector.load %arg7[%c8, %c0_31] : memref<96x256xf32, #tpu.memory_space<vmem>>, vector<64x256xf32>
    %29 = arith.truncf %28 : vector<64x256xf32> to vector<64x256xbf16>
    %c3 = arith.constant 3 : index
    %c0_32 = arith.constant 0 : index
    %c0_33 = arith.constant 0 : index
    %30 = vector.load %arg3[%c3, %c0_32, %c0_33] : memref<9x256x256xbf16, #tpu.memory_space<vmem>>, vector<1x256x256xbf16>
    %31 = vector.shape_cast %30 : vector<1x256x256xbf16> to vector<256x256xbf16>
    %cst_34 = arith.constant dense<0.000000e+00> : vector<64x256xf32>
    %32 = tpu.matmul %29, %31, %cst_34 {dimension_numbers = #tpu.dot_dimension_numbers<[1], [0], [0], [1], [0, 0, 1, 1], [], []>} : vector<64x256xbf16>, vector<256x256xbf16>, vector<64x256xf32> -> vector<64x256xf32>
    %c0_35 = arith.constant 0 : index
    %c0_36 = arith.constant 0 : index
    %33 = vector.load %arg8[%c0_35, %c0_36] : memref<64x256xf32, #tpu.memory_space<vmem>>, vector<64x256xf32>
    %34 = arith.addf %33, %32 : vector<64x256xf32>
    %c0_37 = arith.constant 0 : index
    %c0_38 = arith.constant 0 : index
    %35 = vector.load %arg8[%c0_37, %c0_38] : memref<64x256xf32, #tpu.memory_space<vmem>>, vector<64x256xf32>
    tpu.vector_store %arg8[%c0_37, %c0_38], %34 {strides = array<i32>} : memref<64x256xf32, #tpu.memory_space<vmem>>, vector<64x256xf32>,
    %c9 = arith.constant 9 : index
    %c0_39 = arith.constant 0 : index
    %36 = vector.load %arg7[%c9, %c0_39] : memref<96x256xf32, #tpu.memory_space<vmem>>, vector<64x256xf32>
    %37 = arith.truncf %36 : vector<64x256xf32> to vector<64x256xbf16>
    %c4 = arith.constant 4 : index
    %c0_40 = arith.constant 0 : index
    %c0_41 = arith.constant 0 : index
    %38 = vector.load %arg3[%c4, %c0_40, %c0_41] : memref<9x256x256xbf16, #tpu.memory_space<vmem>>, vector<1x256x256xbf16>
    %39 = vector.shape_cast %38 : vector<1x256x256xbf16> to vector<256x256xbf16>
    %cst_42 = arith.constant dense<0.000000e+00> : vector<64x256xf32>
    %40 = tpu.matmul %37, %39, %cst_42 {dimension_numbers = #tpu.dot_dimension_numbers<[1], [0], [0], [1], [0, 0, 1, 1], [], []>} : vector<64x256xbf16>, vector<256x256xbf16>, vector<64x256xf32> -> vector<64x256xf32>
    %c0_43 = arith.constant 0 : index
    %c0_44 = arith.constant 0 : index
    %41 = vector.load %arg8[%c0_43, %c0_44] : memref<64x256xf32, #tpu.memory_space<vmem>>, vector<64x256xf32>
    %42 = arith.addf %41, %40 : vector<64x256xf32>
    %c0_45 = arith.constant 0 : index
    %c0_46 = arith.constant 0 : index
    %43 = vector.load %arg8[%c0_45, %c0_46] : memref<64x256xf32, #tpu.memory_space<vmem>>, vector<64x256xf32>
    tpu.vector_store %arg8[%c0_45, %c0_46], %42 {strides = array<i32>} : memref<64x256xf32, #tpu.memory_space<vmem>>, vector<64x256xf32>,
    %c10 = arith.constant 10 : index
    %c0_47 = arith.constant 0 : index
    %44 = vector.load %arg7[%c10, %c0_47] : memref<96x256xf32, #tpu.memory_space<vmem>>, vector<64x256xf32>
    %45 = arith.truncf %44 : vector<64x256xf32> to vector<64x256xbf16>
    %c5 = arith.constant 5 : index
    %c0_48 = arith.constant 0 : index
    %c0_49 = arith.constant 0 : index
    %46 = vector.load %arg3[%c5, %c0_48, %c0_49] : memref<9x256x256xbf16, #tpu.memory_space<vmem>>, vector<1x256x256xbf16>
    %47 = vector.shape_cast %46 : vector<1x256x256xbf16> to vector<256x256xbf16>
    %cst_50 = arith.constant dense<0.000000e+00> : vector<64x256xf32>
    %48 = tpu.matmul %45, %47, %cst_50 {dimension_numbers = #tpu.dot_dimension_numbers<[1], [0], [0], [1], [0, 0, 1, 1], [], []>} : vector<64x256xbf16>, vector<256x256xbf16>, vector<64x256xf32> -> vector<64x256xf32>
    %c0_51 = arith.constant 0 : index
    %c0_52 = arith.constant 0 : index
    %49 = vector.load %arg8[%c0_51, %c0_52] : memref<64x256xf32, #tpu.memory_space<vmem>>, vector<64x256xf32>
    %50 = arith.addf %49, %48 : vector<64x256xf32>
    %c0_53 = arith.constant 0 : index
    %c0_54 = arith.constant 0 : index
    %51 = vector.load %arg8[%c0_53, %c0_54] : memref<64x256xf32, #tpu.memory_space<vmem>>, vector<64x256xf32>
    tpu.vector_store %arg8[%c0_53, %c0_54], %50 {strides = array<i32>} : memref<64x256xf32, #tpu.memory_space<vmem>>, vector<64x256xf32>,
    %c16 = arith.constant 16 : index
    %c0_55 = arith.constant 0 : index
    %52 = vector.load %arg7[%c16, %c0_55] : memref<96x256xf32, #tpu.memory_space<vmem>>, vector<64x256xf32>
    %53 = arith.truncf %52 : vector<64x256xf32> to vector<64x256xbf16>
    %c6 = arith.constant 6 : index
    %c0_56 = arith.constant 0 : index
    %c0_57 = arith.constant 0 : index
    %54 = vector.load %arg3[%c6, %c0_56, %c0_57] : memref<9x256x256xbf16, #tpu.memory_space<vmem>>, vector<1x256x256xbf16>
    %55 = vector.shape_cast %54 : vector<1x256x256xbf16> to vector<256x256xbf16>
    %cst_58 = arith.constant dense<0.000000e+00> : vector<64x256xf32>
    %56 = tpu.matmul %53, %55, %cst_58 {dimension_numbers = #tpu.dot_dimension_numbers<[1], [0], [0], [1], [0, 0, 1, 1], [], []>} : vector<64x256xbf16>, vector<256x256xbf16>, vector<64x256xf32> -> vector<64x256xf32>
    %c0_59 = arith.constant 0 : index
    %c0_60 = arith.constant 0 : index
    %57 = vector.load %arg8[%c0_59, %c0_60] : memref<64x256xf32, #tpu.memory_space<vmem>>, vector<64x256xf32>
    %58 = arith.addf %57, %56 : vector<64x256xf32>
    %c0_61 = arith.constant 0 : index
    %c0_62 = arith.constant 0 : index
    %59 = vector.load %arg8[%c0_61, %c0_62] : memref<64x256xf32, #tpu.memory_space<vmem>>, vector<64x256xf32>
    tpu.vector_store %arg8[%c0_61, %c0_62], %58 {strides = array<i32>} : memref<64x256xf32, #tpu.memory_space<vmem>>, vector<64x256xf32>,
    %c17 = arith.constant 17 : index
    %c0_63 = arith.constant 0 : index
    %60 = vector.load %arg7[%c17, %c0_63] : memref<96x256xf32, #tpu.memory_space<vmem>>, vector<64x256xf32>
    %61 = arith.truncf %60 : vector<64x256xf32> to vector<64x256xbf16>
    %c7 = arith.constant 7 : index
    %c0_64 = arith.constant 0 : index
    %c0_65 = arith.constant 0 : index
    %62 = vector.load %arg3[%c7, %c0_64, %c0_65] : memref<9x256x256xbf16, #tpu.memory_space<vmem>>, vector<1x256x256xbf16>
    %63 = vector.shape_cast %62 : vector<1x256x256xbf16> to vector<256x256xbf16>
    %cst_66 = arith.constant dense<0.000000e+00> : vector<64x256xf32>
    %64 = tpu.matmul %61, %63, %cst_66 {dimension_numbers = #tpu.dot_dimension_numbers<[1], [0], [0], [1], [0, 0, 1, 1], [], []>} : vector<64x256xbf16>, vector<256x256xbf16>, vector<64x256xf32> -> vector<64x256xf32>
    %c0_67 = arith.constant 0 : index
    %c0_68 = arith.constant 0 : index
    %65 = vector.load %arg8[%c0_67, %c0_68] : memref<64x256xf32, #tpu.memory_space<vmem>>, vector<64x256xf32>
    %66 = arith.addf %65, %64 : vector<64x256xf32>
    %c0_69 = arith.constant 0 : index
    %c0_70 = arith.constant 0 : index
    %67 = vector.load %arg8[%c0_69, %c0_70] : memref<64x256xf32, #tpu.memory_space<vmem>>, vector<64x256xf32>
    tpu.vector_store %arg8[%c0_69, %c0_70], %66 {strides = array<i32>} : memref<64x256xf32, #tpu.memory_space<vmem>>, vector<64x256xf32>,
    %c18 = arith.constant 18 : index
    %c0_71 = arith.constant 0 : index
    %68 = vector.load %arg7[%c18, %c0_71] : memref<96x256xf32, #tpu.memory_space<vmem>>, vector<64x256xf32>
    %69 = arith.truncf %68 : vector<64x256xf32> to vector<64x256xbf16>
    %c8_72 = arith.constant 8 : index
    %c0_73 = arith.constant 0 : index
    %c0_74 = arith.constant 0 : index
    %70 = vector.load %arg3[%c8_72, %c0_73, %c0_74] : memref<9x256x256xbf16, #tpu.memory_space<vmem>>, vector<1x256x256xbf16>
    %71 = vector.shape_cast %70 : vector<1x256x256xbf16> to vector<256x256xbf16>
    %cst_75 = arith.constant dense<0.000000e+00> : vector<64x256xf32>
    %72 = tpu.matmul %69, %71, %cst_75 {dimension_numbers = #tpu.dot_dimension_numbers<[1], [0], [0], [1], [0, 0, 1, 1], [], []>} : vector<64x256xbf16>, vector<256x256xbf16>, vector<64x256xf32> -> vector<64x256xf32>
    %c0_76 = arith.constant 0 : index
    %c0_77 = arith.constant 0 : index
    %73 = vector.load %arg8[%c0_76, %c0_77] : memref<64x256xf32, #tpu.memory_space<vmem>>, vector<64x256xf32>
    %74 = arith.addf %73, %72 : vector<64x256xf32>
    %c0_78 = arith.constant 0 : index
    %c0_79 = arith.constant 0 : index
    %75 = vector.load %arg8[%c0_78, %c0_79] : memref<64x256xf32, #tpu.memory_space<vmem>>, vector<64x256xf32>
    tpu.vector_store %arg8[%c0_78, %c0_79], %74 {strides = array<i32>} : memref<64x256xf32, #tpu.memory_space<vmem>>, vector<64x256xf32>,
    %c0_80 = arith.constant 0 : index
    %c0_81 = arith.constant 0 : index
    %76 = vector.load %arg8[%c0_80, %c0_81] : memref<64x256xf32, #tpu.memory_space<vmem>>, vector<64x256xf32>
    %c0_82 = arith.constant 0 : index
    %c0_83 = arith.constant 0 : index
    %77 = vector.load %arg4[%c0_82, %c0_83] : memref<1x256xf32, #tpu.memory_space<vmem>>, vector<1x256xf32>
    %78 = vector.broadcast %77 : vector<1x256xf32> to vector<64x256xf32>
    %79 = arith.mulf %76, %78 : vector<64x256xf32>
    %c0_84 = arith.constant 0 : index
    %c0_85 = arith.constant 0 : index
    %80 = vector.load %arg5[%c0_84, %c0_85] : memref<1x256xf32, #tpu.memory_space<vmem>>, vector<1x256xf32>
    %81 = vector.broadcast %80 : vector<1x256xf32> to vector<64x256xf32>
    %82 = arith.addf %79, %81 : vector<64x256xf32>
    %83 = arith.truncf %82 : vector<64x256xf32> to vector<64x256xbf16>
    %c0_86 = arith.constant 0 : index
    %c0_87 = arith.constant 0 : index
    %84 = vector.load %arg6[%c0_86, %c0_87] : memref<64x256xbf16, #tpu.memory_space<vmem>>, vector<64x256xbf16>
    tpu.vector_store %arg6[%c0_86, %c0_87], %83 {strides = array<i32>} : memref<64x256xbf16, #tpu.memory_space<vmem>>, vector<64x256xbf16>,
    return
  }
  func.func @transform_0(%arg0: i32) -> (i32, i32) {
    %c0_i32 = arith.constant 0 : i32
    %c0_i32_0 = arith.constant 0 : i32
    return %arg0, %c0_i32 : i32, i32
  }
  func.func @transform_1(%arg0: i32) -> (i32, i32) {
    %c1_i32 = arith.constant 1 : i32
    %0 = arith.addi %arg0, %c1_i32 : i32
    %c2_i32 = arith.constant 2 : i32
    %1 = arith.muli %0, %c2_i32 : i32
    %c0_i32 = arith.constant 0 : i32
    %c0_i32_0 = arith.constant 0 : i32
    return %1, %c0_i32 : i32, i32
  }
  func.func @transform_2(%arg0: i32) -> (i32, i32, i32) {
    %c0_i32 = arith.constant 0 : i32
    %c0_i32_0 = arith.constant 0 : i32
    %c0_i32_1 = arith.constant 0 : i32
    %c0_i32_2 = arith.constant 0 : i32
    return %c0_i32, %c0_i32_0, %c0_i32_1 : i32, i32, i32
  }
  func.func @transform_3(%arg0: i32) -> (i32, i32) {
    %c0_i32 = arith.constant 0 : i32
    %c0_i32_0 = arith.constant 0 : i32
    %c0_i32_1 = arith.constant 0 : i32
    return %c0_i32, %c0_i32_0 : i32, i32
  }
  func.func @transform_4(%arg0: i32) -> (i32, i32) {
    %c0_i32 = arith.constant 0 : i32
    %c0_i32_0 = arith.constant 0 : i32
    %c0_i32_1 = arith.constant 0 : i32
    return %c0_i32, %c0_i32_0 : i32, i32
  }
  func.func @transform_5(%arg0: i32) -> (i32, i32) {
    %c0_i32 = arith.constant 0 : i32
    %c0_i32_0 = arith.constant 0 : i32
    return %arg0, %c0_i32 : i32, i32
  }
}

module attributes {stable_mosaic.version = 11 : i64} {
  func.func @_mm_plain_kernel(%arg0: i32, %arg1: i32, %arg2: i32, %arg3: memref<16x128xbf16, #tpu.memory_space<vmem>>, %arg4: memref<128x256xbf16, #tpu.memory_space<vmem>>, %arg5: memref<16x256xbf16, #tpu.memory_space<vmem>>, %arg6: memref<16x256xf32, #tpu.memory_space<vmem>>) attributes {dimension_semantics = [#tpu.dimension_semantics<parallel>, #tpu.dimension_semantics<parallel>, #tpu.dimension_semantics<arbitrary>], iteration_bounds = array<i64: 1, 4, 1>, scalar_prefetch = 0 : i64, scratch_operands = 1 : i64, tpu.core_type = #tpu.core_type<tc>, window_params = [{transform_indices = @transform_0, window_bounds = array<i64: 16, 128>}, {transform_indices = @transform_1, window_bounds = array<i64: 128, 256>}, {transform_indices = @transform_2, window_bounds = array<i64: 16, 256>}]} {
    %c0_i32 = arith.constant 0 : i32
    %0 = arith.cmpi eq, %arg2, %c0_i32 : i32
    %1 = arith.extui %0 : i1 to i32
    %c0_i32_0 = arith.constant 0 : i32
    %2 = arith.cmpi ne, %1, %c0_i32_0 : i32
    scf.if %2 {
      %cst_10 = arith.constant 0.000000e+00 : f32
      %12 = vector.broadcast %cst_10 : f32 to vector<16x256xf32>
      %c0_11 = arith.constant 0 : index
      %c0_12 = arith.constant 0 : index
      %13 = vector.load %arg6[%c0_11, %c0_12] : memref<16x256xf32, #tpu.memory_space<vmem>>, vector<16x256xf32>
      tpu.vector_store %arg6[%c0_11, %c0_12], %12 {strides = array<i32>} : memref<16x256xf32, #tpu.memory_space<vmem>>, vector<16x256xf32>,
    } else {
    }
    %c0 = arith.constant 0 : index
    %c0_1 = arith.constant 0 : index
    %3 = vector.load %arg6[%c0, %c0_1] : memref<16x256xf32, #tpu.memory_space<vmem>>, vector<16x256xf32>
    %c0_2 = arith.constant 0 : index
    %c0_3 = arith.constant 0 : index
    %4 = vector.load %arg3[%c0_2, %c0_3] : memref<16x128xbf16, #tpu.memory_space<vmem>>, vector<16x128xbf16>
    %c0_4 = arith.constant 0 : index
    %c0_5 = arith.constant 0 : index
    %5 = vector.load %arg4[%c0_4, %c0_5] : memref<128x256xbf16, #tpu.memory_space<vmem>>, vector<128x256xbf16>
    %cst = arith.constant dense<0.000000e+00> : vector<16x256xf32>
    %6 = tpu.matmul %4, %5, %cst {dimension_numbers = #tpu.dot_dimension_numbers<[1], [0], [0], [1], [0, 0, 1, 1], [], []>} : vector<16x128xbf16>, vector<128x256xbf16>, vector<16x256xf32> -> vector<16x256xf32>
    %7 = arith.addf %3, %6 : vector<16x256xf32>
    %c0_6 = arith.constant 0 : index
    %c0_7 = arith.constant 0 : index
    %8 = vector.load %arg6[%c0_6, %c0_7] : memref<16x256xf32, #tpu.memory_space<vmem>>, vector<16x256xf32>
    tpu.vector_store %arg6[%c0_6, %c0_7], %7 {strides = array<i32>} : memref<16x256xf32, #tpu.memory_space<vmem>>, vector<16x256xf32>,
    %c0_i32_8 = arith.constant 0 : i32
    %9 = arith.cmpi eq, %arg2, %c0_i32_8 : i32
    %10 = arith.extui %9 : i1 to i32
    %c0_i32_9 = arith.constant 0 : i32
    %11 = arith.cmpi ne, %10, %c0_i32_9 : i32
    scf.if %11 {
      %c0_10 = arith.constant 0 : index
      %c0_11 = arith.constant 0 : index
      %12 = vector.load %arg6[%c0_10, %c0_11] : memref<16x256xf32, #tpu.memory_space<vmem>>, vector<16x256xf32>
      %13 = arith.truncf %12 : vector<16x256xf32> to vector<16x256xbf16>
      %c0_12 = arith.constant 0 : index
      %c0_13 = arith.constant 0 : index
      %14 = vector.load %arg5[%c0_12, %c0_13] : memref<16x256xbf16, #tpu.memory_space<vmem>>, vector<16x256xbf16>
      tpu.vector_store %arg5[%c0_12, %c0_13], %13 {strides = array<i32>} : memref<16x256xbf16, #tpu.memory_space<vmem>>, vector<16x256xbf16>,
    } else {
    }
    return
  }
  func.func @transform_0(%arg0: i32, %arg1: i32, %arg2: i32) -> (i32, i32) {
    %c0_i32 = arith.constant 0 : i32
    return %arg0, %arg2 : i32, i32
  }
  func.func @transform_1(%arg0: i32, %arg1: i32, %arg2: i32) -> (i32, i32) {
    %c0_i32 = arith.constant 0 : i32
    return %arg2, %arg1 : i32, i32
  }
  func.func @transform_2(%arg0: i32, %arg1: i32, %arg2: i32) -> (i32, i32) {
    %c0_i32 = arith.constant 0 : i32
    return %arg0, %arg1 : i32, i32
  }
}

module attributes {stable_mosaic.version = 11 : i64} {
  func.func @_mm_plain_kernel(%arg0: i32, %arg1: i32, %arg2: i32, %arg3: memref<16x128xbf16, #tpu.memory_space<vmem>>, %arg4: memref<128x256xbf16, #tpu.memory_space<vmem>>, %arg5: memref<16x256xf32, #tpu.memory_space<vmem>>, %arg6: memref<16x256xf32, #tpu.memory_space<vmem>>) attributes {dimension_semantics = [#tpu.dimension_semantics<parallel>, #tpu.dimension_semantics<parallel>, #tpu.dimension_semantics<arbitrary>], iteration_bounds = array<i64: 1, 16, 1>, scalar_prefetch = 0 : i64, scratch_operands = 1 : i64, tpu.core_type = #tpu.core_type<tc>, window_params = [{transform_indices = @transform_0, window_bounds = array<i64: 16, 128>}, {transform_indices = @transform_1, window_bounds = array<i64: 128, 256>}, {transform_indices = @transform_2, window_bounds = array<i64: 16, 256>}]} {
    %c0_i32 = arith.constant 0 : i32
    %0 = arith.cmpi eq, %arg2, %c0_i32 : i32
    %1 = arith.extui %0 : i1 to i32
    %c0_i32_0 = arith.constant 0 : i32
    %2 = arith.cmpi ne, %1, %c0_i32_0 : i32
    scf.if %2 {
      %cst_10 = arith.constant 0.000000e+00 : f32
      %12 = vector.broadcast %cst_10 : f32 to vector<16x256xf32>
      %c0_11 = arith.constant 0 : index
      %c0_12 = arith.constant 0 : index
      %13 = vector.load %arg6[%c0_11, %c0_12] : memref<16x256xf32, #tpu.memory_space<vmem>>, vector<16x256xf32>
      tpu.vector_store %arg6[%c0_11, %c0_12], %12 {strides = array<i32>} : memref<16x256xf32, #tpu.memory_space<vmem>>, vector<16x256xf32>,
    } else {
    }
    %c0 = arith.constant 0 : index
    %c0_1 = arith.constant 0 : index
    %3 = vector.load %arg6[%c0, %c0_1] : memref<16x256xf32, #tpu.memory_space<vmem>>, vector<16x256xf32>
    %c0_2 = arith.constant 0 : index
    %c0_3 = arith.constant 0 : index
    %4 = vector.load %arg3[%c0_2, %c0_3] : memref<16x128xbf16, #tpu.memory_space<vmem>>, vector<16x128xbf16>
    %c0_4 = arith.constant 0 : index
    %c0_5 = arith.constant 0 : index
    %5 = vector.load %arg4[%c0_4, %c0_5] : memref<128x256xbf16, #tpu.memory_space<vmem>>, vector<128x256xbf16>
    %cst = arith.constant dense<0.000000e+00> : vector<16x256xf32>
    %6 = tpu.matmul %4, %5, %cst {dimension_numbers = #tpu.dot_dimension_numbers<[1], [0], [0], [1], [0, 0, 1, 1], [], []>} : vector<16x128xbf16>, vector<128x256xbf16>, vector<16x256xf32> -> vector<16x256xf32>
    %7 = arith.addf %3, %6 : vector<16x256xf32>
    %c0_6 = arith.constant 0 : index
    %c0_7 = arith.constant 0 : index
    %8 = vector.load %arg6[%c0_6, %c0_7] : memref<16x256xf32, #tpu.memory_space<vmem>>, vector<16x256xf32>
    tpu.vector_store %arg6[%c0_6, %c0_7], %7 {strides = array<i32>} : memref<16x256xf32, #tpu.memory_space<vmem>>, vector<16x256xf32>,
    %c0_i32_8 = arith.constant 0 : i32
    %9 = arith.cmpi eq, %arg2, %c0_i32_8 : i32
    %10 = arith.extui %9 : i1 to i32
    %c0_i32_9 = arith.constant 0 : i32
    %11 = arith.cmpi ne, %10, %c0_i32_9 : i32
    scf.if %11 {
      %c0_10 = arith.constant 0 : index
      %c0_11 = arith.constant 0 : index
      %12 = vector.load %arg6[%c0_10, %c0_11] : memref<16x256xf32, #tpu.memory_space<vmem>>, vector<16x256xf32>
      %c0_12 = arith.constant 0 : index
      %c0_13 = arith.constant 0 : index
      %13 = vector.load %arg5[%c0_12, %c0_13] : memref<16x256xf32, #tpu.memory_space<vmem>>, vector<16x256xf32>
      tpu.vector_store %arg5[%c0_12, %c0_13], %12 {strides = array<i32>} : memref<16x256xf32, #tpu.memory_space<vmem>>, vector<16x256xf32>,
    } else {
    }
    return
  }
  func.func @transform_0(%arg0: i32, %arg1: i32, %arg2: i32) -> (i32, i32) {
    %c0_i32 = arith.constant 0 : i32
    return %arg0, %arg2 : i32, i32
  }
  func.func @transform_1(%arg0: i32, %arg1: i32, %arg2: i32) -> (i32, i32) {
    %c0_i32 = arith.constant 0 : i32
    return %arg2, %arg1 : i32, i32
  }
  func.func @transform_2(%arg0: i32, %arg1: i32, %arg2: i32) -> (i32, i32) {
    %c0_i32 = arith.constant 0 : i32
    return %arg0, %arg1 : i32, i32
  }
}

</mosaic_0001>

<bundles_post_ra>
// kernel: retrain_net_forward.10
= control target key start
LH: loop header
LB: loop body
LE: loop exit
PB: predicated region body
PF: predicated region fallthrough
CT: control target
= control target key end

     0   :  { %9 = vsyncpa [#allocation4], 0  ;;  %s1151_s0 = inlined_call_operand.vmem [shape: bf16[128,128], index: 0, kind: input, shape index: {}]   ;;  %s1152_s1 = inlined_call_operand.hbm [shape: bf16[128,128], index: 1, kind: input, shape index: {}]   ;;  %s1153_s2 = inlined_call_operand.hbm [shape: f32[1,128], index: 2, kind: input, shape index: {}]   ;;  %s1154_s3 = inlined_call_operand.hbm [shape: f32[1,128], index: 3, kind: input, shape index: {}]   ;;  %s1155_s4 = inlined_call_operand.vmem [shape: bf16[128,128], index: 4, kind: output, shape index: {}]  }
   0x1   :  { %10 = vsyncpa [#allocation6], 0  ;;  %s1043_s15 = smov 0   ;;  %s1045_s16 = smov 0  }
   0x2   :  { %s1047_s17 = smov 0  }
   0x3 LB: > { %s1013_s18 = smov [#allocation5]   ;;  %s712_s20 = sadd.s32 4294967295, %s1011_s17   ;;  %s1011_s17 = sphi %s1047_s17, %s16_s17   ;;  %s1007_s16 = sphi %s1045_s16, %s1161_s16   ;;  %s1003_s15 = sphi %s1043_s15, %s1160_s15  }
   0x4   : > { %s208_s19 = sshll.u32 %s1013_s18, 4  ;;  %p714_p0 = scmp.ge.s32.totalorder %s1011_s17, 1  ;;  %s209_s19 = int_to_ptr.vmem [resolvable:$true] %s208_s19 }
   0x5   : > { %p176_p1 = scmp.lt.s32.totalorder %s1011_s17, 3  ;;  %p1061_p2 = scmp.eq.s32.totalorder %s712_s20, 0 }
   0x6   : > { %s35_s23 = sadd.s32 1, %s1007_s16  ;;  %s1014_s26 = smov [#allocation3]  }
   0x7   : > { %p1065_p3 = pnand %p714_p0, %p176_p1  ;;  %p1078_p6 = scmp.ge.s32.totalorder %s35_s23, 2 }
   0x8   : > { %s192_s27 = sshll.u32 %s1014_s26, 4  ;;  %s914_s28 = scalar_lea.vmem %s209_s19, 16  ;;  %s193_s27 = int_to_ptr.vmem [resolvable:$true] %s192_s27 }
   0x9   : > { %p846_p4 = pneg %p1065_p3  ;;  %p915_p8 = scmp.ne.s32.totalorder %s209_s19, %s914_s28 }
   0xa   : > { %s921_s29 = scalar_lea.vmem %s209_s19, 32  ;;  %p922_p11 = scmp.lt.s32.totalorder %s209_s19, %s209_s19 }
   0xb   : > { %p1074_p5 = pnand %p1061_p2, %p846_p4  ;;  %p923_p12 = scmp.lt.s32.totalorder %s921_s29, %s914_s28 }
   0xd   : > { %p905_p7 = pneg %p1074_p5  ;;  %p924_p13 = por %p923_p12, %p922_p11 }
   0xf   : > { %p917_p9 = pnand %p915_p8, %p905_p7 }
  0x11   : > { %p918_p10 = pneg %p917_p9 }
  0x13   : > { %p925_p0 = pnand %p924_p13, %p918_p10 }
  0x15   : > { %928 = shalt.err (!%p925_p0)
}
  0x16   : > { %852 = dma.hbm_to_vmem [thread:$0]  (!%p1074_p5), %s1153_s2, 16, %s209_s19, [#allocation6]  }
  0x17   : > { %s1163_s23 = smov (%p1078_p6, %s35_s23), 0  ;;  %s940_s6 = scalar_lea.vmem %s193_s27, 1024 }
  0x18   : > { %p941_p1 = scmp.ne.s32.totalorder %s193_s27, %s940_s6  ;;  %p948_p9 = scmp.lt.s32.totalorder %s193_s27, %s193_s27 }
  0x19   : > { %p949_p10 = scmp.lt.s32.totalorder %s940_s6, %s940_s6 }
  0x1a   : > { %p943_p4 = pnand %p941_p1, %p905_p7 }
  0x1b   : > { %p950_p11 = por %p949_p10, %p948_p9 }
  0x1c   : > { %p944_p8 = pneg %p943_p4 }
  0x1e   : > { %p951_p12 = pnand %p950_p11, %p944_p8 }
  0x20   : > { %954 = shalt.err (!%p951_p12)
}
  0x21   : > { %s1015_s7 = smov 64   ;;  %s1016_s8 = smov 4  }
  0x22   : > { %849 = dma.hbm_to_vmem [thread:$0]  (!%p1074_p5), %s1152_s1, 1024, %s193_s27, [#allocation4], %s1015_s7, %s1015_s7, %s1016_s8  }
  0x23   : > { %s1017_s11 = smov [#allocation7]  }
  0x24   : > { %s221_s12 = sshll.u32 %s1017_s11, 4  ;;  %s222_s12 = int_to_ptr.vmem [resolvable:$true] %s221_s12 }
  0x25   : > { %s966_s13 = scalar_lea.vmem %s222_s12, 16  ;;  %s973_s14 = scalar_lea.vmem %s222_s12, 32 }
  0x26   : > { %p967_p6 = scmp.ne.s32.totalorder %s222_s12, %s966_s13  ;;  %p974_p1 = scmp.lt.s32.totalorder %s222_s12, %s222_s12 }
  0x27   : > { %p975_p4 = scmp.lt.s32.totalorder %s973_s14, %s966_s13 }
  0x28   : > { %p969_p13 = pnand %p967_p6, %p905_p7 }
  0x29   : > { %p976_p8 = por %p975_p4, %p974_p1 }
  0x2a   : > { %p970_p0 = pneg %p969_p13 }
  0x2c   : > { %p977_p9 = pnand %p976_p8, %p970_p0 }
  0x2e   : > { %980 = shalt.err (!%p977_p9)
}
  0x2f   : > { %855 = dma.hbm_to_vmem [thread:$0]  (!%p1074_p5), %s1154_s3, 16, %s222_s12, [#allocation6]  }
  0x30   : > { %246 = sbr.rel (%p1065_p3) target bundleno = 297 (0x129), region = 36 }
  0x35   : > { %994 = dma.done.wait (%p1061_p2), [#allocation4], 1024  }
  0x36   : > { %996 = vsyncadd (%p1061_p2), [#allocation4], 4294966272 }
  0x37   : > { %998 = dma.done.wait (%p1061_p2), [#allocation6], 32  }
  0x38   : > { %1000 = vsyncadd (%p1061_p2), [#allocation6], 4294967264  ;;  %s723_s20 = sshll.u32 %s1003_s15, 3  ;;  %v891_v0 = vld [vmem:[#allocation3 + $0x38] sm:$0xff]   ;;  %v892_v1 = vld [vmem:[#allocation3 + $0x30] sm:$0xff]  }
  0x39   : > { %p287_p7 = scmp.lt.s32.totalorder %s723_s20, 15  ;;  %794 = vmatprep.subr.bf16.mxu0 %v891_v0  ;;  %818 = vmatprep.subr.bf16.mxu1 %v891_v0  ;;  %v893_v2 = vld [vmem:[#allocation3 + $0x28] sm:$0xff]   ;;  %v894_v3 = vld [vmem:[#allocation3 + $0x20] sm:$0xff]   ;;  %v895_v6 = vld [vmem:[#allocation3 + $0x18] sm:$0xff]  }
  0x3a   : > { %795 = vmatpush3.bf16.msra.mxu0 %v891_v0  ;;  %826 = vmatpush3.bf16.msra.mxu1 %v891_v0  ;;  %v896_v7 = vld [vmem:[#allocation3 + $0x10] sm:$0xff]   ;;  %v897_v8 = vld [vmem:[#allocation3 + $0x8] sm:$0xff]   ;;  %v898_v9 = vld [vmem:[#allocation3] sm:$0xff]  }
  0x3b   : > { %s1165_s20 = smov (!%p287_p7, %s723_s20), 15  ;;  %796 = vmatprep.subr.bf16.mxu0 %v892_v1  ;;  %819 = vmatprep.subr.bf16.mxu1 %v892_v1  ;;  %v739_v12 = vld [vmem:[#allocation5] ss:$0 sm:$0xff]  ;;  %v740_v19 = vld [vmem:[#allocation7] ss:$0 sm:$0xff] }
  0x3c   : > { %s724_s22 = sshll.u32 %s1165_s20, 2 }
  0x3d   : > { %s1131_s15 = scalar_lea.vmem %s1151_s0, %s724_s22  ;;  %s303_s27 = scalar_lea.vmem %s1155_s4, %s724_s22 }
  0x3e   : > { %797 = vmatpush3.bf16.msra.mxu0 %v892_v1  ;;  %827 = vmatpush3.bf16.msra.mxu1 %v892_v1  ;;  %v899_v4 = vld [vmem:[%s1131_s15] sm:$0xff]   ;;  %v900_v5 = vld [vmem:[%s1131_s15 + $0x10] sm:$0xff]   ;;  %v901_v10 = vld [vmem:[%s1131_s15 + $0x8] sm:$0xff]  }
  0x3f   : > { %798 = vmatprep.subr.bf16.mxu0 %v893_v2  ;;  %820 = vmatprep.subr.bf16.mxu1 %v893_v2  ;;  %v902_v11 = vld [vmem:[%s1131_s15 + $0x18] sm:$0xff]  }
  0x40   : > { %810 = vmatprep.mubr.bf16.mxu0 %v899_v4  ;;  %814 = vmatprep.mubr.bf16.mxu1 %v900_v5 }
  0x42   : > { %799 = vmatpush3.bf16.msra.mxu0 %v893_v2  ;;  %828 = vmatpush3.bf16.msra.mxu1 %v893_v2 }
  0x43   : > { %800 = vmatprep.subr.bf16.mxu0 %v894_v3  ;;  %821 = vmatprep.subr.bf16.mxu1 %v894_v3 }
  0x46   : > { %801 = vmatpush3.bf16.msra.mxu0 %v894_v3  ;;  %829 = vmatpush3.bf16.msra.mxu1 %v894_v3 }
  0x47   : > { %802 = vmatprep.subr.bf16.mxu0 %v895_v6  ;;  %822 = vmatprep.subr.bf16.mxu1 %v895_v6 }
  0x4a   : > { %803 = vmatpush3.bf16.msra.mxu0 %v895_v6  ;;  %830 = vmatpush3.bf16.msra.mxu1 %v895_v6 }
  0x4b   : > { %804 = vmatprep.subr.bf16.mxu0 %v896_v7  ;;  %823 = vmatprep.subr.bf16.mxu1 %v896_v7 }
  0x4e   : > { %805 = vmatpush3.bf16.msra.mxu0 %v896_v7  ;;  %831 = vmatpush3.bf16.msra.mxu1 %v896_v7 }
  0x4f   : > { %806 = vmatprep.subr.bf16.mxu0 %v897_v8  ;;  %824 = vmatprep.subr.bf16.mxu1 %v897_v8 }
  0x52   : > { %807 = vmatpush3.bf16.msra.mxu0 %v897_v8  ;;  %832 = vmatpush3.bf16.msra.mxu1 %v897_v8 }
  0x53   : > { %808 = vmatprep.subr.bf16.mxu0 %v898_v9  ;;  %825 = vmatprep.subr.bf16.mxu1 %v898_v9 }
  0x56   : > { %809 = vmatpush3.bf16.msra.mxu0 %v898_v9  ;;  %833 = vmatpush3.bf16.msra.mxu1 %v898_v9 }
  0x59   : > { %811 = vmatmul.mubr.bf16.vlgmr.msra.gmra.mxu0 %v901_v10  ;;  %815 = vmatmul.mubr.bf16.vlgmr.msra.gmra.mxu1 %v902_v11 }
 0x119   : > { %v812_v13 = vpop.f32.mrf.mxu0  ;;  %v816_v14 = vpop.f32.mrf.mxu1 }
 0x11a   : > { %v523_v15 = vmul.f32 %v812_v13, %v739_v12  ;;  %v527_v16 = vmul.f32 %v816_v14, %v739_v12 }
 0x11b   : > { %v456_v17 = vpop.f32.mrf.mxu0  ;;  %v472_v18 = vpop.f32.mrf.mxu1 }
 0x11c   : > { %v521_v20 = vmul.f32 %v739_v12, %v456_v17  ;;  %v525_v21 = vmul.f32 %v739_v12, %v472_v18  ;;  %v538_v24 = vadd.f32 %v740_v19, %v523_v15  ;;  %v542_v25 = vadd.f32 %v740_v19, %v527_v16 }
 0x11d   : > { %v813_v22 = vpop.f32.mrf.mxu0  ;;  %v817_v23 = vpop.f32.mrf.mxu1 }
 0x11e   : > { %v524_v26 = vmul.f32 %v813_v22, %v739_v12  ;;  %v528_v27 = vmul.f32 %v817_v23, %v739_v12  ;;  %v536_v30 = vadd.f32 %v740_v19, %v521_v20  ;;  %v540_v31 = vadd.f32 %v740_v19, %v525_v21 }
 0x11f   : > { %v459_v28 = vpop.f32.mrf.mxu0  ;;  %v475_v29 = vpop.f32.mrf.mxu1  ;;  %v546_v38 = vmax.f32 %v538_v24, 0.0  ;;  %v550_v39 = vmax.f32 %v542_v25, 0.0 }
 0x120   : > { %v522_v32 = vmul.f32 %v739_v12, %v459_v28  ;;  %v526_v33 = vmul.f32 %v739_v12, %v475_v29  ;;  %v539_v34 = vadd.f32 %v740_v19, %v524_v26  ;;  %v543_v35 = vadd.f32 %v740_v19, %v528_v27 }
 0x121   : > { %v544_v42 = vmax.f32 %v536_v30, 0.0  ;;  %v548_v43 = vmax.f32 %v540_v31, 0.0 }
 0x122   : > { %v537_v36 = vadd.f32 %v740_v19, %v522_v32  ;;  %v541_v37 = vadd.f32 %v740_v19, %v526_v33  ;;  %v547_v40 = vmax.f32 %v539_v34, 0.0  ;;  %v551_v41 = vmax.f32 %v543_v35, 0.0 }
 0x124   : > { %v545_v44 = vmax.f32 %v537_v36, 0.0  ;;  %v549_v45 = vmax.f32 %v541_v37, 0.0  ;;  %v767_v46 = vpack.c.bf16 %v547_v40, %v546_v38  ;;  %v777_v47 = vpack.c.bf16 %v551_v41, %v550_v39 }
 0x126   : > { %v762_v48 = vpack.c.bf16 %v545_v44, %v544_v42  ;;  %v772_v49 = vpack.c.bf16 %v549_v45, %v548_v43  ;;  %779 = vst [vmem:[%s303_s27 + $0x8] sm:$0xff] %v767_v46   ;;  %781 = vst [vmem:[%s303_s27 + $0x18] sm:$0xff] %v777_v47  }
 0x128   : > { %763 = vst [vmem:[%s303_s27] sm:$0xff] %v762_v48   ;;  %780 = vst [vmem:[%s303_s27 + $0x10] sm:$0xff] %v772_v49  }
 0x129 PF: > { %s16_s17 = sadd.s32 1, %s1011_s17   ;;  %s1160_s15 = smov %s1007_s16 }
 0x12a   : > { %p13_p2 = scmp.ge.s32.totalorder %s16_s17, 4   ;;  %s1161_s16 = smov %s1163_s23 }
 0x12c   :  { %15 = sbr.rel (!%p13_p2) target bundleno = 3 (0x3), region = 90 }
 0x131   :  { %620 = vsyncpa [#allocation4], 1 }
 0x132   :  { %622 = vsyncpa [#allocation4 + $0x1], 1 }
 0x133   :  { %623 = vsyncpa [#allocation6], 1 }

// kernel: retrain_net_forward.12
= control target key start
LH: loop header
LB: loop body
LE: loop exit
PB: predicated region body
PF: predicated region fallthrough
CT: control target
= control target key end

     0   :  { %s733_s15 = smov 0   ;;  %s735_s16 = smov 0   ;;  %s803_s0 = inlined_call_operand.vmem [shape: bf16[32,128], index: 0, kind: input, shape index: {}]   ;;  %s804_s1 = inlined_call_operand.vmem [shape: bf16[128,128], index: 1, kind: input, shape index: {}]   ;;  %s805_s2 = inlined_call_operand.vmem [shape: f32[1,128], index: 2, kind: input, shape index: {}]   ;;  %s806_s3 = inlined_call_operand.vmem [shape: f32[1,128], index: 3, kind: input, shape index: {}]   ;;  %s807_s4 = inlined_call_operand.vmem [shape: bf16[32,128], index: 4, kind: output, shape index: {}]  }
   0x1   :  { %s737_s17 = smov 0  }
   0x2 LB: > { %s33_s18 = sadd.s32 1, %s700_s16  ;;  %p591_p0 = scmp.ge.s32.totalorder %s704_s17, 1  ;;  %s704_s17 = sphi %s737_s17, %s14_s17   ;;  %s700_s16 = sphi %s735_s16, %s809_s16   ;;  %s696_s15 = sphi %s733_s15, %s808_s15  }
   0x3   : > { %p35_p1 = scmp.ge.s32.totalorder %s33_s18, 2  ;;  %p221_p2 = scmp.lt.s32.totalorder %s704_s17, 3 }
   0x5   : > { %s811_s18 = smov (%p35_p1, %s33_s18), 0  ;;  %p222_p3 = pnand %p591_p0, %p221_p2 }
   0x6   : > { %s592_s23 = sshll.u32 (!%p222_p3), %s696_s15, 1 }
   0x7   : > { %225 = sbr.rel (%p222_p3) target bundleno = 251 (0xfb), region = 36  ;;  %p268_p4 = scmp.lt.s32.totalorder (!%p222_p3), %s592_s23, 3 }
   0xc   : > { %v673_v0 = vld [vmem:[%s804_s1 + $0x38] sm:$0xff]   ;;  %v706_v1 = vmov 0.0   ;;  %v674_v2 = vld [vmem:[%s804_s1 + $0x30] sm:$0xff]   ;;  %vm707_vm0 = vmmov 0   ;;  %s813_s23 = smov (!%p268_p4, %s592_s23), 3  ;;  %v675_v3 = vld [vmem:[%s804_s1 + $0x28] sm:$0xff]  }
   0xd   : > { %627 = vmatprep.subr.bf16.mxu0 %v706_v1  ;;  %643 = vmatprep.mubr.msk.bf16.mxu0 %vm707_vm0, %v706_v1  ;;  %s593_s26 = sshll.u32 %s813_s23, 2  ;;  %v676_v4 = vld [vmem:[%s804_s1 + $0x20] sm:$0xff]   ;;  %v677_v5 = vld [vmem:[%s804_s1 + $0x18] sm:$0xff]   ;;  %v678_v6 = vld [vmem:[%s804_s1 + $0x10] sm:$0xff]  }
   0xe   : > { %628 = vmatpush3.bf16.msra.mxu0 %v673_v0  ;;  %s274_s29 = scalar_lea.vmem %s803_s0, %s593_s26  ;;  %v679_v7 = vld [vmem:[%s804_s1 + $0x8] sm:$0xff]   ;;  %v680_v8 = vld [vmem:[%s804_s1] sm:$0xff]   ;;  %s298_s24 = scalar_lea.vmem %s807_s4, %s593_s26 }
   0xf   : > { %629 = vmatprep.subr.bf16.mxu0 %v706_v1  ;;  %v681_v9 = vld [vmem:[%s274_s29] sm:$0xff]  }
  0x10   : > { %v605_v10 = vld [vmem:[%s805_s2] ss:$0 sm:$0xff] }
  0x11   : > { %v606_v13 = vld [vmem:[%s806_s3] ss:$0 sm:$0xff] }
  0x12   : > { %630 = vmatpush3.bf16.msra.mxu0 %v674_v2 }
  0x13   : > { %631 = vmatprep.subr.bf16.mxu0 %v706_v1 }
  0x16   : > { %632 = vmatpush3.bf16.msra.mxu0 %v675_v3 }
  0x17   : > { %633 = vmatprep.subr.bf16.mxu0 %v706_v1 }
  0x1a   : > { %634 = vmatpush3.bf16.msra.mxu0 %v676_v4 }
  0x1b   : > { %635 = vmatprep.subr.bf16.mxu0 %v706_v1 }
  0x1e   : > { %636 = vmatpush3.bf16.msra.mxu0 %v677_v5 }
  0x1f   : > { %637 = vmatprep.subr.bf16.mxu0 %v706_v1 }
  0x22   : > { %638 = vmatpush3.bf16.msra.mxu0 %v678_v6 }
  0x23   : > { %639 = vmatprep.subr.bf16.mxu0 %v706_v1 }
  0x26   : > { %640 = vmatpush3.bf16.msra.mxu0 %v679_v7 }
  0x27   : > { %641 = vmatprep.subr.bf16.mxu0 %v706_v1 }
  0x2a   : > { %642 = vmatpush3.bf16.msra.mxu0 %v680_v8 }
  0x2d   : > { %644 = vmatmul.mubr.bf16.vlgmr.msra.gmra.mxu0 %v681_v9 }
  0xed   : > { %v415_v11 = vpop.f32.mrf.mxu0 }
  0xee   : > { %v438_v12 = vmul.f32 %v605_v10, %v415_v11 }
  0xef   : > { %v645_v14 = vpop.f32.mrf.mxu0 }
  0xf0   : > { %v447_v16 = vadd.f32 %v606_v13, %v438_v12 }
  0xf1   : > { %v418_v15 = vpop.f32.mrf.mxu0 }
  0xf2   : > { %v439_v17 = vmul.f32 %v605_v10, %v418_v15  ;;  %v449_v20 = vmax.f32 %v447_v16, 0.0 }
  0xf3   : > { %v646_v18 = vpop.f32.mrf.mxu0 }
  0xf4   : > { %v448_v19 = vadd.f32 %v606_v13, %v439_v17 }
  0xf6   : > { %v450_v21 = vmax.f32 %v448_v19, 0.0 }
  0xf8   : > { %v616_v22 = vpack.c.bf16 %v450_v21, %v449_v20 }
  0xfa   : > { %617 = vst [vmem:[%s298_s24] sm:$0xff] %v616_v22  }
  0xfb PF: > { %s14_s17 = sadd.s32 1, %s704_s17   ;;  %s808_s15 = smov %s700_s16 }
  0xfc   : > { %p11_p5 = scmp.ge.s32.totalorder %s14_s17, 4   ;;  %s809_s16 = smov %s811_s18 }
  0xfe   :  { %13 = sbr.rel (!%p11_p5) target bundleno = 2 (0x2), region = 83 }

// kernel: retrain_net_forward.11
= control target key start
LH: loop header
LB: loop body
LE: loop exit
PB: predicated region body
PF: predicated region fallthrough
CT: control target
= control target key end

     0   :  { %10 = vsyncpa [#allocation5], 0  ;;  %s5151_s0 = inlined_call_operand.vmem [shape: bf16[576,128], index: 0, kind: input, shape index: {}, may-alias: {0,1}]   ;;  %s5152_s1 = inlined_call_operand.vmem [shape: bf16[576,128], index: 1, kind: input, shape index: {}, may-alias: {0,1}]   ;;  %s5153_s2 = inlined_call_operand.hbm [shape: bf16[9,128,128], index: 2, kind: input, shape index: {}]   ;;  %s5154_s3 = inlined_call_operand.hbm [shape: f32[1,128], index: 3, kind: input, shape index: {}]   ;;  %s5155_s4 = inlined_call_operand.hbm [shape: f32[1,128], index: 4, kind: input, shape index: {}]   ;;  %s5156_s5 = inlined_call_operand.vmem [shape: bf16[384,128], index: 5, kind: output, shape index: {}]  }
   0x1   :  { %11 = vsyncpa [#allocation7], 0  ;;  %s4497_s18 = smov 0  }
   0x2 LB: > { %s4462_s19 = smov [#allocation6]   ;;  %s4503_s21 = sadd.s32 4294967295, %s4460_s18   ;;  %s4460_s18 = sphi %s4497_s18, %s17_s18  }
   0x3   : > { %s193_s20 = sshll.u32 %s4462_s19, 4  ;;  %p3397_p0 = scmp.ge.s32.totalorder %s4460_s18, 1  ;;  %s194_s20 = int_to_ptr.vmem [resolvable:$true] %s193_s20 }
   0x4   : > { %p167_p1 = scmp.lt.s32.totalorder %s4460_s18, 3  ;;  %p5157_p2 = scmp.eq.s32.totalorder %s4503_s21, 0 }
   0x5   : > { %s4463_s23 = smov [#allocation4]   ;;  %s4464_s26 = smov [#allocation8]  }
   0x6   : > { %p4508_p3 = pnand %p3397_p0, %p167_p1  ;;  %s179_s24 = sshll.u32 %s4463_s23, 4  ;;  %s180_s24 = int_to_ptr.vmem [resolvable:$true] %s179_s24 }
   0x7   : > { %s204_s27 = sshll.u32 %s4464_s26, 4  ;;  %s4379_s28 = scalar_lea.vmem %s194_s20, 16  ;;  %s4520_s27 = int_to_ptr.vmem [resolvable:$true] %s204_s27 }
   0x8   : > { %s5159_s22 = scalar_select %p4508_p3, 1, 0 }
   0x9   : > { %p4253_p4 = pneg %p4508_p3  ;;  %p4380_p7 = scmp.ne.s32.totalorder %s194_s20, %s4379_s28 }
   0xa   : > { %s4386_s29 = scalar_lea.vmem %s194_s20, 32  ;;  %p4387_p10 = scmp.lt.s32.totalorder %s194_s20, %s194_s20 }
   0xb   : > { %p4516_p5 = pnand %p5157_p2, %p4253_p4  ;;  %p4388_p11 = scmp.lt.s32.totalorder %s4386_s29, %s4379_s28 }
   0xd   : > { %p4370_p6 = pneg %p4516_p5  ;;  %p4389_p12 = por %p4388_p11, %p4387_p10 }
   0xf   : > { %p4382_p8 = pnand %p4380_p7, %p4370_p6 }
  0x11   : > { %p4383_p9 = pneg %p4382_p8 }
  0x13   : > { %p4390_p13 = pnand %p4389_p12, %p4383_p9 }
  0x15   : > { %4393 = shalt.err (!%p4390_p13)
}
  0x16   : > { %4259 = dma.hbm_to_vmem [thread:$0]  (!%p4516_p5), %s5154_s3, 16, %s194_s20, [#allocation7]  }
  0x17   : > { %s4405_s7 = scalar_lea.vmem %s180_s24, 9216  ;;  %p4413_p7 = scmp.lt.s32.totalorder %s180_s24, %s180_s24 }
  0x18   : > { %p4406_p0 = scmp.ne.s32.totalorder %s180_s24, %s4405_s7  ;;  %p4414_p8 = scmp.lt.s32.totalorder %s4405_s7, %s4405_s7 }
  0x1a   : > { %p4408_p1 = pnand %p4406_p0, %p4370_p6  ;;  %p4415_p2 = por %p4414_p8, %p4413_p7 }
  0x1c   : > { %p4409_p4 = pneg %p4408_p1 }
  0x1e   : > { %p4416_p3 = pnand %p4415_p2, %p4409_p4 }
  0x20   : > { %4419 = shalt.err (!%p4416_p3)
}
  0x21   : > { %s4465_s8 = smov 64   ;;  %s4466_s9 = smov 4  }
  0x22   : > { %4256 = dma.hbm_to_vmem [thread:$0]  (!%p4516_p5), %s5153_s2, 9216, %s180_s24, [#allocation5], %s4465_s8, %s4465_s8, %s4466_s9  }
  0x23   : > { %s4431_s12 = scalar_lea.vmem %s4520_s27, 16  ;;  %s4438_s13 = scalar_lea.vmem %s4520_s27, 32 }
  0x24   : > { %p4432_p9 = scmp.ne.s32.totalorder %s4520_s27, %s4431_s12  ;;  %p4439_p3 = scmp.lt.s32.totalorder %s4520_s27, %s4520_s27 }
  0x25   : > { %p4440_p11 = scmp.lt.s32.totalorder %s4438_s13, %s4431_s12 }
  0x26   : > { %p4434_p10 = pnand %p4432_p9, %p4370_p6 }
  0x27   : > { %p4441_p12 = por %p4440_p11, %p4439_p3 }
  0x28   : > { %p4435_p2 = pneg %p4434_p10 }
  0x2a   : > { %p4442_p13 = pnand %p4441_p12, %p4435_p2 }
  0x2c   : > { %4445 = shalt.err (!%p4442_p13)
}
  0x2d   : > { %4262 = dma.hbm_to_vmem [thread:$0]  (!%p4516_p5), %s5155_s4, 16, %s4520_s27, [#allocation7]  }
  0x2e   : > { %p5161_p0 = scmp.ne.s32.totalorder %s5159_s22, 0 }
  0x30   : > { %239 = sbr.rel (%p5161_p0) target bundleno = 514 (0x202), region = 40 }
  0x35   : > { %p5162_p6 = scmp.eq.s32.totalorder %s4503_s21, 0 }
  0x37   : > { %4451 = dma.done.wait (%p5162_p6), [#allocation5], 9216   ;;  %p5163_p1 = pmov %p5162_p6 }
  0x39   : > { %4453 = vsyncadd (%p5163_p1), [#allocation5], 4294958080  ;;  %p5164_p4 = pmov %p5163_p1 }
  0x3a   : > { %p5165_p7 = pmov %p5163_p1 }
  0x3b   : > { %4455 = dma.done.wait (%p5164_p4), [#allocation7], 32  }
  0x3c   : > { %4457 = vsyncadd (%p5165_p7), [#allocation7], 4294967264  ;;  %s4565_s16 = smul.u32 24, %s4503_s21  ;;  %v4282_v0 = vld [vmem:[#allocation4 + $0x38] sm:$0xff]   ;;  %v4284_v2 = vld [vmem:[#allocation4 + $0x30] sm:$0xff]   ;;  %s288_s24 = sadd.s32 1, %s4503_s21 }
  0x3d   : > { %v4283_v1 = vld [vmem:[#allocation4 + $0x78] sm:$0xff]   ;;  %3865 = vmatprep.subr.bf16.mxu0 %v4282_v0  ;;  %v4285_v3 = vld [vmem:[#allocation4 + $0x70] sm:$0xff]   ;;  %v4286_v4 = vld [vmem:[#allocation4 + $0x28] sm:$0xff]   ;;  %s4582_s25 = smul.u32 24, %s288_s24 }
  0x3e   : > { %p283_p5 = scmp.lt.s32.totalorder %s4565_s16, 71  ;;  %3905 = vmatprep.subr.bf16.mxu1 %v4283_v1  ;;  %3866 = vmatpush3.bf16.msra.mxu0 %v4282_v0  ;;  %v4287_v5 = vld [vmem:[#allocation4 + $0x68] sm:$0xff]   ;;  %v4288_v6 = vld [vmem:[#allocation4 + $0x20] sm:$0xff]   ;;  %v4290_v8 = vld [vmem:[#allocation4 + $0x18] sm:$0xff]   ;;  %p299_p9 = scmp.lt.s32.totalorder %s4565_s16, 47 }
  0x3f   : > { %3906 = vmatpush3.bf16.msra.mxu1 %v4283_v1  ;;  %3867 = vmatprep.subr.bf16.mxu0 %v4284_v2  ;;  %v4289_v7 = vld [vmem:[#allocation4 + $0x60] sm:$0xff]   ;;  %v4291_v9 = vld [vmem:[#allocation4 + $0x58] sm:$0xff]   ;;  %v4292_v10 = vld [vmem:[#allocation4 + $0x10] sm:$0xff]   ;;  %p291_p8 = scmp.lt.s32.totalorder %s4582_s25, 71 }
  0x40   : > { %3907 = vmatprep.subr.bf16.mxu1 %v4285_v3  ;;  %s284_s17 = scalar_select %p283_p5, %s4565_s16, 71  ;;  %v4293_v14 = vld [vmem:[#allocation4 + $0x50] sm:$0xff]   ;;  %v4294_v22 = vld [vmem:[#allocation4 + $0x8] sm:$0xff]   ;;  %v4296_v30 = vld [vmem:[#allocation4] sm:$0xff]  }
  0x41   : > { %v4295_v23 = vld [vmem:[#allocation4 + $0x48] sm:$0xff]   ;;  %v4297_v31 = vld [vmem:[#allocation4 + $0x40] sm:$0xff]   ;;  %v4300_v39 = vld [vmem:[#allocation4 + $0xb8] sm:$0xff]   ;;  %s5189_s25 = smov (!%p291_p8, %s4582_s25), 71  ;;  %s5191_s16 = smov (!%p299_p9, %s4565_s16), 47 }
  0x42   : > { %3868 = vmatpush3.bf16.msra.mxu0 %v4284_v2  ;;  %s3406_s19 = sshll.u32 %s284_s17, 2  ;;  %v4301_v44 = vld [vmem:[#allocation4 + $0xf8] sm:$0xff]   ;;  %v4302_v52 = vld [vmem:[#allocation4 + $0xb0] sm:$0xff]   ;;  %v4306_v60 = vld [vmem:[#allocation4 + $0xa8] sm:$0xff]   ;;  %s3409_s21 = sshll.u32 %s5189_s25, 2 }
  0x43   : > { %3908 = vmatpush3.bf16.msra.mxu1 %v4285_v3  ;;  %3869 = vmatprep.subr.bf16.mxu0 %v4286_v4  ;;  %s4572_s23 = scalar_lea.vmem %s5151_s0, %s3406_s19  ;;  %v4303_v56 = vld [vmem:[#allocation4 + $0xf0] sm:$0xff]   ;;  %v4307_v63 = vld [vmem:[#allocation4 + $0xe8] sm:$0xff]   ;;  %s4629_s28 = scalar_lea.vmem %s5152_s1, %s3409_s21 }
  0x44   : > { %3909 = vmatprep.subr.bf16.mxu1 %v4287_v5  ;;  %v3542_v11 = vld [vmem:[%s4572_s23] sm:$0xff]   ;;  %v3661_v13 = vld [vmem:[%s4572_s23 + $0x8] sm:$0xff]   ;;  %v3662_v19 = vld [vmem:[%s4572_s23 + $0x10] sm:$0xff]   ;;  %s3410_s29 = sshll.u32 %s5191_s16, 2 }
  0x45   : > { %v4298_v12 = vld [vmem:[%s4572_s23] sm:$0xff]  ;;  %v3543_v15 = vunpack.c.l.bf16 %v3542_v11  ;;  %v3544_v16 = vunpack.c.h.bf16 %v3542_v11  ;;  %v3547_v17 = vunpack.c.l.bf16 %v3661_v13  ;;  %v3548_v18 = vunpack.c.h.bf16 %v3661_v13  ;;  %v3663_v24 = vld [vmem:[%s4572_s23 + $0x18] sm:$0xff]   ;;  %v3665_v32 = vld [vmem:[%s4572_s23 + $0x28] sm:$0xff]   ;;  %s5086_s7 = scalar_lea.vmem %s5156_s5, %s3410_s29 }
  0x46   : > { %3870 = vmatpush3.bf16.msra.mxu0 %v4286_v4  ;;  %3881 = vmatprep.mubr.bf16.mxu0 %v4298_v12  ;;  %v3551_v20 = vunpack.c.l.bf16 %v3662_v19  ;;  %v3552_v21 = vunpack.c.h.bf16 %v3662_v19  ;;  %v3664_v25 = vld [vmem:[%s4572_s23 + $0x20] sm:$0xff]   ;;  %v3555_v26 = vunpack.c.l.bf16 %v3663_v24  ;;  %v3556_v27 = vunpack.c.h.bf16 %v3663_v24  ;;  %v3666_v40 = vld [vmem:[%s4572_s23 + $0x30] sm:$0xff]   ;;  %v4587_v45 = vld [vmem:[%s4572_s23 + $0x8] sm:$0xff] }
  0x47   : > { %3910 = vmatpush3.bf16.msra.mxu1 %v4287_v5  ;;  %3871 = vmatprep.subr.bf16.mxu0 %v4288_v6  ;;  %353 = vst [vmem:[#allocation2] sm:$0xff] %v3543_v15  ;;  %354 = vst [vmem:[#allocation2 + $0x8] sm:$0xff] %v3544_v16  ;;  %v3559_v28 = vunpack.c.l.bf16 %v3664_v25  ;;  %v3560_v29 = vunpack.c.h.bf16 %v3664_v25  ;;  %v3563_v35 = vunpack.c.l.bf16 %v3665_v32  ;;  %v3564_v36 = vunpack.c.h.bf16 %v3665_v32  ;;  %v3667_v47 = vld [vmem:[%s4572_s23 + $0x38] sm:$0xff]   ;;  %v3668_v51 = vld [vmem:[%s4572_s23 + $0x40] sm:$0xff]  }
  0x48   : > { %3911 = vmatprep.subr.bf16.mxu1 %v4289_v7  ;;  %355 = vst [vmem:[#allocation2 + $0x10] sm:$0xff] %v3547_v17  ;;  %356 = vst [vmem:[#allocation2 + $0x18] sm:$0xff] %v3548_v18  ;;  %v3567_v42 = vunpack.c.l.bf16 %v3666_v40  ;;  %v3568_v43 = vunpack.c.h.bf16 %v3666_v40  ;;  %v3571_v49 = vunpack.c.l.bf16 %v3667_v47  ;;  %v3572_v50 = vunpack.c.h.bf16 %v3667_v47  ;;  %v4594_v57 = vld [vmem:[%s4572_s23 + $0x10] sm:$0xff]  ;;  %v4607_v62 = vld [vmem:[%s4572_s23 + $0x18] sm:$0xff] }
  0x49   : > { %357 = vst [vmem:[#allocation2 + $0x20] sm:$0xff] %v3551_v20  ;;  %358 = vst [vmem:[#allocation2 + $0x28] sm:$0xff] %v3552_v21  ;;  %v3575_v54 = vunpack.c.l.bf16 %v3668_v51  ;;  %v3576_v55 = vunpack.c.h.bf16 %v3668_v51  ;;  %v4612_v2 = vld [vmem:[%s4572_s23 + $0x48] sm:$0xff]   ;;  %v4310_v11 = vld [vmem:[#allocation4 + $0xa0] sm:$0xff]  }
  0x4a   : > { %3872 = vmatpush3.bf16.msra.mxu0 %v4288_v6  ;;  %359 = vst [vmem:[#allocation2 + $0x30] sm:$0xff] %v3555_v26  ;;  %360 = vst [vmem:[#allocation2 + $0x38] sm:$0xff] %v3556_v27  ;;  %v3579_v4 = vunpack.c.l.bf16 %v4612_v2  ;;  %v3580_v5 = vunpack.c.h.bf16 %v4612_v2  ;;  %v4619_v6 = vld [vmem:[%s4572_s23 + $0x50] sm:$0xff]   ;;  %v4315_v16 = vld [vmem:[#allocation4 + $0xd8] sm:$0xff]  }
  0x4b   : > { %3912 = vmatpush3.bf16.msra.mxu1 %v4289_v7  ;;  %3873 = vmatprep.subr.bf16.mxu0 %v4290_v8  ;;  %361 = vst [vmem:[#allocation2 + $0x40] sm:$0xff] %v3559_v28  ;;  %362 = vst [vmem:[#allocation2 + $0x48] sm:$0xff] %v3560_v29  ;;  %v4622_v7 = vld [vmem:[%s4572_s23 + $0x20] sm:$0xff]  ;;  %v4311_v12 = vld [vmem:[#allocation4 + $0xe0] sm:$0xff]  }
  0x4c   : > { %3913 = vmatprep.subr.bf16.mxu1 %v4291_v9  ;;  %363 = vst [vmem:[#allocation2 + $0x50] sm:$0xff] %v3563_v35  ;;  %364 = vst [vmem:[#allocation2 + $0x58] sm:$0xff] %v3564_v36  ;;  %v3671_v17 = vld [vmem:[%s4572_s23 + $0x58] sm:$0xff]   ;;  %v3590_v18 = vld [vmem:[%s4629_s28] sm:$0xff]  }
  0x4d   : > { %365 = vst [vmem:[#allocation2 + $0x60] sm:$0xff] %v3567_v42  ;;  %366 = vst [vmem:[#allocation2 + $0x68] sm:$0xff] %v3568_v43  ;;  %v3587_v20 = vunpack.c.l.bf16 %v3671_v17  ;;  %v3588_v21 = vunpack.c.h.bf16 %v3671_v17  ;;  %v4644_v25 = vld [vmem:[%s4572_s23 + $0x28] sm:$0xff]  ;;  %v4649_v27 = vld [vmem:[%s4572_s23 + $0x30] sm:$0xff] }
  0x4e   : > { %3874 = vmatpush3.bf16.msra.mxu0 %v4290_v8  ;;  %v648_v33 = vld [vmem:[#allocation2 + $0x1] sm:$0xff]  ;;  %367 = vst [vmem:[#allocation2 + $0x70] sm:$0xff] %v3571_v49  ;;  %368 = vst [vmem:[#allocation2 + $0x78] sm:$0xff] %v3572_v50  ;;  %v3583_v8 = vunpack.c.l.bf16 %v4619_v6  ;;  %v4320_v35 = vld [vmem:[#allocation4 + $0x88] sm:$0xff]  }
  0x4f   : > { %3914 = vmatpush3.bf16.msra.mxu1 %v4291_v9  ;;  %3875 = vmatprep.subr.bf16.mxu0 %v4292_v10  ;;  %v649_v34 = vld [vmem:[#allocation2 + $0x9] sm:$0xff]  ;;  %v650_v38 = vld [vmem:[#allocation2 + $0x11] sm:$0xff]  ;;  %369 = vst [vmem:[#allocation2 + $0x80] sm:$0xff] %v3575_v54  ;;  %370 = vst [vmem:[#allocation2 + $0x88] sm:$0xff] %v3576_v55  ;;  %v3584_v9 = vunpack.c.h.bf16 %v4619_v6 }
  0x50   : > { %3915 = vmatprep.subr.bf16.mxu1 %v4293_v14  ;;  %v672_v37 = vpack.c.bf16 %v649_v34, %v648_v33  ;;  %v651_v41 = vld [vmem:[#allocation2 + $0x19] sm:$0xff]  ;;  %v652_v46 = vld [vmem:[#allocation2 + $0x21] sm:$0xff]  ;;  %371 = vst [vmem:[#allocation2 + $0x90] sm:$0xff] %v3579_v4  ;;  %372 = vst [vmem:[#allocation2 + $0x98] sm:$0xff] %v3580_v5 }
  0x51   : > { %v4590_v48 = vpack.c.bf16 %v651_v41, %v650_v38  ;;  %v653_v53 = vld [vmem:[#allocation2 + $0x29] sm:$0xff]  ;;  %v654_v59 = vld [vmem:[#allocation2 + $0x31] sm:$0xff]  ;;  %373 = vst [vmem:[#allocation2 + $0xa0] sm:$0xff] %v3583_v8  ;;  %374 = vst [vmem:[#allocation2 + $0xa8] sm:$0xff] %v3584_v9 }
  0x52   : > { %3876 = vmatpush3.bf16.msra.mxu0 %v4292_v10  ;;  %3921 = vmatprep.mubr.bf16.mxu1 %v672_v37  ;;  %v4602_v58 = vpack.c.bf16 %v653_v53, %v652_v46  ;;  %v655_v61 = vld [vmem:[#allocation2 + $0x39] sm:$0xff]  ;;  %v656_v0 = vld [vmem:[#allocation2 + $0x41] sm:$0xff]  ;;  %375 = vst [vmem:[#allocation2 + $0xb0] sm:$0xff] %v3587_v20  ;;  %376 = vst [vmem:[#allocation2 + $0xb8] sm:$0xff] %v3588_v21 }
  0x53   : > { %3916 = vmatpush3.bf16.msra.mxu1 %v4293_v14  ;;  %3877 = vmatprep.subr.bf16.mxu0 %v4294_v22  ;;  %v657_v1 = vld [vmem:[#allocation2 + $0x49] sm:$0xff]  ;;  %v4614_v3 = vpack.c.bf16 %v655_v61, %v654_v59  ;;  %v658_v13 = vld [vmem:[#allocation2 + $0x51] sm:$0xff]  ;;  %v4316_v29 = vld [vmem:[#allocation4 + $0x90] sm:$0xff]  }
  0x54   : > { %3917 = vmatprep.subr.bf16.mxu1 %v4295_v23  ;;  %v4631_v10 = vpack.c.bf16 %v657_v1, %v656_v0  ;;  %v4314_v14 = vld [vmem:[#allocation4 + $0x98] sm:$0xff]   ;;  %v659_v15 = vld [vmem:[#allocation2 + $0x59] sm:$0xff]  ;;  %v4324_v41 = vld [vmem:[#allocation4 + $0x80] sm:$0xff]  }
  0x55   : > { %v660_v19 = vld [vmem:[#allocation2 + $0x61] sm:$0xff]  ;;  %v661_v24 = vld [vmem:[#allocation2 + $0x69] sm:$0xff]  ;;  %v4646_v26 = vpack.c.bf16 %v659_v15, %v658_v13  ;;  %v4658_v36 = vld [vmem:[%s4572_s23 + $0x38] sm:$0xff] }
  0x56   : > { %3878 = vmatpush3.bf16.msra.mxu0 %v4294_v22  ;;  %v3591_v22 = vunpack.c.l.bf16 %v3590_v18  ;;  %v4651_v28 = vpack.c.bf16 %v661_v24, %v660_v19  ;;  %v663_v32 = vld [vmem:[#allocation2 + $0x79] sm:$0xff]  ;;  %v664_v33 = vld [vmem:[#allocation2 + $0x81] sm:$0xff]  ;;  %v4325_v42 = vld [vmem:[#allocation4 + $0xc0] sm:$0xff]  }
  0x57   : > { %3918 = vmatpush3.bf16.msra.mxu1 %v4295_v23  ;;  %3879 = vmatprep.subr.bf16.mxu0 %v4296_v30  ;;  %v3592_v23 = vunpack.c.h.bf16 %v3590_v18  ;;  %v665_v34 = vld [vmem:[#allocation2 + $0x89] sm:$0xff]  ;;  %v4321_v37 = vld [vmem:[#allocation4 + $0xc8] sm:$0xff]   ;;  %v4328_v13 = vld [vmem:[#allocation4 + $0x130] sm:$0xff]  }
  0x58   : > { %3919 = vmatprep.subr.bf16.mxu1 %v4297_v31  ;;  %389 = vst [vmem:[#allocation2 + $0xc0] sm:$0xff] %v3591_v22  ;;  %v4665_v40 = vpack.c.bf16 %v665_v34, %v664_v33  ;;  %v4672_v43 = vld [vmem:[%s4572_s23 + $0x48] sm:$0xff]  ;;  %v667_v46 = vld [vmem:[#allocation2 + $0x99] sm:$0xff]  ;;  %v4677_v53 = vld [vmem:[%s4572_s23 + $0x50] sm:$0xff] }
  0x59   : > { %390 = vst [vmem:[#allocation2 + $0xc8] sm:$0xff] %v3592_v23  ;;  %v4326_v47 = vld [vmem:[#allocation4 + $0x138] sm:$0xff]   ;;  %v670_v59 = vld [vmem:[#allocation2 + $0xb1] sm:$0xff]  ;;  %v953_v4 = vld [vmem:[#allocation2 + $0x1a] sm:$0xff] }
  0x5a   : > { %3880 = vmatpush3.bf16.msra.mxu0 %v4296_v30  ;;  %v4317_v30 = vld [vmem:[#allocation4 + $0xd0] sm:$0xff]   ;;  %v669_v50 = vld [vmem:[#allocation2 + $0xa9] sm:$0xff]  ;;  %v4686_v61 = vld [vmem:[%s4572_s23 + $0x58] sm:$0xff] }
  0x5b   : > { %3920 = vmatpush3.bf16.msra.mxu1 %v4297_v31  ;;  %3945 = vmatprep.subr.bf16.mxu0 %v4300_v39  ;;  %v662_v31 = vld [vmem:[#allocation2 + $0x71] sm:$0xff]  ;;  %v668_v49 = vld [vmem:[#allocation2 + $0xa1] sm:$0xff] }
  0x5c   : > { %3985 = vmatprep.subr.bf16.mxu1 %v4301_v44  ;;  %v4660_v38 = vpack.c.bf16 %v663_v32, %v662_v31  ;;  %v4327_v51 = vld [vmem:[#allocation4 + $0x178] sm:$0xff]   ;;  %v4679_v54 = vpack.c.bf16 %v669_v50, %v668_v49  ;;  %v952_v1 = vld [vmem:[#allocation2 + $0x12] sm:$0xff]  ;;  %v957_v17 = vld [vmem:[#allocation2 + $0x3a] sm:$0xff] }
  0x5d   : > { %3882 = vmatmul.mubr.bf16.vlgmr.msra.gmra.mxu0 %v4587_v45  ;;  %v950_v55 = vld [vmem:[#allocation2 + $0x2] sm:$0xff]  ;;  %v4330_v18 = vld [vmem:[#allocation4 + $0x128] sm:$0xff]   ;;  %v959_v20 = vld [vmem:[#allocation2 + $0x4a] sm:$0xff] }
  0x5e   : > { %3922 = vmatmul.mubr.bf16.vlgmr.msra.gmra.mxu1 %v4590_v48  ;;  %3946 = vmatpush3.bf16.msra.mxu0 %v4300_v39  ;;  %v4663_v39 = vld [vmem:[%s4572_s23 + $0x40] sm:$0xff]  ;;  %v4331_v19 = vld [vmem:[#allocation4 + $0x168] sm:$0xff]   ;;  %v3672_v22 = vld [vmem:[%s4629_s28 + $0x8] sm:$0xff]  }
  0x5f   : > { %3986 = vmatpush3.bf16.msra.mxu1 %v4301_v44  ;;  %3947 = vmatprep.subr.bf16.mxu0 %v4302_v52  ;;  %v666_v44 = vld [vmem:[#allocation2 + $0x91] sm:$0xff]  ;;  %v954_v8 = vld [vmem:[#allocation2 + $0x22] sm:$0xff]  ;;  %v3595_v23 = vunpack.c.l.bf16 %v3672_v22  ;;  %v3596_v24 = vunpack.c.h.bf16 %v3672_v22 }
  0x60   : > { %3987 = vmatprep.subr.bf16.mxu1 %v4303_v56  ;;  %3885 = vmatprep.mubr.bf16.mxu0 %v4594_v57  ;;  %v4333_v31 = vld [vmem:[#allocation4 + $0x160] sm:$0xff]   ;;  %v962_v32 = vld [vmem:[#allocation2 + $0x62] sm:$0xff]  ;;  %v4338_v49 = vld [vmem:[#allocation4 + $0x108] sm:$0xff]  }
  0x61   : > { %3925 = vmatprep.mubr.bf16.mxu1 %v4602_v58  ;;  %391 = vst [vmem:[#allocation2 + $0xd0] sm:$0xff] %v3595_v23  ;;  %392 = vst [vmem:[#allocation2 + $0xd8] sm:$0xff] %v3596_v24  ;;  %v963_v33 = vld [vmem:[#allocation2 + $0x6a] sm:$0xff]  ;;  %v4356_v22 = vld [vmem:[#allocation4 + $0x1c8] sm:$0xff]  }
  0x62   : > { %3948 = vmatpush3.bf16.msra.mxu0 %v4302_v52  ;;  %v4674_v52 = vpack.c.bf16 %v667_v46, %v666_v44  ;;  %v4334_v34 = vld [vmem:[#allocation4 + $0x118] sm:$0xff]   ;;  %v965_v44 = vld [vmem:[#allocation2 + $0x7a] sm:$0xff]  ;;  %v4357_v23 = vld [vmem:[#allocation4 + $0x180] sm:$0xff]  }
  0x63   : > { %3988 = vmatpush3.bf16.msra.mxu1 %v4303_v56  ;;  %3949 = vmatprep.subr.bf16.mxu0 %v4306_v60  ;;  %v951_v56 = vld [vmem:[#allocation2 + $0xa] sm:$0xff]  ;;  %v966_v46 = vld [vmem:[#allocation2 + $0x82] sm:$0xff] }
  0x64   : > { %3989 = vmatprep.subr.bf16.mxu1 %v4307_v63  ;;  %v974_v0 = vpack.c.bf16 %v951_v56, %v950_v55  ;;  %v4342_v56 = vld [vmem:[#allocation4 + $0x140] sm:$0xff]   ;;  %v1576_v24 = vld [vmem:[#allocation2 + $0xc1] sm:$0xff] }
  0x65   : > { %3886 = vmatmul.mubr.bf16.gmra.mxu0 %v4607_v62  ;;  %v4366_v6 = vld [vmem:[%s4629_s28 + $0x8] sm:$0xff] }
  0x66   : > { %3926 = vmatmul.mubr.bf16.gmra.mxu1 %v4614_v3  ;;  %3950 = vmatpush3.bf16.msra.mxu0 %v4306_v60  ;;  %v671_v60 = vld [vmem:[#allocation2 + $0xb9] sm:$0xff] }
  0x67   : > { %3990 = vmatpush3.bf16.msra.mxu1 %v4307_v63  ;;  %3889 = vmatprep.mubr.bf16.mxu0 %v4622_v7  ;;  %v4688_v63 = vpack.c.bf16 %v671_v60, %v670_v59  ;;  %v969_v59 = vld [vmem:[#allocation2 + $0x9a] sm:$0xff]  ;;  %v3673_v60 = vld [vmem:[%s4629_s28 + $0x10] sm:$0xff]  }
  0x68   : > { %3929 = vmatprep.mubr.bf16.mxu1 %v4631_v10  ;;  %3951 = vmatprep.subr.bf16.mxu0 %v4310_v11  ;;  %v2482_v2 = vld [vmem:[#allocation2 + $0xd1] sm:$0xff] }
  0x69   : > { %3991 = vmatprep.subr.bf16.mxu1 %v4311_v12 }
  0x6a   : > { %3952 = vmatpush3.bf16.msra.mxu0 %v4310_v11  ;;  %v4693_v11 = vpack.c.bf16 %v953_v4, %v952_v1  ;;  %v971_v1 = vld [vmem:[#allocation2 + $0xaa] sm:$0xff]  ;;  %v3599_v4 = vunpack.c.l.bf16 %v3673_v60 }
  0x6b   : > { %3992 = vmatpush3.bf16.msra.mxu1 %v4311_v12  ;;  %3953 = vmatprep.subr.bf16.mxu0 %v4314_v14  ;;  %v955_v12 = vld [vmem:[#allocation2 + $0x2a] sm:$0xff] }
  0x6c   : > { %3993 = vmatprep.subr.bf16.mxu1 %v4315_v16  ;;  %v4695_v15 = vpack.c.bf16 %v955_v12, %v954_v8  ;;  %v4343_v8 = vld [vmem:[#allocation4 + $0x1b8] sm:$0xff]   ;;  %393 = vst [vmem:[#allocation2 + $0xe0] sm:$0xff] %v3599_v4 }
  0x6d   : > { %3890 = vmatmul.mubr.bf16.gmra.mxu0 %v4644_v25  ;;  %v2465_v60 = vld [vmem:[#allocation2 + $0x49] sm:$0xff] }
  0x6e   : > { %3930 = vmatmul.mubr.bf16.gmra.mxu1 %v4646_v26  ;;  %3893 = vmatprep.mubr.bf16.mxu0 %v4649_v27 }
  0x6f   : > { %3933 = vmatprep.mubr.bf16.mxu1 %v4651_v28  ;;  %3954 = vmatpush3.bf16.msra.mxu0 %v4314_v14  ;;  %v4329_v14 = vld [vmem:[#allocation4 + $0x170] sm:$0xff]  }
  0x70   : > { %3994 = vmatpush3.bf16.msra.mxu1 %v4315_v16  ;;  %3955 = vmatprep.subr.bf16.mxu0 %v4316_v29  ;;  %v956_v16 = vld [vmem:[#allocation2 + $0x32] sm:$0xff] }
  0x71   : > { %3995 = vmatprep.subr.bf16.mxu1 %v4317_v30  ;;  %v4701_v21 = vpack.c.bf16 %v957_v17, %v956_v16  ;;  %v4738_v17 = vld [vmem:[%s4629_s28] sm:$0xff] }
  0x73   : > { %3956 = vmatpush3.bf16.msra.mxu0 %v4316_v29  ;;  %v4332_v29 = vld [vmem:[#allocation4 + $0x120] sm:$0xff]  }
  0x74   : > { %3996 = vmatpush3.bf16.msra.mxu1 %v4317_v30  ;;  %3957 = vmatprep.subr.bf16.mxu0 %v4320_v35  ;;  %v960_v30 = vld [vmem:[#allocation2 + $0x52] sm:$0xff] }
  0x75   : > { %3894 = vmatmul.mubr.bf16.gmra.mxu0 %v4658_v36  ;;  %3997 = vmatprep.subr.bf16.mxu1 %v4321_v37 }
  0x76   : > { %3934 = vmatmul.mubr.bf16.gmra.mxu1 %v4660_v38  ;;  %3897 = vmatprep.mubr.bf16.mxu0 %v4663_v39 }
  0x77   : > { %3937 = vmatprep.mubr.bf16.mxu1 %v4665_v40  ;;  %3958 = vmatpush3.bf16.msra.mxu0 %v4320_v35  ;;  %v4335_v35 = vld [vmem:[#allocation4 + $0x158] sm:$0xff]  }
  0x78   : > { %3998 = vmatpush3.bf16.msra.mxu1 %v4321_v37  ;;  %3959 = vmatprep.subr.bf16.mxu0 %v4324_v41 }
  0x79   : > { %3999 = vmatprep.subr.bf16.mxu1 %v4325_v42 }
  0x7b   : > { %3960 = vmatpush3.bf16.msra.mxu0 %v4324_v41  ;;  %v4712_v41 = vpack.c.bf16 %v963_v33, %v962_v32  ;;  %v2159_v32 = vld [vmem:[#allocation2 + $0x28] sm:$0xff] }
  0x7c   : > { %4000 = vmatpush3.bf16.msra.mxu1 %v4325_v42  ;;  %4025 = vmatprep.subr.bf16.mxu0 %v4326_v47  ;;  %v4337_v42 = vld [vmem:[#allocation4 + $0x150] sm:$0xff]  }
  0x7d   : > { %3898 = vmatmul.mubr.bf16.gmra.mxu0 %v4672_v43  ;;  %4065 = vmatprep.subr.bf16.mxu1 %v4327_v51  ;;  %v2460_v33 = vld [vmem:[#allocation2 + $0x21] sm:$0xff] }
  0x7e   : > { %3938 = vmatmul.mubr.bf16.gmra.mxu1 %v4674_v52  ;;  %3901 = vmatprep.mubr.bf16.mxu0 %v4677_v53 }
  0x7f   : > { %3941 = vmatprep.mubr.bf16.mxu1 %v4679_v54 }
  0x85   : > { %3902 = vmatmul.mubr.bf16.gmra.mxu0 %v4686_v61 }
  0x86   : > { %3942 = vmatmul.mubr.bf16.gmra.mxu1 %v4688_v63  ;;  %3961 = vmatprep.mubr.bf16.mxu0 %v974_v0  ;;  %v970_v0 = vld [vmem:[#allocation2 + $0xa2] sm:$0xff] }
  0x87   : > { %4001 = vmatprep.mubr.bf16.mxu1 %v4587_v45  ;;  %v958_v45 = vld [vmem:[#allocation2 + $0x42] sm:$0xff] }
  0x8d   : > { %3962 = vmatmul.mubr.bf16.vlgmr.msra.gmra.mxu0 %v4693_v11 }
  0x8e   : > { %4002 = vmatmul.mubr.bf16.vlgmr.msra.gmra.mxu1 %v4594_v57  ;;  %4026 = vmatpush3.bf16.msra.mxu0 %v4326_v47  ;;  %v4704_v57 = vpack.c.bf16 %v959_v20, %v958_v45  ;;  %v967_v47 = vld [vmem:[#allocation2 + $0x8a] sm:$0xff]  ;;  %v4348_v45 = vld [vmem:[#allocation4 + $0x1e8] sm:$0xff]   ;;  %v4353_v20 = vld [vmem:[#allocation4 + $0x190] sm:$0xff]  }
  0x8f   : > { %4066 = vmatpush3.bf16.msra.mxu1 %v4327_v51  ;;  %4027 = vmatprep.subr.bf16.mxu0 %v4328_v13  ;;  %v4339_v51 = vld [vmem:[#allocation4 + $0x148] sm:$0xff]   ;;  %v4720_v55 = vpack.c.bf16 %v967_v47, %v966_v46 }
  0x90   : > { %4067 = vmatprep.subr.bf16.mxu1 %v4329_v14  ;;  %3965 = vmatprep.mubr.bf16.mxu0 %v4695_v15  ;;  %v2161_v46 = vld [vmem:[#allocation2 + $0x38] sm:$0xff] }
  0x91   : > { %4005 = vmatprep.mubr.bf16.mxu1 %v4607_v62  ;;  %v961_v62 = vld [vmem:[#allocation2 + $0x5a] sm:$0xff]  ;;  %v2462_v47 = vld [vmem:[#allocation2 + $0x31] sm:$0xff] }
  0x92   : > { %4028 = vmatpush3.bf16.msra.mxu0 %v4328_v13  ;;  %v4710_v37 = vpack.c.bf16 %v961_v62, %v960_v30  ;;  %v4344_v13 = vld [vmem:[#allocation4 + $0x1f8] sm:$0xff]   ;;  %v2158_v62 = vld [vmem:[#allocation2 + $0x20] sm:$0xff] }
  0x93   : > { %4068 = vmatpush3.bf16.msra.mxu1 %v4329_v14  ;;  %4029 = vmatprep.subr.bf16.mxu0 %v4330_v18  ;;  %v973_v14 = vld [vmem:[#allocation2 + $0xba] sm:$0xff]  ;;  %v1878_v30 = vld [vmem:[#allocation2 + $0xc2] sm:$0xff] }
  0x94   : > { %4069 = vmatprep.subr.bf16.mxu1 %v4331_v19 }
  0x95   : > { %3966 = vmatmul.mubr.bf16.gmra.mxu0 %v4701_v21 }
  0x96   : > { %4006 = vmatmul.mubr.bf16.gmra.mxu1 %v4622_v7  ;;  %4030 = vmatpush3.bf16.msra.mxu0 %v4330_v18  ;;  %v4336_v7 = vld [vmem:[#allocation4 + $0x110] sm:$0xff]  }
  0x97   : > { %4070 = vmatpush3.bf16.msra.mxu1 %v4331_v19  ;;  %3969 = vmatprep.mubr.bf16.mxu0 %v4704_v57  ;;  %v4345_v18 = vld [vmem:[#allocation4 + $0x1b0] sm:$0xff]   ;;  %v4347_v19 = vld [vmem:[#allocation4 + $0x1a8] sm:$0xff]  }
  0x98   : > { %4009 = vmatprep.mubr.bf16.mxu1 %v4644_v25  ;;  %4031 = vmatprep.subr.bf16.mxu0 %v4332_v29  ;;  %v964_v25 = vld [vmem:[#allocation2 + $0x72] sm:$0xff] }
  0x99   : > { %4071 = vmatprep.subr.bf16.mxu1 %v4333_v31  ;;  %v4718_v50 = vpack.c.bf16 %v965_v44, %v964_v25  ;;  %v2160_v44 = vld [vmem:[#allocation2 + $0x30] sm:$0xff] }
  0x9a   : > { %4032 = vmatpush3.bf16.msra.mxu0 %v4332_v29  ;;  %v1577_v29 = vld [vmem:[#allocation2 + $0xc9] sm:$0xff] }
  0x9b   : > { %4072 = vmatpush3.bf16.msra.mxu1 %v4333_v31  ;;  %4033 = vmatprep.subr.bf16.mxu0 %v4334_v34  ;;  %v1879_v31 = vld [vmem:[#allocation2 + $0xca] sm:$0xff] }
  0x9c   : > { %4073 = vmatprep.subr.bf16.mxu1 %v4335_v35 }
  0x9d   : > { %3970 = vmatmul.mubr.bf16.gmra.mxu0 %v4710_v37 }
  0x9e   : > { %4010 = vmatmul.mubr.bf16.gmra.mxu1 %v4649_v27  ;;  %3973 = vmatprep.mubr.bf16.mxu0 %v4712_v41  ;;  %v4341_v27 = vld [vmem:[#allocation4 + $0x100] sm:$0xff]  }
  0x9f   : > { %4013 = vmatprep.mubr.bf16.mxu1 %v4658_v36  ;;  %4034 = vmatpush3.bf16.msra.mxu0 %v4334_v34  ;;  %v968_v36 = vld [vmem:[#allocation2 + $0x92] sm:$0xff]  ;;  %v2461_v34 = vld [vmem:[#allocation2 + $0x29] sm:$0xff] }
  0xa0   : > { %4074 = vmatpush3.bf16.msra.mxu1 %v4335_v35  ;;  %4035 = vmatprep.subr.bf16.mxu0 %v4336_v7  ;;  %v4727_v12 = vpack.c.bf16 %v969_v59, %v968_v36  ;;  %v4764_v35 = vpack.c.bf16 %v1577_v29, %v1576_v24  ;;  %v2484_v25 = vpack.c.bf16 %v2461_v34, %v2460_v33  ;;  %v2163_v36 = vld [vmem:[#allocation2 + $0x48] sm:$0xff]  ;;  %v2172_v33 = vld [vmem:[#allocation2 + $0x90] sm:$0xff]  ;;  %v2174_v34 = vld [vmem:[#allocation2 + $0xa0] sm:$0xff] }
  0xa1   : > { %4075 = vmatprep.subr.bf16.mxu1 %v4337_v42  ;;  %v2464_v59 = vld [vmem:[#allocation2 + $0x41] sm:$0xff] }
  0xa2   : > { %v2486_v4 = vpack.c.bf16 %v2465_v60, %v2464_v59  ;;  %v2171_v24 = vld [vmem:[#allocation2 + $0x88] sm:$0xff] }
  0xa3   : > { %4036 = vmatpush3.bf16.msra.mxu0 %v4336_v7  ;;  %v4766_v7 = vpack.c.bf16 %v1879_v31, %v1878_v30  ;;  %v4363_v29 = vld [vmem:[#allocation4 + $0x218] sm:$0xff]  }
  0xa4   : > { %4076 = vmatpush3.bf16.msra.mxu1 %v4337_v42  ;;  %4037 = vmatprep.subr.bf16.mxu0 %v4338_v49  ;;  %v2182_v42 = vpack.c.bf16 %v2159_v32, %v2158_v62  ;;  %v4364_v32 = vld [vmem:[#allocation4 + $0x210] sm:$0xff]  }
  0xa5   : > { %3974 = vmatmul.mubr.bf16.gmra.mxu0 %v4718_v50  ;;  %4077 = vmatprep.subr.bf16.mxu1 %v4339_v51 }
  0xa6   : > { %4014 = vmatmul.mubr.bf16.gmra.mxu1 %v4663_v39  ;;  %3977 = vmatprep.mubr.bf16.mxu0 %v4720_v55  ;;  %v4729_v39 = vpack.c.bf16 %v971_v1, %v970_v0  ;;  %v4360_v0 = vld [vmem:[#allocation4 + $0x230] sm:$0xff]  }
  0xa7   : > { %4017 = vmatprep.mubr.bf16.mxu1 %v4672_v43  ;;  %4038 = vmatpush3.bf16.msra.mxu0 %v4338_v49  ;;  %v972_v43 = vld [vmem:[#allocation2 + $0xb2] sm:$0xff] }
  0xa8   : > { %4078 = vmatpush3.bf16.msra.mxu1 %v4339_v51  ;;  %4039 = vmatprep.subr.bf16.mxu0 %v4341_v27  ;;  %v4735_v16 = vpack.c.bf16 %v973_v14, %v972_v43  ;;  %v2463_v49 = vld [vmem:[#allocation2 + $0x39] sm:$0xff]  ;;  %v2183_v51 = vpack.c.bf16 %v2161_v46, %v2160_v44  ;;  %v2466_v43 = vld [vmem:[#allocation2 + $0x51] sm:$0xff]  ;;  %v2190_v44 = vpack.c.bf16 %v3584_v9, %v2174_v34 }
  0xa9   : > { %4079 = vmatprep.subr.bf16.mxu1 %v4342_v56  ;;  %v2467_v14 = vld [vmem:[#allocation2 + $0x59] sm:$0xff]  ;;  %v4367_v46 = vld [vmem:[#allocation4 + $0x200] sm:$0xff]  }
  0xab   : > { %4040 = vmatpush3.bf16.msra.mxu0 %v4341_v27  ;;  %v2162_v27 = vld [vmem:[#allocation2 + $0x40] sm:$0xff] }
  0xac   : > { %4080 = vmatpush3.bf16.msra.mxu1 %v4342_v56  ;;  %4105 = vmatprep.subr.bf16.mxu0 %v4343_v8  ;;  %v2485_v56 = vpack.c.bf16 %v2463_v49, %v2462_v47  ;;  %v2184_v1 = vpack.c.bf16 %v2163_v36, %v2162_v27  ;;  %v2784_v27 = vld [vmem:[#allocation2 + $0xd2] sm:$0xff]  ;;  %v2785_v36 = vld [vmem:[#allocation2 + $0xda] sm:$0xff] }
  0xad   : > { %3978 = vmatmul.mubr.bf16.gmra.mxu0 %v4727_v12  ;;  %4145 = vmatprep.subr.bf16.mxu1 %v4344_v13 }
  0xae   : > { %4018 = vmatmul.mubr.bf16.gmra.mxu1 %v4677_v53  ;;  %3981 = vmatprep.mubr.bf16.mxu0 %v4729_v39  ;;  %v4346_v53 = vld [vmem:[#allocation4 + $0x1f0] sm:$0xff]  }
  0xaf   : > { %4021 = vmatprep.mubr.bf16.mxu1 %v4686_v61 }
  0xb5   : > { %3982 = vmatmul.mubr.bf16.gmra.mxu0 %v4735_v16 }
  0xb6   : > { %4022 = vmatmul.mubr.bf16.gmra.mxu1 %v4738_v17  ;;  %4041 = vmatprep.mubr.bf16.mxu0 %v4590_v48  ;;  %v4349_v48 = vld [vmem:[#allocation4 + $0x1a0] sm:$0xff]  }
  0xb7   : > { %4081 = vmatprep.mubr.bf16.mxu1 %v4693_v11  ;;  %v4351_v11 = vld [vmem:[#allocation4 + $0x198] sm:$0xff]  }
  0xbd   : > { %4042 = vmatmul.mubr.bf16.vlgmr.msra.gmra.mxu0 %v4602_v58  ;;  %v4350_v58 = vld [vmem:[#allocation4 + $0x1e0] sm:$0xff]  }
  0xbe   : > { %4082 = vmatmul.mubr.bf16.vlgmr.msra.gmra.mxu1 %v4695_v15  ;;  %4106 = vmatpush3.bf16.msra.mxu0 %v4343_v8  ;;  %v2164_v8 = vld [vmem:[#allocation2 + $0x50] sm:$0xff] }
  0xbf   : > { %4146 = vmatpush3.bf16.msra.mxu1 %v4344_v13  ;;  %4107 = vmatprep.subr.bf16.mxu0 %v4345_v18  ;;  %v2165_v13 = vld [vmem:[#allocation2 + $0x58] sm:$0xff] }
  0xc0   : > { %4147 = vmatprep.subr.bf16.mxu1 %v4346_v53  ;;  %4045 = vmatprep.mubr.bf16.mxu0 %v4614_v3  ;;  %v4352_v3 = vld [vmem:[#allocation4 + $0x1d8] sm:$0xff]  }
  0xc1   : > { %4085 = vmatprep.mubr.bf16.mxu1 %v4701_v21 }
  0xc2   : > { %4108 = vmatpush3.bf16.msra.mxu0 %v4345_v18  ;;  %v4361_v18 = vld [vmem:[#allocation4 + $0x228] sm:$0xff]  }
  0xc3   : > { %4148 = vmatpush3.bf16.msra.mxu1 %v4346_v53  ;;  %4109 = vmatprep.subr.bf16.mxu0 %v4347_v19  ;;  %v2166_v53 = vld [vmem:[#allocation2 + $0x60] sm:$0xff] }
  0xc4   : > { %4149 = vmatprep.subr.bf16.mxu1 %v4348_v45 }
  0xc5   : > { %4046 = vmatmul.mubr.bf16.gmra.mxu0 %v4631_v10  ;;  %v4354_v10 = vld [vmem:[#allocation4 + $0x1d0] sm:$0xff]  }
  0xc6   : > { %4086 = vmatmul.mubr.bf16.gmra.mxu1 %v4704_v57  ;;  %4110 = vmatpush3.bf16.msra.mxu0 %v4347_v19  ;;  %v2167_v19 = vld [vmem:[#allocation2 + $0x68] sm:$0xff] }
  0xc7   : > { %4150 = vmatpush3.bf16.msra.mxu1 %v4348_v45  ;;  %4049 = vmatprep.mubr.bf16.mxu0 %v4646_v26  ;;  %v4355_v26 = vld [vmem:[#allocation4 + $0x188] sm:$0xff]   ;;  %v2185_v45 = vpack.c.bf16 %v2165_v13, %v2164_v8 }
  0xc8   : > { %4089 = vmatprep.mubr.bf16.mxu1 %v4710_v37  ;;  %4111 = vmatprep.subr.bf16.mxu0 %v4349_v48 }
  0xc9   : > { %4151 = vmatprep.subr.bf16.mxu1 %v4350_v58 }
  0xca   : > { %4112 = vmatpush3.bf16.msra.mxu0 %v4349_v48  ;;  %v2468_v48 = vld [vmem:[#allocation2 + $0x61] sm:$0xff] }
  0xcb   : > { %4152 = vmatpush3.bf16.msra.mxu1 %v4350_v58  ;;  %4113 = vmatprep.subr.bf16.mxu0 %v4351_v11  ;;  %v2469_v58 = vld [vmem:[#allocation2 + $0x69] sm:$0xff] }
  0xcc   : > { %4153 = vmatprep.subr.bf16.mxu1 %v4352_v3 }
  0xcd   : > { %4050 = vmatmul.mubr.bf16.gmra.mxu0 %v4651_v28  ;;  %v4358_v28 = vld [vmem:[#allocation4 + $0x1c0] sm:$0xff]  }
  0xce   : > { %4090 = vmatmul.mubr.bf16.gmra.mxu1 %v4712_v41  ;;  %4053 = vmatprep.mubr.bf16.mxu0 %v4660_v38  ;;  %v4359_v38 = vld [vmem:[#allocation4 + $0x238] sm:$0xff]  }
  0xcf   : > { %4093 = vmatprep.mubr.bf16.mxu1 %v4718_v50  ;;  %4114 = vmatpush3.bf16.msra.mxu0 %v4351_v11  ;;  %v2487_v11 = vpack.c.bf16 %v2467_v14, %v2466_v43 }
  0xd0   : > { %4154 = vmatpush3.bf16.msra.mxu1 %v4352_v3  ;;  %4115 = vmatprep.subr.bf16.mxu0 %v4353_v20  ;;  %v2186_v3 = vpack.c.bf16 %v2167_v19, %v2166_v53 }
  0xd1   : > { %4155 = vmatprep.subr.bf16.mxu1 %v4354_v10 }
  0xd3   : > { %4116 = vmatpush3.bf16.msra.mxu0 %v4353_v20  ;;  %v2488_v20 = vpack.c.bf16 %v2469_v58, %v2468_v48 }
  0xd4   : > { %4156 = vmatpush3.bf16.msra.mxu1 %v4354_v10  ;;  %4117 = vmatprep.subr.bf16.mxu0 %v4355_v26  ;;  %v4362_v10 = vld [vmem:[#allocation4 + $0x220] sm:$0xff]  }
  0xd5   : > { %4054 = vmatmul.mubr.bf16.gmra.mxu0 %v4665_v40  ;;  %4157 = vmatprep.subr.bf16.mxu1 %v4356_v22 }
  0xd6   : > { %4094 = vmatmul.mubr.bf16.gmra.mxu1 %v4720_v55  ;;  %4057 = vmatprep.mubr.bf16.mxu0 %v4674_v52 }
  0xd7   : > { %4097 = vmatprep.mubr.bf16.mxu1 %v4727_v12  ;;  %4118 = vmatpush3.bf16.msra.mxu0 %v4355_v26  ;;  %v2168_v26 = vld [vmem:[#allocation2 + $0x70] sm:$0xff] }
  0xd8   : > { %4158 = vmatpush3.bf16.msra.mxu1 %v4356_v22  ;;  %4119 = vmatprep.subr.bf16.mxu0 %v4357_v23  ;;  %v2169_v22 = vld [vmem:[#allocation2 + $0x78] sm:$0xff] }
  0xd9   : > { %4159 = vmatprep.subr.bf16.mxu1 %v4358_v28  ;;  %v2187_v30 = vpack.c.bf16 %v2169_v22, %v2168_v26 }
  0xdb   : > { %4120 = vmatpush3.bf16.msra.mxu0 %v4357_v23  ;;  %v2470_v23 = vld [vmem:[#allocation2 + $0x71] sm:$0xff] }
  0xdc   : > { %4160 = vmatpush3.bf16.msra.mxu1 %v4358_v28  ;;  %4185 = vmatprep.subr.bf16.mxu0 %v4359_v38  ;;  %v2471_v28 = vld [vmem:[#allocation2 + $0x79] sm:$0xff] }
  0xdd   : > { %4058 = vmatmul.mubr.bf16.gmra.mxu0 %v4679_v54  ;;  %4225 = vmatprep.subr.bf16.mxu1 %v4359_v38  ;;  %v2489_v31 = vpack.c.bf16 %v2471_v28, %v2470_v23 }
  0xde   : > { %4098 = vmatmul.mubr.bf16.gmra.mxu1 %v4729_v39  ;;  %4061 = vmatprep.mubr.bf16.mxu0 %v4688_v63 }
  0xdf   : > { %4101 = vmatprep.mubr.bf16.mxu1 %v4735_v16 }
  0xe5   : > { %4062 = vmatmul.mubr.bf16.gmra.mxu0 %v4764_v35 }
  0xe6   : > { %4102 = vmatmul.mubr.bf16.gmra.mxu1 %v4766_v7  ;;  %4121 = vmatprep.mubr.bf16.mxu0 %v2182_v42  ;;  %v4365_v42 = vld [vmem:[#allocation4 + $0x208] sm:$0xff]  }
  0xe7   : > { %4161 = vmatprep.mubr.bf16.mxu1 %v2484_v25  ;;  %v2189_v25 = vpack.c.bf16 %v3580_v5, %v2172_v33  ;;  %v2483_v5 = vld [vmem:[#allocation2 + $0xd9] sm:$0xff] }
  0xe8   : > { %v2495_v9 = vpack.c.bf16 %v2483_v5, %v2482_v2 }
  0xed   : > { %4122 = vmatmul.mubr.bf16.vlgmr.msra.gmra.mxu0 %v2183_v51 }
  0xee   : > { %4162 = vmatmul.mubr.bf16.vlgmr.msra.gmra.mxu1 %v2485_v56  ;;  %4186 = vmatpush3.bf16.msra.mxu0 %v4359_v38 }
  0xef   : > { %4233 = vmatpush3.bf16.msra.mxu1 %v4359_v38  ;;  %4187 = vmatprep.subr.bf16.mxu0 %v4360_v0  ;;  %v2170_v38 = vld [vmem:[#allocation2 + $0x80] sm:$0xff] }
  0xf0   : > { %4226 = vmatprep.subr.bf16.mxu1 %v4360_v0  ;;  %4125 = vmatprep.mubr.bf16.mxu0 %v2184_v1  ;;  %v2188_v62 = vpack.c.bf16 %v2171_v24, %v2170_v38  ;;  %v2797_v1 = vpack.c.bf16 %v2785_v36, %v2784_v27 }
  0xf1   : > { %4165 = vmatprep.mubr.bf16.mxu1 %v2486_v4 }
  0xf2   : > { %4188 = vmatpush3.bf16.msra.mxu0 %v4360_v0 }
  0xf3   : > { %4234 = vmatpush3.bf16.msra.mxu1 %v4360_v0  ;;  %4189 = vmatprep.subr.bf16.mxu0 %v4361_v18 }
  0xf4   : > { %4227 = vmatprep.subr.bf16.mxu1 %v4361_v18 }
  0xf5   : > { %4126 = vmatmul.mubr.bf16.gmra.mxu0 %v2185_v45 }
  0xf6   : > { %4166 = vmatmul.mubr.bf16.gmra.mxu1 %v2487_v11  ;;  %4190 = vmatpush3.bf16.msra.mxu0 %v4361_v18 }
  0xf7   : > { %4235 = vmatpush3.bf16.msra.mxu1 %v4361_v18  ;;  %4129 = vmatprep.mubr.bf16.mxu0 %v2186_v3 }
  0xf8   : > { %4169 = vmatprep.mubr.bf16.mxu1 %v2488_v20  ;;  %4191 = vmatprep.subr.bf16.mxu0 %v4362_v10 }
  0xf9   : > { %4228 = vmatprep.subr.bf16.mxu1 %v4362_v10 }
  0xfa   : > { %4192 = vmatpush3.bf16.msra.mxu0 %v4362_v10 }
  0xfb   : > { %4236 = vmatpush3.bf16.msra.mxu1 %v4362_v10  ;;  %4193 = vmatprep.subr.bf16.mxu0 %v4363_v29 }
  0xfc   : > { %4229 = vmatprep.subr.bf16.mxu1 %v4363_v29 }
  0xfd   : > { %4130 = vmatmul.mubr.bf16.gmra.mxu0 %v2187_v30 }
  0xfe   : > { %4170 = vmatmul.mubr.bf16.gmra.mxu1 %v2489_v31  ;;  %4133 = vmatprep.mubr.bf16.mxu0 %v2188_v62 }
  0xff   : > { %4173 = vmatprep.mubr.bf16.mxu1 %v4665_v40  ;;  %4194 = vmatpush3.bf16.msra.mxu0 %v4363_v29 }
 0x100   : > { %4237 = vmatpush3.bf16.msra.mxu1 %v4363_v29  ;;  %4195 = vmatprep.subr.bf16.mxu0 %v4364_v32 }
 0x101   : > { %4230 = vmatprep.subr.bf16.mxu1 %v4364_v32 }
 0x103   : > { %4196 = vmatpush3.bf16.msra.mxu0 %v4364_v32 }
 0x104   : > { %4238 = vmatpush3.bf16.msra.mxu1 %v4364_v32  ;;  %4197 = vmatprep.subr.bf16.mxu0 %v4365_v42 }
 0x105   : > { %4134 = vmatmul.mubr.bf16.gmra.mxu0 %v2189_v25  ;;  %4231 = vmatprep.subr.bf16.mxu1 %v4365_v42 }
 0x106   : > { %4174 = vmatmul.mubr.bf16.gmra.mxu1 %v4674_v52  ;;  %4137 = vmatprep.mubr.bf16.mxu0 %v2190_v44 }
 0x107   : > { %4177 = vmatprep.mubr.bf16.mxu1 %v4679_v54  ;;  %4198 = vmatpush3.bf16.msra.mxu0 %v4365_v42 }
 0x108   : > { %4239 = vmatpush3.bf16.msra.mxu1 %v4365_v42  ;;  %4199 = vmatprep.subr.bf16.mxu0 %v4367_v46 }
 0x109   : > { %4232 = vmatprep.subr.bf16.mxu1 %v4367_v46 }
 0x10b   : > { %4200 = vmatpush3.bf16.msra.mxu0 %v4367_v46 }
 0x10c   : > { %4240 = vmatpush3.bf16.msra.mxu1 %v4367_v46 }
 0x10d   : > { %4138 = vmatmul.mubr.bf16.gmra.mxu0 %v4686_v61 }
 0x10e   : > { %4178 = vmatmul.mubr.bf16.gmra.mxu1 %v4688_v63  ;;  %4141 = vmatprep.mubr.bf16.mxu0 %v4738_v17 }
 0x10f   : > { %4181 = vmatprep.mubr.bf16.mxu1 %v4764_v35 }
 0x115   : > { %4142 = vmatmul.mubr.bf16.gmra.mxu0 %v4366_v6 }
 0x116   : > { %4182 = vmatmul.mubr.bf16.gmra.mxu1 %v2495_v9  ;;  %4201 = vmatprep.mubr.bf16.mxu0 %v4695_v15 }
 0x117   : > { %4213 = vmatprep.mubr.bf16.mxu1 %v4720_v55 }
 0x11d   : > { %v3883_v40 = vpop.f32.mrf.mxu0  ;;  %4202 = vmatmul.mubr.bf16.vlgmr.msra.gmra.mxu0 %v4701_v21 }
 0x11e   : > { %v3923_v52 = vpop.f32.mrf.mxu1  ;;  %4214 = vmatmul.mubr.bf16.vlgmr.msra.gmra.mxu1 %v4727_v12  ;;  %4205 = vmatprep.mubr.bf16.mxu0 %v4704_v57 }
 0x11f   : > { %v4787_v54 = vadd.f32 %v3923_v52, %v3883_v40  ;;  %v529_v61 = vpop.f32.mrf.mxu0  ;;  %4217 = vmatprep.mubr.bf16.mxu1 %v4729_v39 }
 0x120   : > { %v783_v63 = vpop.f32.mrf.mxu1 }
 0x121   : > { %v4790_v17 = vadd.f32 %v783_v63, %v529_v61  ;;  %v3884_v35 = vpop.f32.mrf.mxu0 }
 0x122   : > { %v3924_v15 = vpop.f32.mrf.mxu1 }
 0x123   : > { %v4792_v47 = vadd.f32 %v3924_v15, %v3884_v35  ;;  %v532_v55 = vpop.f32.mrf.mxu0 }
 0x124   : > { %v786_v49 = vpop.f32.mrf.mxu1 }
 0x125   : > { %v4794_v21 = vadd.f32 %v786_v49, %v532_v55  ;;  %v3887_v51 = vpop.f32.mrf.mxu0  ;;  %4206 = vmatmul.mubr.bf16.gmra.mxu0 %v4710_v37 }
 0x126   : > { %v3927_v57 = vpop.f32.mrf.mxu1  ;;  %4218 = vmatmul.mubr.bf16.gmra.mxu1 %v4735_v16  ;;  %4209 = vmatprep.mubr.bf16.mxu0 %v4712_v41 }
 0x127   : > { %v4799_v12 = vadd.f32 %v3927_v57, %v3887_v51  ;;  %v545_v39 = vpop.f32.mrf.mxu0  ;;  %4221 = vmatprep.mubr.bf16.mxu1 %v4766_v7 }
 0x128   : > { %v799_v56 = vpop.f32.mrf.mxu1 }
 0x129   : > { %v4802_v59 = vadd.f32 %v799_v56, %v545_v39  ;;  %v3888_v60 = vpop.f32.mrf.mxu0 }
 0x12a   : > { %v3928_v0 = vpop.f32.mrf.mxu1 }
 0x12b   : > { %v4804_v4 = vadd.f32 %v3928_v0, %v3888_v60  ;;  %v548_v37 = vpop.f32.mrf.mxu0 }
 0x12c   : > { %v802_v8 = vpop.f32.mrf.mxu1 }
 0x12d   : > { %v4806_v16 = vadd.f32 %v802_v8, %v548_v37  ;;  %v3891_v41 = vpop.f32.mrf.mxu0  ;;  %4210 = vmatmul.mubr.bf16.gmra.mxu0 %v4718_v50 }
 0x12e   : > { %v3931_v13 = vpop.f32.mrf.mxu1  ;;  %4222 = vmatmul.mubr.bf16.gmra.mxu1 %v2797_v1 }
 0x12f   : > { %v4809_v7 = vadd.f32 %v3931_v13, %v3891_v41  ;;  %v561_v43 = vpop.f32.mrf.mxu0 }
 0x130   : > { %v815_v14 = vpop.f32.mrf.mxu1 }
 0x131   : > { %v4811_v18 = vadd.f32 %v815_v14, %v561_v43  ;;  %v3892_v53 = vpop.f32.mrf.mxu0 }
 0x132   : > { %v3932_v19 = vpop.f32.mrf.mxu1 }
 0x133   : > { %v4813_v45 = vadd.f32 %v3932_v19, %v3892_v53  ;;  %v564_v48 = vpop.f32.mrf.mxu0 }
 0x134   : > { %v818_v58 = vpop.f32.mrf.mxu1 }
 0x135   : > { %v4815_v11 = vadd.f32 %v818_v58, %v564_v48  ;;  %v3895_v3 = vpop.f32.mrf.mxu0 }
 0x136   : > { %v3935_v20 = vpop.f32.mrf.mxu1 }
 0x137   : > { %v4817_v10 = vadd.f32 %v3935_v20, %v3895_v3  ;;  %v577_v50 = vpop.f32.mrf.mxu0 }
 0x138   : > { %v831_v26 = vpop.f32.mrf.mxu1 }
 0x139   : > { %v4819_v22 = vadd.f32 %v831_v26, %v577_v50  ;;  %v3896_v23 = vpop.f32.mrf.mxu0 }
 0x13a   : > { %v3936_v28 = vpop.f32.mrf.mxu1 }
 0x13b   : > { %v4821_v38 = vadd.f32 %v3936_v28, %v3896_v23  ;;  %v580_v24 = vpop.f32.mrf.mxu0 }
 0x13c   : > { %v834_v29 = vpop.f32.mrf.mxu1 }
 0x13d   : > { %v4823_v30 = vadd.f32 %v834_v29, %v580_v24  ;;  %v3899_v31 = vpop.f32.mrf.mxu0 }
 0x13e   : > { %v3939_v62 = vpop.f32.mrf.mxu1 }
 0x13f   : > { %v4825_v32 = vadd.f32 %v3939_v62, %v3899_v31  ;;  %v593_v33 = vpop.f32.mrf.mxu0 }
 0x140   : > { %v847_v34 = vpop.f32.mrf.mxu1 }
 0x141   : > { %v4827_v42 = vadd.f32 %v847_v34, %v593_v33  ;;  %v3900_v25 = vpop.f32.mrf.mxu0 }
 0x142   : > { %v3940_v44 = vpop.f32.mrf.mxu1 }
 0x143   : > { %v4829_v46 = vadd.f32 %v3940_v44, %v3900_v25  ;;  %v596_v2 = vpop.f32.mrf.mxu0 }
 0x144   : > { %v850_v5 = vpop.f32.mrf.mxu1 }
 0x145   : > { %v4831_v6 = vadd.f32 %v850_v5, %v596_v2  ;;  %v3903_v9 = vpop.f32.mrf.mxu0 }
 0x146   : > { %v3943_v40 = vpop.f32.mrf.mxu1 }
 0x147   : > { %v4833_v52 = vadd.f32 %v3943_v40, %v3903_v9  ;;  %v609_v61 = vpop.f32.mrf.mxu0 }
 0x148   : > { %v863_v63 = vpop.f32.mrf.mxu1 }
 0x149   : > { %v4835_v35 = vadd.f32 %v863_v63, %v609_v61  ;;  %v3904_v15 = vpop.f32.mrf.mxu0 }
 0x14a   : > { %v3944_v55 = vpop.f32.mrf.mxu1 }
 0x14b   : > { %v4837_v49 = vadd.f32 %v3944_v55, %v3904_v15  ;;  %v612_v51 = vpop.f32.mrf.mxu0 }
 0x14c   : > { %v866_v57 = vpop.f32.mrf.mxu1 }
 0x14d   : > { %v4839_v39 = vadd.f32 %v866_v57, %v612_v51  ;;  %v3963_v27 = vpop.f32.mrf.mxu0 }
 0x14e   : > { %v1206_v36 = vadd.f32 %v3963_v27, %v4787_v54  ;;  %v4003_v56 = vpop.f32.mrf.mxu1 }
 0x14f   : > { %v1085_v60 = vpop.f32.mrf.mxu0 }
 0x150   : > { %v4842_v0 = vadd.f32 %v4003_v56, %v1206_v36  ;;  %v1204_v1 = vadd.f32 %v1085_v60, %v4790_v17  ;;  %v1387_v37 = vpop.f32.mrf.mxu1 }
 0x151   : > { %v3964_v8 = vpop.f32.mrf.mxu0 }
 0x152   : > { %v4845_v41 = vadd.f32 %v1387_v37, %v1204_v1  ;;  %v1207_v13 = vadd.f32 %v3964_v8, %v4792_v47  ;;  %v4004_v43 = vpop.f32.mrf.mxu1 }
 0x153   : > { %v1088_v14 = vpop.f32.mrf.mxu0 }
 0x154   : > { %v4848_v53 = vadd.f32 %v4004_v43, %v1207_v13  ;;  %v1205_v19 = vadd.f32 %v1088_v14, %v4794_v21  ;;  %v1390_v48 = vpop.f32.mrf.mxu1 }
 0x155   : > { %v3967_v54 = vpop.f32.mrf.mxu0 }
 0x156   : > { %v4851_v58 = vadd.f32 %v1390_v48, %v1205_v19  ;;  %v1210_v3 = vadd.f32 %v3967_v54, %v4799_v12  ;;  %v4007_v20 = vpop.f32.mrf.mxu1 }
 0x157   : > { %v1101_v17 = vpop.f32.mrf.mxu0 }
 0x158   : > { %v4854_v50 = vadd.f32 %v4007_v20, %v1210_v3  ;;  %v1208_v26 = vadd.f32 %v1101_v17, %v4802_v59  ;;  %v1403_v23 = vpop.f32.mrf.mxu1 }
 0x159   : > { %v3968_v47 = vpop.f32.mrf.mxu0 }
 0x15a   : > { %v4857_v28 = vadd.f32 %v1403_v23, %v1208_v26  ;;  %v1211_v24 = vadd.f32 %v3968_v47, %v4804_v4  ;;  %v4008_v29 = vpop.f32.mrf.mxu1 }
 0x15b   : > { %v1104_v21 = vpop.f32.mrf.mxu0 }
 0x15c   : > { %v4860_v31 = vadd.f32 %v4008_v29, %v1211_v24  ;;  %v1209_v62 = vadd.f32 %v1104_v21, %v4806_v16  ;;  %v1406_v33 = vpop.f32.mrf.mxu1 }
 0x15d   : > { %v3971_v12 = vpop.f32.mrf.mxu0 }
 0x15e   : > { %v4863_v34 = vadd.f32 %v1406_v33, %v1209_v62  ;;  %v1214_v25 = vadd.f32 %v3971_v12, %v4809_v7  ;;  %v4011_v44 = vpop.f32.mrf.mxu1 }
 0x15f   : > { %v1117_v59 = vpop.f32.mrf.mxu0 }
 0x160   : > { %v4866_v2 = vadd.f32 %v4011_v44, %v1214_v25  ;;  %v1212_v5 = vadd.f32 %v1117_v59, %v4811_v18  ;;  %v1419_v9 = vpop.f32.mrf.mxu1 }
 0x161   : > { %v3972_v4 = vpop.f32.mrf.mxu0 }
 0x162   : > { %v4869_v40 = vadd.f32 %v1419_v9, %v1212_v5  ;;  %v1215_v61 = vadd.f32 %v3972_v4, %v4813_v45  ;;  %v4012_v63 = vpop.f32.mrf.mxu1 }
 0x163   : > { %v1120_v16 = vpop.f32.mrf.mxu0 }
 0x164   : > { %v4872_v15 = vadd.f32 %v4012_v63, %v1215_v61  ;;  %v1213_v55 = vadd.f32 %v1120_v16, %v4815_v11  ;;  %v1422_v51 = vpop.f32.mrf.mxu1 }
 0x165   : > { %v3975_v7 = vpop.f32.mrf.mxu0 }
 0x166   : > { %v4875_v57 = vadd.f32 %v1422_v51, %v1213_v55  ;;  %v1218_v27 = vadd.f32 %v3975_v7, %v4817_v10  ;;  %v4015_v36 = vpop.f32.mrf.mxu1 }
 0x167   : > { %v1133_v18 = vpop.f32.mrf.mxu0 }
 0x168   : > { %v4878_v56 = vadd.f32 %v4015_v36, %v1218_v27  ;;  %v1216_v60 = vadd.f32 %v1133_v18, %v4819_v22  ;;  %v1435_v1 = vpop.f32.mrf.mxu1 }
 0x169   : > { %v3976_v45 = vpop.f32.mrf.mxu0 }
 0x16a   : > { %v4881_v37 = vadd.f32 %v1435_v1, %v1216_v60  ;;  %v1219_v8 = vadd.f32 %v3976_v45, %v4821_v38  ;;  %v4016_v13 = vpop.f32.mrf.mxu1 }
 0x16b   : > { %v1136_v11 = vpop.f32.mrf.mxu0 }
 0x16c   : > { %v4884_v43 = vadd.f32 %v4016_v13, %v1219_v8  ;;  %v1217_v14 = vadd.f32 %v1136_v11, %v4823_v30  ;;  %v1438_v19 = vpop.f32.mrf.mxu1 }
 0x16d   : > { %v3979_v10 = vpop.f32.mrf.mxu0 }
 0x16e   : > { %v4887_v48 = vadd.f32 %v1438_v19, %v1217_v14  ;;  %v1222_v54 = vadd.f32 %v3979_v10, %v4825_v32  ;;  %v4019_v3 = vpop.f32.mrf.mxu1 }
 0x16f   : > { %v1149_v22 = vpop.f32.mrf.mxu0 }
 0x170   : > { %v4890_v20 = vadd.f32 %v4019_v3, %v1222_v54  ;;  %v1220_v17 = vadd.f32 %v1149_v22, %v4827_v42  ;;  %v1451_v26 = vpop.f32.mrf.mxu1 }
 0x171   : > { %v3980_v38 = vpop.f32.mrf.mxu0 }
 0x172   : > { %v4893_v23 = vadd.f32 %v1451_v26, %v1220_v17  ;;  %v1223_v47 = vadd.f32 %v3980_v38, %v4829_v46  ;;  %v4020_v24 = vpop.f32.mrf.mxu1 }
 0x173   : > { %v1152_v30 = vpop.f32.mrf.mxu0 }
 0x174   : > { %v4896_v29 = vadd.f32 %v4020_v24, %v1223_v47  ;;  %v1221_v21 = vadd.f32 %v1152_v30, %v4831_v6  ;;  %v1454_v62 = vpop.f32.mrf.mxu1 }
 0x175   : > { %v3983_v32 = vpop.f32.mrf.mxu0 }
 0x176   : > { %v4899_v33 = vadd.f32 %v1454_v62, %v1221_v21  ;;  %v1226_v12 = vadd.f32 %v3983_v32, %v4833_v52  ;;  %v4023_v25 = vpop.f32.mrf.mxu1 }
 0x177   : > { %v1165_v42 = vpop.f32.mrf.mxu0 }
 0x178   : > { %v4902_v44 = vadd.f32 %v4023_v25, %v1226_v12  ;;  %v1224_v59 = vadd.f32 %v1165_v42, %v4835_v35  ;;  %v1467_v5 = vpop.f32.mrf.mxu1 }
 0x179   : > { %v3984_v46 = vpop.f32.mrf.mxu0 }
 0x17a   : > { %v4905_v9 = vadd.f32 %v1467_v5, %v1224_v59  ;;  %v1227_v4 = vadd.f32 %v3984_v46, %v4837_v49  ;;  %v4024_v61 = vpop.f32.mrf.mxu1 }
 0x17b   : > { %v1168_v6 = vpop.f32.mrf.mxu0 }
 0x17c   : > { %v4908_v63 = vadd.f32 %v4024_v61, %v1227_v4  ;;  %v1225_v16 = vadd.f32 %v1168_v6, %v4839_v39  ;;  %v1470_v55 = vpop.f32.mrf.mxu1 }
 0x17d   : > { %v4043_v52 = vpop.f32.mrf.mxu0 }
 0x17e   : > { %v4911_v51 = vadd.f32 %v1470_v55, %v1225_v16  ;;  %v1810_v7 = vadd.f32 %v4043_v52, %v4842_v0  ;;  %v4083_v27 = vpop.f32.mrf.mxu1 }
 0x17f   : > { %v1689_v35 = vpop.f32.mrf.mxu0 }
 0x180   : > { %v4914_v36 = vadd.f32 %v4083_v27, %v1810_v7  ;;  %v1808_v18 = vadd.f32 %v1689_v35, %v4845_v41  ;;  %v1991_v60 = vpop.f32.mrf.mxu1 }
 0x181   : > { %v4044_v49 = vpop.f32.mrf.mxu0 }
 0x182   : > { %v4917_v1 = vadd.f32 %v1991_v60, %v1808_v18  ;;  %v1811_v45 = vadd.f32 %v4044_v49, %v4848_v53  ;;  %v4084_v8 = vpop.f32.mrf.mxu1 }
 0x183   : > { %v1692_v39 = vpop.f32.mrf.mxu0 }
 0x184   : > { %v4920_v13 = vadd.f32 %v4084_v8, %v1811_v45  ;;  %v1809_v11 = vadd.f32 %v1692_v39, %v4851_v58  ;;  %v1994_v14 = vpop.f32.mrf.mxu1 }
 0x185   : > { %v4047_v0 = vpop.f32.mrf.mxu0 }
 0x186   : > { %v4923_v19 = vadd.f32 %v1994_v14, %v1809_v11  ;;  %v1814_v10 = vadd.f32 %v4047_v0, %v4854_v50  ;;  %v4087_v54 = vpop.f32.mrf.mxu1 }
 0x187   : > { %v1705_v41 = vpop.f32.mrf.mxu0 }
 0x188   : > { %v4926_v3 = vadd.f32 %v4087_v54, %v1814_v10  ;;  %v1812_v22 = vadd.f32 %v1705_v41, %v4857_v28  ;;  %v2007_v17 = vpop.f32.mrf.mxu1 }
 0x189   : > { %v4048_v53 = vpop.f32.mrf.mxu0 }
 0x18a   : > { %v4929_v26 = vadd.f32 %v2007_v17, %v1812_v22  ;;  %v1815_v38 = vadd.f32 %v4048_v53, %v4860_v31  ;;  %v4088_v47 = vpop.f32.mrf.mxu1 }
 0x18b   : > { %v1708_v58 = vpop.f32.mrf.mxu0 }
 0x18c   : > { %v4932_v24 = vadd.f32 %v4088_v47, %v1815_v38  ;;  %v1813_v30 = vadd.f32 %v1708_v58, %v4863_v34  ;;  %v2010_v21 = vpop.f32.mrf.mxu1 }
 0x18d   : > { %v4051_v50 = vpop.f32.mrf.mxu0 }
 0x18e   : > { %v4935_v62 = vadd.f32 %v2010_v21, %v1813_v30  ;;  %v1818_v32 = vadd.f32 %v4051_v50, %v4866_v2  ;;  %v4091_v12 = vpop.f32.mrf.mxu1 }
 0x18f   : > { %v1721_v28 = vpop.f32.mrf.mxu0 }
 0x190   : > { %v4938_v25 = vadd.f32 %v4091_v12, %v1818_v32  ;;  %v1816_v42 = vadd.f32 %v1721_v28, %v4869_v40  ;;  %v2023_v59 = vpop.f32.mrf.mxu1 }
 0x191   : > { %v4052_v31 = vpop.f32.mrf.mxu0 }
 0x192   : > { %v4941_v5 = vadd.f32 %v2023_v59, %v1816_v42  ;;  %v1819_v46 = vadd.f32 %v4052_v31, %v4872_v15  ;;  %v4092_v4 = vpop.f32.mrf.mxu1 }
 0x193   : > { %v1724_v34 = vpop.f32.mrf.mxu0 }
 0x194   : > { %v4944_v61 = vadd.f32 %v4092_v4, %v1819_v46  ;;  %v1817_v6 = vadd.f32 %v1724_v34, %v4875_v57  ;;  %v2026_v16 = vpop.f32.mrf.mxu1 }
 0x195   : > { %v4055_v2 = vpop.f32.mrf.mxu0 }
 0x196   : > { %v4947_v55 = vadd.f32 %v2026_v16, %v1817_v6  ;;  %v1822_v52 = vadd.f32 %v4055_v2, %v4878_v56  ;;  %v4095_v7 = vpop.f32.mrf.mxu1 }
 0x197   : > { %v1737_v40 = vpop.f32.mrf.mxu0 }
 0x198   : > { %v4950_v27 = vadd.f32 %v4095_v7, %v1822_v52  ;;  %v1820_v35 = vadd.f32 %v1737_v40, %v4881_v37  ;;  %v2039_v18 = vpop.f32.mrf.mxu1 }
 0x199   : > { %v4056_v15 = vpop.f32.mrf.mxu0 }
 0x19a   : > { %v4953_v60 = vadd.f32 %v2039_v18, %v1820_v35  ;;  %v1823_v49 = vadd.f32 %v4056_v15, %v4884_v43  ;;  %v4096_v45 = vpop.f32.mrf.mxu1 }
 0x19b   : > { %v1740_v57 = vpop.f32.mrf.mxu0 }
 0x19c   : > { %v4956_v8 = vadd.f32 %v4096_v45, %v1823_v49  ;;  %v1821_v39 = vadd.f32 %v1740_v57, %v4887_v48  ;;  %v2042_v11 = vpop.f32.mrf.mxu1 }
 0x19d   : > { %v4059_v56 = vpop.f32.mrf.mxu0 }
 0x19e   : > { %v4959_v14 = vadd.f32 %v2042_v11, %v1821_v39  ;;  %v1826_v0 = vadd.f32 %v4059_v56, %v4890_v20  ;;  %v4099_v10 = vpop.f32.mrf.mxu1 }
 0x19f   : > { %v1753_v37 = vpop.f32.mrf.mxu0 }
 0x1a0   : > { %v4962_v54 = vadd.f32 %v4099_v10, %v1826_v0  ;;  %v1824_v41 = vadd.f32 %v1753_v37, %v4893_v23  ;;  %v2055_v22 = vpop.f32.mrf.mxu1 }
 0x1a1   : > { %v4060_v43 = vpop.f32.mrf.mxu0 }
 0x1a2   : > { %v4965_v17 = vadd.f32 %v2055_v22, %v1824_v41  ;;  %v1827_v53 = vadd.f32 %v4060_v43, %v4896_v29  ;;  %v4100_v38 = vpop.f32.mrf.mxu1 }
 0x1a3   : > { %v1756_v48 = vpop.f32.mrf.mxu0 }
 0x1a4   : > { %5166 = vst [vmem:[#allocation11_spill] sm:$0xff] %v4965_v17  ;;  %v4968_v47 = vadd.f32 %v4100_v38, %v1827_v53  ;;  %v1825_v58 = vadd.f32 %v1756_v48, %v4899_v33  ;;  %v2058_v30 = vpop.f32.mrf.mxu1 }
 0x1a5   : > { %v4063_v20 = vpop.f32.mrf.mxu0 }
 0x1a6   : > { %5167 = vst [vmem:[#allocation12_spill] sm:$0xff] %v4968_v47  ;;  %v4971_v21 = vadd.f32 %v2058_v30, %v1825_v58  ;;  %v1830_v50 = vadd.f32 %v4063_v20, %v4902_v44  ;;  %v4103_v32 = vpop.f32.mrf.mxu1 }
 0x1a7   : > { %v1769_v23 = vpop.f32.mrf.mxu0 }
 0x1a8   : > { %5168 = vst [vmem:[#allocation13_spill] sm:$0xff] %v4971_v21  ;;  %v4974_v12 = vadd.f32 %v4103_v32, %v1830_v50  ;;  %v1828_v28 = vadd.f32 %v1769_v23, %v4905_v9  ;;  %v2071_v42 = vpop.f32.mrf.mxu1 }
 0x1a9   : > { %v4064_v29 = vpop.f32.mrf.mxu0 }
 0x1aa   : > { %5169 = vst [vmem:[#allocation14_spill] sm:$0xff] %v4974_v12  ;;  %v4977_v59 = vadd.f32 %v2071_v42, %v1828_v28  ;;  %v1831_v31 = vadd.f32 %v4064_v29, %v4908_v63  ;;  %v4104_v46 = vpop.f32.mrf.mxu1 }
 0x1ab   : > { %v1772_v33 = vpop.f32.mrf.mxu0 }
 0x1ac   : > { %5170 = vst [vmem:[#allocation15_spill] sm:$0xff] %v4977_v59  ;;  %v4980_v4 = vadd.f32 %v4104_v46, %v1831_v31  ;;  %v1829_v34 = vadd.f32 %v1772_v33, %v4911_v51  ;;  %v2074_v6 = vpop.f32.mrf.mxu1 }
 0x1ad   : > { %v4123_v44 = vpop.f32.mrf.mxu0 }
 0x1ae   : > { %5171 = vst [vmem:[#allocation16_spill] sm:$0xff] %v4980_v4  ;;  %v4983_v16 = vadd.f32 %v2074_v6, %v1829_v34  ;;  %v4163_v2 = vpop.f32.mrf.mxu1 }
 0x1af   : > { %v2293_v52 = vpop.f32.mrf.mxu0 }
 0x1b0   : > { %5172 = vst [vmem:[#allocation17_spill] sm:$0xff] %v4983_v16  ;;  %v2595_v7 = vpop.f32.mrf.mxu1  ;;  %v2414_v16 = vadd.f32 %v4123_v44, %v4914_v36  ;;  %v2412_v4 = vadd.f32 %v2293_v52, %v4917_v1 }
 0x1b1   : > { %v4124_v9 = vpop.f32.mrf.mxu0 }
 0x1b2   : > { %v4164_v40 = vpop.f32.mrf.mxu1  ;;  %v2415_v12 = vadd.f32 %v4124_v9, %v4920_v13  ;;  %v2716_v52 = vadd.f32 %v4163_v2, %v2414_v16  ;;  %v2714_v13 = vadd.f32 %v2595_v7, %v2412_v4 }
 0x1b3   : > { %v2296_v35 = vpop.f32.mrf.mxu0 }
 0x1b4   : > { %v2598_v18 = vpop.f32.mrf.mxu1  ;;  %v2413_v21 = vadd.f32 %v2296_v35, %v4923_v19 }
 0x1b5   : > { %v4127_v15 = vpop.f32.mrf.mxu0 }
 0x1b6   : > { %v4167_v49 = vpop.f32.mrf.mxu1 }
 0x1b7   : > { %v2309_v63 = vpop.f32.mrf.mxu0 }
 0x1b8   : > { %v2611_v45 = vpop.f32.mrf.mxu1 }
 0x1b9   : > { %v4128_v57 = vpop.f32.mrf.mxu0 }
 0x1ba   : > { %v4168_v39 = vpop.f32.mrf.mxu1 }
 0x1bb   : > { %v2312_v11 = vpop.f32.mrf.mxu0 }
 0x1bc   : > { %v2614_v56 = vpop.f32.mrf.mxu1 }
 0x1bd   : > { %v4131_v51 = vpop.f32.mrf.mxu0 }
 0x1be   : > { %v4171_v0 = vpop.f32.mrf.mxu1  ;;  %v2422_v36 = vadd.f32 %v4131_v51, %v4938_v25 }
 0x1bf   : > { %v2325_v10 = vpop.f32.mrf.mxu0 }
 0x1c0   : > { %v2627_v37 = vpop.f32.mrf.mxu1  ;;  %v2420_v1 = vadd.f32 %v2325_v10, %v4941_v5  ;;  %v5179_v10 = vld [vmem:[#allocation13_spill] sm:$0xff] }
 0x1c1   : > { %v4132_v41 = vpop.f32.mrf.mxu0 }
 0x1c2   : > { %v4172_v22 = vpop.f32.mrf.mxu1  ;;  %v2423_v19 = vadd.f32 %v4132_v41, %v4944_v61  ;;  %v5042_v41 = vld [vmem:[#allocation8] ss:$0 sm:$0xff] }
 0x1c3   : > { %v2328_v43 = vpop.f32.mrf.mxu0 }
 0x1c4   : > { %v2630_v53 = vpop.f32.mrf.mxu1  ;;  %v5031_v2 = vadd.f32 %v4172_v22, %v2423_v19 }
 0x1c5   : > { %v4135_v38 = vpop.f32.mrf.mxu0 }
 0x1c6   : > { %v4175_v48 = vpop.f32.mrf.mxu1  ;;  %v2426_v9 = vadd.f32 %v4135_v38, %v4950_v27 }
 0x1c7   : > { %v2341_v58 = vpop.f32.mrf.mxu0 }
 0x1c8   : > { %v2643_v30 = vpop.f32.mrf.mxu1  ;;  %v2728_v7 = vadd.f32 %v4175_v48, %v2426_v9 }
 0x1c9   : > { %v4136_v20 = vpop.f32.mrf.mxu0 }
 0x1ca   : > { %v4176_v50 = vpop.f32.mrf.mxu1  ;;  %v2427_v4 = vadd.f32 %v4136_v20, %v4956_v8 }
 0x1cb   : > { %v2344_v32 = vpop.f32.mrf.mxu0 }
 0x1cc   : > { %v2646_v23 = vpop.f32.mrf.mxu1  ;;  %v2425_v61 = vadd.f32 %v2344_v32, %v4959_v14  ;;  %v2729_v51 = vadd.f32 %v4176_v50, %v2427_v4 }
 0x1cd   : > { %v4139_v28 = vpop.f32.mrf.mxu0 }
 0x1ce   : > { %v4985_v42 = vpop.f32.mrf.mxu1  ;;  %v2430_v8 = vadd.f32 %v4139_v28, %v4962_v54 }
 0x1cf   : > { %5173 = vst [vmem:[#allocation18_spill] sm:$0xff] %v4985_v42  ;;  %v2357_v29 = vpop.f32.mrf.mxu0  ;;  %v2418_v42 = vadd.f32 %v4127_v15, %v4926_v3  ;;  %v2717_v3 = vadd.f32 %v4164_v40, %v2415_v12  ;;  %v2421_v15 = vadd.f32 %v2328_v43, %v4947_v55  ;;  %v5025_v55 = vadd.f32 %v4171_v0, %v2422_v36  ;;  %v5177_v40 = vld [vmem:[#allocation11_spill] sm:$0xff]  ;;  %v5180_v43 = vld [vmem:[#allocation14_spill] sm:$0xff] }
 0x1d0   : > { %v4987_v31 = vpop.f32.mrf.mxu1  ;;  %v2428_v14 = vadd.f32 %v2357_v29, %v5177_v40  ;;  %v2727_v0 = vadd.f32 %v2646_v23, %v2425_v61 }
 0x1d1   : > { %5174 = vst [vmem:[#allocation19_spill] sm:$0xff] %v4987_v31  ;;  %v4140_v46 = vpop.f32.mrf.mxu0  ;;  %v2416_v31 = vadd.f32 %v2309_v63, %v4929_v26  ;;  %v2715_v26 = vadd.f32 %v2598_v18, %v2413_v21  ;;  %v5013_v25 = vadd.f32 %v4167_v49, %v2418_v42  ;;  %v5035_v49 = vld [vmem:[#allocation6] ss:$0 sm:$0xff]  ;;  %v5037_v63 = vadd.f32 %v2630_v53, %v2421_v15  ;;  %v5181_v53 = vld [vmem:[#allocation15_spill] sm:$0xff] }
 0x1d2   : > { %v4989_v33 = vpop.f32.mrf.mxu1 }
 0x1d3   : > { %5175 = vst [vmem:[#allocation20_spill] sm:$0xff] %v4989_v33  ;;  %v2360_v34 = vpop.f32.mrf.mxu0  ;;  %v2419_v33 = vadd.f32 %v4128_v57, %v4932_v24  ;;  %v2424_v24 = vadd.f32 %v2341_v58, %v4953_v60  ;;  %v5015_v5 = vadd.f32 %v2611_v45, %v2416_v31  ;;  %v5027_v60 = vadd.f32 %v2627_v37, %v2420_v1  ;;  %v5178_v57 = vld [vmem:[#allocation12_spill] sm:$0xff] }
 0x1d4   : > { %v4991_v6 = vpop.f32.mrf.mxu1  ;;  %v2429_v37 = vadd.f32 %v2360_v34, %v5179_v10 }
 0x1d5   : > { %5176 = vst [vmem:[#allocation21_spill] sm:$0xff] %v4991_v6  ;;  %v4143_v59 = vpop.f32.mrf.mxu0  ;;  %v2417_v6 = vadd.f32 %v2312_v11, %v4935_v62  ;;  %v5021_v27 = vadd.f32 %v4168_v39, %v2419_v33  ;;  %v2726_v45 = vadd.f32 %v2643_v30, %v2424_v24  ;;  %v2431_v39 = vadd.f32 %v4140_v46, %v5178_v57 }
 0x1d6   : > { %v4997_v47 = vpop.f32.mrf.mxu1  ;;  %v2434_v38 = vadd.f32 %v4143_v59, %v5180_v43  ;;  %v5182_v32 = vld [vmem:[#allocation18_spill] sm:$0xff] }
 0x1d7   : > { %v2373_v17 = vpop.f32.mrf.mxu0  ;;  %v5023_v21 = vadd.f32 %v2614_v56, %v2417_v6  ;;  %v2732_v28 = vadd.f32 %v5182_v32, %v2430_v8 }
 0x1d8   : > { %v2675_v44 = vpop.f32.mrf.mxu1  ;;  %v2432_v48 = vadd.f32 %v2373_v17, %v5181_v53  ;;  %v5183_v50 = vld [vmem:[#allocation19_spill] sm:$0xff]  ;;  %v5066_v15 = vadd.f32 %v4997_v47, %v2434_v38 }
 0x1d9   : > { %v5007_v35 = vpop.f32.mrf.mxu0  ;;  %v2730_v23 = vadd.f32 %v5183_v50, %v2428_v14 }
 0x1da   : > { %v5011_v62 = vpop.f32.mrf.mxu1  ;;  %v5184_v46 = vld [vmem:[#allocation20_spill] sm:$0xff]  ;;  %v5068_v24 = vadd.f32 %v2675_v44, %v2432_v48 }
 0x1db   : > { %v5019_v16 = vpop.f32.mrf.mxu0  ;;  %v5051_v33 = vadd.f32 %v5184_v46, %v2431_v39 }
 0x1dc   : > { %v5029_v12 = vpop.f32.mrf.mxu1  ;;  %v5185_v36 = vld [vmem:[#allocation21_spill] sm:$0xff] }
 0x1dd   : > { %v4203_v18 = vpop.f32.mrf.mxu0  ;;  %v5061_v1 = vadd.f32 %v5185_v36, %v2429_v37 }
 0x1de   : > { %v3018_v11 = vadd.f32 %v4203_v18, %v2716_v52  ;;  %v4215_v56 = vpop.f32.mrf.mxu1 }
 0x1df   : > { %v3030_v54 = vadd.f32 %v4215_v56, %v2728_v7  ;;  %v2897_v22 = vpop.f32.mrf.mxu0 }
 0x1e0   : > { %v3097_v58 = vmul.f32 %v5035_v49, %v3018_v11  ;;  %v3016_v30 = vadd.f32 %v2897_v22, %v2714_v13  ;;  %v2945_v20 = vpop.f32.mrf.mxu1 }
 0x1e1   : > { %v3109_v42 = vmul.f32 %v5035_v49, %v3030_v54  ;;  %v3028_v29 = vadd.f32 %v2945_v20, %v2726_v45  ;;  %v4204_v31 = vpop.f32.mrf.mxu0 }
 0x1e2   : > { %v3128_v34 = vadd.f32 %v5042_v41, %v3097_v58  ;;  %v3095_v59 = vmul.f32 %v5035_v49, %v3016_v30  ;;  %v3019_v17 = vadd.f32 %v4204_v31, %v2717_v3  ;;  %v4216_v6 = vpop.f32.mrf.mxu1 }
 0x1e3   : > { %v3140_v52 = vadd.f32 %v5042_v41, %v3109_v42  ;;  %v3107_v13 = vmul.f32 %v5035_v49, %v3028_v29  ;;  %v3031_v19 = vadd.f32 %v4216_v6, %v2729_v51  ;;  %v2900_v9 = vpop.f32.mrf.mxu0 }
 0x1e4   : > { %v3098_v4 = vmul.f32 %v5035_v49, %v3019_v17  ;;  %v3017_v61 = vadd.f32 %v2900_v9, %v2715_v26  ;;  %v2948_v3 = vpop.f32.mrf.mxu1  ;;  %v3152_v7 = vmax.f32 %v3128_v34, 0.0  ;;  %v3126_v8 = vadd.f32 %v5042_v41, %v3095_v59  ;;  %v5186_v34 = vld [vmem:[#allocation16_spill] sm:$0xff]  ;;  %v5187_v17 = vld [vmem:[#allocation17_spill] sm:$0xff] }
 0x1e5   : > { %v3110_v40 = vmul.f32 %v5035_v49, %v3031_v19  ;;  %v3029_v14 = vadd.f32 %v2948_v3, %v2727_v0  ;;  %v4207_v18 = vpop.f32.mrf.mxu0  ;;  %v3164_v45 = vmax.f32 %v3140_v52, 0.0  ;;  %v3138_v11 = vadd.f32 %v5042_v41, %v3107_v13 }
 0x1e6   : > { %v3129_v57 = vadd.f32 %v5042_v41, %v3098_v4  ;;  %v3096_v47 = vmul.f32 %v5035_v49, %v3017_v61  ;;  %v3022_v44 = vadd.f32 %v4207_v18, %v5013_v25  ;;  %v4219_v39 = vpop.f32.mrf.mxu1  ;;  %v3150_v30 = vmax.f32 %v3126_v8, 0.0 }
 0x1e7   : > { %v3141_v26 = vadd.f32 %v5042_v41, %v3110_v40  ;;  %v3108_v56 = vmul.f32 %v5035_v49, %v3029_v14  ;;  %v3034_v51 = vadd.f32 %v4219_v39, %v2732_v28  ;;  %v2913_v10 = vpop.f32.mrf.mxu0  ;;  %v3162_v50 = vmax.f32 %v3138_v11, 0.0 }
 0x1e8   : > { %v3153_v37 = vmax.f32 %v3129_v57, 0.0  ;;  %v3127_v0 = vadd.f32 %v5042_v41, %v3096_v47  ;;  %v3101_v54 = vmul.f32 %v5035_v49, %v3022_v44  ;;  %v3020_v22 = vadd.f32 %v2913_v10, %v5015_v5  ;;  %v2961_v43 = vpop.f32.mrf.mxu1 }
 0x1e9   : > { %v3165_v25 = vmax.f32 %v3141_v26, 0.0  ;;  %v3139_v38 = vadd.f32 %v5042_v41, %v3108_v56  ;;  %v3113_v53 = vmul.f32 %v5035_v49, %v3034_v51  ;;  %v3032_v48 = vadd.f32 %v2961_v43, %v2730_v23  ;;  %v4208_v58 = vpop.f32.mrf.mxu0 }
 0x1ea   : > { %v3609_v20 = vpack.c.bf16 %v3153_v37, %v3152_v7  ;;  %v3151_v32 = vmax.f32 %v3127_v0, 0.0  ;;  %v3099_v5 = vmul.f32 %v5035_v49, %v3020_v22  ;;  %v4220_v28 = vpop.f32.mrf.mxu1  ;;  %v2435_v59 = vadd.f32 %v5007_v35, %v5186_v34 }
 0x1eb   : > { %v3639_v42 = vpack.c.bf16 %v3165_v25, %v3164_v45  ;;  %v3163_v29 = vmax.f32 %v3139_v38, 0.0  ;;  %v3111_v31 = vmul.f32 %v5035_v49, %v3032_v48  ;;  %v2916_v46 = vpop.f32.mrf.mxu0  ;;  %v2433_v23 = vadd.f32 %v5019_v16, %v5187_v17 }
 0x1ec   : > { %3674 = vst [vmem:[%s5086_s7 + $0x8] sm:$0xff] %v3609_v20   ;;  %v3604_v6 = vpack.c.bf16 %v3151_v32, %v3150_v30  ;;  %v3023_v36 = vadd.f32 %v4208_v58, %v5021_v27  ;;  %v2964_v52 = vpop.f32.mrf.mxu1  ;;  %v3132_v19 = vadd.f32 %v5042_v41, %v3101_v54  ;;  %v3144_v9 = vadd.f32 %v5042_v41, %v3113_v53 }
 0x1ed   : > { %3680 = vst [vmem:[%s5086_s7 + $0x38] sm:$0xff] %v3639_v42   ;;  %v3634_v13 = vpack.c.bf16 %v3163_v29, %v3162_v50  ;;  %v3035_v4 = vadd.f32 %v4220_v28, %v5051_v33  ;;  %v4211_v61 = vpop.f32.mrf.mxu0  ;;  %v3130_v35 = vadd.f32 %v5042_v41, %v3099_v5  ;;  %v3021_v3 = vadd.f32 %v2916_v46, %v5023_v21 }
 0x1ee   : > { %3605 = vst [vmem:[%s5086_s7] sm:$0xff] %v3604_v6   ;;  %v3102_v16 = vmul.f32 %v5035_v49, %v3023_v36  ;;  %v3033_v7 = vadd.f32 %v2964_v52, %v5061_v1  ;;  %v4223_v27 = vpop.f32.mrf.mxu1  ;;  %v3142_v8 = vadd.f32 %v5042_v41, %v3111_v31  ;;  %v3026_v14 = vadd.f32 %v4211_v61, %v5025_v55 }
 0x1ef   : > { %3679 = vst [vmem:[%s5086_s7 + $0x30] sm:$0xff] %v3634_v13   ;;  %v3114_v40 = vmul.f32 %v5035_v49, %v3035_v4  ;;  %v3038_v33 = vadd.f32 %v4223_v27, %v5066_v15  ;;  %v2929_v18 = vpop.f32.mrf.mxu0  ;;  %v3100_v57 = vmul.f32 %v5035_v49, %v3021_v3  ;;  %v3156_v44 = vmax.f32 %v3132_v19, 0.0 }
 0x1f0   : > { %v3133_v45 = vadd.f32 %v5042_v41, %v3102_v16  ;;  %v3112_v47 = vmul.f32 %v5035_v49, %v3033_v7  ;;  %v3024_v21 = vadd.f32 %v2929_v18, %v5027_v60  ;;  %v2977_v1 = vpop.f32.mrf.mxu1  ;;  %v3168_v39 = vmax.f32 %v3144_v9, 0.0 }
 0x1f1   : > { %v3145_v11 = vadd.f32 %v5042_v41, %v3114_v40  ;;  %v3036_v26 = vadd.f32 %v2977_v1, %v5068_v24  ;;  %v4212_v56 = vpop.f32.mrf.mxu0  ;;  %v3154_v55 = vmax.f32 %v3130_v35, 0.0  ;;  %v3131_v15 = vadd.f32 %v5042_v41, %v3100_v57 }
 0x1f2   : > { %v3157_v51 = vmax.f32 %v3133_v45, 0.0  ;;  %v3143_v10 = vadd.f32 %v5042_v41, %v3112_v47  ;;  %v4224_v37 = vpop.f32.mrf.mxu1  ;;  %v3166_v0 = vmax.f32 %v3142_v8, 0.0  ;;  %v3105_v60 = vmul.f32 %v5035_v49, %v3026_v14 }
 0x1f3   : > { %v3169_v54 = vmax.f32 %v3145_v11, 0.0  ;;  %v3117_v22 = vmul.f32 %v5035_v49, %v3038_v33  ;;  %v3155_v25 = vmax.f32 %v3131_v15, 0.0  ;;  %v3103_v24 = vmul.f32 %v5035_v49, %v3024_v21  ;;  %v2932_v53 = vpop.f32.mrf.mxu0 }
 0x1f4   : > { %v3619_v43 = vpack.c.bf16 %v3157_v51, %v3156_v44  ;;  %v3167_v38 = vmax.f32 %v3143_v10, 0.0  ;;  %v2980_v48 = vpop.f32.mrf.mxu1  ;;  %v2737_v58 = vadd.f32 %v5011_v62, %v2435_v59  ;;  %v2735_v30 = vadd.f32 %v5029_v12, %v2433_v23 }
 0x1f5   : > { %v3649_v20 = vpack.c.bf16 %v3169_v54, %v3168_v39  ;;  %v3115_v32 = vmul.f32 %v5035_v49, %v3036_v26  ;;  %v3614_v5 = vpack.c.bf16 %v3155_v25, %v3154_v55  ;;  %v3027_v50 = vadd.f32 %v4212_v56, %v5031_v2 }
 0x1f6   : > { %3676 = vst [vmem:[%s5086_s7 + $0x18] sm:$0xff] %v3619_v43   ;;  %v3644_v28 = vpack.c.bf16 %v3167_v38, %v3166_v0  ;;  %v3039_v42 = vadd.f32 %v4224_v37, %v2737_v58  ;;  %v3025_v29 = vadd.f32 %v2932_v53, %v5037_v63  ;;  %v3037_v31 = vadd.f32 %v2980_v48, %v2735_v30 }
 0x1f7   : > { %3682 = vst [vmem:[%s5086_s7 + $0x48] sm:$0xff] %v3649_v20   ;;  %3675 = vst [vmem:[%s5086_s7 + $0x10] sm:$0xff] %v3614_v5   ;;  %v3136_v46 = vadd.f32 %v5042_v41, %v3105_v60  ;;  %v3148_v62 = vadd.f32 %v5042_v41, %v3117_v22  ;;  %v3134_v12 = vadd.f32 %v5042_v41, %v3103_v24 }
 0x1f8   : > { %3681 = vst [vmem:[%s5086_s7 + $0x40] sm:$0xff] %v3644_v28   ;;  %v3106_v34 = vmul.f32 %v5035_v49, %v3027_v50  ;;  %v3146_v59 = vadd.f32 %v5042_v41, %v3115_v32  ;;  %v3118_v17 = vmul.f32 %v5035_v49, %v3039_v42  ;;  %v3104_v2 = vmul.f32 %v5035_v49, %v3025_v29 }
 0x1f9   : > { %v3116_v23 = vmul.f32 %v5035_v49, %v3037_v31  ;;  %v3160_v13 = vmax.f32 %v3136_v46, 0.0  ;;  %v3172_v19 = vmax.f32 %v3148_v62, 0.0  ;;  %v3158_v9 = vmax.f32 %v3134_v12, 0.0 }
 0x1fa   : > { %v3137_v63 = vadd.f32 %v5042_v41, %v3106_v34  ;;  %v3149_v6 = vadd.f32 %v5042_v41, %v3118_v17  ;;  %v3135_v36 = vadd.f32 %v5042_v41, %v3104_v2  ;;  %v3170_v61 = vmax.f32 %v3146_v59, 0.0 }
 0x1fb   : > { %v3147_v52 = vadd.f32 %v5042_v41, %v3116_v23 }
 0x1fc   : > { %v3161_v4 = vmax.f32 %v3137_v63, 0.0  ;;  %v3173_v35 = vmax.f32 %v3149_v6, 0.0  ;;  %v3159_v16 = vmax.f32 %v3135_v36, 0.0 }
 0x1fd   : > { %v3171_v49 = vmax.f32 %v3147_v52, 0.0 }
 0x1fe   : > { %v3629_v3 = vpack.c.bf16 %v3161_v4, %v3160_v13  ;;  %v3659_v7 = vpack.c.bf16 %v3173_v35, %v3172_v19  ;;  %v3624_v27 = vpack.c.bf16 %v3159_v16, %v3158_v9 }
 0x1ff   : > { %v3654_v8 = vpack.c.bf16 %v3171_v49, %v3170_v61 }
 0x200   : > { %3678 = vst [vmem:[%s5086_s7 + $0x28] sm:$0xff] %v3629_v3   ;;  %3684 = vst [vmem:[%s5086_s7 + $0x58] sm:$0xff] %v3659_v7  }
 0x201   : > { %3677 = vst [vmem:[%s5086_s7 + $0x20] sm:$0xff] %v3624_v27   ;;  %3683 = vst [vmem:[%s5086_s7 + $0x50] sm:$0xff] %v3654_v8  }
 0x202 PF: > { %s17_s18 = sadd.s32 1, %s4460_s18  }
 0x203   : > { %p14_p10 = scmp.ge.s32.totalorder %s17_s18, 4  }
 0x205   :  { %16 = sbr.rel (!%p14_p10) target bundleno = 2 (0x2), region = 94 }
 0x20a   :  { %3316 = vsyncpa [#allocation5], 1 }
 0x20b   :  { %3318 = vsyncpa [#allocation5 + $0x1], 1 }
 0x20c   :  { %3319 = vsyncpa [#allocation7], 1 }

// kernel: retrain_net_forward.17
= control target key start
LH: loop header
LB: loop body
LE: loop exit
PB: predicated region body
PF: predicated region fallthrough
CT: control target
= control target key end

     0   :  { %s820_s15 = smov 0   ;;  %s822_s16 = smov 0   ;;  %s911_s0 = inlined_call_operand.vmem [shape: bf16[32,256], index: 0, kind: input, shape index: {}]   ;;  %s912_s1 = inlined_call_operand.vmem [shape: bf16[256,128], index: 1, kind: input, shape index: {}]   ;;  %s913_s2 = inlined_call_operand.vmem [shape: f32[1,128], index: 2, kind: input, shape index: {}]   ;;  %s914_s3 = inlined_call_operand.vmem [shape: f32[1,128], index: 3, kind: input, shape index: {}]   ;;  %s915_s4 = inlined_call_operand.vmem [shape: bf16[32,128], index: 4, kind: output, shape index: {}]  }
   0x1   :  { %s824_s17 = smov 0  }
   0x2 LB: > { %s33_s18 = sadd.s32 1, %s789_s16  ;;  %p668_p0 = scmp.ge.s32.totalorder %s793_s17, 1  ;;  %s793_s17 = sphi %s824_s17, %s14_s17   ;;  %s789_s16 = sphi %s822_s16, %s917_s16   ;;  %s785_s15 = sphi %s820_s15, %s916_s15  }
   0x3   : > { %p35_p1 = scmp.ge.s32.totalorder %s33_s18, 2  ;;  %p224_p2 = scmp.lt.s32.totalorder %s793_s17, 3 }
   0x5   : > { %s919_s18 = smov (%p35_p1, %s33_s18), 0  ;;  %p225_p3 = pnand %p668_p0, %p224_p2 }
   0x6   : > { %s669_s21 = sshll.u32 (!%p225_p3), %s785_s15, 1 }
   0x7   : > { %228 = sbr.rel (%p225_p3) target bundleno = 253 (0xfd), region = 36  ;;  %p274_p4 = scmp.lt.s32.totalorder (!%p225_p3), %s669_s21, 3 }
   0xc   : > { %v752_v0 = vld [vmem:[%s912_s1 + $0x78] sm:$0xff]   ;;  %v754_v2 = vld [vmem:[%s912_s1 + $0x70] sm:$0xff]   ;;  %v756_v4 = vld [vmem:[%s912_s1 + $0x68] sm:$0xff]   ;;  %s921_s21 = smov (!%p274_p4, %s669_s21), 3 }
   0xd   : > { %v753_v1 = vld [vmem:[%s912_s1 + $0x38] sm:$0xff]   ;;  %706 = vmatprep.subr.bf16.mxu0 %v752_v0  ;;  %v755_v3 = vld [vmem:[%s912_s1 + $0x30] sm:$0xff]   ;;  %v757_v5 = vld [vmem:[%s912_s1 + $0x28] sm:$0xff]   ;;  %s698_s10 = sshll.u32 %s921_s21, 3  ;;  %s673_s12 = sshll.u32 %s921_s21, 2 }
   0xe   : > { %707 = vmatpush3.bf16.msra.mxu0 %v753_v1  ;;  %v758_v6 = vld [vmem:[%s912_s1 + $0x60] sm:$0xff]   ;;  %v760_v8 = vld [vmem:[%s912_s1 + $0x58] sm:$0xff]   ;;  %s281_s15 = scalar_lea.vmem %s911_s0, %s698_s10  ;;  %v762_v10 = vld [vmem:[%s912_s1 + $0x50] sm:$0xff]  }
   0xf   : > { %708 = vmatprep.subr.bf16.mxu0 %v754_v2  ;;  %v759_v7 = vld [vmem:[%s912_s1 + $0x20] sm:$0xff]   ;;  %v761_v9 = vld [vmem:[%s912_s1 + $0x18] sm:$0xff]   ;;  %v763_v12 = vld [vmem:[%s912_s1 + $0x10] sm:$0xff]  }
  0x10   : > { %v770_v11 = vld [vmem:[%s281_s15 + $0x4] ss:$8 sps:$4 sm:$0xff]   ;;  %v768_v17 = vld [vmem:[%s281_s15] ss:$8 sps:$4 sm:$0xff]   ;;  %s306_s15 = scalar_lea.vmem %s915_s4, %s673_s12 }
  0x11   : > { %489 = vmatprep.mubr.bf16.mxu0 %v770_v11  ;;  %v764_v13 = vld [vmem:[%s912_s1 + $0x48] sm:$0xff]   ;;  %v766_v15 = vld [vmem:[%s912_s1 + $0x40] sm:$0xff]  }
  0x12   : > { %709 = vmatpush3.bf16.msra.mxu0 %v755_v3  ;;  %v765_v14 = vld [vmem:[%s912_s1 + $0x8] sm:$0xff]   ;;  %v767_v16 = vld [vmem:[%s912_s1] sm:$0xff]  }
  0x13   : > { %710 = vmatprep.subr.bf16.mxu0 %v756_v4  ;;  %v692_v21 = vld [vmem:[%s913_s2] ss:$0 sm:$0xff] }
  0x14   : > { %v693_v26 = vld [vmem:[%s914_s3] ss:$0 sm:$0xff] }
  0x16   : > { %711 = vmatpush3.bf16.msra.mxu0 %v757_v5 }
  0x17   : > { %712 = vmatprep.subr.bf16.mxu0 %v758_v6 }
  0x1a   : > { %713 = vmatpush3.bf16.msra.mxu0 %v759_v7 }
  0x1b   : > { %714 = vmatprep.subr.bf16.mxu0 %v760_v8 }
  0x1e   : > { %715 = vmatpush3.bf16.msra.mxu0 %v761_v9 }
  0x1f   : > { %716 = vmatprep.subr.bf16.mxu0 %v762_v10 }
  0x22   : > { %717 = vmatpush3.bf16.msra.mxu0 %v763_v12 }
  0x23   : > { %718 = vmatprep.subr.bf16.mxu0 %v764_v13 }
  0x26   : > { %719 = vmatpush3.bf16.msra.mxu0 %v765_v14 }
  0x27   : > { %720 = vmatprep.subr.bf16.mxu0 %v766_v15 }
  0x2a   : > { %721 = vmatpush3.bf16.msra.mxu0 %v767_v16 }
  0x2d   : > { %490 = vmatmul.mubr.bf16.vlgmr.msra.gmra.mxu0 %v768_v17 }
  0xed   : > { %v722_v18 = vpop.f32.mrf.mxu0 }
  0xef   : > { %v723_v19 = vpop.f32.mrf.mxu0 }
  0xf0   : > { %v724_v20 = vadd.f32 %v723_v19, %v722_v18 }
  0xf1   : > { %v725_v22 = vpop.f32.mrf.mxu0 }
  0xf2   : > { %v514_v24 = vmul.f32 %v724_v20, %v692_v21 }
  0xf3   : > { %v726_v23 = vpop.f32.mrf.mxu0 }
  0xf4   : > { %v727_v25 = vadd.f32 %v726_v23, %v725_v22  ;;  %v523_v28 = vadd.f32 %v693_v26, %v514_v24 }
  0xf6   : > { %v515_v27 = vmul.f32 %v727_v25, %v692_v21 }
  0xf8   : > { %v524_v29 = vadd.f32 %v693_v26, %v515_v27 }
  0xfa   : > { %v704_v30 = vpack.c.bf16 %v524_v29, %v523_v28 }
  0xfc   : > { %705 = vst [vmem:[%s306_s15] sm:$0xff] %v704_v30  }
  0xfd PF: > { %s14_s17 = sadd.s32 1, %s793_s17   ;;  %s916_s15 = smov %s789_s16 }
  0xfe   : > { %p11_p5 = scmp.ge.s32.totalorder %s14_s17, 4   ;;  %s917_s16 = smov %s919_s18 }
 0x100   :  { %13 = sbr.rel (!%p11_p5) target bundleno = 2 (0x2), region = 83 }

// kernel: retrain_net_forward.15
= control target key start
LH: loop header
LB: loop body
LE: loop exit
PB: predicated region body
PF: predicated region fallthrough
CT: control target
= control target key end

     0   :  { %s3169_s18 = smov 0   ;;  %s4039_s0 = inlined_call_operand.vmem [shape: bf16[192,128], index: 0, kind: input, shape index: {}, may-alias: {0,1}]   ;;  %s4040_s1 = inlined_call_operand.vmem [shape: bf16[192,128], index: 1, kind: input, shape index: {}, may-alias: {0,1}]   ;;  %s4041_s2 = inlined_call_operand.vmem [shape: bf16[9,128,256], index: 2, kind: input, shape index: {}]   ;;  %s4042_s3 = inlined_call_operand.vmem [shape: f32[1,256], index: 3, kind: input, shape index: {}]   ;;  %s4043_s4 = inlined_call_operand.vmem [shape: f32[1,256], index: 4, kind: input, shape index: {}]   ;;  %s4044_s5 = inlined_call_operand.vmem [shape: bf16[128,256], index: 5, kind: output, shape index: {}]  }
   0x1 LB: > { %s2538_s19 = sadd.s32 4294967295, %s3136_s18   ;;  %p2544_p0 = scmp.ge.s32.totalorder %s3136_s18, 1  ;;  %s3136_s18 = sphi %s3169_s18, %s15_s18  }
   0x2   : > { %p207_p1 = scmp.lt.s32.totalorder %s3136_s18, 3 }
   0x4   : > { %p208_p2 = pnand %p2544_p0, %p207_p1 }
   0x6   : > { %211 = sbr.rel (%p208_p2) target bundleno = 389 (0x185), region = 40 }
   0xb   : > { %v2906_v0 = vld [vmem:[%s4041_s2 + $0x74] ss:$8 sps:$4 sm:$0xff]   ;;  %v3138_v2 = vmov 0   ;;  %v2910_v3 = vld [vmem:[%s4041_s2 + $0x70] ss:$8 sps:$4 sm:$0xff]   ;;  %s3194_s30 = sshll.u32 %s2538_s19, 3 }
   0xc   : > { %v2908_v1 = vld [vmem:[%s4041_s2 + $0xf4] ss:$8 sps:$4 sm:$0xff]   ;;  %443 = vmatprep.mubr.bf16.mxu0 %v3138_v2  ;;  %641 = vmatprep.mubr.bf16.mxu1 %v3138_v2  ;;  %v2911_v4 = vld [vmem:[%s4041_s2 + $0xf0] ss:$8 sps:$4 sm:$0xff]   ;;  %v2912_v5 = vld [vmem:[%s4041_s2 + $0x64] ss:$8 sps:$4 sm:$0xff]  }
   0xd   : > { %411 = vmatprep.subr.bf16.mxu0 %v2906_v0  ;;  %609 = vmatprep.subr.bf16.mxu1 %v2908_v1  ;;  %v2914_v6 = vld [vmem:[%s4041_s2 + $0xe4] ss:$8 sps:$4 sm:$0xff]   ;;  %v2916_v7 = vld [vmem:[%s4041_s2 + $0x60] ss:$8 sps:$4 sm:$0xff]   ;;  %v2918_v9 = vld [vmem:[%s4041_s2 + $0x54] ss:$8 sps:$4 sm:$0xff]  }
   0xe   : > { %412 = vmatpush1.bf16.msra.mxu0 %v2910_v3  ;;  %610 = vmatpush1.bf16.msra.mxu1 %v2911_v4  ;;  %v2917_v8 = vld [vmem:[%s4041_s2 + $0xe0] ss:$8 sps:$4 sm:$0xff]   ;;  %p244_p3 = scmp.lt.s32.totalorder %s3194_s30, 23  ;;  %v2920_v10 = vld [vmem:[%s4041_s2 + $0xd4] ss:$8 sps:$4 sm:$0xff]   ;;  %s2876_s13 = sadd.s32 8, %s3194_s30 }
   0xf   : > { %413 = vmatprep.subr.bf16.mxu0 %v2912_v5  ;;  %611 = vmatprep.subr.bf16.mxu1 %v2914_v6  ;;  %v2922_v11 = vld [vmem:[%s4041_s2 + $0x50] ss:$8 sps:$4 sm:$0xff]   ;;  %v2924_v13 = vld [vmem:[%s4041_s2 + $0x44] ss:$8 sps:$4 sm:$0xff]   ;;  %v2928_v15 = vld [vmem:[%s4041_s2 + $0x40] ss:$8 sps:$4 sm:$0xff]  }
  0x10   : > { %v2923_v12 = vld [vmem:[%s4041_s2 + $0xd0] ss:$8 sps:$4 sm:$0xff]   ;;  %v2926_v14 = vld [vmem:[%s4041_s2 + $0xc4] ss:$8 sps:$4 sm:$0xff]   ;;  %s245_s27 = scalar_select %p244_p3, %s3194_s30, 23 }
  0x11   : > { %v2929_v16 = vld [vmem:[%s4041_s2 + $0xc0] ss:$8 sps:$4 sm:$0xff]   ;;  %v2930_v17 = vld [vmem:[%s4041_s2 + $0x34] ss:$8 sps:$4 sm:$0xff]   ;;  %v2934_v19 = vld [vmem:[%s4041_s2 + $0x30] ss:$8 sps:$4 sm:$0xff]  }
  0x12   : > { %414 = vmatpush1.bf16.msra.mxu0 %v2916_v7  ;;  %612 = vmatpush1.bf16.msra.mxu1 %v2917_v8  ;;  %v2932_v18 = vld [vmem:[%s4041_s2 + $0xb4] ss:$8 sps:$4 sm:$0xff]   ;;  %v2935_v20 = vld [vmem:[%s4041_s2 + $0xb0] ss:$8 sps:$4 sm:$0xff]   ;;  %s2546_s14 = sshll.u32 %s245_s27, 2  ;;  %p3287_p4 = scmp.lt.s32.totalorder %s2876_s13, 23 }
  0x13   : > { %415 = vmatprep.subr.bf16.mxu0 %v2918_v9  ;;  %613 = vmatprep.subr.bf16.mxu1 %v2920_v10  ;;  %v2936_v21 = vld [vmem:[%s4041_s2 + $0x24] ss:$8 sps:$4 sm:$0xff]   ;;  %s3252_s22 = scalar_lea.vmem %s4039_s0, %s2546_s14  ;;  %v2940_v23 = vld [vmem:[%s4041_s2 + $0x20] ss:$8 sps:$4 sm:$0xff]   ;;  %v2942_v25 = vld [vmem:[%s4041_s2 + $0x14] ss:$8 sps:$4 sm:$0xff]  }
  0x14   : > { %v2938_v22 = vld [vmem:[%s4041_s2 + $0xa4] ss:$8 sps:$4 sm:$0xff]   ;;  %v2941_v24 = vld [vmem:[%s4041_s2 + $0xa0] ss:$8 sps:$4 sm:$0xff]   ;;  %v2944_v26 = vld [vmem:[%s4041_s2 + $0x94] ss:$8 sps:$4 sm:$0xff]  }
  0x15   : > { %v2852_v27 = vld [vmem:[%s3252_s22] sm:$0xff]   ;;  %v2877_v30 = vld [vmem:[%s3252_s22 + $0x8] sm:$0xff]   ;;  %v2946_v31 = vld [vmem:[%s4041_s2 + $0x10] ss:$8 sps:$4 sm:$0xff]   ;;  %s4085_s13 = smov (!%p3287_p4, %s2876_s13), 23  ;;  %p260_p5 = scmp.lt.s32.totalorder %s3194_s30, 15 }
  0x16   : > { %416 = vmatpush1.bf16.msra.mxu0 %v2922_v11  ;;  %614 = vmatpush1.bf16.msra.mxu1 %v2923_v12  ;;  %v2853_v28 = vunpack.c.l.bf16 %v2852_v27  ;;  %v2854_v29 = vunpack.c.h.bf16 %v2852_v27  ;;  %v2857_v32 = vunpack.c.l.bf16 %v2877_v30  ;;  %v2858_v33 = vunpack.c.h.bf16 %v2877_v30  ;;  %v2947_v34 = vld [vmem:[%s4041_s2 + $0x90] ss:$8 sps:$4 sm:$0xff]   ;;  %v2948_v35 = vld [vmem:[%s4041_s2 + $0x4] ss:$8 sps:$4 sm:$0xff]   ;;  %v2952_v37 = vld [vmem:[%s4041_s2] ss:$8 sps:$4 sm:$0xff]  }
  0x17   : > { %417 = vmatprep.subr.bf16.mxu0 %v2924_v13  ;;  %615 = vmatprep.subr.bf16.mxu1 %v2926_v14  ;;  %v2950_v36 = vld [vmem:[%s4041_s2 + $0x84] ss:$8 sps:$4 sm:$0xff]   ;;  %v2953_v38 = vld [vmem:[%s4041_s2 + $0x80] ss:$8 sps:$4 sm:$0xff]   ;;  %v2878_v39 = vld [vmem:[%s3252_s22 + $0x10] sm:$0xff]   ;;  %s2549_s14 = sshll.u32 %s4085_s13, 2 }
  0x18   : > { %283 = vst [vmem:[#allocation2] sm:$0xff] %v2853_v28  ;;  %284 = vst [vmem:[#allocation2 + $0x8] sm:$0xff] %v2854_v29  ;;  %v2957_v40 = vld [vmem:[%s4041_s2 + $0x174] ss:$8 sps:$4 sm:$0xff]   ;;  %v2861_v42 = vunpack.c.l.bf16 %v2878_v39  ;;  %v2862_v43 = vunpack.c.h.bf16 %v2878_v39  ;;  %v2954_v44 = vld [vmem:[%s3252_s22] sm:$0xff]  ;;  %s3347_s24 = scalar_lea.vmem %s4040_s1, %s2549_s14  ;;  %s4087_s30 = smov (!%p260_p5, %s3194_s30), 15 }
  0x19   : > { %285 = vst [vmem:[#allocation2 + $0x10] sm:$0xff] %v2857_v32  ;;  %286 = vst [vmem:[#allocation2 + $0x18] sm:$0xff] %v2858_v33  ;;  %v2960_v41 = vld [vmem:[%s4041_s2 + $0x1f4] ss:$8 sps:$4 sm:$0xff]   ;;  %v2955_v45 = vld [vmem:[%s4041_s2 + $0x170] ss:$8 sps:$4 sm:$0xff]  }
  0x1a   : > { %418 = vmatpush1.bf16.msra.mxu0 %v2928_v15  ;;  %616 = vmatpush1.bf16.msra.mxu1 %v2929_v16  ;;  %287 = vst [vmem:[#allocation2 + $0x20] sm:$0xff] %v2861_v42  ;;  %288 = vst [vmem:[#allocation2 + $0x28] sm:$0xff] %v2862_v43  ;;  %v2958_v48 = vld [vmem:[%s4041_s2 + $0x1f0] ss:$8 sps:$4 sm:$0xff]   ;;  %v2963_v49 = vld [vmem:[%s4041_s2 + $0x164] ss:$8 sps:$4 sm:$0xff]  }
  0x1b   : > { %419 = vmatprep.subr.bf16.mxu0 %v2930_v17  ;;  %617 = vmatprep.subr.bf16.mxu1 %v2932_v18  ;;  %v2966_v51 = vld [vmem:[%s4041_s2 + $0x1e4] ss:$8 sps:$4 sm:$0xff]   ;;  %v2961_v52 = vld [vmem:[%s4041_s2 + $0x160] ss:$8 sps:$4 sm:$0xff]   ;;  %v3322_v53 = vld [vmem:[%s3252_s22 + $0x18] sm:$0xff]   ;;  %s2842_s14 = sshll.u32 %s4087_s30, 3 }
  0x1c   : > { %v2964_v54 = vld [vmem:[%s4041_s2 + $0x1e0] ss:$8 sps:$4 sm:$0xff]   ;;  %v2865_v56 = vunpack.c.l.bf16 %v3322_v53  ;;  %v2866_v57 = vunpack.c.h.bf16 %v3322_v53  ;;  %v2970_v58 = vld [vmem:[%s4041_s2 + $0x154] ss:$8 sps:$4 sm:$0xff]   ;;  %v2968_v63 = vld [vmem:[%s4041_s2 + $0x150] ss:$8 sps:$4 sm:$0xff]   ;;  %s3999_s16 = scalar_lea.vmem %s4044_s5, %s2842_s14 }
  0x1d   : > { %v2973_v59 = vld [vmem:[%s4041_s2 + $0x1d4] ss:$8 sps:$4 sm:$0xff]   ;;  %v3350_v61 = vld [vmem:[%s3252_s22 + $0x8] sm:$0xff]  ;;  %v2971_v0 = vld [vmem:[%s4041_s2 + $0x1d0] ss:$8 sps:$4 sm:$0xff]  }
  0x1e   : > { %420 = vmatpush1.bf16.msra.mxu0 %v2934_v19  ;;  %618 = vmatpush1.bf16.msra.mxu1 %v2935_v20  ;;  %289 = vst [vmem:[#allocation2 + $0x30] sm:$0xff] %v2865_v56  ;;  %290 = vst [vmem:[#allocation2 + $0x38] sm:$0xff] %v2866_v57  ;;  %v2976_v1 = vld [vmem:[%s4041_s2 + $0x144] ss:$8 sps:$4 sm:$0xff]   ;;  %v2974_v5 = vld [vmem:[%s4041_s2 + $0x140] ss:$8 sps:$4 sm:$0xff]  }
  0x1f   : > { %421 = vmatprep.subr.bf16.mxu0 %v2936_v21  ;;  %619 = vmatprep.subr.bf16.mxu1 %v2938_v22  ;;  %v500_v46 = vld [vmem:[#allocation2 + $0x1] sm:$0xff]  ;;  %v2983_v10 = vld [vmem:[%s4041_s2 + $0x134] ss:$8 sps:$4 sm:$0xff]   ;;  %v2981_v15 = vld [vmem:[%s4041_s2 + $0x130] ss:$8 sps:$4 sm:$0xff]  }
  0x20   : > { %v3306_v47 = vld [vmem:[#allocation2 + $0x9] sm:$0xff]  ;;  %v3328_v55 = vld [vmem:[#allocation2 + $0x11] sm:$0xff]  ;;  %v3369_v4 = vld [vmem:[%s3347_s24] sm:$0xff]  }
  0x21   : > { %v508_v50 = vpack.c.bf16 %v3306_v47, %v500_v46  ;;  %v3340_v60 = vld [vmem:[#allocation2 + $0x19] sm:$0xff]  ;;  %v2979_v3 = vld [vmem:[%s4041_s2 + $0x1c4] ss:$8 sps:$4 sm:$0xff]   ;;  %v2869_v6 = vunpack.c.l.bf16 %v3369_v4  ;;  %v2870_v7 = vunpack.c.h.bf16 %v3369_v4  ;;  %v3396_v13 = vld [vmem:[%s3252_s22 + $0x10] sm:$0xff] }
  0x22   : > { %422 = vmatpush1.bf16.msra.mxu0 %v2940_v23  ;;  %620 = vmatpush1.bf16.msra.mxu1 %v2941_v24  ;;  %v3354_v62 = vpack.c.bf16 %v3340_v60, %v3328_v55  ;;  %v2977_v8 = vld [vmem:[%s4041_s2 + $0x1c0] ss:$8 sps:$4 sm:$0xff]   ;;  %v2986_v12 = vld [vmem:[%s4041_s2 + $0x1b4] ss:$8 sps:$4 sm:$0xff]   ;;  %v2984_v16 = vld [vmem:[%s4041_s2 + $0x1b0] ss:$8 sps:$4 sm:$0xff]  }
  0x23   : > { %423 = vmatprep.subr.bf16.mxu0 %v2942_v25  ;;  %621 = vmatprep.subr.bf16.mxu1 %v2944_v26  ;;  %v3381_v9 = vld [vmem:[#allocation2 + $0x21] sm:$0xff]  ;;  %299 = vst [vmem:[#allocation2 + $0x40] sm:$0xff] %v2869_v6  ;;  %300 = vst [vmem:[#allocation2 + $0x48] sm:$0xff] %v2870_v7  ;;  %v2996_v22 = vld [vmem:[%s4041_s2 + $0x114] ss:$8 sps:$4 sm:$0xff]  }
  0x24   : > { %v2989_v17 = vld [vmem:[%s4041_s2 + $0x124] ss:$8 sps:$4 sm:$0xff]   ;;  %v2987_v19 = vld [vmem:[%s4041_s2 + $0x120] ss:$8 sps:$4 sm:$0xff]   ;;  %v2999_v24 = vld [vmem:[%s4041_s2 + $0x194] ss:$8 sps:$4 sm:$0xff]  }
  0x25   : > { %v3388_v11 = vld [vmem:[#allocation2 + $0x29] sm:$0xff]  ;;  %v3422_v21 = vld [vmem:[#allocation2 + $0x31] sm:$0xff]  ;;  %v3493_v46 = vld [vmem:[#allocation2 + $0x1a] sm:$0xff] }
  0x26   : > { %424 = vmatpush1.bf16.msra.mxu0 %v2946_v31  ;;  %622 = vmatpush1.bf16.msra.mxu1 %v2947_v34  ;;  %v3400_v14 = vpack.c.bf16 %v3388_v11, %v3381_v9  ;;  %v2992_v18 = vld [vmem:[%s4041_s2 + $0x1a4] ss:$8 sps:$4 sm:$0xff]   ;;  %v2990_v20 = vld [vmem:[%s4041_s2 + $0x1a0] ss:$8 sps:$4 sm:$0xff]   ;;  %v3435_v25 = vld [vmem:[%s3252_s22 + $0x18] sm:$0xff] }
  0x27   : > { %425 = vmatprep.subr.bf16.mxu0 %v2948_v35  ;;  %623 = vmatprep.subr.bf16.mxu1 %v2950_v36  ;;  %v2994_v27 = vld [vmem:[%s4041_s2 + $0x110] ss:$8 sps:$4 sm:$0xff]   ;;  %v3002_v29 = vld [vmem:[%s4041_s2 + $0x104] ss:$8 sps:$4 sm:$0xff]   ;;  %v3000_v31 = vld [vmem:[%s4041_s2 + $0x100] ss:$8 sps:$4 sm:$0xff]  }
  0x28   : > { %v2997_v28 = vld [vmem:[%s4041_s2 + $0x190] ss:$8 sps:$4 sm:$0xff]   ;;  %v3005_v30 = vld [vmem:[%s4041_s2 + $0x184] ss:$8 sps:$4 sm:$0xff]   ;;  %v3003_v32 = vld [vmem:[%s4041_s2 + $0x180] ss:$8 sps:$4 sm:$0xff]  }
  0x29   : > { %v730_v33 = vld [vmem:[#allocation2 + $0x2] sm:$0xff]  ;;  %v3461_v34 = vld [vmem:[#allocation2 + $0xa] sm:$0xff]  ;;  %v3009_v35 = vld [vmem:[%s4041_s2 + $0x274] ss:$8 sps:$4 sm:$0xff]  }
  0x2a   : > { %426 = vmatpush1.bf16.msra.mxu0 %v2952_v37  ;;  %624 = vmatpush1.bf16.msra.mxu1 %v2953_v38  ;;  %v3427_v23 = vld [vmem:[#allocation2 + $0x39] sm:$0xff]  ;;  %v738_v37 = vpack.c.bf16 %v3461_v34, %v730_v33  ;;  %v3006_v38 = vld [vmem:[%s3252_s22 + $0x4] ss:$4 sps:$4 sm:$0xff]   ;;  %v1198_v33 = vpack.c.bf16 %v3328_v55, %v3306_v47 }
  0x2b   : > { %839 = vmatprep.subr.bf16.mxu0 %v2957_v40  ;;  %1069 = vmatprep.subr.bf16.mxu1 %v2960_v41  ;;  %v3439_v26 = vpack.c.bf16 %v3427_v23, %v3422_v21  ;;  %v3012_v36 = vld [vmem:[%s4041_s2 + $0x2f4] ss:$8 sps:$4 sm:$0xff]   ;;  %v3007_v39 = vld [vmem:[%s4041_s2 + $0x270] ss:$8 sps:$4 sm:$0xff]   ;;  %v3015_v41 = vld [vmem:[%s4041_s2 + $0x264] ss:$8 sps:$4 sm:$0xff]  }
  0x2c   : > { %v3010_v40 = vld [vmem:[%s4041_s2 + $0x2f0] ss:$8 sps:$4 sm:$0xff]   ;;  %v3018_v42 = vld [vmem:[%s4041_s2 + $0x2e4] ss:$8 sps:$4 sm:$0xff]   ;;  %v3013_v43 = vld [vmem:[%s4041_s2 + $0x260] ss:$8 sps:$4 sm:$0xff]  }
  0x2d   : > { %444 = vmatmul.mubr.bf16.vlgmr.msra.gmra.mxu0 %v2954_v44  ;;  %642 = vmatmul.mubr.bf16.vlgmr.msra.gmra.mxu1 %v508_v50  ;;  %v3016_v44 = vld [vmem:[%s4041_s2 + $0x2e0] ss:$8 sps:$4 sm:$0xff]   ;;  %v3019_v50 = vld [vmem:[%s3252_s22 + $0xc] ss:$4 sps:$4 sm:$0xff]   ;;  %v3032_v7 = vld [vmem:[%s3252_s22 + $0x14] ss:$4 sps:$4 sm:$0xff]  }
  0x2e   : > { %840 = vmatpush1.bf16.msra.mxu0 %v2955_v45  ;;  %1070 = vmatpush1.bf16.msra.mxu1 %v2958_v48  ;;  %v3491_v45 = vld [vmem:[#allocation2 + $0x12] sm:$0xff]  ;;  %v3028_v56 = vld [vmem:[%s4041_s2 + $0x244] ss:$8 sps:$4 sm:$0xff]   ;;  %v3054_v4 = vld [vmem:[%s4041_s2 + $0x280] ss:$8 sps:$4 sm:$0xff]  }
  0x2f   : > { %841 = vmatprep.subr.bf16.mxu0 %v2963_v49  ;;  %1071 = vmatprep.subr.bf16.mxu1 %v2966_v51  ;;  %v3022_v48 = vld [vmem:[%s4041_s2 + $0x254] ss:$8 sps:$4 sm:$0xff]   ;;  %v3506_v51 = vpack.c.bf16 %v3493_v46, %v3491_v45  ;;  %v3056_v53 = vld [vmem:[%s4041_s2 + $0x284] ss:$8 sps:$4 sm:$0xff]   ;;  %v3063_v55 = vld [vmem:[%s4041_s2 + $0x360] ss:$8 sps:$4 sm:$0xff]  }
  0x30   : > { %453 = vmatprep.mubr.bf16.mxu0 %v3138_v2  ;;  %651 = vmatprep.mubr.bf16.mxu1 %v3138_v2  ;;  %v3025_v49 = vld [vmem:[%s4041_s2 + $0x2d4] ss:$8 sps:$4 sm:$0xff]   ;;  %v3068_v47 = vld [vmem:[%s4041_s2 + $0x3e4] ss:$8 sps:$4 sm:$0xff]  }
  0x32   : > { %842 = vmatpush1.bf16.msra.mxu0 %v2961_v52  ;;  %1072 = vmatpush1.bf16.msra.mxu1 %v2964_v54  ;;  %v3020_v52 = vld [vmem:[%s4041_s2 + $0x250] ss:$8 sps:$4 sm:$0xff]  }
  0x33   : > { %843 = vmatprep.subr.bf16.mxu0 %v2970_v58  ;;  %1073 = vmatprep.subr.bf16.mxu1 %v2973_v59  ;;  %v3023_v54 = vld [vmem:[%s4041_s2 + $0x2d0] ss:$8 sps:$4 sm:$0xff]   ;;  %v3031_v58 = vld [vmem:[%s4041_s2 + $0x2c4] ss:$8 sps:$4 sm:$0xff]   ;;  %v3026_v59 = vld [vmem:[%s4041_s2 + $0x240] ss:$8 sps:$4 sm:$0xff]  }
  0x35   : > { %454 = vmatmul.mubr.bf16.gmra.mxu0 %v3350_v61  ;;  %652 = vmatmul.mubr.bf16.gmra.mxu1 %v3354_v62 }
  0x36   : > { %844 = vmatpush1.bf16.msra.mxu0 %v2968_v63  ;;  %1074 = vmatpush1.bf16.msra.mxu1 %v2971_v0  ;;  %v3029_v63 = vld [vmem:[%s4041_s2 + $0x2c0] ss:$8 sps:$4 sm:$0xff]  }
  0x37   : > { %845 = vmatprep.subr.bf16.mxu0 %v2976_v1  ;;  %1075 = vmatprep.subr.bf16.mxu1 %v2979_v3  ;;  %v3527_v0 = vld [vmem:[#allocation2 + $0x22] sm:$0xff]  ;;  %v3529_v1 = vld [vmem:[#allocation2 + $0x2a] sm:$0xff]  ;;  %v3035_v3 = vld [vmem:[%s4041_s2 + $0x234] ss:$8 sps:$4 sm:$0xff]  }
  0x38   : > { %463 = vmatprep.mubr.bf16.mxu0 %v3138_v2  ;;  %661 = vmatprep.mubr.bf16.mxu1 %v3138_v2 }
  0x3a   : > { %846 = vmatpush1.bf16.msra.mxu0 %v2974_v5  ;;  %1076 = vmatpush1.bf16.msra.mxu1 %v2977_v8  ;;  %v3038_v5 = vld [vmem:[%s4041_s2 + $0x2b4] ss:$8 sps:$4 sm:$0xff]   ;;  %v3542_v8 = vpack.c.bf16 %v3529_v1, %v3527_v0 }
  0x3b   : > { %847 = vmatprep.subr.bf16.mxu0 %v2983_v10  ;;  %1077 = vmatprep.subr.bf16.mxu1 %v2986_v12  ;;  %v3033_v10 = vld [vmem:[%s4041_s2 + $0x230] ss:$8 sps:$4 sm:$0xff]  }
  0x3c   : > { %v3036_v12 = vld [vmem:[%s4041_s2 + $0x2b0] ss:$8 sps:$4 sm:$0xff]  }
  0x3d   : > { %464 = vmatmul.mubr.bf16.gmra.mxu0 %v3396_v13  ;;  %662 = vmatmul.mubr.bf16.gmra.mxu1 %v3400_v14 }
  0x3e   : > { %848 = vmatpush1.bf16.msra.mxu0 %v2981_v15  ;;  %1078 = vmatpush1.bf16.msra.mxu1 %v2984_v16  ;;  %v3041_v15 = vld [vmem:[%s4041_s2 + $0x224] ss:$8 sps:$4 sm:$0xff]  }
  0x3f   : > { %849 = vmatprep.subr.bf16.mxu0 %v2989_v17  ;;  %1079 = vmatprep.subr.bf16.mxu1 %v2992_v18  ;;  %v3044_v16 = vld [vmem:[%s4041_s2 + $0x2a4] ss:$8 sps:$4 sm:$0xff]   ;;  %v3039_v17 = vld [vmem:[%s4041_s2 + $0x220] ss:$8 sps:$4 sm:$0xff]  }
  0x40   : > { %473 = vmatprep.mubr.bf16.mxu0 %v3138_v2  ;;  %671 = vmatprep.mubr.bf16.mxu1 %v3138_v2  ;;  %v3042_v18 = vld [vmem:[%s4041_s2 + $0x2a0] ss:$8 sps:$4 sm:$0xff]  }
  0x42   : > { %850 = vmatpush1.bf16.msra.mxu0 %v2987_v19  ;;  %1080 = vmatpush1.bf16.msra.mxu1 %v2990_v20  ;;  %v3563_v19 = vld [vmem:[#allocation2 + $0x32] sm:$0xff]  ;;  %v3565_v20 = vld [vmem:[#allocation2 + $0x3a] sm:$0xff] }
  0x43   : > { %851 = vmatprep.subr.bf16.mxu0 %v2996_v22  ;;  %1081 = vmatprep.subr.bf16.mxu1 %v2999_v24  ;;  %v3047_v22 = vld [vmem:[%s4041_s2 + $0x214] ss:$8 sps:$4 sm:$0xff]  }
  0x44   : > { %v3050_v24 = vld [vmem:[%s4041_s2 + $0x294] ss:$8 sps:$4 sm:$0xff]  }
  0x45   : > { %474 = vmatmul.mubr.bf16.gmra.mxu0 %v3435_v25  ;;  %672 = vmatmul.mubr.bf16.gmra.mxu1 %v3439_v26 }
  0x46   : > { %852 = vmatpush1.bf16.msra.mxu0 %v2994_v27  ;;  %1082 = vmatpush1.bf16.msra.mxu1 %v2997_v28  ;;  %v3577_v27 = vpack.c.bf16 %v3565_v20, %v3563_v19  ;;  %v971_v28 = vpack.c.bf16 %v2869_v6, %v2866_v57  ;;  %v3051_v57 = vld [vmem:[%s4041_s2 + $0x200] ss:$8 sps:$4 sm:$0xff]   ;;  %v3059_v6 = vld [vmem:[%s4041_s2 + $0x374] ss:$8 sps:$4 sm:$0xff]  }
  0x47   : > { %853 = vmatprep.subr.bf16.mxu0 %v3002_v29  ;;  %1083 = vmatprep.subr.bf16.mxu1 %v3005_v30  ;;  %v3045_v29 = vld [vmem:[%s4041_s2 + $0x210] ss:$8 sps:$4 sm:$0xff]  }
  0x48   : > { %871 = vmatprep.mubr.bf16.mxu0 %v3138_v2  ;;  %1101 = vmatprep.mubr.bf16.mxu1 %v3138_v2  ;;  %v3048_v30 = vld [vmem:[%s4041_s2 + $0x290] ss:$8 sps:$4 sm:$0xff]  }
  0x4a   : > { %854 = vmatpush1.bf16.msra.mxu0 %v3000_v31  ;;  %1084 = vmatpush1.bf16.msra.mxu1 %v3003_v32  ;;  %v3053_v31 = vld [vmem:[%s4041_s2 + $0x204] ss:$8 sps:$4 sm:$0xff]   ;;  %v3062_v32 = vld [vmem:[%s4041_s2 + $0x3f4] ss:$8 sps:$4 sm:$0xff]  }
  0x4b   : > { %1299 = vmatprep.subr.bf16.mxu0 %v3009_v35  ;;  %1529 = vmatprep.subr.bf16.mxu1 %v3012_v36  ;;  %v1428_v35 = vpack.c.bf16 %v3491_v45, %v3461_v34  ;;  %v3057_v36 = vld [vmem:[%s4041_s2 + $0x370] ss:$8 sps:$4 sm:$0xff]   ;;  %v3066_v34 = vld [vmem:[%s4041_s2 + $0x3e0] ss:$8 sps:$4 sm:$0xff]  }
  0x4c   : > { %v2880_v45 = vld [vmem:[%s3347_s24 + $0x8] sm:$0xff]  }
  0x4d   : > { %872 = vmatmul.mubr.bf16.vlgmr.msra.gmra.mxu0 %v738_v37  ;;  %1102 = vmatmul.mubr.bf16.vlgmr.msra.gmra.mxu1 %v3006_v38  ;;  %v3060_v37 = vld [vmem:[%s4041_s2 + $0x3f0] ss:$8 sps:$4 sm:$0xff]   ;;  %v3065_v38 = vld [vmem:[%s4041_s2 + $0x364] ss:$8 sps:$4 sm:$0xff]  }
  0x4e   : > { %1300 = vmatpush1.bf16.msra.mxu0 %v3007_v39  ;;  %1530 = vmatpush1.bf16.msra.mxu1 %v3010_v40  ;;  %v3071_v39 = vld [vmem:[%s4041_s2 + $0x354] ss:$8 sps:$4 sm:$0xff]  }
  0x4f   : > { %1301 = vmatprep.subr.bf16.mxu0 %v3015_v41  ;;  %1531 = vmatprep.subr.bf16.mxu1 %v3018_v42  ;;  %v3074_v40 = vld [vmem:[%s4041_s2 + $0x3d4] ss:$8 sps:$4 sm:$0xff]   ;;  %v1199_v41 = vpack.c.bf16 %v3381_v9, %v3340_v60  ;;  %v1429_v42 = vpack.c.bf16 %v3527_v0, %v3493_v46  ;;  %v3080_v60 = vld [vmem:[%s4041_s2 + $0x3c4] ss:$8 sps:$4 sm:$0xff]   ;;  %v3075_v9 = vld [vmem:[%s4041_s2 + $0x340] ss:$8 sps:$4 sm:$0xff]  }
  0x50   : > { %881 = vmatprep.mubr.bf16.mxu0 %v3138_v2  ;;  %1111 = vmatprep.mubr.bf16.mxu1 %v3138_v2  ;;  %v3078_v46 = vld [vmem:[%s4041_s2 + $0x3c0] ss:$8 sps:$4 sm:$0xff]  }
  0x51   : > { %v3090_v0 = vld [vmem:[%s4041_s2 + $0x3a0] ss:$8 sps:$4 sm:$0xff]  }
  0x52   : > { %1302 = vmatpush1.bf16.msra.mxu0 %v3013_v43  ;;  %1532 = vmatpush1.bf16.msra.mxu1 %v3016_v44  ;;  %v3069_v43 = vld [vmem:[%s4041_s2 + $0x350] ss:$8 sps:$4 sm:$0xff]  }
  0x53   : > { %1303 = vmatprep.subr.bf16.mxu0 %v3022_v48  ;;  %1533 = vmatprep.subr.bf16.mxu1 %v3025_v49  ;;  %v3072_v44 = vld [vmem:[%s4041_s2 + $0x3d0] ss:$8 sps:$4 sm:$0xff]   ;;  %v3077_v48 = vld [vmem:[%s4041_s2 + $0x344] ss:$8 sps:$4 sm:$0xff]   ;;  %v2873_v49 = vunpack.c.l.bf16 %v2880_v45 }
  0x55   : > { %882 = vmatmul.mubr.bf16.gmra.mxu0 %v3506_v51  ;;  %1112 = vmatmul.mubr.bf16.gmra.mxu1 %v3019_v50  ;;  %301 = vst [vmem:[#allocation2 + $0x50] sm:$0xff] %v2873_v49  ;;  %v3083_v50 = vld [vmem:[%s4041_s2 + $0x334] ss:$8 sps:$4 sm:$0xff]  }
  0x56   : > { %1304 = vmatpush1.bf16.msra.mxu0 %v3020_v52  ;;  %1534 = vmatpush1.bf16.msra.mxu1 %v3023_v54  ;;  %v3086_v52 = vld [vmem:[%s4041_s2 + $0x3b4] ss:$8 sps:$4 sm:$0xff]   ;;  %v1200_v54 = vpack.c.bf16 %v3422_v21, %v3388_v11  ;;  %v3092_v11 = vld [vmem:[%s4041_s2 + $0x3a4] ss:$8 sps:$4 sm:$0xff]   ;;  %v3087_v21 = vld [vmem:[%s4041_s2 + $0x320] ss:$8 sps:$4 sm:$0xff]  }
  0x57   : > { %1305 = vmatprep.subr.bf16.mxu0 %v3028_v56  ;;  %1535 = vmatprep.subr.bf16.mxu1 %v3031_v58  ;;  %v1430_v56 = vpack.c.bf16 %v3563_v19, %v3529_v1  ;;  %v3081_v58 = vld [vmem:[%s4041_s2 + $0x330] ss:$8 sps:$4 sm:$0xff]   ;;  %v3693_v1 = vld [vmem:[#allocation2 + $0x41] sm:$0xff] }
  0x58   : > { %891 = vmatprep.mubr.bf16.mxu0 %v3138_v2  ;;  %1121 = vmatprep.mubr.bf16.mxu1 %v3138_v2  ;;  %v3102_v19 = vld [vmem:[%s4041_s2 + $0x380] ss:$8 sps:$4 sm:$0xff]  }
  0x5a   : > { %1306 = vmatpush1.bf16.msra.mxu0 %v3026_v59  ;;  %1536 = vmatpush1.bf16.msra.mxu1 %v3029_v63  ;;  %v3084_v59 = vld [vmem:[%s4041_s2 + $0x3b0] ss:$8 sps:$4 sm:$0xff]   ;;  %v3089_v63 = vld [vmem:[%s4041_s2 + $0x324] ss:$8 sps:$4 sm:$0xff]  }
  0x5b   : > { %1307 = vmatprep.subr.bf16.mxu0 %v3035_v3  ;;  %1537 = vmatprep.subr.bf16.mxu1 %v3038_v5  ;;  %v3695_v3 = vld [vmem:[#allocation2 + $0x42] sm:$0xff]  ;;  %v3095_v5 = vld [vmem:[%s4041_s2 + $0x314] ss:$8 sps:$4 sm:$0xff]  }
  0x5d   : > { %892 = vmatmul.mubr.bf16.gmra.mxu0 %v3542_v8  ;;  %1122 = vmatmul.mubr.bf16.gmra.mxu1 %v3032_v7  ;;  %v3098_v7 = vld [vmem:[%s4041_s2 + $0x394] ss:$8 sps:$4 sm:$0xff]  }
  0x5e   : > { %1308 = vmatpush1.bf16.msra.mxu0 %v3033_v10  ;;  %1538 = vmatpush1.bf16.msra.mxu1 %v3036_v12  ;;  %v1201_v10 = vpack.c.bf16 %v3693_v1, %v3427_v23  ;;  %v1431_v12 = vpack.c.bf16 %v3695_v3, %v3565_v20  ;;  %v3104_v23 = vld [vmem:[%s4041_s2 + $0x384] ss:$8 sps:$4 sm:$0xff]   ;;  %v3107_v20 = vld [vmem:[%s4041_s2 + $0x474] ss:$8 sps:$4 sm:$0xff]  }
  0x5f   : > { %1309 = vmatprep.subr.bf16.mxu0 %v3041_v15  ;;  %1539 = vmatprep.subr.bf16.mxu1 %v3044_v16  ;;  %v3093_v15 = vld [vmem:[%s4041_s2 + $0x310] ss:$8 sps:$4 sm:$0xff]  }
  0x60   : > { %901 = vmatprep.mubr.bf16.mxu0 %v3138_v2  ;;  %1131 = vmatprep.mubr.bf16.mxu1 %v3138_v2  ;;  %v3096_v16 = vld [vmem:[%s4041_s2 + $0x390] ss:$8 sps:$4 sm:$0xff]  }
  0x62   : > { %1310 = vmatpush1.bf16.msra.mxu0 %v3039_v17  ;;  %1540 = vmatpush1.bf16.msra.mxu1 %v3042_v18  ;;  %v3101_v17 = vld [vmem:[%s4041_s2 + $0x304] ss:$8 sps:$4 sm:$0xff]   ;;  %v3099_v18 = vld [vmem:[%s4041_s2 + $0x300] ss:$8 sps:$4 sm:$0xff]  }
  0x63   : > { %1311 = vmatprep.subr.bf16.mxu0 %v3047_v22  ;;  %1541 = vmatprep.subr.bf16.mxu1 %v3050_v24  ;;  %v3105_v22 = vld [vmem:[%s4041_s2 + $0x470] ss:$8 sps:$4 sm:$0xff]   ;;  %v3110_v24 = vld [vmem:[%s4041_s2 + $0x464] ss:$8 sps:$4 sm:$0xff]  }
  0x65   : > { %902 = vmatmul.mubr.bf16.gmra.mxu0 %v3577_v27  ;;  %1132 = vmatmul.mubr.bf16.gmra.mxu1 %v971_v28  ;;  %v3108_v28 = vld [vmem:[%s4041_s2 + $0x460] ss:$8 sps:$4 sm:$0xff]  }
  0x66   : > { %1312 = vmatpush1.bf16.msra.mxu0 %v3045_v29  ;;  %1542 = vmatpush1.bf16.msra.mxu1 %v3048_v30  ;;  %v3113_v29 = vld [vmem:[%s4041_s2 + $0x454] ss:$8 sps:$4 sm:$0xff]   ;;  %v3114_v30 = vld [vmem:[%s4041_s2 + $0x440] ss:$8 sps:$4 sm:$0xff]  }
  0x67   : > { %1313 = vmatprep.subr.bf16.mxu0 %v3053_v31  ;;  %1543 = vmatprep.subr.bf16.mxu1 %v3056_v53  ;;  %v3119_v31 = vld [vmem:[%s4041_s2 + $0x434] ss:$8 sps:$4 sm:$0xff]   ;;  %v3120_v53 = vld [vmem:[%s4041_s2 + $0x420] ss:$8 sps:$4 sm:$0xff]  }
  0x68   : > { %1331 = vmatprep.mubr.bf16.mxu0 %v3138_v2  ;;  %1561 = vmatprep.mubr.bf16.mxu1 %v3138_v2 }
  0x6a   : > { %1314 = vmatpush1.bf16.msra.mxu0 %v3051_v57  ;;  %1544 = vmatpush1.bf16.msra.mxu1 %v3054_v4  ;;  %v1887_v57 = vld [vmem:[#allocation2 + $0x49] sm:$0xff]  ;;  %v3126_v4 = vld [vmem:[%s4041_s2 + $0x414] ss:$8 sps:$4 sm:$0xff]  }
  0x6b   : > { %1759 = vmatprep.subr.bf16.mxu0 %v3059_v6  ;;  %1989 = vmatprep.subr.bf16.mxu1 %v3062_v32  ;;  %v3124_v6 = vld [vmem:[%s4041_s2 + $0x410] ss:$8 sps:$4 sm:$0xff]   ;;  %v3129_v32 = vld [vmem:[%s4041_s2 + $0x404] ss:$8 sps:$4 sm:$0xff]  }
  0x6d   : > { %1332 = vmatmul.mubr.bf16.vlgmr.msra.gmra.mxu0 %v1198_v33  ;;  %1562 = vmatmul.mubr.bf16.vlgmr.msra.gmra.mxu1 %v1428_v35  ;;  %v3127_v33 = vld [vmem:[%s4041_s2 + $0x400] ss:$8 sps:$4 sm:$0xff]  }
  0x6e   : > { %1760 = vmatpush1.bf16.msra.mxu0 %v3057_v36  ;;  %1990 = vmatpush1.bf16.msra.mxu1 %v3060_v37  ;;  %v2117_v35 = vld [vmem:[#allocation2 + $0x4a] sm:$0xff] }
  0x6f   : > { %1761 = vmatprep.subr.bf16.mxu0 %v3065_v38  ;;  %1991 = vmatprep.subr.bf16.mxu1 %v3068_v47  ;;  %v2121_v36 = vpack.c.bf16 %v2117_v35, %v3695_v3 }
  0x70   : > { %1341 = vmatprep.mubr.bf16.mxu0 %v3138_v2  ;;  %1571 = vmatprep.mubr.bf16.mxu1 %v3138_v2 }
  0x72   : > { %1762 = vmatpush1.bf16.msra.mxu0 %v3063_v55  ;;  %1992 = vmatpush1.bf16.msra.mxu1 %v3066_v34 }
  0x73   : > { %1763 = vmatprep.subr.bf16.mxu0 %v3071_v39  ;;  %1993 = vmatprep.subr.bf16.mxu1 %v3074_v40 }
  0x75   : > { %1342 = vmatmul.mubr.bf16.gmra.mxu0 %v1199_v41  ;;  %1572 = vmatmul.mubr.bf16.gmra.mxu1 %v1429_v42 }
  0x76   : > { %1764 = vmatpush1.bf16.msra.mxu0 %v3069_v43  ;;  %1994 = vmatpush1.bf16.msra.mxu1 %v3072_v44 }
  0x77   : > { %1765 = vmatprep.subr.bf16.mxu0 %v3077_v48  ;;  %1995 = vmatprep.subr.bf16.mxu1 %v3080_v60 }
  0x78   : > { %1351 = vmatprep.mubr.bf16.mxu0 %v3138_v2  ;;  %1581 = vmatprep.mubr.bf16.mxu1 %v3138_v2 }
  0x7a   : > { %1766 = vmatpush1.bf16.msra.mxu0 %v3075_v9  ;;  %1996 = vmatpush1.bf16.msra.mxu1 %v3078_v46 }
  0x7b   : > { %1767 = vmatprep.subr.bf16.mxu0 %v3083_v50  ;;  %1997 = vmatprep.subr.bf16.mxu1 %v3086_v52 }
  0x7d   : > { %1352 = vmatmul.mubr.bf16.gmra.mxu0 %v1200_v54  ;;  %1582 = vmatmul.mubr.bf16.gmra.mxu1 %v1430_v56 }
  0x7e   : > { %1768 = vmatpush1.bf16.msra.mxu0 %v3081_v58  ;;  %1998 = vmatpush1.bf16.msra.mxu1 %v3084_v59 }
  0x7f   : > { %1769 = vmatprep.subr.bf16.mxu0 %v3089_v63  ;;  %1999 = vmatprep.subr.bf16.mxu1 %v3092_v11 }
  0x80   : > { %1361 = vmatprep.mubr.bf16.mxu0 %v3138_v2  ;;  %1591 = vmatprep.mubr.bf16.mxu1 %v3138_v2 }
  0x82   : > { %1770 = vmatpush1.bf16.msra.mxu0 %v3087_v21  ;;  %2000 = vmatpush1.bf16.msra.mxu1 %v3090_v0 }
  0x83   : > { %1771 = vmatprep.subr.bf16.mxu0 %v3095_v5  ;;  %2001 = vmatprep.subr.bf16.mxu1 %v3098_v7 }
  0x85   : > { %1362 = vmatmul.mubr.bf16.gmra.mxu0 %v1201_v10  ;;  %1592 = vmatmul.mubr.bf16.gmra.mxu1 %v1431_v12 }
  0x86   : > { %1772 = vmatpush1.bf16.msra.mxu0 %v3093_v15  ;;  %2002 = vmatpush1.bf16.msra.mxu1 %v3096_v16 }
  0x87   : > { %1773 = vmatprep.subr.bf16.mxu0 %v3101_v17  ;;  %2003 = vmatprep.subr.bf16.mxu1 %v3104_v23 }
  0x88   : > { %1791 = vmatprep.mubr.bf16.mxu0 %v3138_v2  ;;  %2021 = vmatprep.mubr.bf16.mxu1 %v3138_v2 }
  0x8a   : > { %1774 = vmatpush1.bf16.msra.mxu0 %v3099_v18  ;;  %2004 = vmatpush1.bf16.msra.mxu1 %v3102_v19 }
  0x8b   : > { %2219 = vmatprep.subr.bf16.mxu0 %v3107_v20  ;;  %2881 = vmatprep.subr.bf16.mxu1 %v3107_v20 }
  0x8d   : > { %1792 = vmatmul.mubr.bf16.vlgmr.msra.gmra.mxu0 %v3350_v61  ;;  %2022 = vmatmul.mubr.bf16.vlgmr.msra.gmra.mxu1 %v3354_v62  ;;  %v3111_v61 = vld [vmem:[%s4041_s2 + $0x450] ss:$8 sps:$4 sm:$0xff]   ;;  %v3116_v62 = vld [vmem:[%s4041_s2 + $0x444] ss:$8 sps:$4 sm:$0xff]  }
  0x8e   : > { %2220 = vmatpush1.bf16.msra.mxu0 %v3105_v22  ;;  %2889 = vmatpush1.bf16.msra.mxu1 %v3105_v22 }
  0x8f   : > { %2221 = vmatprep.subr.bf16.mxu0 %v3110_v24  ;;  %2882 = vmatprep.subr.bf16.mxu1 %v3110_v24 }
  0x90   : > { %1801 = vmatprep.mubr.bf16.mxu0 %v3138_v2  ;;  %2031 = vmatprep.mubr.bf16.mxu1 %v3138_v2 }
  0x92   : > { %2222 = vmatpush1.bf16.msra.mxu0 %v3108_v28  ;;  %2890 = vmatpush1.bf16.msra.mxu1 %v3108_v28 }
  0x93   : > { %2223 = vmatprep.subr.bf16.mxu0 %v3113_v29  ;;  %2883 = vmatprep.subr.bf16.mxu1 %v3113_v29 }
  0x95   : > { %1802 = vmatmul.mubr.bf16.gmra.mxu0 %v3396_v13  ;;  %2032 = vmatmul.mubr.bf16.gmra.mxu1 %v3400_v14  ;;  %v3117_v13 = vld [vmem:[%s4041_s2 + $0x430] ss:$8 sps:$4 sm:$0xff]   ;;  %v3122_v14 = vld [vmem:[%s4041_s2 + $0x424] ss:$8 sps:$4 sm:$0xff]  }
  0x96   : > { %2224 = vmatpush1.bf16.msra.mxu0 %v3111_v61  ;;  %2891 = vmatpush1.bf16.msra.mxu1 %v3111_v61 }
  0x97   : > { %2225 = vmatprep.subr.bf16.mxu0 %v3116_v62  ;;  %2884 = vmatprep.subr.bf16.mxu1 %v3116_v62 }
  0x98   : > { %1811 = vmatprep.mubr.bf16.mxu0 %v3138_v2  ;;  %2041 = vmatprep.mubr.bf16.mxu1 %v3138_v2 }
  0x9a   : > { %2226 = vmatpush1.bf16.msra.mxu0 %v3114_v30  ;;  %2892 = vmatpush1.bf16.msra.mxu1 %v3114_v30 }
  0x9b   : > { %2227 = vmatprep.subr.bf16.mxu0 %v3119_v31  ;;  %2885 = vmatprep.subr.bf16.mxu1 %v3119_v31 }
  0x9d   : > { %1812 = vmatmul.mubr.bf16.gmra.mxu0 %v3435_v25  ;;  %2042 = vmatmul.mubr.bf16.gmra.mxu1 %v3439_v26  ;;  %v3123_v25 = vld [vmem:[%s3347_s24] sm:$0xff]  ;;  %v1891_v26 = vpack.c.bf16 %v1887_v57, %v3693_v1 }
  0x9e   : > { %2228 = vmatpush1.bf16.msra.mxu0 %v3117_v13  ;;  %2893 = vmatpush1.bf16.msra.mxu1 %v3117_v13 }
  0x9f   : > { %2229 = vmatprep.subr.bf16.mxu0 %v3122_v14  ;;  %2886 = vmatprep.subr.bf16.mxu1 %v3122_v14 }
  0xa0   : > { %1821 = vmatprep.mubr.bf16.mxu0 %v3138_v2  ;;  %2051 = vmatprep.mubr.bf16.mxu1 %v3138_v2 }
  0xa2   : > { %2230 = vmatpush1.bf16.msra.mxu0 %v3120_v53  ;;  %2894 = vmatpush1.bf16.msra.mxu1 %v3120_v53 }
  0xa3   : > { %2231 = vmatprep.subr.bf16.mxu0 %v3126_v4  ;;  %2887 = vmatprep.subr.bf16.mxu1 %v3126_v4 }
  0xa5   : > { %1822 = vmatmul.mubr.bf16.gmra.mxu0 %v3123_v25  ;;  %2052 = vmatmul.mubr.bf16.gmra.mxu1 %v1891_v26 }
  0xa6   : > { %2232 = vmatpush1.bf16.msra.mxu0 %v3124_v6  ;;  %2895 = vmatpush1.bf16.msra.mxu1 %v3124_v6 }
  0xa7   : > { %2233 = vmatprep.subr.bf16.mxu0 %v3129_v32  ;;  %2888 = vmatprep.subr.bf16.mxu1 %v3129_v32 }
  0xa8   : > { %2251 = vmatprep.mubr.bf16.mxu0 %v3138_v2  ;;  %2271 = vmatprep.mubr.bf16.mxu1 %v3138_v2 }
  0xaa   : > { %2234 = vmatpush1.bf16.msra.mxu0 %v3127_v33  ;;  %2896 = vmatpush1.bf16.msra.mxu1 %v3127_v33 }
  0xad   : > { %2252 = vmatmul.mubr.bf16.vlgmr.msra.gmra.mxu0 %v3506_v51  ;;  %2272 = vmatmul.mubr.bf16.vlgmr.msra.gmra.mxu1 %v3577_v27 }
  0xae   : > { %2261 = vmatprep.mubr.bf16.mxu0 %v3138_v2  ;;  %2281 = vmatprep.mubr.bf16.mxu1 %v3138_v2 }
  0xb5   : > { %2262 = vmatmul.mubr.bf16.gmra.mxu0 %v3542_v8  ;;  %2282 = vmatmul.mubr.bf16.gmra.mxu1 %v2121_v36 }
  0xed   : > { %v445_v37 = vpop.f32.mrf.mxu0  ;;  %v643_v38 = vpop.f32.mrf.mxu1 }
  0xee   : > { %v698_v47 = vadd.f32 %v643_v38, %v445_v37 }
  0xef   : > { %v447_v55 = vpop.f32.mrf.mxu0  ;;  %v645_v34 = vpop.f32.mrf.mxu1 }
  0xf0   : > { %v699_v39 = vadd.f32 %v645_v34, %v447_v55 }
  0xf1   : > { %v449_v40 = vpop.f32.mrf.mxu0  ;;  %v647_v51 = vpop.f32.mrf.mxu1 }
  0xf2   : > { %v700_v41 = vadd.f32 %v647_v51, %v449_v40 }
  0xf3   : > { %v451_v27 = vpop.f32.mrf.mxu0  ;;  %v649_v42 = vpop.f32.mrf.mxu1 }
  0xf4   : > { %v701_v43 = vadd.f32 %v649_v42, %v451_v27 }
  0xf5   : > { %v455_v44 = vpop.f32.mrf.mxu0  ;;  %v653_v2 = vpop.f32.mrf.mxu1 }
  0xf6   : > { %v702_v45 = vadd.f32 %v653_v2, %v455_v44 }
  0xf7   : > { %v457_v48 = vpop.f32.mrf.mxu0  ;;  %v655_v49 = vpop.f32.mrf.mxu1 }
  0xf8   : > { %v703_v60 = vadd.f32 %v655_v49, %v457_v48 }
  0xf9   : > { %v459_v8 = vpop.f32.mrf.mxu0  ;;  %v657_v9 = vpop.f32.mrf.mxu1 }
  0xfa   : > { %v704_v46 = vadd.f32 %v657_v9, %v459_v8 }
  0xfb   : > { %v461_v50 = vpop.f32.mrf.mxu0  ;;  %v659_v52 = vpop.f32.mrf.mxu1 }
  0xfc   : > { %v705_v54 = vadd.f32 %v659_v52, %v461_v50 }
  0xfd   : > { %v465_v56 = vpop.f32.mrf.mxu0  ;;  %v663_v58 = vpop.f32.mrf.mxu1 }
  0xfe   : > { %v706_v59 = vadd.f32 %v663_v58, %v465_v56 }
  0xff   : > { %v467_v63 = vpop.f32.mrf.mxu0  ;;  %v665_v11 = vpop.f32.mrf.mxu1 }
 0x100   : > { %v707_v21 = vadd.f32 %v665_v11, %v467_v63 }
 0x101   : > { %v469_v0 = vpop.f32.mrf.mxu0  ;;  %v667_v1 = vpop.f32.mrf.mxu1 }
 0x102   : > { %v708_v3 = vadd.f32 %v667_v1, %v469_v0 }
 0x103   : > { %v471_v5 = vpop.f32.mrf.mxu0  ;;  %v669_v7 = vpop.f32.mrf.mxu1 }
 0x104   : > { %v709_v10 = vadd.f32 %v669_v7, %v471_v5 }
 0x105   : > { %v475_v12 = vpop.f32.mrf.mxu0  ;;  %v673_v15 = vpop.f32.mrf.mxu1 }
 0x106   : > { %v710_v16 = vadd.f32 %v673_v15, %v475_v12 }
 0x107   : > { %v477_v17 = vpop.f32.mrf.mxu0  ;;  %v675_v23 = vpop.f32.mrf.mxu1 }
 0x108   : > { %v711_v18 = vadd.f32 %v675_v23, %v477_v17 }
 0x109   : > { %v479_v19 = vpop.f32.mrf.mxu0  ;;  %v677_v20 = vpop.f32.mrf.mxu1 }
 0x10a   : > { %v712_v22 = vadd.f32 %v677_v20, %v479_v19 }
 0x10b   : > { %v481_v24 = vpop.f32.mrf.mxu0  ;;  %v679_v28 = vpop.f32.mrf.mxu1 }
 0x10c   : > { %v3799_v29 = vadd.f32 %v679_v28, %v481_v24 }
 0x10d   : > { %v873_v61 = vpop.f32.mrf.mxu0  ;;  %v1103_v62 = vpop.f32.mrf.mxu1 }
 0x10e   : > { %v928_v30 = vadd.f32 %v873_v61, %v698_v47 }
 0x10f   : > { %v875_v31 = vpop.f32.mrf.mxu0  ;;  %v1105_v13 = vpop.f32.mrf.mxu1 }
 0x110   : > { %v3801_v14 = vadd.f32 %v1103_v62, %v928_v30  ;;  %v929_v53 = vadd.f32 %v875_v31, %v699_v39 }
 0x111   : > { %v877_v57 = vpop.f32.mrf.mxu0  ;;  %v1107_v4 = vpop.f32.mrf.mxu1 }
 0x112   : > { %v3803_v25 = vadd.f32 %v1105_v13, %v929_v53  ;;  %v930_v26 = vadd.f32 %v877_v57, %v700_v41 }
 0x113   : > { %v879_v6 = vpop.f32.mrf.mxu0  ;;  %v1109_v32 = vpop.f32.mrf.mxu1 }
 0x114   : > { %v3805_v33 = vadd.f32 %v1107_v4, %v930_v26  ;;  %v931_v35 = vadd.f32 %v879_v6, %v701_v43 }
 0x115   : > { %v883_v36 = vpop.f32.mrf.mxu0  ;;  %v1113_v37 = vpop.f32.mrf.mxu1 }
 0x116   : > { %v3807_v38 = vadd.f32 %v1109_v32, %v931_v35  ;;  %v932_v47 = vadd.f32 %v883_v36, %v702_v45 }
 0x117   : > { %v885_v55 = vpop.f32.mrf.mxu0  ;;  %v1115_v34 = vpop.f32.mrf.mxu1 }
 0x118   : > { %v3809_v40 = vadd.f32 %v1113_v37, %v932_v47  ;;  %v933_v39 = vadd.f32 %v885_v55, %v703_v60 }
 0x119   : > { %v887_v51 = vpop.f32.mrf.mxu0  ;;  %v1117_v27 = vpop.f32.mrf.mxu1 }
 0x11a   : > { %v3811_v42 = vadd.f32 %v1115_v34, %v933_v39  ;;  %v934_v41 = vadd.f32 %v887_v51, %v704_v46 }
 0x11b   : > { %v889_v44 = vpop.f32.mrf.mxu0  ;;  %v1119_v2 = vpop.f32.mrf.mxu1 }
 0x11c   : > { %v3813_v48 = vadd.f32 %v1117_v27, %v934_v41  ;;  %v935_v43 = vadd.f32 %v889_v44, %v705_v54 }
 0x11d   : > { %v893_v49 = vpop.f32.mrf.mxu0  ;;  %v1123_v8 = vpop.f32.mrf.mxu1 }
 0x11e   : > { %v3815_v9 = vadd.f32 %v1119_v2, %v935_v43  ;;  %v936_v45 = vadd.f32 %v893_v49, %v706_v59 }
 0x11f   : > { %v895_v50 = vpop.f32.mrf.mxu0  ;;  %v1125_v52 = vpop.f32.mrf.mxu1 }
 0x120   : > { %v3817_v56 = vadd.f32 %v1123_v8, %v936_v45  ;;  %v937_v60 = vadd.f32 %v895_v50, %v707_v21 }
 0x121   : > { %v897_v58 = vpop.f32.mrf.mxu0  ;;  %v1127_v63 = vpop.f32.mrf.mxu1 }
 0x122   : > { %v3819_v11 = vadd.f32 %v1125_v52, %v937_v60  ;;  %v938_v46 = vadd.f32 %v897_v58, %v708_v3 }
 0x123   : > { %v899_v0 = vpop.f32.mrf.mxu0  ;;  %v1129_v1 = vpop.f32.mrf.mxu1 }
 0x124   : > { %v3821_v5 = vadd.f32 %v1127_v63, %v938_v46  ;;  %v939_v54 = vadd.f32 %v899_v0, %v709_v10 }
 0x125   : > { %v903_v7 = vpop.f32.mrf.mxu0  ;;  %v1133_v12 = vpop.f32.mrf.mxu1 }
 0x126   : > { %v3823_v15 = vadd.f32 %v1129_v1, %v939_v54  ;;  %v940_v59 = vadd.f32 %v903_v7, %v710_v16 }
 0x127   : > { %v905_v17 = vpop.f32.mrf.mxu0  ;;  %v1135_v23 = vpop.f32.mrf.mxu1 }
 0x128   : > { %v3825_v19 = vadd.f32 %v1133_v12, %v940_v59  ;;  %v941_v21 = vadd.f32 %v905_v17, %v711_v18 }
 0x129   : > { %v907_v20 = vpop.f32.mrf.mxu0  ;;  %v1137_v24 = vpop.f32.mrf.mxu1 }
 0x12a   : > { %v3827_v28 = vadd.f32 %v1135_v23, %v941_v21  ;;  %v942_v3 = vadd.f32 %v907_v20, %v712_v22  ;;  %v2358_v20 = vlaneseq }
 0x12b   : > { %v909_v61 = vpop.f32.mrf.mxu0  ;;  %v1139_v62 = vpop.f32.mrf.mxu1 }
 0x12c   : > { %v3829_v30 = vadd.f32 %v1137_v24, %v942_v3  ;;  %v943_v10 = vadd.f32 %v909_v61, %v3799_v29 }
 0x12d   : > { %v1333_v31 = vpop.f32.mrf.mxu0  ;;  %v3832_v13 = vpop.f32.mrf.mxu1 }
 0x12e   : > { %v3834_v16 = vadd.f32 %v1139_v62, %v943_v10  ;;  %v2359_v10 = vshrl.u32 %v2358_v20, 7  ;;  %v2384_v20 = vld [vmem:[%s4043_s4] sm:$0x3] }
 0x12f   : > { %v1335_v53 = vpop.f32.mrf.mxu0  ;;  %v3836_v57 = vpop.f32.mrf.mxu1 }
 0x131   : > { %v1337_v18 = vpop.f32.mrf.mxu0  ;;  %v3838_v4 = vpop.f32.mrf.mxu1 }
 0x133   : > { %v1339_v26 = vpop.f32.mrf.mxu0  ;;  %v3840_v6 = vpop.f32.mrf.mxu1 }
 0x135   : > { %v1343_v22 = vpop.f32.mrf.mxu0  ;;  %v3842_v32 = vpop.f32.mrf.mxu1 }
 0x137   : > { %v1345_v35 = vpop.f32.mrf.mxu0  ;;  %v3844_v36 = vpop.f32.mrf.mxu1 }
 0x139   : > { %v3846_v29 = vpop.f32.mrf.mxu0  ;;  %v3848_v37 = vpop.f32.mrf.mxu1 }
 0x13b   : > { %v3850_v47 = vpop.f32.mrf.mxu0  ;;  %v3852_v55 = vpop.f32.mrf.mxu1 }
 0x13d   : > { %v1353_v34 = vpop.f32.mrf.mxu0  ;;  %v1583_v39 = vpop.f32.mrf.mxu1 }
 0x13f   : > { %v1355_v51 = vpop.f32.mrf.mxu0  ;;  %v3854_v27 = vpop.f32.mrf.mxu1 }
 0x141   : > { %v1357_v41 = vpop.f32.mrf.mxu0  ;;  %v3856_v44 = vpop.f32.mrf.mxu1 }
 0x143   : > { %v1359_v2 = vpop.f32.mrf.mxu0  ;;  %v3858_v43 = vpop.f32.mrf.mxu1 }
 0x145   : > { %v1363_v49 = vpop.f32.mrf.mxu0  ;;  %v3860_v8 = vpop.f32.mrf.mxu1 }
 0x147   : > { %v1365_v45 = vpop.f32.mrf.mxu0  ;;  %v3862_v50 = vpop.f32.mrf.mxu1 }
 0x148   : > { %4046 = vst [vmem:[#allocation4_spill] sm:$0xff] %v3862_v50  ;;  %v1391_v50 = vadd.f32 %v1339_v26, %v3807_v38  ;;  %v1395_v38 = vadd.f32 %v3850_v47, %v3815_v9 }
 0x149   : > { %v1367_v52 = vpop.f32.mrf.mxu0  ;;  %v3864_v60 = vpop.f32.mrf.mxu1 }
 0x14a   : > { %4047 = vst [vmem:[#allocation5_spill] sm:$0xff] %v3864_v60 }
 0x14b   : > { %v1369_v58 = vpop.f32.mrf.mxu0  ;;  %v3866_v63 = vpop.f32.mrf.mxu1 }
 0x14c   : > { %4048 = vst [vmem:[#allocation6_spill] sm:$0xff] %v3866_v63 }
 0x14d   : > { %v3868_v46 = vpop.f32.mrf.mxu0  ;;  %v3870_v0 = vpop.f32.mrf.mxu1 }
 0x14e   : > { %4049 = vst [vmem:[#allocation7_spill] sm:$0xff] %v3870_v0 }
 0x14f   : > { %v1795_v1 = vpop.f32.mrf.mxu0  ;;  %v3872_v54 = vpop.f32.mrf.mxu1 }
 0x150   : > { %4050 = vst [vmem:[#allocation8_spill] sm:$0xff] %v3872_v54 }
 0x151   : > { %v3874_v7 = vpop.f32.mrf.mxu0  ;;  %v3876_v12 = vpop.f32.mrf.mxu1 }
 0x152   : > { %4051 = vst [vmem:[#allocation9_spill] sm:$0xff] %v3874_v7  ;;  %4052 = vst [vmem:[#allocation10_spill] sm:$0xff] %v3876_v12 }
 0x153   : > { %v3878_v59 = vpop.f32.mrf.mxu0  ;;  %v3880_v17 = vpop.f32.mrf.mxu1 }
 0x154   : > { %4053 = vst [vmem:[#allocation11_spill] sm:$0xff] %v3878_v59  ;;  %4054 = vst [vmem:[#allocation12_spill] sm:$0xff] %v3880_v17  ;;  %v2364_v59 = vsub.s32 1, %v2359_v10 }
 0x155   : > { %v3882_v23 = vpop.f32.mrf.mxu0  ;;  %v3884_v21 = vpop.f32.mrf.mxu1 }
 0x156   : > { %4055 = vst [vmem:[#allocation13_spill] sm:$0xff] %v3882_v23  ;;  %4056 = vst [vmem:[#allocation14_spill] sm:$0xff] %v3884_v21  ;;  %v2360_v23 = vsub.s32 0, %v2359_v10  ;;  %v3920_v60 = vrot.slane %v2384_v20, %v2364_v59 }
 0x157   : > { %v3886_v24 = vpop.f32.mrf.mxu0  ;;  %v3888_v3 = vpop.f32.mrf.mxu1 }
 0x158   : > { %4057 = vst [vmem:[#allocation15_spill] sm:$0xff] %v3886_v24  ;;  %4058 = vst [vmem:[#allocation16_spill] sm:$0xff] %v3888_v3  ;;  %v2356_v3 = vld [vmem:[%s4042_s3] sm:$0x3]  ;;  %v3916_v24 = vrot.slane %v2384_v20, %v2360_v23 }
 0x159   : > { %v3890_v61 = vpop.f32.mrf.mxu0  ;;  %v3892_v62 = vpop.f32.mrf.mxu1  ;;  %v3918_v63 = vrot.slane %v2356_v3, %v2364_v59  ;;  %v1394_v59 = vadd.f32 %v3846_v29, %v3813_v48  ;;  %v1621_v48 = vadd.f32 %v3840_v6, %v1391_v50  ;;  %v4067_v50 = vld [vmem:[#allocation6_spill] sm:$0xff] }
 0x15a   : > { %4059 = vst [vmem:[#allocation17_spill] sm:$0xff] %v3890_v61  ;;  %4060 = vst [vmem:[#allocation18_spill] sm:$0xff] %v3892_v62  ;;  %v1388_v62 = vadd.f32 %v1333_v31, %v3801_v14  ;;  %v1392_v14 = vadd.f32 %v1343_v22, %v3809_v40 }
 0x15b   : > { %v3894_v54 = vpop.f32.mrf.mxu0  ;;  %v3896_v12 = vpop.f32.mrf.mxu1 }
 0x15c   : > { %4061 = vst [vmem:[#allocation19_spill] sm:$0xff] %v3894_v54  ;;  %4062 = vst [vmem:[#allocation20_spill] sm:$0xff] %v3896_v12  ;;  %v1389_v12 = vadd.f32 %v1335_v53, %v3803_v25  ;;  %v1390_v54 = vadd.f32 %v1337_v18, %v3805_v33  ;;  %v1393_v25 = vadd.f32 %v1345_v35, %v3811_v42 }
 0x15d   : > { %v1813_v0 = vpop.f32.mrf.mxu0  ;;  %v3898_v17 = vpop.f32.mrf.mxu1  ;;  %v1397_v33 = vadd.f32 %v1355_v51, %v3819_v11  ;;  %v1618_v53 = vadd.f32 %v3832_v13, %v1388_v62  ;;  %v1398_v42 = vadd.f32 %v1357_v41, %v3821_v5  ;;  %v1399_v11 = vadd.f32 %v1359_v2, %v3823_v15  ;;  %v4065_v2 = vld [vmem:[#allocation4_spill] sm:$0xff] }
 0x15e   : > { %4063 = vst [vmem:[#allocation21_spill] sm:$0xff] %v3898_v17  ;;  %v1396_v17 = vadd.f32 %v1353_v34, %v3817_v56  ;;  %v1619_v18 = vadd.f32 %v3836_v57, %v1389_v12  ;;  %v1620_v34 = vadd.f32 %v3838_v4, %v1390_v54  ;;  %v1400_v13 = vadd.f32 %v1363_v49, %v3825_v19 }
 0x15f   : > { %v1815_v21 = vpop.f32.mrf.mxu0  ;;  %v3900_v7 = vpop.f32.mrf.mxu1  ;;  %v1401_v57 = vadd.f32 %v1365_v45, %v3827_v28  ;;  %v1402_v4 = vadd.f32 %v1367_v52, %v3829_v30  ;;  %v1403_v35 = vadd.f32 %v1369_v58, %v3834_v16  ;;  %v1622_v9 = vadd.f32 %v3842_v32, %v1392_v14  ;;  %v4066_v45 = vld [vmem:[#allocation5_spill] sm:$0xff] }
 0x160   : > { %4064 = vst [vmem:[#allocation22_spill] sm:$0xff] %v3900_v7  ;;  %v3914_v7 = vrot.slane %v2356_v3, %v2360_v23  ;;  %v1626_v40 = vadd.f32 %v1583_v39, %v1396_v17  ;;  %v1623_v29 = vadd.f32 %v3844_v36, %v1393_v25  ;;  %v1627_v5 = vadd.f32 %v3854_v27, %v1397_v33  ;;  %v4068_v58 = vld [vmem:[#allocation9_spill] sm:$0xff] }
 0x161   : > { %v1817_v10 = vpop.f32.mrf.mxu0  ;;  %v3912_v61 = vpop.f32.mrf.mxu1  ;;  %v1624_v39 = vadd.f32 %v3848_v37, %v1394_v59  ;;  %v1848_v19 = vadd.f32 %v3868_v46, %v1618_v53  ;;  %v1849_v28 = vadd.f32 %v1795_v1, %v1619_v18  ;;  %v1625_v30 = vadd.f32 %v3852_v55, %v1395_v38  ;;  %v4069_v55 = vld [vmem:[#allocation11_spill] sm:$0xff]  ;;  %v4074_v62 = vld [vmem:[#allocation17_spill] sm:$0xff] }
 0x162   : > { %v1856_v51 = vadd.f32 %v1813_v0, %v1626_v40  ;;  %v1628_v16 = vadd.f32 %v3856_v44, %v1398_v42  ;;  %v1629_v6 = vadd.f32 %v3858_v43, %v1399_v11  ;;  %v1857_v32 = vadd.f32 %v1815_v21, %v1627_v5  ;;  %v4070_v44 = vld [vmem:[#allocation13_spill] sm:$0xff]  ;;  %v4071_v43 = vld [vmem:[#allocation15_spill] sm:$0xff]  ;;  %v4073_v21 = vld [vmem:[#allocation8_spill] sm:$0xff] }
 0x163   : > { %v1819_v56 = vpop.f32.mrf.mxu0  ;;  %v3926_v31 = vpop.f32.mrf.mxu1  ;;  %v1630_v27 = vadd.f32 %v3860_v8, %v1400_v13  ;;  %v1631_v49 = vadd.f32 %v4065_v2, %v1401_v57  ;;  %v1632_v37 = vadd.f32 %v4066_v45, %v1402_v4  ;;  %v1633_v52 = vadd.f32 %v4067_v50, %v1403_v35  ;;  %v4072_v8 = vld [vmem:[#allocation7_spill] sm:$0xff]  ;;  %v4078_v35 = vld [vmem:[#allocation10_spill] sm:$0xff] }
 0x164   : > { %v1850_v46 = vadd.f32 %v4068_v58, %v1620_v34  ;;  %v1851_v0 = vadd.f32 %v4069_v55, %v1621_v48  ;;  %v1852_v1 = vadd.f32 %v4070_v44, %v1622_v9  ;;  %v1853_v54 = vadd.f32 %v4071_v43, %v1623_v29  ;;  %v4076_v33 = vld [vmem:[#allocation19_spill] sm:$0xff]  ;;  %v4079_v9 = vld [vmem:[#allocation12_spill] sm:$0xff]  ;;  %v4080_v5 = vld [vmem:[#allocation14_spill] sm:$0xff] }
 0x165   : > { %v1823_v26 = vpop.f32.mrf.mxu0  ;;  %v3937_v22 = vpop.f32.mrf.mxu1  ;;  %v2078_v23 = vadd.f32 %v4072_v8, %v1848_v19  ;;  %v2079_v3 = vadd.f32 %v4073_v21, %v1849_v28  ;;  %v1854_v20 = vadd.f32 %v4074_v62, %v1624_v39  ;;  %v4075_v14 = vld [vmem:[#allocation21_spill] sm:$0xff]  ;;  %v1855_v53 = vadd.f32 %v4076_v33, %v1625_v30  ;;  %v4081_v19 = vld [vmem:[#allocation16_spill] sm:$0xff] }
 0x166   : > { %v2086_v25 = vadd.f32 %v4075_v14, %v1856_v51  ;;  %v1858_v59 = vadd.f32 %v1817_v10, %v1628_v16  ;;  %v1859_v38 = vadd.f32 %v1819_v56, %v1629_v6  ;;  %v1860_v11 = vadd.f32 %v1823_v26, %v1630_v27  ;;  %v4082_v16 = vld [vmem:[#allocation18_spill] sm:$0xff] }
 0x167   : > { %v1825_v15 = vpop.f32.mrf.mxu0  ;;  %v2055_v47 = vpop.f32.mrf.mxu1  ;;  %v4077_v18 = vld [vmem:[#allocation22_spill] sm:$0xff]  ;;  %v2080_v48 = vadd.f32 %v4078_v35, %v1850_v46  ;;  %v2081_v29 = vadd.f32 %v4079_v9, %v1851_v0  ;;  %v2082_v39 = vadd.f32 %v4080_v5, %v1852_v1  ;;  %v2083_v28 = vadd.f32 %v4081_v19, %v1853_v54 }
 0x168   : > { %v2087_v34 = vadd.f32 %v4077_v18, %v1857_v32  ;;  %v1861_v13 = vadd.f32 %v1825_v15, %v1631_v49  ;;  %v2084_v6 = vadd.f32 %v4082_v16, %v1854_v20  ;;  %v4083_v32 = vld [vmem:[#allocation20_spill] sm:$0xff]  ;;  %v2088_v2 = vadd.f32 %v3912_v61, %v1858_v59 }
 0x169   : > { %v1827_v41 = vpop.f32.mrf.mxu0  ;;  %v3952_v36 = vpop.f32.mrf.mxu1  ;;  %v3984_v27 = vadd.f32 %v4083_v32, %v1855_v53  ;;  %v2089_v49 = vadd.f32 %v3926_v31, %v1859_v38  ;;  %v2090_v58 = vadd.f32 %v3937_v22, %v1860_v11 }
 0x16a   : > { %v2091_v46 = vadd.f32 %v2055_v47, %v1861_v13  ;;  %v1862_v47 = vadd.f32 %v1827_v41, %v1632_v37 }
 0x16b   : > { %v1829_v12 = vpop.f32.mrf.mxu0  ;;  %v3963_v17 = vpop.f32.mrf.mxu1 }
 0x16d   : > { %v2253_v40 = vpop.f32.mrf.mxu0  ;;  %v2273_v42 = vpop.f32.mrf.mxu1 }
 0x16e   : > { %v2308_v57 = vadd.f32 %v2253_v40, %v2078_v23  ;;  %v2316_v4 = vadd.f32 %v2273_v42, %v2086_v25 }
 0x16f   : > { %v2255_v10 = vpop.f32.mrf.mxu0  ;;  %v2275_v56 = vpop.f32.mrf.mxu1 }
 0x170   : > { %v2368_v51 = vmul.f32 %v3914_v7, %v2308_v57  ;;  %v2376_v26 = vmul.f32 %v3914_v7, %v2316_v4  ;;  %v2309_v15 = vadd.f32 %v2255_v10, %v2079_v3  ;;  %v2317_v30 = vadd.f32 %v2275_v56, %v2087_v34 }
 0x171   : > { %v2257_v45 = vpop.f32.mrf.mxu0  ;;  %v2277_v50 = vpop.f32.mrf.mxu1  ;;  %v1863_v3 = vadd.f32 %v1829_v12, %v1633_v52  ;;  %v2092_v57 = vadd.f32 %v3952_v36, %v1862_v47 }
 0x172   : > { %v2369_v55 = vmul.f32 %v3918_v63, %v2309_v15  ;;  %v2377_v0 = vmul.f32 %v3918_v63, %v2317_v30  ;;  %v2396_v44 = vadd.f32 %v3916_v24, %v2368_v51  ;;  %v2404_v1 = vadd.f32 %v3916_v24, %v2376_v26 }
 0x173   : > { %v2310_v43 = vadd.f32 %v2257_v45, %v2080_v48  ;;  %v2318_v54 = vadd.f32 %v2277_v50, %v2088_v2  ;;  %v2259_v8 = vpop.f32.mrf.mxu0  ;;  %v2279_v61 = vpop.f32.mrf.mxu1  ;;  %v2093_v4 = vadd.f32 %v3963_v17, %v1863_v3 }
 0x174   : > { %v2397_v31 = vadd.f32 %v3920_v60, %v2369_v55  ;;  %v2405_v23 = vadd.f32 %v3920_v60, %v2377_v0  ;;  %v2311_v21 = vadd.f32 %v2259_v8, %v2081_v29  ;;  %v2319_v22 = vadd.f32 %v2279_v61, %v2089_v49 }
 0x175   : > { %v2370_v62 = vmul.f32 %v3914_v7, %v2310_v43  ;;  %v2378_v20 = vmul.f32 %v3914_v7, %v2318_v54  ;;  %v2263_v14 = vpop.f32.mrf.mxu0  ;;  %v2283_v25 = vpop.f32.mrf.mxu1 }
 0x176   : > { %v2843_v33 = vpack.c.bf16 %v2397_v31, %v2396_v44  ;;  %v2847_v53 = vpack.c.bf16 %v2405_v23, %v2404_v1  ;;  %v2371_v18 = vmul.f32 %v3918_v63, %v2311_v21  ;;  %v2379_v41 = vmul.f32 %v3918_v63, %v2319_v22 }
 0x177   : > { %v2398_v37 = vadd.f32 %v3916_v24, %v2370_v62  ;;  %v2406_v52 = vadd.f32 %v3916_v24, %v2378_v20  ;;  %v2312_v12 = vadd.f32 %v2263_v14, %v2082_v39  ;;  %v2320_v34 = vadd.f32 %v2283_v25, %v2090_v58  ;;  %v2265_v59 = vpop.f32.mrf.mxu0  ;;  %v2285_v38 = vpop.f32.mrf.mxu1 }
 0x178   : > { %2460 = vst [vmem:[%s3999_s16] sm:$0xff] %v2843_v33  ;;  %2464 = vst [vmem:[%s3999_s16 + $0x20] sm:$0xff] %v2847_v53  ;;  %v2399_v40 = vadd.f32 %v3920_v60, %v2371_v18  ;;  %v2407_v42 = vadd.f32 %v3920_v60, %v2379_v41  ;;  %v2313_v11 = vadd.f32 %v2265_v59, %v2083_v28 }
 0x179   : > { %v2321_v13 = vadd.f32 %v2285_v38, %v2091_v46  ;;  %v2372_v35 = vmul.f32 %v3914_v7, %v2312_v12  ;;  %v2380_v48 = vmul.f32 %v3914_v7, %v2320_v34  ;;  %v2267_v9 = vpop.f32.mrf.mxu0  ;;  %v2287_v29 = vpop.f32.mrf.mxu1 }
 0x17a   : > { %v2844_v5 = vpack.c.bf16 %v2399_v40, %v2398_v37  ;;  %v2848_v39 = vpack.c.bf16 %v2407_v42, %v2406_v52  ;;  %v2373_v19 = vmul.f32 %v3918_v63, %v2313_v11  ;;  %v2314_v56 = vadd.f32 %v2267_v9, %v2084_v6 }
 0x17b   : > { %v2381_v10 = vmul.f32 %v3918_v63, %v2321_v13  ;;  %v2400_v28 = vadd.f32 %v3916_v24, %v2372_v35  ;;  %v2408_v36 = vadd.f32 %v3916_v24, %v2380_v48  ;;  %v2322_v17 = vadd.f32 %v2287_v29, %v2092_v57  ;;  %v2269_v51 = vpop.f32.mrf.mxu0  ;;  %v2289_v26 = vpop.f32.mrf.mxu1 }
 0x17c   : > { %2461 = vst [vmem:[%s3999_s16 + $0x8] sm:$0xff] %v2844_v5  ;;  %2465 = vst [vmem:[%s3999_s16 + $0x28] sm:$0xff] %v2848_v39  ;;  %v2401_v15 = vadd.f32 %v3920_v60, %v2373_v19  ;;  %v2315_v16 = vadd.f32 %v2269_v51, %v3984_v27  ;;  %v2323_v32 = vadd.f32 %v2289_v26, %v2093_v4 }
 0x17d   : > { %v2409_v30 = vadd.f32 %v3920_v60, %v2381_v10  ;;  %v2374_v2 = vmul.f32 %v3914_v7, %v2314_v56  ;;  %v2382_v6 = vmul.f32 %v3914_v7, %v2322_v17 }
 0x17e   : > { %v2845_v49 = vpack.c.bf16 %v2401_v15, %v2400_v28  ;;  %v2375_v50 = vmul.f32 %v3918_v63, %v2315_v16  ;;  %v2383_v58 = vmul.f32 %v3918_v63, %v2323_v32 }
 0x17f   : > { %v2849_v45 = vpack.c.bf16 %v2409_v30, %v2408_v36  ;;  %v2402_v46 = vadd.f32 %v3916_v24, %v2374_v2  ;;  %v2410_v55 = vadd.f32 %v3916_v24, %v2382_v6 }
 0x180   : > { %2462 = vst [vmem:[%s3999_s16 + $0x10] sm:$0xff] %v2845_v49  ;;  %v2403_v27 = vadd.f32 %v3920_v60, %v2375_v50  ;;  %v2411_v0 = vadd.f32 %v3920_v60, %v2383_v58 }
 0x181   : > { %2466 = vst [vmem:[%s3999_s16 + $0x30] sm:$0xff] %v2849_v45 }
 0x182   : > { %v2846_v44 = vpack.c.bf16 %v2403_v27, %v2402_v46  ;;  %v2850_v1 = vpack.c.bf16 %v2411_v0, %v2410_v55 }
 0x184   : > { %2463 = vst [vmem:[%s3999_s16 + $0x18] sm:$0xff] %v2846_v44  ;;  %2467 = vst [vmem:[%s3999_s16 + $0x38] sm:$0xff] %v2850_v1 }
 0x185 PF: > { %s15_s18 = sadd.s32 1, %s3136_s18  }
 0x186   : > { %p12_p6 = scmp.ge.s32.totalorder %s15_s18, 4  }
 0x188   :  { %14 = sbr.rel (!%p12_p6) target bundleno = 1 (0x1), region = 81 }

// kernel: retrain_net_forward.18
= control target key start
LH: loop header
LB: loop body
LE: loop exit
PB: predicated region body
PF: predicated region fallthrough
CT: control target
= control target key end

     0   :  { %s789_s9 = smov 0   ;;  %s791_s10 = smov 0   ;;  %s886_s0 = inlined_call_operand.vmem [shape: bf16[16,128], index: 0, kind: input, shape index: {}]   ;;  %s887_s1 = inlined_call_operand.vmem [shape: bf16[128,1024], index: 1, kind: input, shape index: {}]   ;;  %s888_s2 = inlined_call_operand.vmem [shape: bf16[16,1024], index: 2, kind: output, shape index: {}]  }
   0x1   :  { %s793_s11 = smov 0   ;;  %s795_s12 = smov 0  }
   0x2   :  { %s797_s13 = smov 0  }
   0x3 LB: > { %s27_s14 = sadd.s32 1, %s767_s12  ;;  %s628_s15 = sadd.s32 4294967295, %s771_s13   ;;  %s771_s13 = sphi %s797_s13, %s12_s13   ;;  %s767_s12 = sphi %s795_s12, %s893_s12   ;;  %s763_s11 = sphi %s793_s11, %s892_s11   ;;  %s759_s10 = sphi %s791_s10, %s891_s10   ;;  %s755_s9 = sphi %s789_s9, %s890_s9  }
   0x4   : > { %p29_p0 = scmp.ge.s32.totalorder %s27_s14, 4  ;;  %p75_p1 = scmp.ne.s32.totalorder %s759_s10, %s755_s9 }
   0x5   : > { %p76_p2 = scmp.eq.s32.totalorder %s771_s13, 0  ;;  %p107_p4 = scmp.eq.s32.totalorder %s628_s15, 3 }
   0x6   : > { %s895_s14 = smov (%p29_p0, %s27_s14), 0  ;;  %s68_s17 = sadd.s32 1, %s759_s10 }
   0x7   : > { %p77_p3 = por %p76_p2, %p75_p1  ;;  %s64_s16 = ssub.s32 %s767_s12, %s895_s14 }
   0x8   : > { %p66_p5 = scmp.eq.s32.totalorder %s64_s16, 0  ;;  %p824_p6 = por %p107_p4, %p75_p1 }
   0x9   : > { %p632_p7 = scmp.ge.s32.totalorder %s771_s13, 4 }
   0xa   : > { %s829_s19 = scalar_select %p66_p5, %s759_s10, %s68_s17  }
   0xb   : > { %141 = sbr.rel (%p632_p7) target bundleno = 36 (0x24), region = 20 }
  0x10   : > { %144 = sbr.rel (!%p77_p3) target bundleno = 36 (0x24), region = 24  ;;  %s146_s20 = sand.u32 (%p77_p3), 1, %s759_s10  }
  0x11   : > { %s663_s21 = sshll.u32 (%p77_p3), %s767_s12, 3  ;;  %s633_s22 = sshll.u32 (%p77_p3), %s146_s20, 7 }
  0x12   : > { %s837_s25 = scalar_lea.vmem (%p77_p3), %s887_s1, %s663_s21  ;;  %s148_s26 = scalar_lea.vmem (%p77_p3), [#allocation3], %s633_s22 }
  0x13   : > { %v213_v0 = vld [vmem:[%s837_s25] sm:$0xff] (%p77_p3) }
  0x14   : > { %v215_v1 = vld [vmem:[%s837_s25 + $0x20] sm:$0xff] (%p77_p3)  ;;  %214 = vst [vmem:[%s148_s26] sm:$0xff] (%p77_p3), %v213_v0 }
  0x15   : > { %v217_v2 = vld [vmem:[%s837_s25 + $0x40] sm:$0xff]  ;;  %216 = vst [vmem:[%s148_s26 + $0x8] sm:$0xff] %v215_v1 }
  0x16   : > { %218 = vst [vmem:[%s148_s26 + $0x10] sm:$0xff] %v217_v2  ;;  %v219_v3 = vld [vmem:[%s837_s25 + $0x60] sm:$0xff] }
  0x17   : > { %v221_v4 = vld [vmem:[%s837_s25 + $0x80] sm:$0xff]  ;;  %220 = vst [vmem:[%s148_s26 + $0x18] sm:$0xff] %v219_v3 }
  0x18   : > { %v223_v5 = vld [vmem:[%s837_s25 + $0xa0] sm:$0xff]  ;;  %222 = vst [vmem:[%s148_s26 + $0x20] sm:$0xff] %v221_v4 }
  0x19   : > { %224 = vst [vmem:[%s148_s26 + $0x28] sm:$0xff] %v223_v5  ;;  %v225_v6 = vld [vmem:[%s837_s25 + $0xc0] sm:$0xff] }
  0x1a   : > { %v227_v7 = vld [vmem:[%s837_s25 + $0xe0] sm:$0xff]  ;;  %226 = vst [vmem:[%s148_s26 + $0x30] sm:$0xff] %v225_v6 }
  0x1b   : > { %v229_v8 = vld [vmem:[%s837_s25 + $0x100] sm:$0xff]  ;;  %228 = vst [vmem:[%s148_s26 + $0x38] sm:$0xff] %v227_v7 }
  0x1c   : > { %230 = vst [vmem:[%s148_s26 + $0x40] sm:$0xff] %v229_v8  ;;  %v231_v9 = vld [vmem:[%s837_s25 + $0x120] sm:$0xff] }
  0x1d   : > { %v233_v10 = vld [vmem:[%s837_s25 + $0x140] sm:$0xff]  ;;  %232 = vst [vmem:[%s148_s26 + $0x48] sm:$0xff] %v231_v9 }
  0x1e   : > { %v235_v11 = vld [vmem:[%s837_s25 + $0x160] sm:$0xff]  ;;  %234 = vst [vmem:[%s148_s26 + $0x50] sm:$0xff] %v233_v10 }
  0x1f   : > { %236 = vst [vmem:[%s148_s26 + $0x58] sm:$0xff] %v235_v11  ;;  %v237_v12 = vld [vmem:[%s837_s25 + $0x180] sm:$0xff] }
  0x20   : > { %v239_v13 = vld [vmem:[%s837_s25 + $0x1a0] sm:$0xff]  ;;  %238 = vst [vmem:[%s148_s26 + $0x60] sm:$0xff] %v237_v12 }
  0x21   : > { %v241_v14 = vld [vmem:[%s837_s25 + $0x1c0] sm:$0xff]  ;;  %240 = vst [vmem:[%s148_s26 + $0x68] sm:$0xff] %v239_v13 }
  0x22   : > { %242 = vst [vmem:[%s148_s26 + $0x70] sm:$0xff] %v241_v14  ;;  %v243_v15 = vld [vmem:[%s837_s25 + $0x1e0] sm:$0xff] }
  0x23   : > { %244 = vst [vmem:[%s148_s26 + $0x78] sm:$0xff] %v243_v15 }
  0x24 PF: > { %p636_p8 = scmp.ge.s32.totalorder %s771_s13, 1  ;;  %p249_p9 = scmp.lt.s32.totalorder %s771_s13, 5 }
  0x26   : > { %p250_p10 = pnand %p636_p8, %p249_p9 }
  0x27   : > { %s256_s27 = sand.u32 (!%p250_p10), 1, %s755_s9  }
  0x28   : > { %253 = sbr.rel (%p250_p10) target bundleno = 288 (0x120), region = 62  ;;  %s637_s28 = sshll.u32 (!%p250_p10), %s256_s27, 7 }
  0x29   : > { %s258_s29 = scalar_lea.vmem (!%p250_p10), [#allocation3], %s637_s28  ;;  %s638_s4 = sshll.u32 (!%p250_p10), %s256_s27, 4 }
  0x2a   : > { %s283_s5 = scalar_lea.vmem (!%p250_p10), [#allocation4], %s638_s4 }
  0x2d   : > { %v773_v16 = vmov 0   ;;  %v708_v17 = vld [vmem:[%s258_s29 + $0x74] ss:$8 sps:$4 sm:$0xff]   ;;  %v710_v18 = vld [vmem:[%s258_s29 + $0x70] ss:$8 sps:$4 sm:$0xff]   ;;  %v732_v33 = vld [vmem:[%s886_s0] sm:$0xff]  }
  0x2e   : > { %446 = vmatprep.mubr.bf16.mxu0 %v773_v16  ;;  %414 = vmatprep.subr.bf16.mxu0 %v708_v17  ;;  %v711_v19 = vld [vmem:[%s258_s29 + $0x64] ss:$8 sps:$4 sm:$0xff]   ;;  %v713_v20 = vld [vmem:[%s258_s29 + $0x60] ss:$8 sps:$4 sm:$0xff]   ;;  %v714_v21 = vld [vmem:[%s258_s29 + $0x54] ss:$8 sps:$4 sm:$0xff]  }
  0x2f   : > { %415 = vmatpush1.bf16.msra.mxu0 %v710_v18  ;;  %v716_v22 = vld [vmem:[%s258_s29 + $0x50] ss:$8 sps:$4 sm:$0xff]   ;;  %v717_v23 = vld [vmem:[%s258_s29 + $0x44] ss:$8 sps:$4 sm:$0xff]   ;;  %v719_v24 = vld [vmem:[%s258_s29 + $0x40] ss:$8 sps:$4 sm:$0xff]  }
  0x30   : > { %416 = vmatprep.subr.bf16.mxu0 %v711_v19  ;;  %v720_v25 = vld [vmem:[%s258_s29 + $0x34] ss:$8 sps:$4 sm:$0xff]   ;;  %v722_v26 = vld [vmem:[%s258_s29 + $0x30] ss:$8 sps:$4 sm:$0xff]   ;;  %v723_v27 = vld [vmem:[%s258_s29 + $0x24] ss:$8 sps:$4 sm:$0xff]  }
  0x31   : > { %v725_v28 = vld [vmem:[%s258_s29 + $0x20] ss:$8 sps:$4 sm:$0xff]   ;;  %v726_v29 = vld [vmem:[%s258_s29 + $0x14] ss:$8 sps:$4 sm:$0xff]   ;;  %v728_v30 = vld [vmem:[%s258_s29 + $0x10] ss:$8 sps:$4 sm:$0xff]  }
  0x32   : > { %v729_v31 = vld [vmem:[%s258_s29 + $0x4] ss:$8 sps:$4 sm:$0xff]   ;;  %v731_v32 = vld [vmem:[%s258_s29] ss:$8 sps:$4 sm:$0xff]   ;;  %s666_s6 = sshll.u32 (%p824_p6), %s763_s11, 3 }
  0x33   : > { %417 = vmatpush1.bf16.msra.mxu0 %v713_v20  ;;  %s498_s9 = scalar_lea.vmem (%p824_p6), %s888_s2, %s666_s6 }
  0x34   : > { %418 = vmatprep.subr.bf16.mxu0 %v714_v21 }
  0x37   : > { %419 = vmatpush1.bf16.msra.mxu0 %v716_v22 }
  0x38   : > { %420 = vmatprep.subr.bf16.mxu0 %v717_v23 }
  0x3b   : > { %421 = vmatpush1.bf16.msra.mxu0 %v719_v24 }
  0x3c   : > { %422 = vmatprep.subr.bf16.mxu0 %v720_v25 }
  0x3f   : > { %423 = vmatpush1.bf16.msra.mxu0 %v722_v26 }
  0x40   : > { %424 = vmatprep.subr.bf16.mxu0 %v723_v27 }
  0x43   : > { %425 = vmatpush1.bf16.msra.mxu0 %v725_v28 }
  0x44   : > { %426 = vmatprep.subr.bf16.mxu0 %v726_v29 }
  0x47   : > { %427 = vmatpush1.bf16.msra.mxu0 %v728_v30 }
  0x48   : > { %428 = vmatprep.subr.bf16.mxu0 %v729_v31 }
  0x4b   : > { %429 = vmatpush1.bf16.msra.mxu0 %v731_v32 }
  0x4e   : > { %447 = vmatmul.mubr.bf16.vlgmr.msra.gmra.mxu0 %v732_v33 }
 0x10e   : > { %v448_v34 = vpop.f32.mrf.mxu0 }
 0x110   : > { %v450_v35 = vpop.f32.mrf.mxu0 }
 0x111   : > { %v664_v36 = vpack.c.bf16 %v450_v35, %v448_v34 }
 0x112   : > { %v452_v37 = vpop.f32.mrf.mxu0 }
 0x113   : > { %484 = vst [vmem:[%s283_s5] sm:$0xff] %v664_v36  ;;  %492 = sbr.rel (!%p824_p6) target bundleno = 288 (0x120), region = 78 }
 0x114   : > { %v454_v38 = vpop.f32.mrf.mxu0 }
 0x115   : > { %v665_v39 = vpack.c.bf16 %v454_v38, %v452_v37 }
 0x117   : > { %485 = vst [vmem:[%s283_s5 + $0x8] sm:$0xff] %v665_v39 }
 0x11a   : > { %v529_v40 = vld [vmem:[%s283_s5] sm:$0xff] }
 0x11b   : > { %530 = vst [vmem:[%s498_s9] sm:$0xff] %v529_v40 }
 0x11e   : > { %v531_v41 = vld [vmem:[%s283_s5 + $0x8] sm:$0xff] }
 0x11f   : > { %532 = vst [vmem:[%s498_s9 + $0x20] sm:$0xff] %v531_v41 }
 0x120 PF: > { %s12_s13 = sadd.s32 1, %s771_s13   ;;  %s890_s9 = smov %s759_s10 }
 0x121   : > { %p9_p11 = scmp.ge.s32.totalorder %s12_s13, 6   ;;  %s891_s10 = smov %s829_s19 }
 0x122   : > { %s892_s11 = smov %s767_s12  ;;  %s893_s12 = smov %s895_s14 }
 0x123   :  { %11 = sbr.rel (!%p9_p11) target bundleno = 3 (0x3), region = 150 }

// kernel: retrain_net_forward.19
= control target key start
LH: loop header
LB: loop body
LE: loop exit
PB: predicated region body
PF: predicated region fallthrough
CT: control target
= control target key end

     0   :  { %s761_s9 = smov 0   ;;  %s763_s10 = smov 0   ;;  %s858_s0 = inlined_call_operand.vmem [shape: bf16[16,128], index: 0, kind: input, shape index: {}]   ;;  %s859_s1 = inlined_call_operand.vmem [shape: bf16[128,4096], index: 1, kind: input, shape index: {}]   ;;  %s860_s2 = inlined_call_operand.vmem [shape: f32[16,4096], index: 2, kind: output, shape index: {}]  }
   0x1   :  { %s765_s11 = smov 0   ;;  %s767_s12 = smov 0  }
   0x2   :  { %s769_s13 = smov 0  }
   0x3 LB: > { %s27_s14 = sadd.s32 1, %s739_s12  ;;  %s604_s15 = sadd.s32 4294967295, %s743_s13   ;;  %s743_s13 = sphi %s769_s13, %s12_s13   ;;  %s739_s12 = sphi %s767_s12, %s865_s12   ;;  %s735_s11 = sphi %s765_s11, %s864_s11   ;;  %s731_s10 = sphi %s763_s10, %s863_s10   ;;  %s727_s9 = sphi %s761_s9, %s862_s9  }
   0x4   : > { %p29_p0 = scmp.ge.s32.totalorder %s27_s14, 16  ;;  %p75_p1 = scmp.ne.s32.totalorder %s731_s10, %s727_s9 }
   0x5   : > { %p76_p2 = scmp.eq.s32.totalorder %s743_s13, 0  ;;  %p107_p4 = scmp.eq.s32.totalorder %s604_s15, 15 }
   0x6   : > { %s867_s14 = smov (%p29_p0, %s27_s14), 0  ;;  %s68_s17 = sadd.s32 1, %s731_s10 }
   0x7   : > { %p77_p3 = por %p76_p2, %p75_p1  ;;  %s64_s16 = ssub.s32 %s739_s12, %s867_s14 }
   0x8   : > { %p66_p5 = scmp.eq.s32.totalorder %s64_s16, 0  ;;  %p796_p6 = por %p107_p4, %p75_p1 }
   0x9   : > { %p608_p7 = scmp.ge.s32.totalorder %s743_s13, 16 }
   0xa   : > { %s801_s19 = scalar_select %p66_p5, %s731_s10, %s68_s17  }
   0xb   : > { %141 = sbr.rel (%p608_p7) target bundleno = 36 (0x24), region = 20 }
  0x10   : > { %144 = sbr.rel (!%p77_p3) target bundleno = 36 (0x24), region = 24  ;;  %s146_s20 = sand.u32 (%p77_p3), 1, %s731_s10  }
  0x11   : > { %s637_s21 = sshll.u32 (%p77_p3), %s739_s12, 3  ;;  %s609_s22 = sshll.u32 (%p77_p3), %s146_s20, 7 }
  0x12   : > { %s809_s25 = scalar_lea.vmem (%p77_p3), %s859_s1, %s637_s21  ;;  %s148_s26 = scalar_lea.vmem (%p77_p3), [#allocation3], %s609_s22 }
  0x13   : > { %v213_v0 = vld [vmem:[%s809_s25] sm:$0xff] (%p77_p3) }
  0x14   : > { %v215_v1 = vld [vmem:[%s809_s25 + $0x80] sm:$0xff] (%p77_p3)  ;;  %214 = vst [vmem:[%s148_s26] sm:$0xff] (%p77_p3), %v213_v0 }
  0x15   : > { %v217_v2 = vld [vmem:[%s809_s25 + $0x100] sm:$0xff]  ;;  %216 = vst [vmem:[%s148_s26 + $0x8] sm:$0xff] %v215_v1 }
  0x16   : > { %218 = vst [vmem:[%s148_s26 + $0x10] sm:$0xff] %v217_v2  ;;  %v219_v3 = vld [vmem:[%s809_s25 + $0x180] sm:$0xff] }
  0x17   : > { %v221_v4 = vld [vmem:[%s809_s25 + $0x200] sm:$0xff]  ;;  %220 = vst [vmem:[%s148_s26 + $0x18] sm:$0xff] %v219_v3 }
  0x18   : > { %v223_v5 = vld [vmem:[%s809_s25 + $0x280] sm:$0xff]  ;;  %222 = vst [vmem:[%s148_s26 + $0x20] sm:$0xff] %v221_v4 }
  0x19   : > { %224 = vst [vmem:[%s148_s26 + $0x28] sm:$0xff] %v223_v5  ;;  %v225_v6 = vld [vmem:[%s809_s25 + $0x300] sm:$0xff] }
  0x1a   : > { %v227_v7 = vld [vmem:[%s809_s25 + $0x380] sm:$0xff]  ;;  %226 = vst [vmem:[%s148_s26 + $0x30] sm:$0xff] %v225_v6 }
  0x1b   : > { %v229_v8 = vld [vmem:[%s809_s25 + $0x400] sm:$0xff]  ;;  %228 = vst [vmem:[%s148_s26 + $0x38] sm:$0xff] %v227_v7 }
  0x1c   : > { %230 = vst [vmem:[%s148_s26 + $0x40] sm:$0xff] %v229_v8  ;;  %v231_v9 = vld [vmem:[%s809_s25 + $0x480] sm:$0xff] }
  0x1d   : > { %v233_v10 = vld [vmem:[%s809_s25 + $0x500] sm:$0xff]  ;;  %232 = vst [vmem:[%s148_s26 + $0x48] sm:$0xff] %v231_v9 }
  0x1e   : > { %v235_v11 = vld [vmem:[%s809_s25 + $0x580] sm:$0xff]  ;;  %234 = vst [vmem:[%s148_s26 + $0x50] sm:$0xff] %v233_v10 }
  0x1f   : > { %236 = vst [vmem:[%s148_s26 + $0x58] sm:$0xff] %v235_v11  ;;  %v237_v12 = vld [vmem:[%s809_s25 + $0x600] sm:$0xff] }
  0x20   : > { %v239_v13 = vld [vmem:[%s809_s25 + $0x680] sm:$0xff]  ;;  %238 = vst [vmem:[%s148_s26 + $0x60] sm:$0xff] %v237_v12 }
  0x21   : > { %v241_v14 = vld [vmem:[%s809_s25 + $0x700] sm:$0xff]  ;;  %240 = vst [vmem:[%s148_s26 + $0x68] sm:$0xff] %v239_v13 }
  0x22   : > { %242 = vst [vmem:[%s148_s26 + $0x70] sm:$0xff] %v241_v14  ;;  %v243_v15 = vld [vmem:[%s809_s25 + $0x780] sm:$0xff] }
  0x23   : > { %244 = vst [vmem:[%s148_s26 + $0x78] sm:$0xff] %v243_v15 }
  0x24 PF: > { %p612_p8 = scmp.ge.s32.totalorder %s743_s13, 1  ;;  %p249_p9 = scmp.lt.s32.totalorder %s743_s13, 17 }
  0x26   : > { %p250_p10 = pnand %p612_p8, %p249_p9 }
  0x27   : > { %s256_s27 = sand.u32 (!%p250_p10), 1, %s727_s9  }
  0x28   : > { %253 = sbr.rel (%p250_p10) target bundleno = 286 (0x11e), region = 62  ;;  %s613_s28 = sshll.u32 (!%p250_p10), %s256_s27, 7 }
  0x29   : > { %s258_s29 = scalar_lea.vmem (!%p250_p10), [#allocation3], %s613_s28  ;;  %s614_s4 = sshll.u32 (!%p250_p10), %s256_s27, 5 }
  0x2a   : > { %s283_s5 = scalar_lea.vmem (!%p250_p10), [#allocation4], %s614_s4 }
  0x2d   : > { %v745_v16 = vmov 0   ;;  %v680_v17 = vld [vmem:[%s258_s29 + $0x74] ss:$8 sps:$4 sm:$0xff]   ;;  %v682_v18 = vld [vmem:[%s258_s29 + $0x70] ss:$8 sps:$4 sm:$0xff]   ;;  %v704_v33 = vld [vmem:[%s858_s0] sm:$0xff]  }
  0x2e   : > { %446 = vmatprep.mubr.bf16.mxu0 %v745_v16  ;;  %414 = vmatprep.subr.bf16.mxu0 %v680_v17  ;;  %v683_v19 = vld [vmem:[%s258_s29 + $0x64] ss:$8 sps:$4 sm:$0xff]   ;;  %v685_v20 = vld [vmem:[%s258_s29 + $0x60] ss:$8 sps:$4 sm:$0xff]   ;;  %v686_v21 = vld [vmem:[%s258_s29 + $0x54] ss:$8 sps:$4 sm:$0xff]  }
  0x2f   : > { %415 = vmatpush1.bf16.msra.mxu0 %v682_v18  ;;  %v688_v22 = vld [vmem:[%s258_s29 + $0x50] ss:$8 sps:$4 sm:$0xff]   ;;  %v689_v23 = vld [vmem:[%s258_s29 + $0x44] ss:$8 sps:$4 sm:$0xff]   ;;  %v691_v24 = vld [vmem:[%s258_s29 + $0x40] ss:$8 sps:$4 sm:$0xff]  }
  0x30   : > { %416 = vmatprep.subr.bf16.mxu0 %v683_v19  ;;  %v692_v25 = vld [vmem:[%s258_s29 + $0x34] ss:$8 sps:$4 sm:$0xff]   ;;  %v694_v26 = vld [vmem:[%s258_s29 + $0x30] ss:$8 sps:$4 sm:$0xff]   ;;  %v695_v27 = vld [vmem:[%s258_s29 + $0x24] ss:$8 sps:$4 sm:$0xff]  }
  0x31   : > { %v697_v28 = vld [vmem:[%s258_s29 + $0x20] ss:$8 sps:$4 sm:$0xff]   ;;  %v698_v29 = vld [vmem:[%s258_s29 + $0x14] ss:$8 sps:$4 sm:$0xff]   ;;  %v700_v30 = vld [vmem:[%s258_s29 + $0x10] ss:$8 sps:$4 sm:$0xff]  }
  0x32   : > { %v701_v31 = vld [vmem:[%s258_s29 + $0x4] ss:$8 sps:$4 sm:$0xff]   ;;  %v703_v32 = vld [vmem:[%s258_s29] ss:$8 sps:$4 sm:$0xff]   ;;  %s638_s6 = sshll.u32 (%p796_p6), %s735_s11, 4 }
  0x33   : > { %417 = vmatpush1.bf16.msra.mxu0 %v685_v20  ;;  %s488_s9 = scalar_lea.vmem (%p796_p6), %s860_s2, %s638_s6 }
  0x34   : > { %418 = vmatprep.subr.bf16.mxu0 %v686_v21 }
  0x37   : > { %419 = vmatpush1.bf16.msra.mxu0 %v688_v22 }
  0x38   : > { %420 = vmatprep.subr.bf16.mxu0 %v689_v23 }
  0x3b   : > { %421 = vmatpush1.bf16.msra.mxu0 %v691_v24 }
  0x3c   : > { %422 = vmatprep.subr.bf16.mxu0 %v692_v25 }
  0x3f   : > { %423 = vmatpush1.bf16.msra.mxu0 %v694_v26 }
  0x40   : > { %424 = vmatprep.subr.bf16.mxu0 %v695_v27 }
  0x43   : > { %425 = vmatpush1.bf16.msra.mxu0 %v697_v28 }
  0x44   : > { %426 = vmatprep.subr.bf16.mxu0 %v698_v29 }
  0x47   : > { %427 = vmatpush1.bf16.msra.mxu0 %v700_v30 }
  0x48   : > { %428 = vmatprep.subr.bf16.mxu0 %v701_v31 }
  0x4b   : > { %429 = vmatpush1.bf16.msra.mxu0 %v703_v32 }
  0x4e   : > { %447 = vmatmul.mubr.bf16.vlgmr.msra.gmra.mxu0 %v704_v33 }
 0x10e   : > { %v448_v34 = vpop.f32.mrf.mxu0 }
 0x10f   : > { %472 = vst [vmem:[%s283_s5] sm:$0xff] %v448_v34 }
 0x110   : > { %v450_v35 = vpop.f32.mrf.mxu0 }
 0x111   : > { %473 = vst [vmem:[%s283_s5 + $0x8] sm:$0xff] %v450_v35  ;;  %482 = sbr.rel (!%p796_p6) target bundleno = 286 (0x11e), region = 78 }
 0x112   : > { %v452_v36 = vpop.f32.mrf.mxu0 }
 0x113   : > { %474 = vst [vmem:[%s283_s5 + $0x10] sm:$0xff] %v452_v36 }
 0x114   : > { %v454_v37 = vpop.f32.mrf.mxu0 }
 0x115   : > { %475 = vst [vmem:[%s283_s5 + $0x18] sm:$0xff] %v454_v37 }
 0x116   : > { %v501_v38 = vld [vmem:[%s283_s5] sm:$0xff] }
 0x117   : > { %502 = vst [vmem:[%s488_s9] sm:$0xff] %v501_v38 }
 0x118   : > { %v503_v39 = vld [vmem:[%s283_s5 + $0x8] sm:$0xff] }
 0x119   : > { %504 = vst [vmem:[%s488_s9 + $0x8] sm:$0xff] %v503_v39 }
 0x11a   : > { %v505_v40 = vld [vmem:[%s283_s5 + $0x10] sm:$0xff] }
 0x11b   : > { %506 = vst [vmem:[%s488_s9 + $0x100] sm:$0xff] %v505_v40 }
 0x11c   : > { %v507_v41 = vld [vmem:[%s283_s5 + $0x18] sm:$0xff] }
 0x11d   : > { %508 = vst [vmem:[%s488_s9 + $0x108] sm:$0xff] %v507_v41 }
 0x11e PF: > { %s12_s13 = sadd.s32 1, %s743_s13   ;;  %s862_s9 = smov %s731_s10 }
 0x11f   : > { %p9_p11 = scmp.ge.s32.totalorder %s12_s13, 18   ;;  %s863_s10 = smov %s801_s19 }
 0x120   : > { %s864_s11 = smov %s739_s12  ;;  %s865_s12 = smov %s867_s14 }
 0x121   :  { %11 = sbr.rel (!%p9_p11) target bundleno = 3 (0x3), region = 135 }

// kernel: retrain_net_forward.16
= control target key start
LH: loop header
LB: loop body
LE: loop exit
PB: predicated region body
PF: predicated region fallthrough
CT: control target
= control target key end

     0   :  { %s5030_s18 = smov 0   ;;  %s6595_s0 = inlined_call_operand.vmem [shape: bf16[192,256], index: 0, kind: input, shape index: {}, may-alias: {0,1}]   ;;  %s6596_s1 = inlined_call_operand.vmem [shape: bf16[192,256], index: 1, kind: input, shape index: {}, may-alias: {0,1}]   ;;  %s6597_s2 = inlined_call_operand.vmem [shape: bf16[9,256,256], index: 2, kind: input, shape index: {}]   ;;  %s6598_s3 = inlined_call_operand.vmem [shape: f32[1,256], index: 3, kind: input, shape index: {}]   ;;  %s6599_s4 = inlined_call_operand.vmem [shape: f32[1,256], index: 4, kind: input, shape index: {}]   ;;  %s6600_s5 = inlined_call_operand.vmem [shape: bf16[128,256], index: 5, kind: output, shape index: {}]  }
   0x1 LB: > { %s3913_s19 = sadd.s32 4294967295, %s4998_s18   ;;  %p3919_p0 = scmp.ge.s32.totalorder %s4998_s18, 1  ;;  %s4998_s18 = sphi %s5030_s18, %s15_s18  }
   0x2   : > { %p209_p1 = scmp.lt.s32.totalorder %s4998_s18, 3 }
   0x4   : > { %p210_p2 = pnand %p3919_p0, %p209_p1 }
   0x6   : > { %213 = sbr.rel (%p210_p2) target bundleno = 549 (0x225), region = 40 }
   0xb   : > { %v4544_v0 = vld [vmem:[%s6597_s2 + $0x74] ss:$8 sps:$4 sm:$0xff]   ;;  %v4548_v2 = vld [vmem:[%s6597_s2 + $0x70] ss:$8 sps:$4 sm:$0xff]   ;;  %v4550_v4 = vld [vmem:[%s6597_s2 + $0x64] ss:$8 sps:$4 sm:$0xff]  }
   0xc   : > { %v4546_v1 = vld [vmem:[%s6597_s2 + $0x174] ss:$8 sps:$4 sm:$0xff]   ;;  %548 = vmatprep.subr.bf16.mxu0 %v4544_v0  ;;  %v4549_v3 = vld [vmem:[%s6597_s2 + $0x170] ss:$8 sps:$4 sm:$0xff]   ;;  %v4552_v5 = vld [vmem:[%s6597_s2 + $0x164] ss:$8 sps:$4 sm:$0xff]  }
   0xd   : > { %939 = vmatprep.subr.bf16.mxu1 %v4546_v1  ;;  %549 = vmatpush1.bf16.msra.mxu0 %v4548_v2  ;;  %v4554_v6 = vld [vmem:[%s6597_s2 + $0x60] ss:$8 sps:$4 sm:$0xff]   ;;  %v4556_v8 = vld [vmem:[%s6597_s2 + $0x54] ss:$8 sps:$4 sm:$0xff]   ;;  %v4560_v10 = vld [vmem:[%s6597_s2 + $0x50] ss:$8 sps:$4 sm:$0xff]  }
   0xe   : > { %940 = vmatpush1.bf16.msra.mxu1 %v4549_v3  ;;  %550 = vmatprep.subr.bf16.mxu0 %v4550_v4  ;;  %v4555_v7 = vld [vmem:[%s6597_s2 + $0x160] ss:$8 sps:$4 sm:$0xff]   ;;  %v4558_v9 = vld [vmem:[%s6597_s2 + $0x154] ss:$8 sps:$4 sm:$0xff]   ;;  %v4561_v11 = vld [vmem:[%s6597_s2 + $0x150] ss:$8 sps:$4 sm:$0xff]  }
   0xf   : > { %941 = vmatprep.subr.bf16.mxu1 %v4552_v5  ;;  %v4562_v12 = vld [vmem:[%s6597_s2 + $0x44] ss:$8 sps:$4 sm:$0xff]   ;;  %v4566_v14 = vld [vmem:[%s6597_s2 + $0x40] ss:$8 sps:$4 sm:$0xff]   ;;  %v4568_v16 = vld [vmem:[%s6597_s2 + $0x34] ss:$8 sps:$4 sm:$0xff]  }
  0x10   : > { %v4564_v13 = vld [vmem:[%s6597_s2 + $0x144] ss:$8 sps:$4 sm:$0xff]   ;;  %v4567_v15 = vld [vmem:[%s6597_s2 + $0x140] ss:$8 sps:$4 sm:$0xff]   ;;  %v4570_v17 = vld [vmem:[%s6597_s2 + $0x134] ss:$8 sps:$4 sm:$0xff]  }
  0x11   : > { %551 = vmatpush1.bf16.msra.mxu0 %v4554_v6  ;;  %v4572_v18 = vld [vmem:[%s6597_s2 + $0x30] ss:$8 sps:$4 sm:$0xff]   ;;  %v4574_v20 = vld [vmem:[%s6597_s2 + $0x24] ss:$8 sps:$4 sm:$0xff]   ;;  %v4578_v22 = vld [vmem:[%s6597_s2 + $0x20] ss:$8 sps:$4 sm:$0xff]  }
  0x12   : > { %942 = vmatpush1.bf16.msra.mxu1 %v4555_v7  ;;  %552 = vmatprep.subr.bf16.mxu0 %v4556_v8  ;;  %v4573_v19 = vld [vmem:[%s6597_s2 + $0x130] ss:$8 sps:$4 sm:$0xff]   ;;  %v4576_v21 = vld [vmem:[%s6597_s2 + $0x124] ss:$8 sps:$4 sm:$0xff]   ;;  %v4579_v23 = vld [vmem:[%s6597_s2 + $0x120] ss:$8 sps:$4 sm:$0xff]  }
  0x13   : > { %943 = vmatprep.subr.bf16.mxu1 %v4558_v9  ;;  %v4580_v24 = vld [vmem:[%s6597_s2 + $0x14] ss:$8 sps:$4 sm:$0xff]   ;;  %v4584_v26 = vld [vmem:[%s6597_s2 + $0x10] ss:$8 sps:$4 sm:$0xff]   ;;  %v4586_v28 = vld [vmem:[%s6597_s2 + $0x4] ss:$8 sps:$4 sm:$0xff]  }
  0x14   : > { %v4582_v25 = vld [vmem:[%s6597_s2 + $0x114] ss:$8 sps:$4 sm:$0xff]   ;;  %v4585_v27 = vld [vmem:[%s6597_s2 + $0x110] ss:$8 sps:$4 sm:$0xff]   ;;  %v4588_v29 = vld [vmem:[%s6597_s2 + $0x104] ss:$8 sps:$4 sm:$0xff]  }
  0x15   : > { %553 = vmatpush1.bf16.msra.mxu0 %v4560_v10  ;;  %s5130_s9 = sshll.u32 %s3913_s19, 3  ;;  %v4590_v30 = vld [vmem:[%s6597_s2] ss:$8 sps:$4 sm:$0xff]   ;;  %v4592_v32 = vld [vmem:[%s6597_s2 + $0xf4] ss:$8 sps:$4 sm:$0xff]   ;;  %vm1131_vm1 = vcmask 1046528  }
  0x16   : > { %944 = vmatpush1.bf16.msra.mxu1 %v4561_v11  ;;  %554 = vmatprep.subr.bf16.mxu0 %v4562_v12  ;;  %v4591_v31 = vld [vmem:[%s6597_s2 + $0x100] ss:$8 sps:$4 sm:$0xff]   ;;  %p248_p3 = scmp.lt.s32.totalorder %s5130_s9, 23  ;;  %v4594_v33 = vld [vmem:[%s6597_s2 + $0x1f4] ss:$8 sps:$4 sm:$0xff]   ;;  %s4503_s8 = sadd.s32 8, %s5130_s9 }
  0x17   : > { %945 = vmatprep.subr.bf16.mxu1 %v4564_v13  ;;  %v4596_v34 = vld [vmem:[%s6597_s2 + $0xf0] ss:$8 sps:$4 sm:$0xff]   ;;  %v4598_v36 = vld [vmem:[%s6597_s2 + $0xe4] ss:$8 sps:$4 sm:$0xff]   ;;  %v4602_v38 = vld [vmem:[%s6597_s2 + $0xe0] ss:$8 sps:$4 sm:$0xff]  }
  0x18   : > { %v4597_v35 = vld [vmem:[%s6597_s2 + $0x1f0] ss:$8 sps:$4 sm:$0xff]   ;;  %s249_s25 = scalar_select %p248_p3, %s5130_s9, 23  ;;  %v4600_v37 = vld [vmem:[%s6597_s2 + $0x1e4] ss:$8 sps:$4 sm:$0xff]  }
  0x19   : > { %555 = vmatpush1.bf16.msra.mxu0 %v4566_v14  ;;  %v4603_v39 = vld [vmem:[%s6597_s2 + $0x1e0] ss:$8 sps:$4 sm:$0xff]   ;;  %v4604_v40 = vld [vmem:[%s6597_s2 + $0xd4] ss:$8 sps:$4 sm:$0xff]   ;;  %v4608_v42 = vld [vmem:[%s6597_s2 + $0xd0] ss:$8 sps:$4 sm:$0xff]  }
  0x1a   : > { %946 = vmatpush1.bf16.msra.mxu1 %v4567_v15  ;;  %556 = vmatprep.subr.bf16.mxu0 %v4568_v16  ;;  %s4488_s10 = sshll.u32 %s249_s25, 3  ;;  %v4606_v41 = vld [vmem:[%s6597_s2 + $0x1d4] ss:$8 sps:$4 sm:$0xff]   ;;  %v4609_v43 = vld [vmem:[%s6597_s2 + $0x1d0] ss:$8 sps:$4 sm:$0xff]   ;;  %p5310_p4 = scmp.lt.s32.totalorder %s4503_s8, 23 }
  0x1b   : > { %947 = vmatprep.subr.bf16.mxu1 %v4570_v17  ;;  %s5179_s20 = scalar_lea.vmem %s6595_s0, %s4488_s10  ;;  %v4610_v44 = vld [vmem:[%s6597_s2 + $0xc4] ss:$8 sps:$4 sm:$0xff]   ;;  %v4614_v46 = vld [vmem:[%s6597_s2 + $0xc0] ss:$8 sps:$4 sm:$0xff]   ;;  %v4616_v54 = vld [vmem:[%s6597_s2 + $0xb4] ss:$8 sps:$4 sm:$0xff]  }
  0x1c   : > { %v4612_v45 = vld [vmem:[%s6597_s2 + $0x1c4] ss:$8 sps:$4 sm:$0xff]   ;;  %v274_v52 = vld [vmem:[%s5179_s20 + $0x10] sm:$0xff]  ;;  %v4615_v53 = vld [vmem:[%s6597_s2 + $0x1c0] ss:$8 sps:$4 sm:$0xff]   ;;  %s6649_s8 = smov (!%p5310_p4, %s4503_s8), 23 }
  0x1d   : > { %557 = vmatpush1.bf16.msra.mxu0 %v4572_v18  ;;  %v272_v47 = vld [vmem:[%s5179_s20] sm:$0xff]  ;;  %v273_v48 = vld [vmem:[%s5179_s20 + $0x8] sm:$0xff]  ;;  %v275_v57 = vld [vmem:[%s5179_s20 + $0x18] sm:$0xff]  ;;  %v285_v58 = vunpack.c.h.bf16 %v274_v52  ;;  %v284_v59 = vunpack.c.l.bf16 %v274_v52  ;;  %vm698_vm0 = vsmask.f32 7424  ;;  %s4492_s10 = sshll.u32 %s6649_s8, 3 }
  0x1e   : > { %948 = vmatpush1.bf16.msra.mxu1 %v4573_v19  ;;  %558 = vmatprep.subr.bf16.mxu0 %v4574_v20  ;;  %v280_v49 = vunpack.c.l.bf16 %v272_v47  ;;  %v281_v50 = vunpack.c.h.bf16 %v272_v47  ;;  %v4640_v51 = vld [vmem:[%s5179_s20 + $0x4] ss:$8 sps:$4 sm:$0xff]   ;;  %v5200_v55 = vunpack.c.l.bf16 %v273_v48  ;;  %v5202_v56 = vunpack.c.h.bf16 %v273_v48  ;;  %v4618_v60 = vld [vmem:[%s6597_s2 + $0x1b4] ss:$8 sps:$4 sm:$0xff]   ;;  %v4620_v63 = vld [vmem:[%s6597_s2 + $0xb0] ss:$8 sps:$4 sm:$0xff]   ;;  %s5397_s22 = scalar_lea.vmem %s6596_s1, %s4492_s10 }
  0x1f   : > { %949 = vmatprep.subr.bf16.mxu1 %v4576_v21  ;;  %v287_v61 = vunpack.c.h.bf16 %v275_v57  ;;  %v286_v62 = vunpack.c.l.bf16 %v275_v57  ;;  %580 = vmatprep.mubr.bf16.mxu0 %v4640_v51  ;;  %301 = vst [vmem:[#allocation2 + $0x28] sm:$0xff] %v285_v58  ;;  %300 = vst [vmem:[#allocation2 + $0x60] sm:$0xff] %v284_v59  ;;  %v4621_v0 = vld [vmem:[%s6597_s2 + $0x1b0] ss:$8 sps:$4 sm:$0xff]   ;;  %v4622_v1 = vld [vmem:[%s6597_s2 + $0xa4] ss:$8 sps:$4 sm:$0xff]  }
  0x20   : > { %296 = vst [vmem:[#allocation2 + $0xb0] sm:$0xff] %v280_v49  ;;  %297 = vst [vmem:[#allocation2] sm:$0xff] %v281_v50  ;;  %v4624_v2 = vld [vmem:[%s6597_s2 + $0x1a4] ss:$8 sps:$4 sm:$0xff]   ;;  %v5223_v3 = vld [vmem:[%s5179_s20 + $0x14] ss:$8 sps:$4 sm:$0xff]  }
  0x21   : > { %559 = vmatpush1.bf16.msra.mxu0 %v4578_v22  ;;  %298 = vst [vmem:[#allocation2 + $0x10] sm:$0xff] %v5200_v55  ;;  %299 = vst [vmem:[#allocation2 + $0x48] sm:$0xff] %v5202_v56  ;;  %v4626_v4 = vld [vmem:[%s6597_s2 + $0xa0] ss:$8 sps:$4 sm:$0xff]   ;;  %v5232_v6 = vld [vmem:[%s5179_s20 + $0x10] ss:$8 sps:$4 sm:$0xff]  }
  0x22   : > { %950 = vmatpush1.bf16.msra.mxu1 %v4579_v23  ;;  %560 = vmatprep.subr.bf16.mxu0 %v4580_v24  ;;  %303 = vst [vmem:[#allocation2 + $0x78] sm:$0xff] %v287_v61  ;;  %302 = vst [vmem:[#allocation2 + $0x40] sm:$0xff] %v286_v62  ;;  %v4627_v5 = vld [vmem:[%s6597_s2 + $0x1a0] ss:$8 sps:$4 sm:$0xff]   ;;  %v4628_v9 = vld [vmem:[%s6597_s2 + $0x94] ss:$8 sps:$4 sm:$0xff]  }
  0x23   : > { %951 = vmatprep.subr.bf16.mxu1 %v4582_v25  ;;  %v4630_v10 = vld [vmem:[%s6597_s2 + $0x194] ss:$8 sps:$4 sm:$0xff]   ;;  %v719_v12 = vshll.u32 %v5223_v3, 16  ;;  %v4632_v14 = vld [vmem:[%s6597_s2 + $0x90] ss:$8 sps:$4 sm:$0xff]   ;;  %v707_v22 = vshll.u32 %v5232_v6, 16 }
  0x24   : > { %v4633_v15 = vld [vmem:[%s6597_s2 + $0x190] ss:$8 sps:$4 sm:$0xff]   ;;  %v4634_v16 = vld [vmem:[%s6597_s2 + $0x84] ss:$8 sps:$4 sm:$0xff]   ;;  %p266_p5 = scmp.lt.s32.totalorder %s5130_s9, 15 }
  0x25   : > { %561 = vmatpush1.bf16.msra.mxu0 %v4584_v26  ;;  %v4636_v20 = vld [vmem:[%s6597_s2 + $0x184] ss:$8 sps:$4 sm:$0xff]   ;;  %v721_v24 = vrot.slane %v719_v12, 1  ;;  %v4638_v26 = vld [vmem:[%s6597_s2 + $0x80] ss:$8 sps:$4 sm:$0xff]   ;;  %v5359_v12 = vld [vmem:[%s5179_s20 + $0x30] sm:$0xff] }
  0x26   : > { %952 = vmatpush1.bf16.msra.mxu1 %v4585_v27  ;;  %562 = vmatprep.subr.bf16.mxu0 %v4586_v28  ;;  %v4639_v27 = vld [vmem:[%s6597_s2 + $0x180] ss:$8 sps:$4 sm:$0xff]   ;;  %v4659_v47 = vld [vmem:[%s6597_s2 + $0x350] ss:$8 sps:$4 sm:$0xff]   ;;  %v5317_v51 = vld [vmem:[%s5179_s20 + $0x24] ss:$8 sps:$4 sm:$0xff]  }
  0x27   : > { %953 = vmatprep.subr.bf16.mxu1 %v4588_v29  ;;  %v638_v7 = vld [vmem:[#allocation2] sm:$0xfe]  ;;  %v637_v8 = vld [vmem:[#allocation2 + $0xb0] sm:$0xfe]  ;;  %v277_v49 = vld [vmem:[%s5179_s20 + $0x28] sm:$0xff]  ;;  %v735_v61 = vshll.u32 %v5317_v51, 16 }
  0x28   : > { %v656_v11 = vpack.c.bf16 %v5202_v56, %v638_v7  ;;  %v655_v13 = vpack.c.bf16 %v5200_v55, %v637_v8  ;;  %v5306_v48 = vld [vmem:[%s5179_s20 + $0x20] sm:$0xff]  ;;  %v291_v57 = vunpack.c.h.bf16 %v277_v49  ;;  %v290_v58 = vunpack.c.l.bf16 %v277_v49  ;;  %s6651_s9 = smov (!%p266_p5, %s5130_s9), 15 }
  0x29   : > { %563 = vmatpush1.bf16.msra.mxu0 %v4590_v30  ;;  %v709_v30 = vrot.slane %v707_v22, 1  ;;  %v289_v50 = vunpack.c.h.bf16 %v5306_v48  ;;  %v288_v52 = vunpack.c.l.bf16 %v5306_v48  ;;  %v4667_v59 = vld [vmem:[%s6597_s2 + $0x344] ss:$8 sps:$4 sm:$0xff]   ;;  %v747_v7 = vshrl.u32 %v5317_v51, 16  ;;  %s4493_s10 = sshll.u32 %s6651_s9, 3 }
  0x2a   : > { %954 = vmatpush1.bf16.msra.mxu1 %v4591_v31  ;;  %564 = vmatprep.subr.bf16.mxu0 %v4592_v32  ;;  %v712_v17 = vshrl.u32 %v656_v11, 16  ;;  %v714_v18 = vshll.u32 %v656_v11, 16  ;;  %v702_v19 = vshll.u32 %v655_v13, 16  ;;  %v700_v21 = vshrl.u32 %v655_v13, 16  ;;  %v4646_v31 = vld [vmem:[%s6597_s2 + $0x274] ss:$8 sps:$4 sm:$0xff]   ;;  %s6554_s12 = scalar_lea.vmem %s6600_s5, %s4493_s10 }
  0x2b   : > { %955 = vmatprep.subr.bf16.mxu1 %v4594_v33  ;;  %v4649_v33 = vld [vmem:[%s6597_s2 + $0x374] ss:$8 sps:$4 sm:$0xff]   ;;  %305 = vst [vmem:[#allocation2 + $0x90] sm:$0xff] %v289_v50  ;;  %304 = vst [vmem:[#allocation2 + $0x88] sm:$0xff] %v288_v52  ;;  %v4676_v22 = vld [vmem:[%s6597_s2 + $0x224] ss:$8 sps:$4 sm:$0xff]  }
  0x2c   : > { %v716_v23 = vrot.slane %v714_v18, 1  ;;  %v704_v25 = vrot.slane %v702_v19, 1  ;;  %307 = vst [vmem:[#allocation2 + $0x98] sm:$0xff] %v291_v57  ;;  %306 = vst [vmem:[#allocation2 + $0x18] sm:$0xff] %v290_v58  ;;  %v5362_v13 = vld [vmem:[%s5179_s20 + $0x38] sm:$0xff] }
  0x2d   : > { %565 = vmatpush2.bf16.msra.mxu0 %v4596_v34  ;;  %v4642_v34 = vld [vmem:[%s5179_s20] ss:$8 sps:$4 sm:$0xff]   ;;  %v294_v18 = vunpack.c.l.bf16 %v5362_v13  ;;  %v5373_v19 = vld [vmem:[%s5179_s20 + $0x30] ss:$8 sps:$4 sm:$0xff]   ;;  %v4842_v48 = vld [vmem:[%s6597_s2 + $0x484] ss:$8 sps:$4 sm:$0xff]  }
  0x2e   : > { %956 = vmatpush2.bf16.msra.mxu1 %v4597_v35  ;;  %566 = vmatprep.subr.bf16.mxu0 %v4598_v36  ;;  %v717_v28 = vor.u32 %v716_v23, %v712_v17  ;;  %v705_v29 = vor.u32 %v704_v25, %v700_v21  ;;  %v4644_v35 = vld [vmem:[%s6597_s2 + $0x270] ss:$8 sps:$4 sm:$0xff]   ;;  %v292_v17 = vunpack.c.l.bf16 %v5359_v12  ;;  %v755_v49 = vshrl.u32 %v5373_v19, 16 }
  0x2f   : > { %957 = vmatprep.subr.bf16.mxu1 %v4600_v37  ;;  %v4647_v36 = vld [vmem:[%s6597_s2 + $0x370] ss:$8 sps:$4 sm:$0xff]   ;;  %310 = vst [vmem:[#allocation2 + $0x70] sm:$0xff] %v294_v18 }
  0x30   : > { %v722_v32 = vsel %vm698_vm0, %v717_v28, %v721_v24  ;;  %v710_v37 = vsel %vm698_vm0, %v705_v29, %v709_v30  ;;  %v4671_v21 = vld [vmem:[%s6597_s2 + $0x330] ss:$8 sps:$4 sm:$0xff]   ;;  %308 = vst [vmem:[#allocation2 + $0x38] sm:$0xff] %v292_v17  ;;  %v4674_v28 = vld [vmem:[%s6597_s2 + $0x220] ss:$8 sps:$4 sm:$0xff]  }
  0x31   : > { %567 = vmatpush2.bf16.msra.mxu0 %v4602_v38  ;;  %971 = vmatprep.mubr.bf16.mxu1 %v722_v32  ;;  %v4652_v38 = vld [vmem:[%s6597_s2 + $0x264] ss:$8 sps:$4 sm:$0xff]   ;;  %v4682_v32 = vld [vmem:[%s6597_s2 + $0x214] ss:$8 sps:$4 sm:$0xff]  }
  0x32   : > { %958 = vmatpush2.bf16.msra.mxu1 %v4603_v39  ;;  %568 = vmatprep.subr.bf16.mxu0 %v4604_v40  ;;  %v4655_v39 = vld [vmem:[%s6597_s2 + $0x364] ss:$8 sps:$4 sm:$0xff]   ;;  %v4650_v40 = vld [vmem:[%s6597_s2 + $0x260] ss:$8 sps:$4 sm:$0xff]   ;;  %v1060_v57 = vld [vmem:[#allocation2 + $0xb0] sm:$0xfc] }
  0x33   : > { %959 = vmatprep.subr.bf16.mxu1 %v4606_v41  ;;  %v4653_v41 = vld [vmem:[%s6597_s2 + $0x360] ss:$8 sps:$4 sm:$0xff]  }
  0x35   : > { %569 = vmatpush2.bf16.msra.mxu0 %v4608_v42  ;;  %v4658_v42 = vld [vmem:[%s6597_s2 + $0x254] ss:$8 sps:$4 sm:$0xff]  }
  0x36   : > { %960 = vmatpush2.bf16.msra.mxu1 %v4609_v43  ;;  %570 = vmatprep.subr.bf16.mxu0 %v4610_v44  ;;  %v4661_v43 = vld [vmem:[%s6597_s2 + $0x354] ss:$8 sps:$4 sm:$0xff]   ;;  %v731_v44 = vshrl.u32 %v5223_v3, 16 }
  0x37   : > { %961 = vmatprep.subr.bf16.mxu1 %v4612_v45  ;;  %v723_v45 = vshrl.u32 %v5232_v6, 16 }
  0x39   : > { %571 = vmatpush2.bf16.msra.mxu0 %v4614_v46  ;;  %v4656_v46 = vld [vmem:[%s6597_s2 + $0x250] ss:$8 sps:$4 sm:$0xff]   ;;  %v725_v62 = vor.u32 %v723_v45, %v709_v30  ;;  %v4694_v45 = vld [vmem:[%s6597_s2 + $0x2f4] ss:$8 sps:$4 sm:$0xff]  }
  0x3a   : > { %962 = vmatpush2.bf16.msra.mxu1 %v4615_v53  ;;  %572 = vmatprep.subr.bf16.mxu0 %v4616_v54  ;;  %v5321_v53 = vld [vmem:[%s5179_s20 + $0x20] ss:$8 sps:$4 sm:$0xff]   ;;  %v4664_v54 = vld [vmem:[%s6597_s2 + $0x244] ss:$8 sps:$4 sm:$0xff]  }
  0x3b   : > { %963 = vmatprep.subr.bf16.mxu1 %v4618_v60  ;;  %v733_v60 = vor.u32 %v731_v44, %v721_v24  ;;  %v739_v8 = vshrl.u32 %v5321_v53, 16  ;;  %v4689_v44 = vld [vmem:[%s6597_s2 + $0x300] ss:$8 sps:$4 sm:$0xff]  }
  0x3d   : > { %573 = vmatpush2.bf16.msra.mxu0 %v4620_v63  ;;  %v727_v63 = vshll.u32 %v5321_v53, 16 }
  0x3e   : > { %964 = vmatpush2.bf16.msra.mxu1 %v4621_v0  ;;  %574 = vmatprep.subr.bf16.mxu0 %v4622_v1  ;;  %v4662_v0 = vld [vmem:[%s6597_s2 + $0x240] ss:$8 sps:$4 sm:$0xff]  }
  0x3f   : > { %965 = vmatprep.subr.bf16.mxu1 %v4624_v2  ;;  %v4665_v1 = vld [vmem:[%s6597_s2 + $0x340] ss:$8 sps:$4 sm:$0xff]   ;;  %v737_v2 = vrot.slane %v735_v61, 1  ;;  %v1136_v61 = vrot.slane %v5223_v3, 1 }
  0x41   : > { %575 = vmatpush2.bf16.msra.mxu0 %v4626_v4  ;;  %v729_v4 = vrot.slane %v727_v63, 1  ;;  %v749_v23 = vor.u32 %v747_v7, %v737_v2  ;;  %v1133_v63 = vrot.slane %v5232_v6, 1  ;;  %v4705_v7 = vld [vmem:[%s6597_s2 + $0x3e4] ss:$8 sps:$4 sm:$0xff]  }
  0x42   : > { %966 = vmatpush2.bf16.msra.mxu1 %v4627_v5  ;;  %576 = vmatprep.subr.bf16.mxu0 %v4628_v9  ;;  %v4670_v5 = vld [vmem:[%s6597_s2 + $0x234] ss:$8 sps:$4 sm:$0xff]  }
  0x43   : > { %967 = vmatprep.subr.bf16.mxu1 %v4630_v10  ;;  %v4673_v9 = vld [vmem:[%s6597_s2 + $0x334] ss:$8 sps:$4 sm:$0xff]   ;;  %v738_v10 = vsel %vm698_vm0, %v733_v60, %v737_v2  ;;  %v730_v11 = vsel %vm698_vm0, %v725_v62, %v729_v4  ;;  %v741_v25 = vor.u32 %v739_v8, %v729_v4  ;;  %v1078_v62 = vpack.c.bf16 %v5200_v55, %v1060_v57  ;;  %v4695_v4 = vld [vmem:[%s6597_s2 + $0x3f0] ss:$8 sps:$4 sm:$0xff]   ;;  %v4702_v55 = vld [vmem:[%s6597_s2 + $0x2e4] ss:$8 sps:$4 sm:$0xff]  }
  0x44   : > { %v4740_v57 = vld [vmem:[%s6597_s2 + $0x284] ss:$8 sps:$4 sm:$0xff]  }
  0x45   : > { %577 = vmatpush2.bf16.msra.mxu0 %v4632_v14  ;;  %v293_v14 = vunpack.c.h.bf16 %v5359_v12  ;;  %v4854_v12 = vld [vmem:[%s6597_s2 + $0x664] ss:$8 sps:$4 sm:$0xff]  }
  0x46   : > { %968 = vmatpush2.bf16.msra.mxu1 %v4633_v15  ;;  %578 = vmatprep.subr.bf16.mxu0 %v4634_v16  ;;  %v295_v15 = vunpack.c.h.bf16 %v5362_v13  ;;  %v5368_v16 = vld [vmem:[%s5179_s20 + $0x34] ss:$8 sps:$4 sm:$0xff]  }
  0x47   : > { %969 = vmatprep.subr.bf16.mxu1 %v4636_v20  ;;  %v4668_v20 = vld [vmem:[%s6597_s2 + $0x230] ss:$8 sps:$4 sm:$0xff]   ;;  %309 = vst [vmem:[#allocation2 + $0x50] sm:$0xff] %v293_v14  ;;  %v751_v24 = vshll.u32 %v5368_v16, 16 }
  0x48   : > { %311 = vst [vmem:[#allocation2 + $0xa0] sm:$0xff] %v295_v15 }
  0x49   : > { %579 = vmatpush2.bf16.msra.mxu0 %v4638_v26  ;;  %v743_v26 = vshll.u32 %v5373_v19, 16  ;;  %v753_v29 = vrot.slane %v751_v24, 1  ;;  %v4708_v24 = vld [vmem:[%s6597_s2 + $0x2d4] ss:$8 sps:$4 sm:$0xff]  }
  0x4a   : > { %970 = vmatpush2.bf16.msra.mxu1 %v4639_v27  ;;  %1318 = vmatprep.subr.bf16.mxu0 %v4646_v31  ;;  %v4679_v27 = vld [vmem:[%s6597_s2 + $0x324] ss:$8 sps:$4 sm:$0xff]   ;;  %v4677_v31 = vld [vmem:[%s6597_s2 + $0x320] ss:$8 sps:$4 sm:$0xff]  }
  0x4b   : > { %1656 = vmatprep.subr.bf16.mxu1 %v4649_v33  ;;  %v745_v30 = vrot.slane %v743_v26, 1  ;;  %v754_v33 = vsel %vm698_vm0, %v749_v23, %v753_v29  ;;  %v4703_v23 = vld [vmem:[%s6597_s2 + $0x3e0] ss:$8 sps:$4 sm:$0xff]  }
  0x4c   : > { %581 = vmatmul.mubr.bf16.vlgmr.msra.gmra.mxu0 %v4642_v34 }
  0x4d   : > { %972 = vmatmul.mubr.bf16.vlgmr.msra.gmra.mxu1 %v710_v37  ;;  %1319 = vmatpush1.bf16.msra.mxu0 %v4644_v35  ;;  %v746_v34 = vsel %vm698_vm0, %v741_v25, %v745_v30  ;;  %v5412_v35 = vld [vmem:[%s5397_s22] sm:$0xff]  ;;  %v4711_v25 = vld [vmem:[%s6597_s2 + $0x3d4] ss:$8 sps:$4 sm:$0xff]  }
  0x4e   : > { %1657 = vmatpush1.bf16.msra.mxu1 %v4647_v36  ;;  %1320 = vmatprep.subr.bf16.mxu0 %v4652_v38  ;;  %v4685_v36 = vld [vmem:[%s6597_s2 + $0x314] ss:$8 sps:$4 sm:$0xff]   ;;  %v317_v37 = vunpack.c.h.bf16 %v5412_v35  ;;  %v316_v38 = vunpack.c.l.bf16 %v5412_v35 }
  0x4f   : > { %1658 = vmatprep.subr.bf16.mxu1 %v4655_v39  ;;  %590 = vmatprep.mubr.bf16.mxu0 %v5223_v3  ;;  %v4680_v39 = vld [vmem:[%s6597_s2 + $0x210] ss:$8 sps:$4 sm:$0xff]  }
  0x50   : > { %981 = vmatprep.mubr.bf16.mxu1 %v738_v10  ;;  %325 = vst [vmem:[#allocation2 + $0x68] sm:$0xff] %v317_v37  ;;  %324 = vst [vmem:[#allocation2 + $0xa8] sm:$0xff] %v316_v38  ;;  %v757_v10 = vor.u32 %v755_v49, %v745_v30  ;;  %v4709_v30 = vld [vmem:[%s6597_s2 + $0x3d0] ss:$8 sps:$4 sm:$0xff]  }
  0x51   : > { %1321 = vmatpush1.bf16.msra.mxu0 %v4650_v40  ;;  %v4683_v40 = vld [vmem:[%s6597_s2 + $0x310] ss:$8 sps:$4 sm:$0xff]  }
  0x52   : > { %1659 = vmatpush1.bf16.msra.mxu1 %v4653_v41  ;;  %1322 = vmatprep.subr.bf16.mxu0 %v4658_v42  ;;  %v4688_v41 = vld [vmem:[%s6597_s2 + $0x204] ss:$8 sps:$4 sm:$0xff]   ;;  %v4732_v49 = vld [vmem:[%s6597_s2 + $0x290] ss:$8 sps:$4 sm:$0xff]  }
  0x53   : > { %1660 = vmatprep.subr.bf16.mxu1 %v4661_v43  ;;  %v4691_v42 = vld [vmem:[%s6597_s2 + $0x304] ss:$8 sps:$4 sm:$0xff]   ;;  %v4686_v43 = vld [vmem:[%s6597_s2 + $0x200] ss:$8 sps:$4 sm:$0xff]   ;;  %v4758_v3 = vld [vmem:[%s6597_s2 + $0x450] ss:$8 sps:$4 sm:$0xff]  }
  0x54   : > { %591 = vmatmul.mubr.bf16.gmra.mxu0 %v5232_v6  ;;  %v4766_v6 = vld [vmem:[%s6597_s2 + $0x440] ss:$8 sps:$4 sm:$0xff]  }
  0x55   : > { %1323 = vmatpush1.bf16.msra.mxu0 %v4656_v46  ;;  %600 = vmatprep.mubr.bf16.mxu0 %v5317_v51  ;;  %v4697_v46 = vld [vmem:[%s6597_s2 + $0x3f4] ss:$8 sps:$4 sm:$0xff]  }
  0x56   : > { %1661 = vmatpush1.bf16.msra.mxu1 %v4659_v47  ;;  %1324 = vmatprep.subr.bf16.mxu0 %v4664_v54  ;;  %v763_v47 = vshrl.u32 %v5368_v16, 16  ;;  %v1061_v54 = vld [vmem:[#allocation2] sm:$0xfc] }
  0x57   : > { %1662 = vmatprep.subr.bf16.mxu1 %v4667_v59  ;;  %982 = vmatmul.mubr.bf16.gmra.mxu1 %v730_v11  ;;  %v654_v58 = vld [vmem:[#allocation2 + $0x68] sm:$0x1]  ;;  %v1079_v60 = vpack.c.bf16 %v5202_v56, %v1061_v54  ;;  %v4735_v54 = vld [vmem:[%s6597_s2 + $0x390] ss:$8 sps:$4 sm:$0xff]  }
  0x58   : > { %991 = vmatprep.mubr.bf16.mxu1 %v754_v33  ;;  %v653_v59 = vld [vmem:[#allocation2 + $0xa8] sm:$0x1]  ;;  %v765_v8 = vor.u32 %v763_v47, %v753_v29  ;;  %v4706_v29 = vld [vmem:[%s6597_s2 + $0x2d0] ss:$8 sps:$4 sm:$0xff]   ;;  %v4737_v47 = vld [vmem:[%s6597_s2 + $0x394] ss:$8 sps:$4 sm:$0xff]  }
  0x59   : > { %1325 = vmatpush1.bf16.msra.mxu0 %v4662_v0  ;;  %v4692_v0 = vld [vmem:[%s6597_s2 + $0x2f0] ss:$8 sps:$4 sm:$0xff]   ;;  %v663_v2 = vpack.c.bf16 %v653_v59, %v653_v59  ;;  %v1135_v56 = vrot.slane %v1079_v60, 1  ;;  %v4714_v33 = vld [vmem:[%s6597_s2 + $0x2c0] ss:$8 sps:$4 sm:$0xff]  }
  0x5a   : > { %1663 = vmatpush1.bf16.msra.mxu1 %v4665_v1  ;;  %1326 = vmatprep.subr.bf16.mxu0 %v4670_v5  ;;  %v664_v1 = vpack.c.bf16 %v654_v58, %v654_v58  ;;  %v1132_v5 = vrot.slane %v1078_v62, 1  ;;  %v4743_v58 = vld [vmem:[%s6597_s2 + $0x384] ss:$8 sps:$4 sm:$0xff]   ;;  %v4738_v59 = vld [vmem:[%s6597_s2 + $0x280] ss:$8 sps:$4 sm:$0xff]  }
  0x5b   : > { %1664 = vmatprep.subr.bf16.mxu1 %v4673_v9  ;;  %v759_v11 = vshll.u32 %v663_v2, 16  ;;  %v1137_v15 = vsel %vm1131_vm1, %v1135_v56, %v1136_v61  ;;  %v4741_v60 = vld [vmem:[%s6597_s2 + $0x380] ss:$8 sps:$4 sm:$0xff]   ;;  %v4748_v62 = vld [vmem:[%s6597_s2 + $0x474] ss:$8 sps:$4 sm:$0xff]   ;;  %v1140_v56 = vrot.slane %v5317_v51, 1 }
  0x5c   : > { %601 = vmatmul.mubr.bf16.gmra.mxu0 %v5321_v53  ;;  %v767_v9 = vshll.u32 %v664_v1, 16  ;;  %v5473_v18 = vsel %vm1131_vm1, %v1132_v5, %v1133_v63  ;;  %v4745_v1 = vld [vmem:[%s5179_s20 + $0x8] ss:$8 sps:$4 sm:$0xff]   ;;  %v4754_v5 = vld [vmem:[%s6597_s2 + $0x464] ss:$8 sps:$4 sm:$0xff]  }
  0x5d   : > { %1327 = vmatpush1.bf16.msra.mxu0 %v4668_v20  ;;  %610 = vmatprep.mubr.bf16.mxu0 %v5368_v16  ;;  %v4746_v2 = vld [vmem:[%s6597_s2 + $0x470] ss:$8 sps:$4 sm:$0xff]   ;;  %v4752_v51 = vld [vmem:[%s6597_s2 + $0x460] ss:$8 sps:$4 sm:$0xff]  }
  0x5e   : > { %1665 = vmatpush1.bf16.msra.mxu1 %v4671_v21  ;;  %1328 = vmatprep.subr.bf16.mxu0 %v4676_v22  ;;  %v769_v20 = vrot.slane %v767_v9, 1  ;;  %v761_v21 = vrot.slane %v759_v11, 1  ;;  %v4700_v22 = vld [vmem:[%s6597_s2 + $0x2e0] ss:$8 sps:$4 sm:$0xff]   ;;  %v1141_v9 = vsel %vm1131_vm1, %v1136_v61, %v1140_v56  ;;  %v4760_v11 = vld [vmem:[%s6597_s2 + $0x454] ss:$8 sps:$4 sm:$0xff]  }
  0x5f   : > { %1666 = vmatprep.subr.bf16.mxu1 %v4679_v27  ;;  %992 = vmatmul.mubr.bf16.gmra.mxu1 %v746_v34  ;;  %v4717_v34 = vld [vmem:[%s6597_s2 + $0x3c0] ss:$8 sps:$4 sm:$0xff]  }
  0x60   : > { %v770_v26 = vsel %vm698_vm0, %v765_v8, %v769_v20  ;;  %v762_v27 = vsel %vm698_vm0, %v757_v10, %v761_v21  ;;  %v4755_v8 = vld [vmem:[%s6597_s2 + $0x560] ss:$8 sps:$4 sm:$0xff]   ;;  %v1138_v10 = vrot.slane %v5321_v53, 1  ;;  %v4761_v53 = vld [vmem:[%s6597_s2 + $0x550] ss:$8 sps:$4 sm:$0xff]  }
  0x61   : > { %1329 = vmatpush1.bf16.msra.mxu0 %v4674_v28  ;;  %1001 = vmatprep.mubr.bf16.mxu1 %v770_v26  ;;  %v4744_v28 = vld [vmem:[%s5179_s20 + $0xc] ss:$8 sps:$4 sm:$0xff]   ;;  %v4765_v61 = vld [vmem:[%s5179_s20 + $0x18] ss:$8 sps:$4 sm:$0xff]   ;;  %v1077_v20 = vld [vmem:[#allocation2 + $0x68] sm:$0x3] }
  0x62   : > { %1667 = vmatpush1.bf16.msra.mxu1 %v4677_v31  ;;  %1330 = vmatprep.subr.bf16.mxu0 %v4682_v32  ;;  %v4716_v31 = vld [vmem:[%s6597_s2 + $0x2c4] ss:$8 sps:$4 sm:$0xff]   ;;  %v1139_v21 = vsel %vm1131_vm1, %v1133_v63, %v1138_v10  ;;  %v1142_v26 = vrot.slane %v5373_v19, 1 }
  0x63   : > { %1668 = vmatprep.subr.bf16.mxu1 %v4685_v36  ;;  %v4719_v32 = vld [vmem:[%s6597_s2 + $0x3c4] ss:$8 sps:$4 sm:$0xff]   ;;  %v4722_v36 = vld [vmem:[%s6597_s2 + $0x2b4] ss:$8 sps:$4 sm:$0xff]  }
  0x64   : > { %611 = vmatmul.mubr.bf16.gmra.mxu0 %v5373_v19 }
  0x65   : > { %1331 = vmatpush1.bf16.msra.mxu0 %v4680_v39  ;;  %1350 = vmatprep.mubr.bf16.mxu0 %v1137_v15  ;;  %v4725_v39 = vld [vmem:[%s6597_s2 + $0x3b4] ss:$8 sps:$4 sm:$0xff]  }
  0x66   : > { %1669 = vmatpush1.bf16.msra.mxu1 %v4683_v40  ;;  %1332 = vmatprep.subr.bf16.mxu0 %v4688_v41  ;;  %v4720_v40 = vld [vmem:[%s6597_s2 + $0x2b0] ss:$8 sps:$4 sm:$0xff]   ;;  %v4763_v15 = vld [vmem:[%s6597_s2 + $0x554] ss:$8 sps:$4 sm:$0xff]  }
  0x67   : > { %1670 = vmatprep.subr.bf16.mxu1 %v4691_v42  ;;  %1002 = vmatmul.mubr.bf16.gmra.mxu1 %v762_v27  ;;  %v4723_v41 = vld [vmem:[%s6597_s2 + $0x3b0] ss:$8 sps:$4 sm:$0xff]   ;;  %v4728_v42 = vld [vmem:[%s6597_s2 + $0x2a4] ss:$8 sps:$4 sm:$0xff]  }
  0x68   : > { %1688 = vmatprep.mubr.bf16.mxu1 %v4744_v28  ;;  %v1778_v27 = vld [vmem:[#allocation2 + $0x48] sm:$0xfe] }
  0x69   : > { %1333 = vmatpush1.bf16.msra.mxu0 %v4686_v43  ;;  %v4731_v43 = vld [vmem:[%s6597_s2 + $0x3a4] ss:$8 sps:$4 sm:$0xff]  }
  0x6a   : > { %1671 = vmatpush1.bf16.msra.mxu1 %v4689_v44  ;;  %1334 = vmatprep.subr.bf16.mxu0 %v4694_v45  ;;  %v4726_v44 = vld [vmem:[%s6597_s2 + $0x2a0] ss:$8 sps:$4 sm:$0xff]  }
  0x6b   : > { %1672 = vmatprep.subr.bf16.mxu1 %v4697_v46  ;;  %v4729_v45 = vld [vmem:[%s6597_s2 + $0x3a0] ss:$8 sps:$4 sm:$0xff]   ;;  %v4734_v46 = vld [vmem:[%s6597_s2 + $0x294] ss:$8 sps:$4 sm:$0xff]  }
  0x6c   : > { %v5620_v28 = vld [vmem:[#allocation2 + $0x28] sm:$0xff] }
  0x6d   : > { %1335 = vmatpush2.bf16.msra.mxu0 %v4692_v0  ;;  %v4751_v0 = vld [vmem:[%s6597_s2 + $0x574] ss:$8 sps:$4 sm:$0xff]  }
  0x6e   : > { %1673 = vmatpush2.bf16.msra.mxu1 %v4695_v4  ;;  %1336 = vmatprep.subr.bf16.mxu0 %v4702_v55  ;;  %v4749_v4 = vld [vmem:[%s6597_s2 + $0x570] ss:$8 sps:$4 sm:$0xff]   ;;  %v4757_v55 = vld [vmem:[%s6597_s2 + $0x564] ss:$8 sps:$4 sm:$0xff]  }
  0x6f   : > { %1674 = vmatprep.subr.bf16.mxu1 %v4705_v7  ;;  %v4764_v7 = vld [vmem:[%s5179_s20 + $0x1c] ss:$8 sps:$4 sm:$0xff]  }
  0x71   : > { %1337 = vmatpush2.bf16.msra.mxu0 %v4700_v22  ;;  %v4768_v22 = vld [vmem:[%s6597_s2 + $0x444] ss:$8 sps:$4 sm:$0xff]  }
  0x72   : > { %1675 = vmatpush2.bf16.msra.mxu1 %v4703_v23  ;;  %1338 = vmatprep.subr.bf16.mxu0 %v4708_v24  ;;  %v4771_v23 = vld [vmem:[%s6597_s2 + $0x544] ss:$8 sps:$4 sm:$0xff]  }
  0x73   : > { %1676 = vmatprep.subr.bf16.mxu1 %v4711_v25  ;;  %v4778_v24 = vld [vmem:[%s5179_s20 + $0x2c] ss:$8 sps:$4 sm:$0xff]   ;;  %v1087_v25 = vpack.c.bf16 %v1077_v20, %v1077_v20  ;;  %v4795_v20 = vld [vmem:[%s6597_s2 + $0x500] ss:$8 sps:$4 sm:$0xff]  }
  0x75   : > { %1339 = vmatpush2.bf16.msra.mxu0 %v4706_v29  ;;  %v5622_v29 = vld [vmem:[#allocation2 + $0x78] sm:$0xff] }
  0x76   : > { %1677 = vmatpush2.bf16.msra.mxu1 %v4709_v30  ;;  %1340 = vmatprep.subr.bf16.mxu0 %v4716_v31  ;;  %v4774_v30 = vld [vmem:[%s6597_s2 + $0x434] ss:$8 sps:$4 sm:$0xff]   ;;  %v2594_v19 = vpack.c.bf16 %v5622_v29, %v5620_v28 }
  0x77   : > { %1678 = vmatprep.subr.bf16.mxu1 %v4719_v32  ;;  %v4777_v31 = vld [vmem:[%s6597_s2 + $0x534] ss:$8 sps:$4 sm:$0xff]   ;;  %v1076_v32 = vld [vmem:[#allocation2 + $0xa8] sm:$0x3] }
  0x79   : > { %1341 = vmatpush2.bf16.msra.mxu0 %v4714_v33  ;;  %v1796_v33 = vpack.c.bf16 %v5620_v28, %v1778_v27  ;;  %v4804_v27 = vld [vmem:[%s6597_s2 + $0x4e0] ss:$8 sps:$4 sm:$0xff]  }
  0x7a   : > { %1679 = vmatpush2.bf16.msra.mxu1 %v4717_v34  ;;  %1342 = vmatprep.subr.bf16.mxu0 %v4722_v36  ;;  %v4772_v34 = vld [vmem:[%s6597_s2 + $0x430] ss:$8 sps:$4 sm:$0xff]  }
  0x7b   : > { %1680 = vmatprep.subr.bf16.mxu1 %v4725_v39  ;;  %v4775_v36 = vld [vmem:[%s6597_s2 + $0x530] ss:$8 sps:$4 sm:$0xff]  }
  0x7c   : > { %v4779_v39 = vld [vmem:[%s5179_s20 + $0x28] ss:$8 sps:$4 sm:$0xff]  }
  0x7d   : > { %1343 = vmatpush2.bf16.msra.mxu0 %v4720_v40  ;;  %v1148_v40 = vrot.slane %v1087_v25, 1  ;;  %v4806_v25 = vld [vmem:[%s6597_s2 + $0x4e4] ss:$8 sps:$4 sm:$0xff]  }
  0x7e   : > { %1681 = vmatpush2.bf16.msra.mxu1 %v4723_v41  ;;  %1344 = vmatprep.subr.bf16.mxu0 %v4728_v42  ;;  %v5643_v41 = vpack.c.bf16 %v289_v50, %v5622_v29  ;;  %v1853_v42 = vshll.u32 %v1796_v33, 16  ;;  %v4785_v50 = vld [vmem:[%s6597_s2 + $0x524] ss:$8 sps:$4 sm:$0xff]  }
  0x7f   : > { %1682 = vmatprep.subr.bf16.mxu1 %v4731_v43  ;;  %v2200_v43 = vld [vmem:[#allocation2 + $0x48] sm:$0xfc] }
  0x81   : > { %1345 = vmatpush2.bf16.msra.mxu0 %v4726_v44  ;;  %v1143_v44 = vsel %vm1131_vm1, %v1138_v10, %v1142_v26 }
  0x82   : > { %1683 = vmatpush2.bf16.msra.mxu1 %v4729_v45  ;;  %1346 = vmatprep.subr.bf16.mxu0 %v4734_v46  ;;  %v1086_v45 = vpack.c.bf16 %v1076_v32, %v1076_v32  ;;  %v5646_v46 = vld [vmem:[#allocation2 + $0x60] sm:$0xff]  ;;  %v4815_v32 = vld [vmem:[%s6597_s2 + $0x5d4] ss:$8 sps:$4 sm:$0xff]  }
  0x83   : > { %1684 = vmatprep.subr.bf16.mxu1 %v4737_v47  ;;  %v5648_v47 = vld [vmem:[#allocation2 + $0x40] sm:$0xff] }
  0x85   : > { %1347 = vmatpush2.bf16.msra.mxu0 %v4732_v49  ;;  %v4782_v49 = vld [vmem:[%s6597_s2 + $0x424] ss:$8 sps:$4 sm:$0xff]  }
  0x86   : > { %1685 = vmatpush2.bf16.msra.mxu1 %v4735_v54  ;;  %1348 = vmatprep.subr.bf16.mxu0 %v4740_v57  ;;  %v2593_v54 = vpack.c.bf16 %v5648_v47, %v5646_v46 }
  0x87   : > { %1686 = vmatprep.subr.bf16.mxu1 %v4743_v58  ;;  %v4990_v58 = vcombine.high %v5362_v13, %v5412_v35 }
  0x89   : > { %1349 = vmatpush2.bf16.msra.mxu0 %v4738_v59  ;;  %v4780_v59 = vld [vmem:[%s6597_s2 + $0x420] ss:$8 sps:$4 sm:$0xff]  }
  0x8a   : > { %1687 = vmatpush2.bf16.msra.mxu1 %v4741_v60  ;;  %2078 = vmatprep.subr.bf16.mxu0 %v4748_v62  ;;  %v1851_v60 = vshrl.u32 %v1796_v33, 16  ;;  %v1855_v62 = vrot.slane %v1853_v42, 1  ;;  %v4810_v33 = vld [vmem:[%s6597_s2 + $0x4d0] ss:$8 sps:$4 sm:$0xff]   ;;  %v4819_v42 = vld [vmem:[%s6597_s2 + $0x5c0] ss:$8 sps:$4 sm:$0xff]  }
  0x8b   : > { %2456 = vmatprep.subr.bf16.mxu1 %v4751_v0  ;;  %v1858_v0 = vshll.u32 %v5643_v41, 16 }
  0x8c   : > { %1351 = vmatmul.mubr.bf16.vlgmr.msra.gmra.mxu0 %v5473_v18  ;;  %v1144_v18 = vrot.slane %v5368_v16, 1  ;;  %v4769_v16 = vld [vmem:[%s6597_s2 + $0x540] ss:$8 sps:$4 sm:$0xff]  }
  0x8d   : > { %1689 = vmatmul.mubr.bf16.vlgmr.msra.gmra.mxu1 %v4745_v1  ;;  %2079 = vmatpush1.bf16.msra.mxu0 %v4746_v2  ;;  %v2218_v1 = vpack.c.bf16 %v5620_v28, %v2200_v43  ;;  %v4783_v2 = vld [vmem:[%s6597_s2 + $0x520] ss:$8 sps:$4 sm:$0xff]   ;;  %v4824_v43 = vld [vmem:[%s6597_s2 + $0x4b4] ss:$8 sps:$4 sm:$0xff]   ;;  %v4905_v28 = vld [vmem:[%s6597_s2 + $0x7e4] ss:$8 sps:$4 sm:$0xff]  }
  0x8e   : > { %2457 = vmatpush1.bf16.msra.mxu1 %v4749_v4  ;;  %2080 = vmatprep.subr.bf16.mxu0 %v4754_v5  ;;  %v1145_v63 = vsel %vm1131_vm1, %v1140_v56, %v1144_v18  ;;  %v1149_v57 = vsel %vm1131_vm1, %v1144_v18, %v1148_v40  ;;  %v1146_v4 = vrot.slane %v1086_v45, 1  ;;  %v4788_v56 = vld [vmem:[%s6597_s2 + $0x414] ss:$8 sps:$4 sm:$0xff]   ;;  %v4816_v40 = vld [vmem:[%s6597_s2 + $0x4c0] ss:$8 sps:$4 sm:$0xff]  }
  0x8f   : > { %2458 = vmatprep.subr.bf16.mxu1 %v4757_v55  ;;  %1360 = vmatprep.mubr.bf16.mxu0 %v1141_v9  ;;  %v4791_v5 = vld [vmem:[%s6597_s2 + $0x514] ss:$8 sps:$4 sm:$0xff]   ;;  %v4991_v55 = vcombine.low %v5362_v13, %v5412_v35  ;;  %v2274_v9 = vrot.slane %v5643_v41, 1  ;;  %v4794_v13 = vld [vmem:[%s6597_s2 + $0x404] ss:$8 sps:$4 sm:$0xff]  }
  0x90   : > { %1698 = vmatprep.mubr.bf16.mxu1 %v4764_v7  ;;  %v1856_v7 = vor.u32 %v1855_v62, %v1851_v60  ;;  %v1147_v10 = vsel %vm1131_vm1, %v1142_v26, %v1146_v4  ;;  %v1777_v45 = vld [vmem:[#allocation2 + $0x10] sm:$0xfe]  ;;  %v4828_v60 = vld [vmem:[%s6597_s2 + $0x4a0] ss:$8 sps:$4 sm:$0xff]  }
  0x91   : > { %2081 = vmatpush1.bf16.msra.mxu0 %v4752_v51  ;;  %v5677_v51 = vrot.slane %v1858_v0, 1  ;;  %v4831_v62 = vld [vmem:[%s6597_s2 + $0x5a0] ss:$8 sps:$4 sm:$0xff]   ;;  %v4836_v0 = vld [vmem:[%s6597_s2 + $0x494] ss:$8 sps:$4 sm:$0xff]  }
  0x92   : > { %2459 = vmatpush1.bf16.msra.mxu1 %v4755_v8  ;;  %2082 = vmatprep.subr.bf16.mxu0 %v4760_v11  ;;  %v2273_v8 = vrot.slane %v2218_v1, 1  ;;  %v4786_v11 = vld [vmem:[%s6597_s2 + $0x410] ss:$8 sps:$4 sm:$0xff]   ;;  %v4839_v1 = vld [vmem:[%s6597_s2 + $0x594] ss:$8 sps:$4 sm:$0xff]  }
  0x93   : > { %2460 = vmatprep.subr.bf16.mxu1 %v4763_v15  ;;  %v4789_v15 = vld [vmem:[%s6597_s2 + $0x510] ss:$8 sps:$4 sm:$0xff]  }
  0x94   : > { %1361 = vmatmul.mubr.bf16.gmra.mxu0 %v1139_v21  ;;  %v2275_v18 = vsel %vm1131_vm1, %v2273_v8, %v2274_v9  ;;  %v4800_v21 = vld [vmem:[%s6597_s2 + $0x4f4] ss:$8 sps:$4 sm:$0xff]   ;;  %v4845_v8 = vld [vmem:[%s6597_s2 + $0x584] ss:$8 sps:$4 sm:$0xff]  }
  0x95   : > { %1699 = vmatmul.mubr.bf16.gmra.mxu1 %v4765_v61  ;;  %2083 = vmatpush1.bf16.msra.mxu0 %v4758_v3  ;;  %v4797_v3 = vld [vmem:[%s6597_s2 + $0x504] ss:$8 sps:$4 sm:$0xff]   ;;  %v1861_v61 = vsel %vm698_vm0, %v1856_v7, %v5677_v51  ;;  %v4837_v7 = vld [vmem:[%s6597_s2 + $0x590] ss:$8 sps:$4 sm:$0xff]  }
  0x96   : > { %2461 = vmatpush1.bf16.msra.mxu1 %v4761_v53  ;;  %2084 = vmatprep.subr.bf16.mxu0 %v4768_v22  ;;  %v4792_v53 = vld [vmem:[%s6597_s2 + $0x400] ss:$8 sps:$4 sm:$0xff]   ;;  %v4803_v22 = vld [vmem:[%s6597_s2 + $0x5f4] ss:$8 sps:$4 sm:$0xff]  }
  0x97   : > { %2462 = vmatprep.subr.bf16.mxu1 %v4771_v23  ;;  %1370 = vmatprep.mubr.bf16.mxu0 %v1145_v63  ;;  %v4798_v23 = vld [vmem:[%s6597_s2 + $0x4f0] ss:$8 sps:$4 sm:$0xff]  }
  0x98   : > { %1708 = vmatprep.mubr.bf16.mxu1 %v4778_v24  ;;  %v4801_v24 = vld [vmem:[%s6597_s2 + $0x5f0] ss:$8 sps:$4 sm:$0xff]  }
  0x99   : > { %2085 = vmatpush1.bf16.msra.mxu0 %v4766_v6  ;;  %v4809_v6 = vld [vmem:[%s6597_s2 + $0x5e4] ss:$8 sps:$4 sm:$0xff]  }
  0x9a   : > { %2463 = vmatpush1.bf16.msra.mxu1 %v4769_v16  ;;  %2086 = vmatprep.subr.bf16.mxu0 %v4774_v30  ;;  %v5723_v16 = vld [vmem:[%s5397_s22 + $0x8] sm:$0xff] }
  0x9b   : > { %2464 = vmatprep.subr.bf16.mxu1 %v4777_v31  ;;  %v319_v63 = vunpack.c.h.bf16 %v5723_v16  ;;  %v318_v26 = vunpack.c.l.bf16 %v5723_v16  ;;  %v4807_v30 = vld [vmem:[%s6597_s2 + $0x5e0] ss:$8 sps:$4 sm:$0xff]   ;;  %v4812_v31 = vld [vmem:[%s6597_s2 + $0x4d4] ss:$8 sps:$4 sm:$0xff]  }
  0x9c   : > { %1371 = vmatmul.mubr.bf16.gmra.mxu0 %v1143_v44  ;;  %v4827_v44 = vld [vmem:[%s6597_s2 + $0x5b4] ss:$8 sps:$4 sm:$0xff]  }
  0x9d   : > { %1709 = vmatmul.mubr.bf16.gmra.mxu1 %v4779_v39  ;;  %2087 = vmatpush1.bf16.msra.mxu0 %v4772_v34  ;;  %327 = vst [vmem:[#allocation2 + $0x58] sm:$0xff] %v319_v63  ;;  %326 = vst [vmem:[#allocation2 + $0x30] sm:$0xff] %v318_v26  ;;  %v4813_v34 = vld [vmem:[%s6597_s2 + $0x5d0] ss:$8 sps:$4 sm:$0xff]   ;;  %v4821_v39 = vld [vmem:[%s6597_s2 + $0x5c4] ss:$8 sps:$4 sm:$0xff]  }
  0x9e   : > { %2465 = vmatpush1.bf16.msra.mxu1 %v4775_v36  ;;  %2088 = vmatprep.subr.bf16.mxu0 %v4782_v49  ;;  %v4818_v36 = vld [vmem:[%s6597_s2 + $0x4c4] ss:$8 sps:$4 sm:$0xff]   ;;  %v4822_v49 = vld [vmem:[%s6597_s2 + $0x4b0] ss:$8 sps:$4 sm:$0xff]  }
  0x9f   : > { %2466 = vmatprep.subr.bf16.mxu1 %v4785_v50  ;;  %1380 = vmatprep.mubr.bf16.mxu0 %v1149_v57  ;;  %v4825_v50 = vld [vmem:[%s6597_s2 + $0x5b0] ss:$8 sps:$4 sm:$0xff]   ;;  %v4830_v57 = vld [vmem:[%s6597_s2 + $0x4a4] ss:$8 sps:$4 sm:$0xff]  }
  0xa0   : > { %1718 = vmatprep.mubr.bf16.mxu1 %v4990_v58  ;;  %v1795_v58 = vpack.c.bf16 %v5646_v46, %v1777_v45 }
  0xa1   : > { %2089 = vmatpush1.bf16.msra.mxu0 %v4780_v59  ;;  %v4833_v59 = vld [vmem:[%s6597_s2 + $0x5a4] ss:$8 sps:$4 sm:$0xff]  }
  0xa2   : > { %2467 = vmatpush1.bf16.msra.mxu1 %v4783_v2  ;;  %2090 = vmatprep.subr.bf16.mxu0 %v4788_v56  ;;  %v5795_v2 = vpack.c.bf16 %v288_v52, %v5648_v47  ;;  %v1841_v4 = vshll.u32 %v1795_v58, 16  ;;  %v5797_v56 = vld [vmem:[#allocation2 + $0x98] sm:$0xff] }
  0xa3   : > { %2468 = vmatprep.subr.bf16.mxu1 %v4791_v5  ;;  %v2199_v5 = vld [vmem:[#allocation2 + $0x10] sm:$0xfc]  ;;  %v5811_v52 = vpack.c.bf16 %v293_v14, %v5797_v56  ;;  %v4840_v14 = vld [vmem:[%s6597_s2 + $0x480] ss:$8 sps:$4 sm:$0xff]  }
  0xa4   : > { %1381 = vmatmul.mubr.bf16.gmra.mxu0 %v1147_v10  ;;  %v1839_v10 = vshrl.u32 %v1795_v58, 16 }
  0xa5   : > { %1719 = vmatmul.mubr.bf16.gmra.mxu1 %v4991_v55  ;;  %2091 = vmatpush1.bf16.msra.mxu0 %v4786_v11  ;;  %v4834_v55 = vld [vmem:[%s6597_s2 + $0x490] ss:$8 sps:$4 sm:$0xff]   ;;  %v1843_v11 = vrot.slane %v1841_v4, 1 }
  0xa6   : > { %2469 = vmatpush1.bf16.msra.mxu1 %v4789_v15  ;;  %2092 = vmatprep.subr.bf16.mxu0 %v4794_v13  ;;  %v1846_v15 = vshll.u32 %v5795_v2, 16  ;;  %v2217_v13 = vpack.c.bf16 %v5646_v46, %v2199_v5  ;;  %v4861_v4 = vld [vmem:[%s6597_s2 + $0x750] ss:$8 sps:$4 sm:$0xff]  }
  0xa7   : > { %2470 = vmatprep.subr.bf16.mxu1 %v4797_v3  ;;  %2110 = vmatprep.mubr.bf16.mxu0 %v1861_v61  ;;  %v5818_v3 = vld [vmem:[#allocation2 + $0x18] sm:$0xff]  ;;  %v2271_v61 = vrot.slane %v5795_v2, 1 }
  0xa8   : > { %2488 = vmatprep.mubr.bf16.mxu1 %v2275_v18  ;;  %v1870_v18 = vshrl.u32 %v5643_v41, 16 }
  0xa9   : > { %2093 = vmatpush1.bf16.msra.mxu0 %v4792_v53  ;;  %v4843_v53 = vld [vmem:[%s6597_s2 + $0x580] ss:$8 sps:$4 sm:$0xff]  }
  0xaa   : > { %2471 = vmatpush1.bf16.msra.mxu1 %v4795_v20  ;;  %2094 = vmatprep.subr.bf16.mxu0 %v4800_v21  ;;  %v1874_v20 = vshll.u32 %v5811_v52, 16  ;;  %v1844_v21 = vor.u32 %v1843_v11, %v1839_v10 }
  0xab   : > { %2472 = vmatprep.subr.bf16.mxu1 %v4803_v22  ;;  %v1848_v22 = vrot.slane %v1846_v15, 1  ;;  %v2916_v15 = vld [vmem:[#allocation2 + $0x28] sm:$0xfe] }
  0xad   : > { %2095 = vmatpush2.bf16.msra.mxu0 %v4798_v23  ;;  %v2270_v23 = vrot.slane %v2217_v13, 1  ;;  %v4869_v13 = vld [vmem:[%s6597_s2 + $0x744] ss:$8 sps:$4 sm:$0xff]  }
  0xae   : > { %2473 = vmatpush2.bf16.msra.mxu1 %v4801_v24  ;;  %2096 = vmatprep.subr.bf16.mxu0 %v4806_v25  ;;  %v4848_v24 = vld [vmem:[%s6597_s2 + $0x674] ss:$8 sps:$4 sm:$0xff]   ;;  %v5835_v25 = vpack.c.bf16 %v292_v17, %v5818_v3  ;;  %v1872_v17 = vor.u32 %v1870_v18, %v5677_v51  ;;  %v4857_v51 = vld [vmem:[%s6597_s2 + $0x764] ss:$8 sps:$4 sm:$0xff]  }
  0xaf   : > { %2474 = vmatprep.subr.bf16.mxu1 %v4809_v6  ;;  %v5837_v6 = vld [vmem:[#allocation2 + $0xa0] sm:$0xff] }
  0xb0   : > { %v1878_v10 = vshrl.u32 %v5835_v25, 16 }
  0xb1   : > { %2097 = vmatpush2.bf16.msra.mxu0 %v4804_v27  ;;  %v4851_v27 = vld [vmem:[%s6597_s2 + $0x774] ss:$8 sps:$4 sm:$0xff]  }
  0xb2   : > { %2475 = vmatpush2.bf16.msra.mxu1 %v4807_v30  ;;  %2098 = vmatprep.subr.bf16.mxu0 %v4812_v31  ;;  %v4846_v30 = vld [vmem:[%s6597_s2 + $0x670] ss:$8 sps:$4 sm:$0xff]  }
  0xb3   : > { %2476 = vmatprep.subr.bf16.mxu1 %v4815_v32  ;;  %v4849_v31 = vld [vmem:[%s6597_s2 + $0x770] ss:$8 sps:$4 sm:$0xff]   ;;  %v1876_v32 = vrot.slane %v1874_v20, 1 }
  0xb5   : > { %2099 = vmatpush2.bf16.msra.mxu0 %v4810_v33  ;;  %v2278_v33 = vrot.slane %v5811_v52, 1  ;;  %v1877_v45 = vsel %vm698_vm0, %v1872_v17, %v1876_v32 }
  0xb6   : > { %2477 = vmatpush2.bf16.msra.mxu1 %v4813_v34  ;;  %2100 = vmatprep.subr.bf16.mxu0 %v4818_v36  ;;  %v5856_v34 = vpack.c.bf16 %v317_v37, %v5837_v6  ;;  %v1849_v36 = vsel %vm698_vm0, %v1844_v21, %v1848_v22  ;;  %v4852_v37 = vld [vmem:[%s6597_s2 + $0x660] ss:$8 sps:$4 sm:$0xff]  }
  0xb7   : > { %2478 = vmatprep.subr.bf16.mxu1 %v4821_v39  ;;  %v2272_v39 = vsel %vm1131_vm1, %v2270_v23, %v2271_v61  ;;  %v4875_v23 = vld [vmem:[%s6597_s2 + $0x734] ss:$8 sps:$4 sm:$0xff]  }
  0xb8   : > { %v2282_v35 = vrot.slane %v5856_v34, 1 }
  0xb9   : > { %2101 = vmatpush2.bf16.msra.mxu0 %v4816_v40  ;;  %v1862_v40 = vshrl.u32 %v5795_v2, 16  ;;  %v4867_v2 = vld [vmem:[%s6597_s2 + $0x740] ss:$8 sps:$4 sm:$0xff]  }
  0xba   : > { %2479 = vmatpush2.bf16.msra.mxu1 %v4819_v42  ;;  %2102 = vmatprep.subr.bf16.mxu0 %v4824_v43  ;;  %v1866_v42 = vshll.u32 %v5835_v25, 16  ;;  %v5867_v43 = vld [vmem:[#allocation2 + $0x70] sm:$0xff] }
  0xbb   : > { %2480 = vmatprep.subr.bf16.mxu1 %v4827_v44  ;;  %v4855_v44 = vld [vmem:[%s6597_s2 + $0x760] ss:$8 sps:$4 sm:$0xff]   ;;  %v1864_v58 = vor.u32 %v1862_v40, %v1848_v22  ;;  %v5888_v41 = vpack.c.bf16 %v316_v38, %v5867_v43  ;;  %v4866_v38 = vld [vmem:[%s6597_s2 + $0x644] ss:$8 sps:$4 sm:$0xff]   ;;  %v4872_v22 = vld [vmem:[%s6597_s2 + $0x634] ss:$8 sps:$4 sm:$0xff]  }
  0xbd   : > { %2103 = vmatpush2.bf16.msra.mxu0 %v4822_v49  ;;  %v2279_v49 = vsel %vm1131_vm1, %v2274_v9, %v2278_v33  ;;  %v1794_v9 = vld [vmem:[#allocation2 + $0x58] sm:$0x1]  ;;  %v1882_v11 = vshll.u32 %v5888_v41, 16  ;;  %v2280_v18 = vrot.slane %v5888_v41, 1 }
  0xbe   : > { %2481 = vmatpush2.bf16.msra.mxu1 %v4825_v50  ;;  %2104 = vmatprep.subr.bf16.mxu0 %v4830_v57  ;;  %v1886_v50 = vshrl.u32 %v5811_v52, 16  ;;  %v1890_v57 = vshll.u32 %v5856_v34, 16 }
  0xbf   : > { %2482 = vmatprep.subr.bf16.mxu1 %v4833_v59  ;;  %v1868_v59 = vrot.slane %v1866_v42, 1 }
  0xc0   : > { %v1888_v5 = vor.u32 %v1886_v50, %v1876_v32  ;;  %v2215_v32 = vld [vmem:[#allocation2 + $0x30] sm:$0x3] }
  0xc1   : > { %2105 = vmatpush2.bf16.msra.mxu0 %v4828_v60  ;;  %v4860_v60 = vld [vmem:[%s6597_s2 + $0x654] ss:$8 sps:$4 sm:$0xff]   ;;  %v1869_v52 = vsel %vm698_vm0, %v1864_v58, %v1868_v59  ;;  %v4878_v58 = vld [vmem:[%s6597_s2 + $0x624] ss:$8 sps:$4 sm:$0xff]  }
  0xc2   : > { %2483 = vmatpush2.bf16.msra.mxu1 %v4831_v62  ;;  %2106 = vmatprep.subr.bf16.mxu0 %v4836_v0  ;;  %v2276_v62 = vrot.slane %v5835_v25, 1  ;;  %v4863_v0 = vld [vmem:[%s6597_s2 + $0x754] ss:$8 sps:$4 sm:$0xff]  }
  0xc3   : > { %2484 = vmatprep.subr.bf16.mxu1 %v4839_v1  ;;  %v4858_v1 = vld [vmem:[%s6597_s2 + $0x650] ss:$8 sps:$4 sm:$0xff]  }
  0xc4   : > { %v2281_v40 = vsel %vm1131_vm1, %v2276_v62, %v2280_v18 }
  0xc5   : > { %2107 = vmatpush2.bf16.msra.mxu0 %v4834_v55  ;;  %v1892_v55 = vrot.slane %v1890_v57, 1 }
  0xc6   : > { %2485 = vmatpush2.bf16.msra.mxu1 %v4837_v7  ;;  %2108 = vmatprep.subr.bf16.mxu0 %v4842_v48  ;;  %v1804_v7 = vpack.c.bf16 %v1794_v9, %v1794_v9  ;;  %v2216_v48 = vld [vmem:[#allocation2 + $0x58] sm:$0x3]  ;;  %v4876_v9 = vld [vmem:[%s6597_s2 + $0x620] ss:$8 sps:$4 sm:$0xff]  }
  0xc7   : > { %2486 = vmatprep.subr.bf16.mxu1 %v4845_v8  ;;  %v2277_v8 = vsel %vm1131_vm1, %v2271_v61, %v2276_v62  ;;  %v2283_v61 = vsel %vm1131_vm1, %v2278_v33, %v2282_v35  ;;  %v2226_v20 = vpack.c.bf16 %v2216_v48, %v2216_v48  ;;  %v1893_v21 = vsel %vm698_vm0, %v1888_v5, %v1892_v55  ;;  %v5932_v33 = vld [vmem:[#allocation2 + $0x90] sm:$0xff] }
  0xc8   : > { %v1906_v25 = vshll.u32 %v1804_v7, 16  ;;  %v2225_v62 = vpack.c.bf16 %v2215_v32, %v2215_v32  ;;  %v4912_v32 = vld [vmem:[%s6597_s2 + $0x6c0] ss:$8 sps:$4 sm:$0xff]  }
  0xc9   : > { %2109 = vmatpush2.bf16.msra.mxu0 %v4840_v14  ;;  %v1793_v14 = vld [vmem:[#allocation2 + $0x30] sm:$0x1]  ;;  %v2286_v42 = vrot.slane %v2226_v20, 1  ;;  %v4896_v20 = vld [vmem:[%s6597_s2 + $0x6f4] ss:$8 sps:$4 sm:$0xff]  }
  0xca   : > { %2487 = vmatpush2.bf16.msra.mxu1 %v4843_v53  ;;  %2794 = vmatprep.subr.bf16.mxu0 %v4848_v24  ;;  %v4864_v53 = vld [vmem:[%s6597_s2 + $0x640] ss:$8 sps:$4 sm:$0xff]   ;;  %v1902_v24 = vshrl.u32 %v5856_v34, 16  ;;  %v1803_v17 = vpack.c.bf16 %v1793_v14, %v1793_v14  ;;  %v4884_v34 = vld [vmem:[%s6597_s2 + $0x614] ss:$8 sps:$4 sm:$0xff]  }
  0xcb   : > { %3216 = vmatprep.subr.bf16.mxu1 %v4851_v27  ;;  %v2934_v27 = vpack.c.bf16 %v5622_v29, %v2916_v15  ;;  %v4882_v15 = vld [vmem:[%s6597_s2 + $0x610] ss:$8 sps:$4 sm:$0xff]   ;;  %v4900_v29 = vld [vmem:[%s6597_s2 + $0x6e0] ss:$8 sps:$4 sm:$0xff]  }
  0xcc   : > { %2111 = vmatmul.mubr.bf16.vlgmr.msra.gmra.mxu0 %v1849_v36 }
  0xcd   : > { %2489 = vmatmul.mubr.bf16.vlgmr.msra.gmra.mxu1 %v2272_v39  ;;  %2795 = vmatpush1.bf16.msra.mxu0 %v4846_v30  ;;  %v314_v30 = vld [vmem:[%s5397_s22 + $0x10] sm:$0xff]  ;;  %v2991_v50 = vshll.u32 %v2934_v27, 16 }
  0xce   : > { %3217 = vmatpush1.bf16.msra.mxu1 %v4849_v31  ;;  %2796 = vmatprep.subr.bf16.mxu0 %v4854_v12  ;;  %v1880_v31 = vor.u32 %v1878_v10, %v1868_v59  ;;  %v1884_v12 = vrot.slane %v1882_v11, 1  ;;  %v321_v36 = vunpack.c.h.bf16 %v314_v30  ;;  %v320_v39 = vunpack.c.l.bf16 %v314_v30  ;;  %v4906_v30 = vld [vmem:[%s6597_s2 + $0x6d0] ss:$8 sps:$4 sm:$0xff]  }
  0xcf   : > { %3218 = vmatprep.subr.bf16.mxu1 %v4857_v51  ;;  %2120 = vmatprep.mubr.bf16.mxu0 %v1877_v45  ;;  %v4870_v51 = vld [vmem:[%s6597_s2 + $0x630] ss:$8 sps:$4 sm:$0xff]   ;;  %v1908_v45 = vrot.slane %v1906_v25, 1  ;;  %v1894_v59 = vshrl.u32 %v5888_v41, 16  ;;  %v2993_v5 = vrot.slane %v2991_v50, 1 }
  0xd0   : > { %2498 = vmatprep.mubr.bf16.mxu1 %v2279_v49  ;;  %329 = vst [vmem:[#allocation2 + $0xb8] sm:$0xff] %v321_v36  ;;  %v5945_v49 = vpack.c.bf16 %v5797_v56, %v5932_v33  ;;  %328 = vst [vmem:[#allocation2 + $0x80] sm:$0xff] %v320_v39  ;;  %v1885_v57 = vsel %vm698_vm0, %v1880_v31, %v1884_v12  ;;  %v4881_v56 = vld [vmem:[%s6597_s2 + $0x724] ss:$8 sps:$4 sm:$0xff]   ;;  %v4888_v41 = vld [vmem:[%s6597_s2 + $0x600] ss:$8 sps:$4 sm:$0xff]  }
  0xd1   : > { %2797 = vmatpush1.bf16.msra.mxu0 %v4852_v37  ;;  %v4873_v37 = vld [vmem:[%s6597_s2 + $0x730] ss:$8 sps:$4 sm:$0xff]   ;;  %v1896_v7 = vor.u32 %v1894_v59, %v1884_v12  ;;  %v4908_v25 = vld [vmem:[%s6597_s2 + $0x6d4] ss:$8 sps:$4 sm:$0xff]   ;;  %v4914_v12 = vld [vmem:[%s6597_s2 + $0x6c4] ss:$8 sps:$4 sm:$0xff]  }
  0xd2   : > { %3219 = vmatpush1.bf16.msra.mxu1 %v4855_v44  ;;  %2798 = vmatprep.subr.bf16.mxu0 %v4860_v60  ;;  %v1904_v44 = vor.u32 %v1902_v24, %v1892_v55  ;;  %v1898_v60 = vshll.u32 %v1803_v17, 16  ;;  %v2996_v55 = vshll.u32 %v5945_v49, 16  ;;  %v4902_v24 = vld [vmem:[%s6597_s2 + $0x6e4] ss:$8 sps:$4 sm:$0xff]   ;;  %v4909_v31 = vld [vmem:[%s6597_s2 + $0x7d0] ss:$8 sps:$4 sm:$0xff]  }
  0xd3   : > { %3220 = vmatprep.subr.bf16.mxu1 %v4863_v0  ;;  %v2287_v0 = vsel %vm1131_vm1, %v2282_v35, %v2286_v42  ;;  %v2284_v35 = vrot.slane %v2225_v62, 1  ;;  %v4917_v17 = vld [vmem:[%s6597_s2 + $0x7c4] ss:$8 sps:$4 sm:$0xff]   ;;  %v4915_v36 = vld [vmem:[%s6597_s2 + $0x7c0] ss:$8 sps:$4 sm:$0xff]  }
  0xd4   : > { %2121 = vmatmul.mubr.bf16.gmra.mxu0 %v1869_v52  ;;  %v1900_v48 = vrot.slane %v1898_v60, 1  ;;  %v4887_v52 = vld [vmem:[%s6597_s2 + $0x714] ss:$8 sps:$4 sm:$0xff]   ;;  %v5972_v10 = vrot.slane %v2996_v55, 1  ;;  %v4918_v42 = vld [vmem:[%s6597_s2 + $0x6b0] ss:$8 sps:$4 sm:$0xff]  }
  0xd5   : > { %2499 = vmatmul.mubr.bf16.gmra.mxu1 %v2277_v8  ;;  %2799 = vmatpush1.bf16.msra.mxu0 %v4858_v1  ;;  %v4879_v1 = vld [vmem:[%s6597_s2 + $0x720] ss:$8 sps:$4 sm:$0xff]   ;;  %v2285_v14 = vsel %vm1131_vm1, %v2280_v18, %v2284_v35  ;;  %v4920_v39 = vld [vmem:[%s6597_s2 + $0x6b4] ss:$8 sps:$4 sm:$0xff]   ;;  %v4929_v50 = vld [vmem:[%s6597_s2 + $0x7a4] ss:$8 sps:$4 sm:$0xff]  }
  0xd6   : > { %3221 = vmatpush1.bf16.msra.mxu1 %v4861_v4  ;;  %2800 = vmatprep.subr.bf16.mxu0 %v4866_v38  ;;  %v1909_v4 = vsel %vm698_vm0, %v1904_v44, %v1908_v45  ;;  %v2989_v38 = vshrl.u32 %v2934_v27, 16  ;;  %v1901_v11 = vsel %vm698_vm0, %v1896_v7, %v1900_v48  ;;  %v4891_v18 = vld [vmem:[%s6597_s2 + $0x700] ss:$8 sps:$4 sm:$0xff]   ;;  %v4911_v27 = vld [vmem:[%s6597_s2 + $0x7d4] ss:$8 sps:$4 sm:$0xff]  }
  0xd7   : > { %3222 = vmatprep.subr.bf16.mxu1 %v4869_v13  ;;  %2130 = vmatprep.mubr.bf16.mxu0 %v1893_v21  ;;  %v4885_v13 = vld [vmem:[%s6597_s2 + $0x710] ss:$8 sps:$4 sm:$0xff]   ;;  %v4899_v21 = vld [vmem:[%s6597_s2 + $0x7f4] ss:$8 sps:$4 sm:$0xff]   ;;  %v4926_v45 = vld [vmem:[%s6597_s2 + $0x6a4] ss:$8 sps:$4 sm:$0xff]  }
  0xd8   : > { %2508 = vmatprep.mubr.bf16.mxu1 %v2283_v61  ;;  %v2994_v8 = vor.u32 %v2993_v5, %v2989_v38  ;;  %v4927_v59 = vld [vmem:[%s6597_s2 + $0x7a0] ss:$8 sps:$4 sm:$0xff]   ;;  %v4938_v7 = vld [vmem:[%s6597_s2 + $0x684] ss:$8 sps:$4 sm:$0xff]   ;;  %v6102_v48 = vld [vmem:[#allocation2 + $0x38] sm:$0xff] }
  0xd9   : > { %2801 = vmatpush1.bf16.msra.mxu0 %v4864_v53  ;;  %v4890_v53 = vld [vmem:[%s6597_s2 + $0x604] ss:$8 sps:$4 sm:$0xff]  }
  0xda   : > { %3223 = vmatpush1.bf16.msra.mxu1 %v4867_v2  ;;  %2802 = vmatprep.subr.bf16.mxu0 %v4872_v22  ;;  %v4893_v2 = vld [vmem:[%s6597_s2 + $0x704] ss:$8 sps:$4 sm:$0xff]   ;;  %v2999_v61 = vsel %vm698_vm0, %v2994_v8, %v5972_v10  ;;  %v4894_v22 = vld [vmem:[%s6597_s2 + $0x6f0] ss:$8 sps:$4 sm:$0xff]   ;;  %v4939_v8 = vld [vmem:[%s6597_s2 + $0x780] ss:$8 sps:$4 sm:$0xff]  }
  0xdb   : > { %3224 = vmatprep.subr.bf16.mxu1 %v4875_v23  ;;  %v4897_v23 = vld [vmem:[%s6597_s2 + $0x7f0] ss:$8 sps:$4 sm:$0xff]  }
  0xdc   : > { %2131 = vmatmul.mubr.bf16.gmra.mxu0 %v1885_v57  ;;  %v6068_v57 = vld [vmem:[#allocation2 + $0x88] sm:$0xff] }
  0xdd   : > { %2509 = vmatmul.mubr.bf16.gmra.mxu1 %v2281_v40  ;;  %2803 = vmatpush1.bf16.msra.mxu0 %v4870_v51  ;;  %v4923_v51 = vld [vmem:[%s6597_s2 + $0x7b4] ss:$8 sps:$4 sm:$0xff]   ;;  %v2915_v40 = vld [vmem:[#allocation2 + $0x60] sm:$0xfe]  ;;  %v6078_v60 = vpack.c.bf16 %v5818_v3, %v6068_v57  ;;  %v4933_v3 = vld [vmem:[%s6597_s2 + $0x790] ss:$8 sps:$4 sm:$0xff]  }
  0xde   : > { %3225 = vmatpush1.bf16.msra.mxu1 %v4873_v37  ;;  %2804 = vmatprep.subr.bf16.mxu0 %v4878_v58  ;;  %v4921_v37 = vld [vmem:[%s6597_s2 + $0x7b0] ss:$8 sps:$4 sm:$0xff]   ;;  %v2933_v44 = vpack.c.bf16 %v5648_v47, %v2915_v40  ;;  %v4924_v58 = vld [vmem:[%s6597_s2 + $0x6a0] ss:$8 sps:$4 sm:$0xff]  }
  0xdf   : > { %3226 = vmatprep.subr.bf16.mxu1 %v4881_v56  ;;  %2140 = vmatprep.mubr.bf16.mxu0 %v1909_v4  ;;  %v2924_v56 = vld [vmem:[#allocation2 + $0x50] sm:$0xff]  ;;  %v2984_v55 = vshll.u32 %v6078_v60, 16  ;;  %v2932_v47 = vld [vmem:[#allocation2 + $0xb8] sm:$0x1] }
  0xe0   : > { %2518 = vmatprep.mubr.bf16.mxu1 %v2287_v0  ;;  %v2979_v62 = vshll.u32 %v2933_v44, 16  ;;  %v4935_v0 = vld [vmem:[%s6597_s2 + $0x794] ss:$8 sps:$4 sm:$0xff]   ;;  %v6090_v4 = vpack.c.bf16 %v5837_v6, %v2924_v56  ;;  %v2977_v38 = vshrl.u32 %v2933_v44, 16  ;;  %v4941_v6 = vld [vmem:[%s6597_s2 + $0x784] ss:$8 sps:$4 sm:$0xff]  }
  0xe1   : > { %2805 = vmatpush1.bf16.msra.mxu0 %v4876_v9  ;;  %v4932_v9 = vld [vmem:[%s6597_s2 + $0x694] ss:$8 sps:$4 sm:$0xff]   ;;  %v4948_v40 = vld [vmem:[%s6597_s2 + $0x850] ss:$8 sps:$4 sm:$0xff]  }
  0xe2   : > { %3227 = vmatpush1.bf16.msra.mxu1 %v4879_v1  ;;  %2806 = vmatprep.subr.bf16.mxu0 %v4884_v34  ;;  %v4930_v1 = vld [vmem:[%s6597_s2 + $0x690] ss:$8 sps:$4 sm:$0xff]   ;;  %v2981_v5 = vrot.slane %v2979_v62, 1  ;;  %v3008_v34 = vshrl.u32 %v5945_v49, 16  ;;  %v3012_v35 = vshll.u32 %v6090_v4, 16 }
  0xe3   : > { %3228 = vmatprep.subr.bf16.mxu1 %v4887_v52  ;;  %v4936_v52 = vld [vmem:[%s6597_s2 + $0x680] ss:$8 sps:$4 sm:$0xff]  }
  0xe4   : > { %2141 = vmatmul.mubr.bf16.gmra.mxu0 %v1901_v11  ;;  %v2982_v11 = vor.u32 %v2981_v5, %v2977_v38 }
  0xe5   : > { %2519 = vmatmul.mubr.bf16.gmra.mxu1 %v2285_v14  ;;  %2807 = vmatpush1.bf16.msra.mxu0 %v4882_v15  ;;  %v2986_v15 = vrot.slane %v2984_v55, 1  ;;  %v2928_v14 = vld [vmem:[#allocation2 + $0x68] sm:$0xff] }
  0xe6   : > { %3229 = vmatpush1.bf16.msra.mxu1 %v4885_v13  ;;  %2808 = vmatprep.subr.bf16.mxu0 %v4890_v53  ;;  %v6114_v13 = vpack.c.bf16 %v5867_v43, %v6102_v48  ;;  %v4944_v53 = vld [vmem:[%s6597_s2 + $0x874] ss:$8 sps:$4 sm:$0xff]   ;;  %v4942_v43 = vld [vmem:[%s6597_s2 + $0x870] ss:$8 sps:$4 sm:$0xff]  }
  0xe7   : > { %3230 = vmatprep.subr.bf16.mxu1 %v4893_v2  ;;  %2826 = vmatprep.mubr.bf16.mxu0 %v2594_v19  ;;  %v4903_v19 = vld [vmem:[%s6597_s2 + $0x7e0] ss:$8 sps:$4 sm:$0xff]   ;;  %v3010_v2 = vor.u32 %v3008_v34, %v5972_v10  ;;  %v4947_v10 = vld [vmem:[%s6597_s2 + $0x864] ss:$8 sps:$4 sm:$0xff]  }
  0xe8   : > { %3248 = vmatprep.mubr.bf16.mxu1 %v2999_v61  ;;  %v3014_v61 = vrot.slane %v3012_v35, 1 }
  0xe9   : > { %2809 = vmatpush1.bf16.msra.mxu0 %v4888_v41  ;;  %v6122_v41 = vpack.c.bf16 %v319_v63, %v2928_v14  ;;  %v2927_v63 = vld [vmem:[#allocation2 + $0xa8] sm:$0xff] }
  0xea   : > { %3231 = vmatpush1.bf16.msra.mxu1 %v4891_v18  ;;  %2810 = vmatprep.subr.bf16.mxu0 %v4896_v20  ;;  %v2987_v18 = vsel %vm698_vm0, %v2982_v11, %v2986_v15  ;;  %v3000_v20 = vshrl.u32 %v6078_v60, 16  ;;  %v6146_v46 = vpack.c.bf16 %v318_v26, %v2927_v63  ;;  %v2942_v26 = vpack.c.bf16 %v2932_v47, %v2932_v47 }
  0xeb   : > { %3232 = vmatprep.subr.bf16.mxu1 %v4899_v21  ;;  %v3004_v21 = vshll.u32 %v6114_v13, 16  ;;  %v3040_v56 = vshrl.u32 %v6122_v41, 16 }
  0xec   : > { %v3032_v11 = vshrl.u32 %v6146_v46, 16 }
  0xed   : > { %2811 = vmatpush2.bf16.msra.mxu0 %v4894_v22 }
  0xee   : > { %3233 = vmatpush2.bf16.msra.mxu1 %v4897_v23  ;;  %2812 = vmatprep.subr.bf16.mxu0 %v4902_v24  ;;  %v3015_v24 = vsel %vm698_vm0, %v3010_v2, %v3014_v61  ;;  %v3340_v2 = vld [vmem:[#allocation2 + $0x78] sm:$0xff] }
  0xef   : > { %3234 = vmatprep.subr.bf16.mxu1 %v4905_v28  ;;  %v3024_v28 = vshrl.u32 %v6090_v4, 16 }
  0xf1   : > { %2813 = vmatpush2.bf16.msra.mxu0 %v4900_v29  ;;  %v3028_v29 = vshll.u32 %v6122_v41, 16 }
  0xf2   : > { %3235 = vmatpush2.bf16.msra.mxu1 %v4903_v19  ;;  %2814 = vmatprep.subr.bf16.mxu0 %v4908_v25  ;;  %v4945_v25 = vld [vmem:[%s6597_s2 + $0x860] ss:$8 sps:$4 sm:$0xff]  }
  0xf3   : > { %3236 = vmatprep.subr.bf16.mxu1 %v4911_v27  ;;  %v3002_v27 = vor.u32 %v3000_v20, %v2986_v15  ;;  %v3030_v16 = vrot.slane %v3028_v29, 1 }
  0xf5   : > { %2815 = vmatpush2.bf16.msra.mxu0 %v4906_v30  ;;  %v3006_v30 = vrot.slane %v3004_v21, 1 }
  0xf6   : > { %3237 = vmatpush2.bf16.msra.mxu1 %v4909_v31  ;;  %2816 = vmatprep.subr.bf16.mxu0 %v4914_v12  ;;  %v4950_v12 = vld [vmem:[%s6597_s2 + $0x854] ss:$8 sps:$4 sm:$0xff]  }
  0xf7   : > { %3238 = vmatprep.subr.bf16.mxu1 %v4917_v17 }
  0xf9   : > { %2817 = vmatpush2.bf16.msra.mxu0 %v4912_v32 }
  0xfa   : > { %3239 = vmatpush2.bf16.msra.mxu1 %v4915_v36  ;;  %2818 = vmatprep.subr.bf16.mxu0 %v4920_v39  ;;  %v3026_v39 = vor.u32 %v3024_v28, %v3014_v61  ;;  %v3344_v61 = vld [vmem:[#allocation2 + $0x98] sm:$0xff]  ;;  %v4957_v28 = vld [vmem:[%s6597_s2 + $0x820] ss:$8 sps:$4 sm:$0xff]  }
  0xfb   : > { %3240 = vmatprep.subr.bf16.mxu1 %v4923_v51 }
  0xfc   : > { %v3031_v62 = vsel %vm698_vm0, %v3026_v39, %v3030_v16  ;;  %v3420_v39 = vrot.slane %v6122_v41, 1 }
  0xfd   : > { %2819 = vmatpush2.bf16.msra.mxu0 %v4918_v42  ;;  %v3007_v42 = vsel %vm698_vm0, %v3002_v27, %v3006_v30 }
  0xfe   : > { %3241 = vmatpush2.bf16.msra.mxu1 %v4921_v37  ;;  %2820 = vmatprep.subr.bf16.mxu0 %v4926_v45  ;;  %v3016_v37 = vshrl.u32 %v6114_v13, 16 }
  0xff   : > { %3242 = vmatprep.subr.bf16.mxu1 %v4929_v50  ;;  %v4953_v50 = vld [vmem:[%s6597_s2 + $0x844] ss:$8 sps:$4 sm:$0xff]  }
 0x101   : > { %2821 = vmatpush2.bf16.msra.mxu0 %v4924_v58  ;;  %v2931_v58 = vld [vmem:[#allocation2 + $0x80] sm:$0x1] }
 0x102   : > { %3243 = vmatpush2.bf16.msra.mxu1 %v4927_v59  ;;  %2822 = vmatprep.subr.bf16.mxu0 %v4932_v9  ;;  %v3044_v9 = vshll.u32 %v2942_v26, 16  ;;  %v2941_v5 = vpack.c.bf16 %v2931_v58, %v2931_v58 }
 0x103   : > { %3244 = vmatprep.subr.bf16.mxu1 %v4935_v0 }
 0x104   : > { %v3046_v34 = vrot.slane %v3044_v9, 1  ;;  %v3036_v15 = vshll.u32 %v2941_v5, 16  ;;  %v4968_v9 = vld [vmem:[%s6597_s2 + $0x8f4] ss:$8 sps:$4 sm:$0xff]   ;;  %v4971_v5 = vld [vmem:[%s6597_s2 + $0x8e4] ss:$8 sps:$4 sm:$0xff]  }
 0x105   : > { %2823 = vmatpush2.bf16.msra.mxu0 %v4930_v1  ;;  %v4951_v1 = vld [vmem:[%s6597_s2 + $0x840] ss:$8 sps:$4 sm:$0xff]  }
 0x106   : > { %3245 = vmatpush2.bf16.msra.mxu1 %v4933_v3  ;;  %2824 = vmatprep.subr.bf16.mxu0 %v4938_v7  ;;  %v3018_v3 = vor.u32 %v3016_v37, %v3006_v30  ;;  %v4954_v7 = vld [vmem:[%s6597_s2 + $0x830] ss:$8 sps:$4 sm:$0xff]  }
 0x107   : > { %3246 = vmatprep.subr.bf16.mxu1 %v4941_v6  ;;  %v3042_v6 = vor.u32 %v3040_v56, %v3030_v16  ;;  %v4960_v16 = vld [vmem:[%s6597_s2 + $0x810] ss:$8 sps:$4 sm:$0xff]  }
 0x109   : > { %2825 = vmatpush2.bf16.msra.mxu0 %v4936_v52 }
 0x10a   : > { %3247 = vmatpush2.bf16.msra.mxu1 %v4939_v8  ;;  %3594 = vmatprep.subr.bf16.mxu0 %v4944_v53 }
 0x10b   : > { %4504 = vmatprep.subr.bf16.mxu1 %v4944_v53  ;;  %v3338_v53 = vld [vmem:[#allocation2 + $0x28] sm:$0xfc] }
 0x10c   : > { %v582_v22 = vpop.f32.mrf.mxu0  ;;  %2827 = vmatmul.mubr.bf16.vlgmr.msra.gmra.mxu0 %v2593_v54 }
 0x10d   : > { %v973_v23 = vpop.f32.mrf.mxu1  ;;  %3249 = vmatmul.mubr.bf16.vlgmr.msra.gmra.mxu1 %v2987_v18  ;;  %3595 = vmatpush1.bf16.msra.mxu0 %v4942_v43  ;;  %v4959_v18 = vld [vmem:[%s6597_s2 + $0x824] ss:$8 sps:$4 sm:$0xff]  }
 0x10e   : > { %v6139_v19 = vadd.f32 %v973_v23, %v582_v22  ;;  %4520 = vmatpush1.bf16.msra.mxu1 %v4942_v43  ;;  %v584_v54 = vpop.f32.mrf.mxu0  ;;  %3596 = vmatprep.subr.bf16.mxu0 %v4947_v10  ;;  %v3356_v23 = vpack.c.bf16 %v3340_v2, %v3338_v53 }
 0x10f   : > { %v975_v31 = vpop.f32.mrf.mxu1  ;;  %4505 = vmatprep.subr.bf16.mxu1 %v4947_v10  ;;  %2836 = vmatprep.mubr.bf16.mxu0 %v5945_v49  ;;  %v3020_v49 = vshll.u32 %v6146_v46, 16  ;;  %v3047_v10 = vsel %vm698_vm0, %v3042_v6, %v3046_v34 }
 0x110   : > { %v6151_v17 = vadd.f32 %v975_v31, %v584_v54  ;;  %3258 = vmatprep.mubr.bf16.mxu1 %v3015_v24  ;;  %v586_v32 = vpop.f32.mrf.mxu0  ;;  %v3358_v24 = vpack.c.bf16 %v3344_v61, %v5932_v33  ;;  %v4975_v61 = vld [vmem:[%s6597_s2 + $0x8c0] ss:$8 sps:$4 sm:$0xff]  }
 0x111   : > { %v977_v36 = vpop.f32.mrf.mxu1  ;;  %3597 = vmatpush1.bf16.msra.mxu0 %v4945_v25  ;;  %v3022_v38 = vrot.slane %v3020_v49, 1 }
 0x112   : > { %v6154_v51 = vadd.f32 %v977_v36, %v586_v32  ;;  %4521 = vmatpush1.bf16.msra.mxu1 %v4945_v25  ;;  %v588_v44 = vpop.f32.mrf.mxu0  ;;  %3598 = vmatprep.subr.bf16.mxu0 %v4950_v12  ;;  %v3038_v25 = vrot.slane %v3036_v15, 1  ;;  %v6203_v32 = vrot.slane %v3358_v24, 1  ;;  %v3416_v36 = vrot.slane %v6090_v4, 1  ;;  %v4986_v24 = vld [vmem:[%s6597_s2 + $0x894] ss:$8 sps:$4 sm:$0xff]  }
 0x113   : > { %v979_v45 = vpop.f32.mrf.mxu1  ;;  %4506 = vmatprep.subr.bf16.mxu1 %v4950_v12  ;;  %v3023_v8 = vsel %vm698_vm0, %v3018_v3, %v3022_v38  ;;  %v3034_v29 = vor.u32 %v3032_v11, %v3022_v38  ;;  %v3411_v12 = vrot.slane %v3356_v23, 1  ;;  %v4966_v38 = vld [vmem:[%s6597_s2 + $0x8f0] ss:$8 sps:$4 sm:$0xff]   ;;  %v4981_v23 = vld [vmem:[%s6597_s2 + $0x8a0] ss:$8 sps:$4 sm:$0xff]  }
 0x114   : > { %v6165_v59 = vadd.f32 %v979_v45, %v588_v44  ;;  %2837 = vmatmul.mubr.bf16.gmra.mxu0 %v6078_v60  ;;  %v592_v0 = vpop.f32.mrf.mxu0  ;;  %v4956_v60 = vld [vmem:[%s6597_s2 + $0x834] ss:$8 sps:$4 sm:$0xff]   ;;  %v3421_v58 = vsel %vm1131_vm1, %v3416_v36, %v3420_v39 }
 0x115   : > { %3259 = vmatmul.mubr.bf16.gmra.mxu1 %v3007_v42  ;;  %3599 = vmatpush1.bf16.msra.mxu0 %v4948_v40  ;;  %v3039_v26 = vsel %vm698_vm0, %v3034_v29, %v3038_v25  ;;  %v4965_v42 = vld [vmem:[%s6597_s2 + $0x804] ss:$8 sps:$4 sm:$0xff]   ;;  %v3343_v25 = vld [vmem:[#allocation2 + $0x18] sm:$0xff] }
 0x116   : > { %4522 = vmatpush1.bf16.msra.mxu1 %v4948_v40  ;;  %3600 = vmatprep.subr.bf16.mxu0 %v4953_v50  ;;  %v594_v55 = vpop.f32.mrf.mxu0  ;;  %v3339_v29 = vld [vmem:[#allocation2 + $0x40] sm:$0xff] }
 0x117   : > { %4507 = vmatprep.subr.bf16.mxu1 %v4953_v50  ;;  %2846 = vmatprep.mubr.bf16.mxu0 %v6090_v4  ;;  %v983_v35 = vpop.f32.mrf.mxu1  ;;  %v3413_v50 = vsel %vm1131_vm1, %v3411_v12, %v6203_v32 }
 0x118   : > { %3268 = vmatprep.mubr.bf16.mxu1 %v3031_v62  ;;  %v596_v52 = vpop.f32.mrf.mxu0  ;;  %v6182_v14 = vadd.f32 %v983_v35, %v592_v0  ;;  %v4963_v62 = vld [vmem:[%s6597_s2 + $0x800] ss:$8 sps:$4 sm:$0xff]   ;;  %v4972_v35 = vld [vmem:[%s6597_s2 + $0x8d0] ss:$8 sps:$4 sm:$0xff]  }
 0x119   : > { %3601 = vmatpush1.bf16.msra.mxu0 %v4951_v1  ;;  %v985_v43 = vpop.f32.mrf.mxu1 }
 0x11a   : > { %4523 = vmatpush1.bf16.msra.mxu1 %v4951_v1  ;;  %3602 = vmatprep.subr.bf16.mxu0 %v4956_v60  ;;  %v598_v20 = vpop.f32.mrf.mxu0  ;;  %v6187_v21 = vadd.f32 %v985_v43, %v594_v55  ;;  %v4969_v55 = vld [vmem:[%s6597_s2 + $0x8e0] ss:$8 sps:$4 sm:$0xff]   ;;  %v4980_v43 = vld [vmem:[%s6597_s2 + $0x8b4] ss:$8 sps:$4 sm:$0xff]  }
 0x11b   : > { %4508 = vmatprep.subr.bf16.mxu1 %v4956_v60  ;;  %v987_v63 = vpop.f32.mrf.mxu1 }
 0x11c   : > { %2847 = vmatmul.mubr.bf16.gmra.mxu0 %v6114_v13  ;;  %v602_v22 = vpop.f32.mrf.mxu0  ;;  %v6195_v27 = vadd.f32 %v987_v63, %v596_v52  ;;  %v4962_v13 = vld [vmem:[%s6597_s2 + $0x814] ss:$8 sps:$4 sm:$0xff]   ;;  %v4978_v63 = vld [vmem:[%s6597_s2 + $0x8b0] ss:$8 sps:$4 sm:$0xff]  }
 0x11d   : > { %3269 = vmatmul.mubr.bf16.gmra.mxu1 %v3023_v8  ;;  %3603 = vmatpush1.bf16.msra.mxu0 %v4954_v7  ;;  %v989_v30 = vpop.f32.mrf.mxu1  ;;  %v4977_v8 = vld [vmem:[%s6597_s2 + $0x8c4] ss:$8 sps:$4 sm:$0xff]  }
 0x11e   : > { %4524 = vmatpush1.bf16.msra.mxu1 %v4954_v7  ;;  %3604 = vmatprep.subr.bf16.mxu0 %v4959_v18  ;;  %v604_v47 = vpop.f32.mrf.mxu0  ;;  %v6201_v33 = vadd.f32 %v989_v30, %v598_v20  ;;  %v4974_v7 = vld [vmem:[%s6597_s2 + $0x8d4] ss:$8 sps:$4 sm:$0xff]   ;;  %v3354_v30 = vld [vmem:[#allocation2 + $0xb8] sm:$0x3] }
 0x11f   : > { %4509 = vmatprep.subr.bf16.mxu1 %v4959_v18  ;;  %2856 = vmatprep.mubr.bf16.mxu0 %v6122_v41  ;;  %v993_v54 = vpop.f32.mrf.mxu1 }
 0x120   : > { %3278 = vmatprep.mubr.bf16.mxu1 %v3047_v10  ;;  %v606_v31 = vpop.f32.mrf.mxu0  ;;  %v6211_v40 = vadd.f32 %v993_v54, %v602_v22  ;;  %v4983_v22 = vld [vmem:[%s6597_s2 + $0x8a4] ss:$8 sps:$4 sm:$0xff]  }
 0x121   : > { %3605 = vmatpush1.bf16.msra.mxu0 %v4957_v28  ;;  %v995_v37 = vpop.f32.mrf.mxu1 }
 0x122   : > { %4525 = vmatpush1.bf16.msra.mxu1 %v4957_v28  ;;  %3606 = vmatprep.subr.bf16.mxu0 %v4962_v13  ;;  %v6216_v49 = vadd.f32 %v995_v37, %v604_v47  ;;  %v608_v45 = vpop.f32.mrf.mxu0  ;;  %v3337_v28 = vld [vmem:[#allocation2 + $0x60] sm:$0xfc]  ;;  %v4984_v47 = vld [vmem:[%s6597_s2 + $0x890] ss:$8 sps:$4 sm:$0xff]  }
 0x123   : > { %4510 = vmatprep.subr.bf16.mxu1 %v4962_v13  ;;  %v997_v44 = vpop.f32.mrf.mxu1  ;;  %v3347_v13 = vld [vmem:[#allocation2 + $0x70] sm:$0xff]  ;;  %v3355_v54 = vpack.c.bf16 %v3339_v29, %v3337_v28 }
 0x124   : > { %2857 = vmatmul.mubr.bf16.gmra.mxu0 %v6146_v46  ;;  %v6229_v56 = vadd.f32 %v997_v44, %v606_v31  ;;  %v612_v3 = vpop.f32.mrf.mxu0  ;;  %v3357_v31 = vpack.c.bf16 %v3343_v25, %v6068_v57  ;;  %v3359_v12 = vpack.c.bf16 %v3347_v13, %v6102_v48  ;;  %v3418_v57 = vrot.slane %v6146_v46, 1 }
 0x125   : > { %3279 = vmatmul.mubr.bf16.gmra.mxu1 %v3039_v26  ;;  %3607 = vmatpush1.bf16.msra.mxu0 %v4960_v16  ;;  %v999_v0 = vpop.f32.mrf.mxu1  ;;  %v3364_v26 = vpack.c.bf16 %v3354_v30, %v3354_v30  ;;  %v3408_v37 = vrot.slane %v3355_v54, 1 }
 0x126   : > { %4526 = vmatpush1.bf16.msra.mxu1 %v4960_v16  ;;  %3608 = vmatprep.subr.bf16.mxu0 %v4965_v42  ;;  %v6234_v1 = vadd.f32 %v999_v0, %v608_v45  ;;  %v614_v60 = vpop.f32.mrf.mxu0  ;;  %v4989_v16 = vld [vmem:[%s6597_s2 + $0x884] ss:$8 sps:$4 sm:$0xff]   ;;  %v3409_v44 = vrot.slane %v3357_v31, 1  ;;  %v3414_v45 = vrot.slane %v3359_v12, 1  ;;  %v3417_v0 = vsel %vm1131_vm1, %v6203_v32, %v3416_v36 }
 0x127   : > { %4511 = vmatprep.subr.bf16.mxu1 %v4965_v42  ;;  %3626 = vmatprep.mubr.bf16.mxu0 %v3413_v50  ;;  %v1003_v6 = vpop.f32.mrf.mxu1  ;;  %v4987_v42 = vld [vmem:[%s6597_s2 + $0x880] ss:$8 sps:$4 sm:$0xff]   ;;  %v3424_v48 = vrot.slane %v3364_v26, 1 }
 0x128   : > { %3646 = vmatprep.mubr.bf16.mxu1 %v3421_v58  ;;  %v616_v34 = vpop.f32.mrf.mxu0  ;;  %v6251_v52 = vadd.f32 %v1003_v6, %v612_v3  ;;  %v3353_v50 = vld [vmem:[#allocation2 + $0x80] sm:$0x3]  ;;  %v3410_v58 = vsel %vm1131_vm1, %v3408_v37, %v3409_v44 }
 0x129   : > { %3609 = vmatpush1.bf16.msra.mxu0 %v4963_v62  ;;  %v1005_v11 = vpop.f32.mrf.mxu1  ;;  %v3425_v46 = vsel %vm1131_vm1, %v3420_v39, %v3424_v48 }
 0x12a   : > { %4527 = vmatpush1.bf16.msra.mxu1 %v4963_v62  ;;  %3610 = vmatprep.subr.bf16.mxu0 %v4968_v9  ;;  %v6256_v15 = vadd.f32 %v1005_v11, %v614_v60  ;;  %v618_v2 = vpop.f32.mrf.mxu0  ;;  %v3419_v62 = vsel %vm1131_vm1, %v3414_v45, %v3418_v57 }
 0x12b   : > { %4512 = vmatprep.subr.bf16.mxu1 %v4968_v9  ;;  %v1007_v53 = vpop.f32.mrf.mxu1  ;;  %v3363_v9 = vpack.c.bf16 %v3353_v50, %v3353_v50 }
 0x12c   : > { %v6261_v18 = vadd.f32 %v1007_v53, %v616_v34  ;;  %v3415_v34 = vsel %vm1131_vm1, %v3409_v44, %v3414_v45 }
 0x12d   : > { %3611 = vmatpush2.bf16.msra.mxu0 %v4966_v38  ;;  %v1009_v20 = vpop.f32.mrf.mxu1  ;;  %v3422_v60 = vrot.slane %v3363_v9, 1 }
 0x12e   : > { %4528 = vmatpush2.bf16.msra.mxu1 %v4966_v38  ;;  %3612 = vmatprep.subr.bf16.mxu0 %v4971_v5  ;;  %v6266_v10 = vadd.f32 %v1009_v20, %v618_v2 }
 0x12f   : > { %4513 = vmatprep.subr.bf16.mxu1 %v4971_v5 }
 0x131   : > { %3613 = vmatpush2.bf16.msra.mxu0 %v4969_v55 }
 0x132   : > { %4529 = vmatpush2.bf16.msra.mxu1 %v4969_v55  ;;  %3614 = vmatprep.subr.bf16.mxu0 %v4974_v7 }
 0x133   : > { %4514 = vmatprep.subr.bf16.mxu1 %v4974_v7 }
 0x135   : > { %3615 = vmatpush2.bf16.msra.mxu0 %v4972_v35 }
 0x136   : > { %4530 = vmatpush2.bf16.msra.mxu1 %v4972_v35  ;;  %3616 = vmatprep.subr.bf16.mxu0 %v4977_v8  ;;  %v3423_v35 = vsel %vm1131_vm1, %v3418_v57, %v3422_v60 }
 0x137   : > { %4515 = vmatprep.subr.bf16.mxu1 %v4977_v8 }
 0x139   : > { %3617 = vmatpush2.bf16.msra.mxu0 %v4975_v61 }
 0x13a   : > { %4531 = vmatpush2.bf16.msra.mxu1 %v4975_v61  ;;  %3618 = vmatprep.subr.bf16.mxu0 %v4980_v43 }
 0x13b   : > { %4516 = vmatprep.subr.bf16.mxu1 %v4980_v43 }
 0x13d   : > { %3619 = vmatpush2.bf16.msra.mxu0 %v4978_v63 }
 0x13e   : > { %4532 = vmatpush2.bf16.msra.mxu1 %v4978_v63  ;;  %3620 = vmatprep.subr.bf16.mxu0 %v4983_v22 }
 0x13f   : > { %4517 = vmatprep.subr.bf16.mxu1 %v4983_v22 }
 0x141   : > { %3621 = vmatpush2.bf16.msra.mxu0 %v4981_v23 }
 0x142   : > { %4533 = vmatpush2.bf16.msra.mxu1 %v4981_v23  ;;  %3622 = vmatprep.subr.bf16.mxu0 %v4986_v24 }
 0x143   : > { %4518 = vmatprep.subr.bf16.mxu1 %v4986_v24 }
 0x145   : > { %3623 = vmatpush2.bf16.msra.mxu0 %v4984_v47 }
 0x146   : > { %4534 = vmatpush2.bf16.msra.mxu1 %v4984_v47  ;;  %3624 = vmatprep.subr.bf16.mxu0 %v4989_v16 }
 0x147   : > { %4519 = vmatprep.subr.bf16.mxu1 %v4989_v16 }
 0x149   : > { %3625 = vmatpush2.bf16.msra.mxu0 %v4987_v42 }
 0x14a   : > { %4535 = vmatpush2.bf16.msra.mxu1 %v4987_v42 }
 0x14c   : > { %v1352_v3 = vpop.f32.mrf.mxu0  ;;  %3627 = vmatmul.mubr.bf16.vlgmr.msra.gmra.mxu0 %v3410_v58 }
 0x14d   : > { %v1690_v38 = vpop.f32.mrf.mxu1  ;;  %3647 = vmatmul.mubr.bf16.vlgmr.msra.gmra.mxu1 %v3419_v62  ;;  %v1407_v5 = vadd.f32 %v1352_v3, %v6139_v19  ;;  %3636 = vmatprep.mubr.bf16.mxu0 %v3417_v0 }
 0x14e   : > { %3656 = vmatprep.mubr.bf16.mxu1 %v3425_v46  ;;  %v1354_v55 = vpop.f32.mrf.mxu0 }
 0x14f   : > { %v1692_v7 = vpop.f32.mrf.mxu1  ;;  %v6302_v6 = vadd.f32 %v1690_v38, %v1407_v5  ;;  %v1408_v4 = vadd.f32 %v1354_v55, %v6151_v17 }
 0x150   : > { %v1356_v32 = vpop.f32.mrf.mxu0 }
 0x151   : > { %v1694_v36 = vpop.f32.mrf.mxu1  ;;  %v6305_v41 = vadd.f32 %v1692_v7, %v1408_v4  ;;  %v1409_v39 = vadd.f32 %v1356_v32, %v6154_v51 }
 0x152   : > { %v1358_v19 = vpop.f32.mrf.mxu0 }
 0x153   : > { %v1696_v8 = vpop.f32.mrf.mxu1  ;;  %v6310_v11 = vadd.f32 %v1694_v36, %v1409_v39  ;;  %v1410_v53 = vadd.f32 %v1358_v19, %v6165_v59 }
 0x154   : > { %v1362_v2 = vpop.f32.mrf.mxu0  ;;  %3637 = vmatmul.mubr.bf16.gmra.mxu0 %v3415_v34 }
 0x155   : > { %3657 = vmatmul.mubr.bf16.gmra.mxu1 %v3423_v35  ;;  %v1700_v17 = vpop.f32.mrf.mxu1  ;;  %v6313_v61 = vadd.f32 %v1696_v8, %v1410_v53  ;;  %v1411_v43 = vadd.f32 %v1362_v2, %v6182_v14 }
 0x156   : > { %v1364_v20 = vpop.f32.mrf.mxu0 }
 0x157   : > { %v1702_v51 = vpop.f32.mrf.mxu1  ;;  %v1412_v63 = vadd.f32 %v1364_v20, %v6187_v21  ;;  %v6317_v22 = vadd.f32 %v1700_v17, %v1411_v43 }
 0x158   : > { %v1366_v23 = vpop.f32.mrf.mxu0 }
 0x159   : > { %v1704_v24 = vpop.f32.mrf.mxu1  ;;  %v1413_v28 = vadd.f32 %v1366_v23, %v6195_v27  ;;  %v6320_v29 = vadd.f32 %v1702_v51, %v1412_v63 }
 0x15a   : > { %v1368_v59 = vpop.f32.mrf.mxu0 }
 0x15b   : > { %v1706_v25 = vpop.f32.mrf.mxu1  ;;  %v1414_v13 = vadd.f32 %v1368_v59, %v6201_v33  ;;  %v6323_v30 = vadd.f32 %v1704_v24, %v1413_v28 }
 0x15c   : > { %v1372_v47 = vpop.f32.mrf.mxu0 }
 0x15d   : > { %v1710_v14 = vpop.f32.mrf.mxu1  ;;  %v1415_v54 = vadd.f32 %v1372_v47, %v6211_v40  ;;  %v6326_v31 = vadd.f32 %v1706_v25, %v1414_v13 }
 0x15e   : > { %v1374_v21 = vpop.f32.mrf.mxu0 }
 0x15f   : > { %v1712_v12 = vpop.f32.mrf.mxu1  ;;  %v1416_v16 = vadd.f32 %v1374_v21, %v6216_v49  ;;  %v6329_v26 = vadd.f32 %v1710_v14, %v1415_v54 }
 0x160   : > { %v1376_v27 = vpop.f32.mrf.mxu0 }
 0x161   : > { %v1714_v42 = vpop.f32.mrf.mxu1  ;;  %v1417_v37 = vadd.f32 %v1376_v27, %v6229_v56  ;;  %v6332_v44 = vadd.f32 %v1712_v12, %v1416_v16 }
 0x162   : > { %v1378_v33 = vpop.f32.mrf.mxu0 }
 0x163   : > { %v1716_v45 = vpop.f32.mrf.mxu1  ;;  %v1418_v57 = vadd.f32 %v1378_v33, %v6234_v1  ;;  %v6335_v48 = vadd.f32 %v1714_v42, %v1417_v37 }
 0x164   : > { %v1382_v40 = vpop.f32.mrf.mxu0 }
 0x165   : > { %v1720_v50 = vpop.f32.mrf.mxu1  ;;  %v1419_v58 = vadd.f32 %v1382_v40, %v6251_v52  ;;  %v6338_v62 = vadd.f32 %v1716_v45, %v1418_v57 }
 0x166   : > { %v1384_v49 = vpop.f32.mrf.mxu0 }
 0x167   : > { %v1722_v9 = vpop.f32.mrf.mxu1  ;;  %v1420_v0 = vadd.f32 %v1384_v49, %v6256_v15  ;;  %v6341_v46 = vadd.f32 %v1720_v50, %v1419_v58 }
 0x168   : > { %v1386_v56 = vpop.f32.mrf.mxu0 }
 0x169   : > { %v1724_v3 = vpop.f32.mrf.mxu1  ;;  %v1421_v38 = vadd.f32 %v1386_v56, %v6261_v18  ;;  %v6344_v5 = vadd.f32 %v1722_v9, %v1420_v0 }
 0x16a   : > { %v1388_v1 = vpop.f32.mrf.mxu0 }
 0x16b   : > { %v1726_v60 = vpop.f32.mrf.mxu1  ;;  %v1422_v55 = vadd.f32 %v1388_v1, %v6266_v10  ;;  %v6347_v7 = vadd.f32 %v1724_v3, %v1421_v38 }
 0x16d   : > { %v6349_v52 = vadd.f32 %v1726_v60, %v1422_v55 }
 0x18c   : > { %v2112_v4 = vpop.f32.mrf.mxu0 }
 0x18d   : > { %v6351_v32 = vpop.f32.mrf.mxu1 }
 0x18e   : > { %v2114_v15 = vpop.f32.mrf.mxu0 }
 0x18f   : > { %v6353_v36 = vpop.f32.mrf.mxu1 }
 0x190   : > { %v2116_v39 = vpop.f32.mrf.mxu0 }
 0x191   : > { %v6355_v34 = vpop.f32.mrf.mxu1 }
 0x192   : > { %v2118_v18 = vpop.f32.mrf.mxu0 }
 0x193   : > { %v6357_v35 = vpop.f32.mrf.mxu1 }
 0x194   : > { %v6359_v19 = vpop.f32.mrf.mxu0 }
 0x195   : > { %v6361_v8 = vpop.f32.mrf.mxu1 }
 0x196   : > { %v6363_v10 = vpop.f32.mrf.mxu0 }
 0x197   : > { %v6365_v53 = vpop.f32.mrf.mxu1 }
 0x198   : > { %v2126_v2 = vpop.f32.mrf.mxu0 }
 0x199   : > { %v6367_v17 = vpop.f32.mrf.mxu1 }
 0x19a   : > { %v6369_v43 = vpop.f32.mrf.mxu0 }
 0x19b   : > { %v6371_v20 = vpop.f32.mrf.mxu1 }
 0x19c   : > { %v2132_v51 = vpop.f32.mrf.mxu0 }
 0x19d   : > { %v6373_v63 = vpop.f32.mrf.mxu1 }
 0x19e   : > { %v2134_v23 = vpop.f32.mrf.mxu0 }
 0x19f   : > { %v6375_v24 = vpop.f32.mrf.mxu1 }
 0x1a0   : > { %v6377_v28 = vpop.f32.mrf.mxu0 }
 0x1a1   : > { %v6379_v59 = vpop.f32.mrf.mxu1 }
 0x1a2   : > { %v6381_v25 = vpop.f32.mrf.mxu0 }
 0x1a3   : > { %v6383_v13 = vpop.f32.mrf.mxu1 }
 0x1a4   : > { %v6385_v47 = vpop.f32.mrf.mxu0 }
 0x1a5   : > { %v6387_v14 = vpop.f32.mrf.mxu1 }
 0x1a6   : > { %v2144_v54 = vpop.f32.mrf.mxu0 }
 0x1a7   : > { %v6389_v21 = vpop.f32.mrf.mxu1 }
 0x1a8   : > { %v2146_v12 = vpop.f32.mrf.mxu0 }
 0x1a9   : > { %v6391_v16 = vpop.f32.mrf.mxu1 }
 0x1aa   : > { %6602 = vst [vmem:[#allocation4_spill] sm:$0xff] %v6391_v16  ;;  %v6393_v27 = vpop.f32.mrf.mxu0  ;;  %v2172_v16 = vadd.f32 %v6363_v10, %v6320_v29  ;;  %v2174_v29 = vadd.f32 %v6369_v43, %v6326_v31  ;;  %v2181_v10 = vadd.f32 %v2146_v12, %v6347_v7 }
 0x1ab   : > { %v6395_v42 = vpop.f32.mrf.mxu1 }
 0x1ac   : > { %6603 = vst [vmem:[#allocation5_spill] sm:$0xff] %v6395_v42  ;;  %v3733_v42 = vlaneseq }
 0x1cc   : > { %v6397_v37 = vpop.f32.mrf.mxu0 }
 0x1cd   : > { %v6399_v33 = vpop.f32.mrf.mxu1 }
 0x1ce   : > { %6604 = vst [vmem:[#allocation6_spill] sm:$0xff] %v6399_v33  ;;  %v6401_v45 = vpop.f32.mrf.mxu0 }
 0x1cf   : > { %v6403_v57 = vpop.f32.mrf.mxu1 }
 0x1d0   : > { %6605 = vst [vmem:[#allocation7_spill] sm:$0xff] %v6403_v57  ;;  %v6405_v40 = vpop.f32.mrf.mxu0 }
 0x1d1   : > { %v6407_v50 = vpop.f32.mrf.mxu1 }
 0x1d2   : > { %6606 = vst [vmem:[#allocation8_spill] sm:$0xff] %v6407_v50  ;;  %v6409_v58 = vpop.f32.mrf.mxu0 }
 0x1d3   : > { %6607 = vst [vmem:[#allocation9_spill] sm:$0xff] %v6409_v58  ;;  %v6411_v49 = vpop.f32.mrf.mxu1 }
 0x1d4   : > { %6608 = vst [vmem:[#allocation10_spill] sm:$0xff] %v6411_v49  ;;  %v6413_v9 = vpop.f32.mrf.mxu0 }
 0x1d5   : > { %6609 = vst [vmem:[#allocation11_spill] sm:$0xff] %v6413_v9  ;;  %v6415_v0 = vpop.f32.mrf.mxu1 }
 0x1d6   : > { %6610 = vst [vmem:[#allocation12_spill] sm:$0xff] %v6415_v0  ;;  %v6417_v56 = vpop.f32.mrf.mxu0 }
 0x1d7   : > { %6611 = vst [vmem:[#allocation13_spill] sm:$0xff] %v6417_v56  ;;  %v6419_v3 = vpop.f32.mrf.mxu1 }
 0x1d8   : > { %6612 = vst [vmem:[#allocation14_spill] sm:$0xff] %v6419_v3  ;;  %v6421_v38 = vpop.f32.mrf.mxu0  ;;  %v3734_v3 = vshrl.u32 %v3733_v42, 7  ;;  %v2168_v42 = vadd.f32 %v2114_v15, %v6305_v41  ;;  %v2173_v41 = vadd.f32 %v2126_v2, %v6323_v30  ;;  %v2177_v30 = vadd.f32 %v6377_v28, %v6335_v48  ;;  %v6625_v28 = vld [vmem:[#allocation4_spill] sm:$0xff] }
 0x1d9   : > { %6613 = vst [vmem:[#allocation15_spill] sm:$0xff] %v6421_v38  ;;  %v6423_v1 = vpop.f32.mrf.mxu1  ;;  %v2550_v2 = vadd.f32 %v6365_v53, %v2172_v16 }
 0x1da   : > { %6614 = vst [vmem:[#allocation16_spill] sm:$0xff] %v6423_v1  ;;  %v6425_v60 = vpop.f32.mrf.mxu0  ;;  %v2167_v1 = vadd.f32 %v2112_v4, %v6302_v6  ;;  %v2170_v6 = vadd.f32 %v2118_v18, %v6313_v61  ;;  %v2551_v31 = vadd.f32 %v6367_v17, %v2173_v41  ;;  %v2555_v53 = vadd.f32 %v6379_v59, %v2177_v30 }
 0x1db   : > { %6615 = vst [vmem:[#allocation17_spill] sm:$0xff] %v6425_v60  ;;  %v6427_v55 = vpop.f32.mrf.mxu1  ;;  %v3735_v60 = vsub.s32 0, %v3734_v3 }
 0x1dc   : > { %6616 = vst [vmem:[#allocation18_spill] sm:$0xff] %v6427_v55  ;;  %v2848_v50 = vpop.f32.mrf.mxu0  ;;  %v2545_v4 = vadd.f32 %v6351_v32, %v2167_v1  ;;  %v6627_v12 = vld [vmem:[#allocation11_spill] sm:$0xff] }
 0x1dd   : > { %v6429_v57 = vpop.f32.mrf.mxu1 }
 0x1de   : > { %6617 = vst [vmem:[#allocation19_spill] sm:$0xff] %v6429_v57  ;;  %v2850_v49 = vpop.f32.mrf.mxu0  ;;  %v2171_v57 = vadd.f32 %v6359_v19, %v6317_v22  ;;  %v2548_v22 = vadd.f32 %v6357_v35, %v2170_v6 }
 0x1df   : > { %v6431_v33 = vpop.f32.mrf.mxu1 }
 0x1e0   : > { %6618 = vst [vmem:[#allocation20_spill] sm:$0xff] %v6431_v33  ;;  %v6433_v0 = vpop.f32.mrf.mxu0  ;;  %v3731_v33 = vld [vmem:[%s6598_s3] sm:$0x3]  ;;  %v2549_v35 = vadd.f32 %v6361_v8, %v2171_v57  ;;  %v2552_v8 = vadd.f32 %v6371_v20, %v2174_v29 }
 0x1e1   : > { %6619 = vst [vmem:[#allocation21_spill] sm:$0xff] %v6433_v0  ;;  %v6435_v56 = vpop.f32.mrf.mxu1 }
 0x1e2   : > { %6620 = vst [vmem:[#allocation22_spill] sm:$0xff] %v6435_v56  ;;  %v6437_v9 = vpop.f32.mrf.mxu0  ;;  %v3759_v56 = vld [vmem:[%s6599_s4] sm:$0x3]  ;;  %v2887_v16 = vadd.f32 %v6627_v12, %v2549_v35 }
 0x1e3   : > { %6621 = vst [vmem:[#allocation23_spill] sm:$0xff] %v6437_v9  ;;  %v6439_v38 = vpop.f32.mrf.mxu1  ;;  %v2169_v9 = vadd.f32 %v2116_v39, %v6310_v11  ;;  %v6459_v0 = vrot.slane %v3759_v56, %v3735_v60  ;;  %v2176_v11 = vadd.f32 %v2134_v23, %v6332_v44  ;;  %v2178_v44 = vadd.f32 %v6381_v25, %v6338_v62 }
 0x1e4   : > { %6622 = vst [vmem:[#allocation24_spill] sm:$0xff] %v6439_v38  ;;  %v6442_v55 = vpop.f32.mrf.mxu0  ;;  %v3739_v38 = vsub.s32 1, %v3734_v3  ;;  %v2559_v25 = vadd.f32 %v6625_v28, %v2181_v10  ;;  %v6642_v10 = vld [vmem:[#allocation14_spill] sm:$0xff] }
 0x1e5   : > { %6623 = vst [vmem:[#allocation25_spill] sm:$0xff] %v6442_v55  ;;  %v6444_v58 = vpop.f32.mrf.mxu1  ;;  %v2175_v55 = vadd.f32 %v2132_v51, %v6329_v26  ;;  %v2546_v26 = vadd.f32 %v6353_v36, %v2168_v42  ;;  %v2547_v32 = vadd.f32 %v6355_v34, %v2169_v9  ;;  %v2179_v36 = vadd.f32 %v6385_v47, %v6341_v46  ;;  %v6626_v47 = vld [vmem:[#allocation9_spill] sm:$0xff] }
 0x1e6   : > { %6624 = vst [vmem:[#allocation26_spill] sm:$0xff] %v6444_v58  ;;  %v6457_v58 = vrot.slane %v3731_v33, %v3735_v60  ;;  %v6467_v15 = vpop.f32.mrf.mxu0  ;;  %v6473_v39 = vrot.slane %v3731_v33, %v3739_v38  ;;  %v6475_v18 = vrot.slane %v3759_v56, %v3739_v38  ;;  %v2180_v34 = vadd.f32 %v2144_v54, %v6344_v5  ;;  %v6634_v56 = vld [vmem:[#allocation8_spill] sm:$0xff]  ;;  %v6635_v38 = vld [vmem:[#allocation17_spill] sm:$0xff] }
 0x1e7   : > { %v6469_v61 = vpop.f32.mrf.mxu1  ;;  %v2553_v19 = vadd.f32 %v6373_v63, %v2175_v55  ;;  %v2554_v48 = vadd.f32 %v6375_v24, %v2176_v11  ;;  %v2182_v51 = vadd.f32 %v6393_v27, %v6349_v52  ;;  %v2883_v46 = vadd.f32 %v6397_v37, %v2545_v4  ;;  %v6628_v27 = vld [vmem:[#allocation13_spill] sm:$0xff]  ;;  %v6629_v37 = vld [vmem:[#allocation15_spill] sm:$0xff]  ;;  %v6638_v11 = vld [vmem:[#allocation20_spill] sm:$0xff] }
 0x1e8   : > { %v2862_v43 = vpop.f32.mrf.mxu0  ;;  %v2884_v5 = vadd.f32 %v6401_v45, %v2546_v26  ;;  %v2556_v17 = vadd.f32 %v6383_v13, %v2178_v44  ;;  %v2885_v63 = vadd.f32 %v6405_v40, %v2547_v32  ;;  %v2557_v23 = vadd.f32 %v6387_v14, %v2179_v36  ;;  %v6630_v14 = vld [vmem:[#allocation5_spill] sm:$0xff]  ;;  %v6632_v40 = vld [vmem:[#allocation7_spill] sm:$0xff]  ;;  %v6640_v44 = vld [vmem:[#allocation10_spill] sm:$0xff] }
 0x1e9   : > { %v6493_v62 = vpop.f32.mrf.mxu1  ;;  %v2891_v7 = vadd.f32 %v2848_v50, %v2553_v19  ;;  %v2558_v24 = vadd.f32 %v6389_v21, %v2180_v34  ;;  %v2892_v52 = vadd.f32 %v2850_v49, %v2554_v48  ;;  %v2886_v54 = vadd.f32 %v6626_v47, %v2548_v22  ;;  %v6631_v21 = vld [vmem:[#allocation6_spill] sm:$0xff]  ;;  %v6633_v49 = vld [vmem:[#allocation19_spill] sm:$0xff]  ;;  %v6636_v60 = vld [vmem:[#allocation21_spill] sm:$0xff] }
 0x1ea   : > { %v2888_v20 = vadd.f32 %v6628_v27, %v2550_v2  ;;  %v2889_v59 = vadd.f32 %v6629_v37, %v2551_v31  ;;  %v2864_v33 = vpop.f32.mrf.mxu0  ;;  %v2560_v45 = vadd.f32 %v6630_v14, %v2182_v51  ;;  %v3305_v57 = vadd.f32 %v6631_v21, %v2883_v46  ;;  %v6637_v42 = vld [vmem:[#allocation23_spill] sm:$0xff]  ;;  %v6641_v36 = vld [vmem:[#allocation12_spill] sm:$0xff] }
 0x1eb   : > { %v6511_v13 = vpop.f32.mrf.mxu1  ;;  %v3306_v50 = vadd.f32 %v6632_v40, %v2884_v5  ;;  %v3313_v9 = vadd.f32 %v6633_v49, %v2891_v7  ;;  %v3307_v3 = vadd.f32 %v6634_v56, %v2885_v63  ;;  %v2890_v1 = vadd.f32 %v6635_v38, %v2552_v8  ;;  %v6643_v2 = vld [vmem:[#allocation16_spill] sm:$0xff]  ;;  %v6645_v63 = vld [vmem:[#allocation22_spill] sm:$0xff] }
 0x1ec   : > { %v2893_v55 = vadd.f32 %v6636_v60, %v2555_v53  ;;  %v2894_v6 = vadd.f32 %v6637_v42, %v2556_v17  ;;  %v3314_v26 = vadd.f32 %v6638_v11, %v2892_v52  ;;  %v6639_v32 = vld [vmem:[#allocation25_spill] sm:$0xff]  ;;  %v3308_v19 = vadd.f32 %v6640_v44, %v2886_v54  ;;  %v6644_v53 = vld [vmem:[#allocation18_spill] sm:$0xff]  ;;  %v6646_v28 = vld [vmem:[#allocation24_spill] sm:$0xff] }
 0x1ed   : > { %v2895_v22 = vadd.f32 %v6639_v32, %v2557_v23  ;;  %v3309_v34 = vadd.f32 %v6641_v36, %v2887_v16  ;;  %v3310_v35 = vadd.f32 %v6642_v10, %v2888_v20  ;;  %v6532_v31 = vadd.f32 %v6643_v2, %v2889_v59  ;;  %v6647_v16 = vld [vmem:[#allocation26_spill] sm:$0xff] }
 0x1ee   : > { %v6537_v17 = vadd.f32 %v6644_v53, %v2890_v1  ;;  %v3315_v23 = vadd.f32 %v6645_v63, %v2893_v55  ;;  %v3316_v52 = vadd.f32 %v6646_v28, %v2894_v6  ;;  %v2896_v47 = vadd.f32 %v6467_v15, %v2558_v24 }
 0x1ef   : > { %v3317_v27 = vadd.f32 %v6647_v16, %v2895_v22  ;;  %v2897_v20 = vadd.f32 %v2862_v43, %v2559_v25  ;;  %v2898_v25 = vadd.f32 %v2864_v33, %v2560_v45 }
 0x1f0   : > { %v3318_v43 = vadd.f32 %v6469_v61, %v2896_v47 }
 0x1f1   : > { %v3319_v44 = vadd.f32 %v6493_v62, %v2897_v20 }
 0x20c   : > { %v3628_v4 = vpop.f32.mrf.mxu0 }
 0x20d   : > { %v3648_v41 = vpop.f32.mrf.mxu1  ;;  %v3683_v29 = vadd.f32 %v3628_v4, %v3305_v57 }
 0x20e   : > { %v3691_v30 = vadd.f32 %v3648_v41, %v3313_v9  ;;  %v3630_v48 = vpop.f32.mrf.mxu0 }
 0x20f   : > { %v3650_v51 = vpop.f32.mrf.mxu1  ;;  %v3743_v46 = vmul.f32 %v6457_v58, %v3683_v29  ;;  %v3684_v7 = vadd.f32 %v3630_v48, %v3306_v50 }
 0x210   : > { %v3751_v5 = vmul.f32 %v6457_v58, %v3691_v30  ;;  %v3692_v8 = vadd.f32 %v3650_v51, %v3314_v26  ;;  %v3632_v54 = vpop.f32.mrf.mxu0 }
 0x211   : > { %v3652_v12 = vpop.f32.mrf.mxu1  ;;  %v3744_v37 = vmul.f32 %v6473_v39, %v3684_v7  ;;  %v3771_v14 = vadd.f32 %v6459_v0, %v3743_v46  ;;  %v3685_v57 = vadd.f32 %v3632_v54, %v3307_v3 }
 0x212   : > { %v3752_v59 = vmul.f32 %v6473_v39, %v3692_v8  ;;  %v3779_v21 = vadd.f32 %v6459_v0, %v3751_v5  ;;  %v3693_v40 = vadd.f32 %v3652_v12, %v3315_v23  ;;  %v3634_v50 = vpop.f32.mrf.mxu0 }
 0x213   : > { %v3654_v49 = vpop.f32.mrf.mxu1  ;;  %v3772_v15 = vadd.f32 %v6475_v18, %v3744_v37  ;;  %v3686_v9 = vadd.f32 %v3634_v50, %v3308_v19  ;;  %v3745_v3 = vmul.f32 %v6457_v58, %v3685_v57  ;;  %v3320_v19 = vadd.f32 %v6511_v13, %v2898_v25 }
 0x214   : > { %v3780_v24 = vadd.f32 %v6475_v18, %v3752_v59  ;;  %v3694_v56 = vadd.f32 %v3654_v49, %v3316_v52  ;;  %v3753_v38 = vmul.f32 %v6457_v58, %v3693_v40  ;;  %v3638_v1 = vpop.f32.mrf.mxu0 }
 0x215   : > { %v3658_v60 = vpop.f32.mrf.mxu1  ;;  %v4494_v55 = vpack.c.bf16 %v3772_v15, %v3771_v14  ;;  %v3746_v6 = vmul.f32 %v6473_v39, %v3686_v9  ;;  %v3773_v33 = vadd.f32 %v6459_v0, %v3745_v3  ;;  %v3687_v4 = vadd.f32 %v3638_v1, %v3309_v34 }
 0x216   : > { %v4498_v42 = vpack.c.bf16 %v3780_v24, %v3779_v21  ;;  %v3754_v61 = vmul.f32 %v6473_v39, %v3694_v56  ;;  %v3781_v45 = vadd.f32 %v6459_v0, %v3753_v38  ;;  %v3695_v41 = vadd.f32 %v3658_v60, %v3317_v27  ;;  %v3640_v11 = vpop.f32.mrf.mxu0 }
 0x217   : > { %v3660_v26 = vpop.f32.mrf.mxu1  ;;  %3835 = vst [vmem:[%s6554_s12] sm:$0xff] %v4494_v55  ;;  %v3774_v32 = vadd.f32 %v6475_v18, %v3746_v6  ;;  %v3688_v29 = vadd.f32 %v3640_v11, %v3310_v35  ;;  %v3747_v36 = vmul.f32 %v6457_v58, %v3687_v4 }
 0x218   : > { %3839 = vst [vmem:[%s6554_s12 + $0x20] sm:$0xff] %v4498_v42  ;;  %v3782_v22 = vadd.f32 %v6475_v18, %v3754_v61  ;;  %v3696_v30 = vadd.f32 %v3660_v26, %v3318_v43  ;;  %v3755_v34 = vmul.f32 %v6457_v58, %v3695_v41  ;;  %v3642_v10 = vpop.f32.mrf.mxu0 }
 0x219   : > { %v3662_v2 = vpop.f32.mrf.mxu1  ;;  %v4495_v48 = vpack.c.bf16 %v3774_v32, %v3773_v33  ;;  %v3748_v46 = vmul.f32 %v6473_v39, %v3688_v29  ;;  %v3775_v35 = vadd.f32 %v6459_v0, %v3747_v36  ;;  %v3689_v7 = vadd.f32 %v3642_v10, %v6532_v31 }
 0x21a   : > { %v4499_v51 = vpack.c.bf16 %v3782_v22, %v3781_v45  ;;  %v3756_v5 = vmul.f32 %v6473_v39, %v3696_v30  ;;  %v3783_v62 = vadd.f32 %v6459_v0, %v3755_v34  ;;  %v3697_v13 = vadd.f32 %v3662_v2, %v3319_v44  ;;  %v3644_v8 = vpop.f32.mrf.mxu0 }
 0x21b   : > { %v3664_v53 = vpop.f32.mrf.mxu1  ;;  %3836 = vst [vmem:[%s6554_s12 + $0x8] sm:$0xff] %v4495_v48  ;;  %v3776_v63 = vadd.f32 %v6475_v18, %v3748_v46  ;;  %v3690_v28 = vadd.f32 %v3644_v8, %v6537_v17  ;;  %v3749_v47 = vmul.f32 %v6457_v58, %v3689_v7 }
 0x21c   : > { %3840 = vst [vmem:[%s6554_s12 + $0x28] sm:$0xff] %v4499_v51  ;;  %v3784_v23 = vadd.f32 %v6475_v18, %v3756_v5  ;;  %v3698_v52 = vadd.f32 %v3664_v53, %v3320_v19  ;;  %v3757_v31 = vmul.f32 %v6457_v58, %v3697_v13 }
 0x21d   : > { %v4496_v54 = vpack.c.bf16 %v3776_v63, %v3775_v35  ;;  %v3750_v16 = vmul.f32 %v6473_v39, %v3690_v28  ;;  %v3777_v20 = vadd.f32 %v6459_v0, %v3749_v47 }
 0x21e   : > { %v4500_v12 = vpack.c.bf16 %v3784_v23, %v3783_v62  ;;  %v3758_v27 = vmul.f32 %v6473_v39, %v3698_v52  ;;  %v3785_v37 = vadd.f32 %v6459_v0, %v3757_v31 }
 0x21f   : > { %3837 = vst [vmem:[%s6554_s12 + $0x10] sm:$0xff] %v4496_v54  ;;  %v3778_v17 = vadd.f32 %v6475_v18, %v3750_v16 }
 0x220   : > { %3841 = vst [vmem:[%s6554_s12 + $0x30] sm:$0xff] %v4500_v12  ;;  %v3786_v59 = vadd.f32 %v6475_v18, %v3758_v27 }
 0x221   : > { %v4497_v14 = vpack.c.bf16 %v3778_v17, %v3777_v20 }
 0x222   : > { %v4501_v21 = vpack.c.bf16 %v3786_v59, %v3785_v37 }
 0x223   : > { %3838 = vst [vmem:[%s6554_s12 + $0x18] sm:$0xff] %v4497_v14 }
 0x224   : > { %3842 = vst [vmem:[%s6554_s12 + $0x38] sm:$0xff] %v4501_v21 }
 0x225 PF: > { %s15_s18 = sadd.s32 1, %s4998_s18  }
 0x226   : > { %p12_p6 = scmp.ge.s32.totalorder %s15_s18, 4  }
 0x228   :  { %14 = sbr.rel (!%p12_p6) target bundleno = 1 (0x1), region = 81 }

</bundles_post_ra>
